<compile_context>
chip_gen: v7x
topology: tpu7x:2x2x1
jax: 0.10.0
libtpu: 0.0.40
codegen_flags: <defaults>
</compile_context>

<pallas_src>
import functools

import jax
import jax.numpy as jnp
from jax.experimental import pallas as pl
from jax.experimental.pallas import tpu as pltpu


def _round_up(x, m):
    return (x + m - 1) // m * m


# ---------------------------------------------------------------------------
# Pallas kernel 1: (patches @ weight) + bias (+ ReLU); full-K block, no K grid axis
# ---------------------------------------------------------------------------
def _matmul_bias_act_kernel(a_ref, w_ref, b_ref, o_ref, *, apply_relu):
    acc = jnp.dot(a_ref[...], w_ref[...], preferred_element_type=jnp.float32)
    acc = acc + b_ref[...]                      # (1, tn) broadcasts over rows
    if apply_relu:
        acc = jnp.maximum(acc, 0.0)
    o_ref[...] = acc.astype(o_ref.dtype)


def pallas_matmul_bias_act(a_bf16, w_bf16, bias_row, apply_relu,
                           out_dtype=jnp.bfloat16):
    """a: (M, K) bf16, w: (K, N) bf16, bias_row: (1, N) f32 -> (M, N) out_dtype."""
    M, K = a_bf16.shape
    K2, N = w_bf16.shape
    assert K == K2 and bias_row.shape == (1, N)

    # Full-K blocks: all layers' K (16 / 1024 / 2048 / 4096) fit VMEM comfortably,
    # so there is no reduction grid axis and no accumulator scratch.
    tk = K
    # Never pad N above the real dim (a full-dim last block is legal); cap at 256.
    tn = N if N <= 256 else 256
    assert N % tn == 0
    # Tiny-K layers (layer 1, K=16) do trivial MXU work per row -> big M tiles so the
    # per-grid-step overhead amortizes; K>=1024 layers use 512-row tiles.
    tm_cap = 2048 if K <= 64 else 512
    tm = min(tm_cap, _round_up(M, 16))
    Mp = _round_up(M, tm)

    a = a_bf16 if Mp == M else jnp.pad(a_bf16, ((0, Mp - M), (0, 0)))

    grid = (N // tn, Mp // tm)   # N outermost -> weight tile stays VMEM-resident
    out_bytes = jnp.dtype(out_dtype).itemsize
    need = 2 * (tm * tk * 2 + tk * tn * 2 + tn * 4 + tm * tn * out_bytes)
    vmem_limit = int(max(16 << 20, min(64 << 20, 4 * need)))

    out = pl.pallas_call(
        functools.partial(_matmul_bias_act_kernel, apply_relu=apply_relu),
        out_shape=jax.ShapeDtypeStruct((Mp, N), out_dtype),
        grid_spec=pltpu.PrefetchScalarGridSpec(
            num_scalar_prefetch=0,
            grid=grid,
            in_specs=[
                pl.BlockSpec((tm, tk), lambda j, i: (i, 0)),
                pl.BlockSpec((tk, tn), lambda j, i: (0, j)),
                pl.BlockSpec((1, tn), lambda j, i: (0, j)),
            ],
            out_specs=pl.BlockSpec((tm, tn), lambda j, i: (i, j)),
        ),
        compiler_params=pltpu.CompilerParams(
            dimension_semantics=("parallel", "parallel"),
            vmem_limit_bytes=vmem_limit,
        ),
    )(a, w_bf16, bias_row)

    if Mp != M:
        out = out[:M]
    return out


# ---------------------------------------------------------------------------
# Pallas kernel 2: head — per-row dot (OC=1 conv) as a row-tiled VPU reduction
# ---------------------------------------------------------------------------
def _dot_reduce_kernel(x_ref, w_ref, o_ref):
    x = x_ref[...].astype(jnp.float32)          # (tm, K)
    w = w_ref[...].astype(jnp.float32)          # (1, K)
    o_ref[...] = jnp.sum(x * w, axis=-1, keepdims=True)


def pallas_rowdot(patches_bf16, w_row_bf16):
    m, k = patches_bf16.shape
    tm = min(256, _round_up(m, 8))
    Mp = _round_up(m, tm)
    x = patches_bf16 if Mp == m else jnp.pad(patches_bf16, ((0, Mp - m), (0, 0)))
    out = pl.pallas_call(
        _dot_reduce_kernel,
        out_shape=jax.ShapeDtypeStruct((Mp, 1), jnp.float32),
        grid_spec=pltpu.PrefetchScalarGridSpec(
            num_scalar_prefetch=0,
            grid=(Mp // tm,),
            in_specs=[
                pl.BlockSpec((tm, k), lambda i: (i, 0)),
                pl.BlockSpec((1, k), lambda i: (0, 0)),
            ],
            out_specs=pl.BlockSpec((tm, 1), lambda i: (i, 0)),
        ),
        compiler_params=pltpu.CompilerParams(
            dimension_semantics=("parallel",)),
    )(x, w_row_bf16)
    if Mp != m:
        out = out[:m]
    return out


# ---------------------------------------------------------------------------
# Glue: channel-last im2col (strided slices only — no big transposes)
# ---------------------------------------------------------------------------
def im2col_nhwc(x, kh, kw, stride, pad):
    """x: (N, H, W, C) -> patches (N*OH*OW, KH*KW*C), K flattened as (kh, kw, c)."""
    if pad > 0:
        x = jnp.pad(x, ((0, 0), (pad, pad), (pad, pad), (0, 0)))
    n, h, w, c = x.shape
    oh = (h - kh) // stride + 1
    ow = (w - kw) // stride + 1
    taps = []
    for i in range(kh):
        for j in range(kw):
            taps.append(x[:, i:i + stride * oh:stride, j:j + stride * ow:stride, :])
    p = jnp.stack(taps, axis=3)                       # (N, OH, OW, KH*KW, C)
    return p.reshape(n * oh * ow, kh * kw * c), (n, oh, ow)


def conv2d_relu_pallas(x_nhwc, w_kkc_oc, bias_row, *, stride, pad, apply_relu,
                       kh, kw, out_dtype=jnp.bfloat16):
    """x: (N,H,W,C) bf16; w: (kh*kw*C, OC) bf16; bias_row: (1,OC) f32 -> (N,OH,OW,OC)."""
    oc = w_kkc_oc.shape[1]
    patches, (n, oh, ow) = im2col_nhwc(x_nhwc, kh, kw, stride, pad)
    out = pallas_matmul_bias_act(patches, w_kkc_oc, bias_row, apply_relu, out_dtype)
    return out.reshape(n, oh, ow, oc)


def conv_pool_head_pallas(x_nhwc, w_kkc_oc, bias_row, *, stride, pad, kh, kw):
    """Final conv (OC=1, no ReLU) fused with AdaptiveAvgPool2d(1) -> (N,1,1,1) f32."""
    assert w_kkc_oc.shape[1] == 1
    patches, (n, oh, ow) = im2col_nhwc(x_nhwc, kh, kw, stride, pad)
    m, k = patches.shape
    per_pos = pallas_rowdot(patches, w_kkc_oc.reshape(1, k))
    out = per_pos.reshape(n, oh * ow).mean(axis=1) + bias_row.astype(jnp.float32)[0, 0]
    return out.reshape(n, 1, 1, 1)


# ---------------------------------------------------------------------------
# NormalDiscriminator forward
# ---------------------------------------------------------------------------
# (stride, pad, relu) for convs1..convs5 — fixed by the module definition.
_LAYER_CFG = [(2, 1, True), (2, 1, True), (2, 1, True), (2, 1, True), (2, 0, False)]


def init_params(key, std=0.02):
    """Mimics weight_init(mean=0.0, std=0.02): normal weights, zero biases (PyTorch OIHW)."""
    shapes = [
        (64, 1, 4, 4),
        (128, 64, 4, 4),
        (256, 128, 4, 4),
        (512, 256, 4, 4),
        (1, 512, 4, 4),
    ]
    params = []
    for i, s in enumerate(shapes):
        k = jax.random.fold_in(key, i)
        w = std * jax.random.normal(k, s, dtype=jnp.float32)
        b = jnp.zeros((s[0],), dtype=jnp.float32)
        params.append((w, b))
    return params


def prepare_params(params):
    """(OC, C, KH, KW) f32 -> ((KH*KW*C, OC) bf16, (1, OC) f32), matching (kh,kw,c) patch order."""
    prepared = []
    for w, b in params:
        oc, c, kh, kw = w.shape
        w2 = jnp.transpose(w, (2, 3, 1, 0)).reshape(kh * kw * c, oc).astype(jnp.bfloat16)
        prepared.append((w2, b.astype(jnp.float32).reshape(1, oc)))
    return prepared


@functools.partial(jax.jit, static_argnames=("img_size",))
def normal_discriminator_forward(imgs, prepared, img_size=64):
    # imgs.view(-1, 1, H, W) with C==1 is byte-identical to NHWC (-1, H, W, 1).
    x = imgs.reshape(-1, img_size, img_size, 1).astype(jnp.bfloat16)
    for (w2, b), (s, p, r) in zip(prepared[:-1], _LAYER_CFG[:-1]):
        x = conv2d_relu_pallas(x, w2, b, stride=s, pad=p, apply_relu=r, kh=4, kw=4)
    w5, b5 = prepared[-1]
    s5, p5, _ = _LAYER_CFG[-1]
    return conv_pool_head_pallas(x, w5, b5, stride=s5, pad=p5, kh=4, kw=4)


# ---------------------------------------------------------------------------
# Pure-JAX reference (lax conv; bf16 MXU inputs, f32 accumulation, bf16 inter-layer
# storage — matching the Pallas path's precision choices)
# ---------------------------------------------------------------------------
def reference_forward(imgs, params, img_size=64):
    out = imgs.reshape(-1, 1, img_size, img_size).astype(jnp.bfloat16)
    n_layers = len(params)
    for idx, ((w, b), (s, p, r)) in enumerate(zip(params, _LAYER_CFG)):
        conv = jax.lax.conv_general_dilated(
            out.astype(jnp.bfloat16), w.astype(jnp.bfloat16),
            window_strides=(s, s), padding=[(p, p), (p, p)],
            dimension_numbers=("NCHW", "OIHW", "NCHW"),
            preferred_element_type=jnp.float32)
        out = conv + b.reshape(1, -1, 1, 1)
        if r:
            out = jnp.maximum(out, 0.0)
        if idx < n_layers - 1:
            out = out.astype(jnp.bfloat16)
    return jnp.mean(out, axis=(2, 3), keepdims=True)


if __name__ == "__main__":
    IMG_SIZE = 64   # minimum size the module supports (conv5 needs a 4x4 input)
    BATCH = 2

    key = jax.random.PRNGKey(0)
    x = jax.random.normal(jax.random.fold_in(key, 100),
                          (BATCH, 1, IMG_SIZE, IMG_SIZE), dtype=jnp.float32)
    params = init_params(jax.random.fold_in(key, 200))
    prepared = prepare_params(params)

    out = normal_discriminator_forward(x, prepared, img_size=IMG_SIZE)
    out = jax.block_until_ready(out)
    assert out.shape == (BATCH, 1, 1, 1), out.shape

    ref = jax.block_until_ready(reference_forward(x, params, img_size=IMG_SIZE))
    if not jnp.allclose(out, ref, rtol=5e-2, atol=2e-3):
        raise AssertionError(
            f"mismatch: pallas={out.ravel()} ref={ref.ravel()} "
            f"max_abs_diff={jnp.max(jnp.abs(out - ref))}")

    print("KERNEL_OK")
</pallas_src>

<mosaic_0001>
module attributes {stable_mosaic.version = 11 : i64} {
  func.func @_matmul_bias_act_kernel(%arg0: i32, %arg1: i32, %arg2: memref<2048x16xbf16, #tpu.memory_space<vmem>>, %arg3: memref<16x64xbf16, #tpu.memory_space<vmem>>, %arg4: memref<1x64xf32, #tpu.memory_space<vmem>>, %arg5: memref<2048x64xbf16, #tpu.memory_space<vmem>>) attributes {dimension_semantics = [#tpu.dimension_semantics<parallel>, #tpu.dimension_semantics<parallel>], iteration_bounds = array<i64: 1, 1>, scalar_prefetch = 0 : i64, scratch_operands = 0 : i64, tpu.core_type = #tpu.core_type<tc>, window_params = [{transform_indices = @transform_0, window_bounds = array<i64: 2048, 16>}, {transform_indices = @transform_1, window_bounds = array<i64: 16, 64>}, {transform_indices = @transform_2, window_bounds = array<i64: 1, 64>}, {transform_indices = @transform_3, window_bounds = array<i64: 2048, 64>}]} {
    %c0 = arith.constant 0 : index
    %c0_0 = arith.constant 0 : index
    %0 = vector.load %arg2[%c0, %c0_0] : memref<2048x16xbf16, #tpu.memory_space<vmem>>, vector<2048x16xbf16>
    %c0_1 = arith.constant 0 : index
    %c0_2 = arith.constant 0 : index
    %1 = vector.load %arg3[%c0_1, %c0_2] : memref<16x64xbf16, #tpu.memory_space<vmem>>, vector<16x64xbf16>
    %cst = arith.constant dense<0.000000e+00> : vector<2048x64xf32>
    %2 = tpu.matmul %0, %1, %cst {dimension_numbers = #tpu.dot_dimension_numbers<[1], [0], [0], [1], [0, 0, 1, 1], [], []>} : vector<2048x16xbf16>, vector<16x64xbf16>, vector<2048x64xf32> -> vector<2048x64xf32>
    %c0_3 = arith.constant 0 : index
    %c0_4 = arith.constant 0 : index
    %3 = vector.load %arg4[%c0_3, %c0_4] : memref<1x64xf32, #tpu.memory_space<vmem>>, vector<1x64xf32>
    %4 = vector.broadcast %3 : vector<1x64xf32> to vector<2048x64xf32>
    %5 = arith.addf %2, %4 : vector<2048x64xf32>
    %cst_5 = arith.constant 0.000000e+00 : f32
    %6 = vector.broadcast %cst_5 : f32 to vector<2048x64xf32>
    %7 = arith.maximumf %5, %6 : vector<2048x64xf32>
    %8 = arith.truncf %7 : vector<2048x64xf32> to vector<2048x64xbf16>
    %c0_6 = arith.constant 0 : index
    %c0_7 = arith.constant 0 : index
    %9 = vector.load %arg5[%c0_6, %c0_7] : memref<2048x64xbf16, #tpu.memory_space<vmem>>, vector<2048x64xbf16>
    tpu.vector_store %arg5[%c0_6, %c0_7], %8 {strides = array<i32>} : memref<2048x64xbf16, #tpu.memory_space<vmem>>, vector<2048x64xbf16>,
    return
  }
  func.func @transform_0(%arg0: i32, %arg1: i32) -> (i32, i32) {
    %c0_i32 = arith.constant 0 : i32
    %c0_i32_0 = arith.constant 0 : i32
    return %arg1, %c0_i32 : i32, i32
  }
  func.func @transform_1(%arg0: i32, %arg1: i32) -> (i32, i32) {
    %c0_i32 = arith.constant 0 : i32
    %c0_i32_0 = arith.constant 0 : i32
    return %c0_i32, %arg0 : i32, i32
  }
  func.func @transform_2(%arg0: i32, %arg1: i32) -> (i32, i32) {
    %c0_i32 = arith.constant 0 : i32
    %c0_i32_0 = arith.constant 0 : i32
    return %c0_i32, %arg0 : i32, i32
  }
  func.func @transform_3(%arg0: i32, %arg1: i32) -> (i32, i32) {
    %c0_i32 = arith.constant 0 : i32
    return %arg1, %arg0 : i32, i32
  }
}

module attributes {stable_mosaic.version = 11 : i64} {
  func.func @_matmul_bias_act_kernel(%arg0: i32, %arg1: i32, %arg2: memref<512x1024xbf16, #tpu.memory_space<vmem>>, %arg3: memref<1024x128xbf16, #tpu.memory_space<vmem>>, %arg4: memref<1x128xf32, #tpu.memory_space<vmem>>, %arg5: memref<512x128xbf16, #tpu.memory_space<vmem>>) attributes {dimension_semantics = [#tpu.dimension_semantics<parallel>, #tpu.dimension_semantics<parallel>], iteration_bounds = array<i64: 1, 1>, scalar_prefetch = 0 : i64, scratch_operands = 0 : i64, tpu.core_type = #tpu.core_type<tc>, window_params = [{transform_indices = @transform_0, window_bounds = array<i64: 512, 1024>}, {transform_indices = @transform_1, window_bounds = array<i64: 1024, 128>}, {transform_indices = @transform_2, window_bounds = array<i64: 1, 128>}, {transform_indices = @transform_3, window_bounds = array<i64: 512, 128>}]} {
    %c0 = arith.constant 0 : index
    %c0_0 = arith.constant 0 : index
    %0 = vector.load %arg2[%c0, %c0_0] : memref<512x1024xbf16, #tpu.memory_space<vmem>>, vector<512x1024xbf16>
    %c0_1 = arith.constant 0 : index
    %c0_2 = arith.constant 0 : index
    %1 = vector.load %arg3[%c0_1, %c0_2] : memref<1024x128xbf16, #tpu.memory_space<vmem>>, vector<1024x128xbf16>
    %cst = arith.constant dense<0.000000e+00> : vector<512x128xf32>
    %2 = tpu.matmul %0, %1, %cst {dimension_numbers = #tpu.dot_dimension_numbers<[1], [0], [0], [1], [0, 0, 1, 1], [], []>} : vector<512x1024xbf16>, vector<1024x128xbf16>, vector<512x128xf32> -> vector<512x128xf32>
    %c0_3 = arith.constant 0 : index
    %c0_4 = arith.constant 0 : index
    %3 = vector.load %arg4[%c0_3, %c0_4] : memref<1x128xf32, #tpu.memory_space<vmem>>, vector<1x128xf32>
    %4 = vector.broadcast %3 : vector<1x128xf32> to vector<512x128xf32>
    %5 = arith.addf %2, %4 : vector<512x128xf32>
    %cst_5 = arith.constant 0.000000e+00 : f32
    %6 = vector.broadcast %cst_5 : f32 to vector<512x128xf32>
    %7 = arith.maximumf %5, %6 : vector<512x128xf32>
    %8 = arith.truncf %7 : vector<512x128xf32> to vector<512x128xbf16>
    %c0_6 = arith.constant 0 : index
    %c0_7 = arith.constant 0 : index
    %9 = vector.load %arg5[%c0_6, %c0_7] : memref<512x128xbf16, #tpu.memory_space<vmem>>, vector<512x128xbf16>
    tpu.vector_store %arg5[%c0_6, %c0_7], %8 {strides = array<i32>} : memref<512x128xbf16, #tpu.memory_space<vmem>>, vector<512x128xbf16>,
    return
  }
  func.func @transform_0(%arg0: i32, %arg1: i32) -> (i32, i32) {
    %c0_i32 = arith.constant 0 : i32
    %c0_i32_0 = arith.constant 0 : i32
    return %arg1, %c0_i32 : i32, i32
  }
  func.func @transform_1(%arg0: i32, %arg1: i32) -> (i32, i32) {
    %c0_i32 = arith.constant 0 : i32
    %c0_i32_0 = arith.constant 0 : i32
    return %c0_i32, %arg0 : i32, i32
  }
  func.func @transform_2(%arg0: i32, %arg1: i32) -> (i32, i32) {
    %c0_i32 = arith.constant 0 : i32
    %c0_i32_0 = arith.constant 0 : i32
    return %c0_i32, %arg0 : i32, i32
  }
  func.func @transform_3(%arg0: i32, %arg1: i32) -> (i32, i32) {
    %c0_i32 = arith.constant 0 : i32
    return %arg1, %arg0 : i32, i32
  }
}

module attributes {stable_mosaic.version = 11 : i64} {
  func.func @_matmul_bias_act_kernel(%arg0: i32, %arg1: i32, %arg2: memref<128x2048xbf16, #tpu.memory_space<vmem>>, %arg3: memref<2048x256xbf16, #tpu.memory_space<vmem>>, %arg4: memref<1x256xf32, #tpu.memory_space<vmem>>, %arg5: memref<128x256xbf16, #tpu.memory_space<vmem>>) attributes {dimension_semantics = [#tpu.dimension_semantics<parallel>, #tpu.dimension_semantics<parallel>], iteration_bounds = array<i64: 1, 1>, scalar_prefetch = 0 : i64, scratch_operands = 0 : i64, tpu.core_type = #tpu.core_type<tc>, window_params = [{transform_indices = @transform_0, window_bounds = array<i64: 128, 2048>}, {transform_indices = @transform_1, window_bounds = array<i64: 2048, 256>}, {transform_indices = @transform_2, window_bounds = array<i64: 1, 256>}, {transform_indices = @transform_3, window_bounds = array<i64: 128, 256>}]} {
    %c0 = arith.constant 0 : index
    %c0_0 = arith.constant 0 : index
    %0 = vector.load %arg2[%c0, %c0_0] : memref<128x2048xbf16, #tpu.memory_space<vmem>>, vector<128x2048xbf16>
    %c0_1 = arith.constant 0 : index
    %c0_2 = arith.constant 0 : index
    %1 = vector.load %arg3[%c0_1, %c0_2] : memref<2048x256xbf16, #tpu.memory_space<vmem>>, vector<2048x256xbf16>
    %cst = arith.constant dense<0.000000e+00> : vector<128x256xf32>
    %2 = tpu.matmul %0, %1, %cst {dimension_numbers = #tpu.dot_dimension_numbers<[1], [0], [0], [1], [0, 0, 1, 1], [], []>} : vector<128x2048xbf16>, vector<2048x256xbf16>, vector<128x256xf32> -> vector<128x256xf32>
    %c0_3 = arith.constant 0 : index
    %c0_4 = arith.constant 0 : index
    %3 = vector.load %arg4[%c0_3, %c0_4] : memref<1x256xf32, #tpu.memory_space<vmem>>, vector<1x256xf32>
    %4 = vector.broadcast %3 : vector<1x256xf32> to vector<128x256xf32>
    %5 = arith.addf %2, %4 : vector<128x256xf32>
    %cst_5 = arith.constant 0.000000e+00 : f32
    %6 = vector.broadcast %cst_5 : f32 to vector<128x256xf32>
    %7 = arith.maximumf %5, %6 : vector<128x256xf32>
    %8 = arith.truncf %7 : vector<128x256xf32> to vector<128x256xbf16>
    %c0_6 = arith.constant 0 : index
    %c0_7 = arith.constant 0 : index
    %9 = vector.load %arg5[%c0_6, %c0_7] : memref<128x256xbf16, #tpu.memory_space<vmem>>, vector<128x256xbf16>
    tpu.vector_store %arg5[%c0_6, %c0_7], %8 {strides = array<i32>} : memref<128x256xbf16, #tpu.memory_space<vmem>>, vector<128x256xbf16>,
    return
  }
  func.func @transform_0(%arg0: i32, %arg1: i32) -> (i32, i32) {
    %c0_i32 = arith.constant 0 : i32
    %c0_i32_0 = arith.constant 0 : i32
    return %arg1, %c0_i32 : i32, i32
  }
  func.func @transform_1(%arg0: i32, %arg1: i32) -> (i32, i32) {
    %c0_i32 = arith.constant 0 : i32
    %c0_i32_0 = arith.constant 0 : i32
    return %c0_i32, %arg0 : i32, i32
  }
  func.func @transform_2(%arg0: i32, %arg1: i32) -> (i32, i32) {
    %c0_i32 = arith.constant 0 : i32
    %c0_i32_0 = arith.constant 0 : i32
    return %c0_i32, %arg0 : i32, i32
  }
  func.func @transform_3(%arg0: i32, %arg1: i32) -> (i32, i32) {
    %c0_i32 = arith.constant 0 : i32
    return %arg1, %arg0 : i32, i32
  }
}

module attributes {stable_mosaic.version = 11 : i64} {
  func.func @_matmul_bias_act_kernel(%arg0: i32, %arg1: i32, %arg2: memref<32x4096xbf16, #tpu.memory_space<vmem>>, %arg3: memref<4096x256xbf16, #tpu.memory_space<vmem>>, %arg4: memref<1x256xf32, #tpu.memory_space<vmem>>, %arg5: memref<32x256xbf16, #tpu.memory_space<vmem>>) attributes {dimension_semantics = [#tpu.dimension_semantics<parallel>, #tpu.dimension_semantics<parallel>], iteration_bounds = array<i64: 2, 1>, scalar_prefetch = 0 : i64, scratch_operands = 0 : i64, tpu.core_type = #tpu.core_type<tc>, window_params = [{transform_indices = @transform_0, window_bounds = array<i64: 32, 4096>}, {transform_indices = @transform_1, window_bounds = array<i64: 4096, 256>}, {transform_indices = @transform_2, window_bounds = array<i64: 1, 256>}, {transform_indices = @transform_3, window_bounds = array<i64: 32, 256>}]} {
    %c0 = arith.constant 0 : index
    %c0_0 = arith.constant 0 : index
    %0 = vector.load %arg2[%c0, %c0_0] : memref<32x4096xbf16, #tpu.memory_space<vmem>>, vector<32x4096xbf16>
    %c0_1 = arith.constant 0 : index
    %c0_2 = arith.constant 0 : index
    %1 = vector.load %arg3[%c0_1, %c0_2] : memref<4096x256xbf16, #tpu.memory_space<vmem>>, vector<4096x256xbf16>
    %cst = arith.constant dense<0.000000e+00> : vector<32x256xf32>
    %2 = tpu.matmul %0, %1, %cst {dimension_numbers = #tpu.dot_dimension_numbers<[1], [0], [0], [1], [0, 0, 1, 1], [], []>} : vector<32x4096xbf16>, vector<4096x256xbf16>, vector<32x256xf32> -> vector<32x256xf32>
    %c0_3 = arith.constant 0 : index
    %c0_4 = arith.constant 0 : index
    %3 = vector.load %arg4[%c0_3, %c0_4] : memref<1x256xf32, #tpu.memory_space<vmem>>, vector<1x256xf32>
    %4 = vector.broadcast %3 : vector<1x256xf32> to vector<32x256xf32>
    %5 = arith.addf %2, %4 : vector<32x256xf32>
    %cst_5 = arith.constant 0.000000e+00 : f32
    %6 = vector.broadcast %cst_5 : f32 to vector<32x256xf32>
    %7 = arith.maximumf %5, %6 : vector<32x256xf32>
    %8 = arith.truncf %7 : vector<32x256xf32> to vector<32x256xbf16>
    %c0_6 = arith.constant 0 : index
    %c0_7 = arith.constant 0 : index
    %9 = vector.load %arg5[%c0_6, %c0_7] : memref<32x256xbf16, #tpu.memory_space<vmem>>, vector<32x256xbf16>
    tpu.vector_store %arg5[%c0_6, %c0_7], %8 {strides = array<i32>} : memref<32x256xbf16, #tpu.memory_space<vmem>>, vector<32x256xbf16>,
    return
  }
  func.func @transform_0(%arg0: i32, %arg1: i32) -> (i32, i32) {
    %c0_i32 = arith.constant 0 : i32
    %c0_i32_0 = arith.constant 0 : i32
    return %arg1, %c0_i32 : i32, i32
  }
  func.func @transform_1(%arg0: i32, %arg1: i32) -> (i32, i32) {
    %c0_i32 = arith.constant 0 : i32
    %c0_i32_0 = arith.constant 0 : i32
    return %c0_i32, %arg0 : i32, i32
  }
  func.func @transform_2(%arg0: i32, %arg1: i32) -> (i32, i32) {
    %c0_i32 = arith.constant 0 : i32
    %c0_i32_0 = arith.constant 0 : i32
    return %c0_i32, %arg0 : i32, i32
  }
  func.func @transform_3(%arg0: i32, %arg1: i32) -> (i32, i32) {
    %c0_i32 = arith.constant 0 : i32
    return %arg1, %arg0 : i32, i32
  }
}

module attributes {stable_mosaic.version = 11 : i64} {
  func.func @_dot_reduce_kernel(%arg0: i32, %arg1: memref<8x8192xbf16, #tpu.memory_space<vmem>>, %arg2: memref<1x8192xbf16, #tpu.memory_space<vmem>>, %arg3: memref<8x1xf32, #tpu.memory_space<vmem>>) attributes {dimension_semantics = [#tpu.dimension_semantics<parallel>], iteration_bounds = array<i64: 1>, scalar_prefetch = 0 : i64, scratch_operands = 0 : i64, tpu.core_type = #tpu.core_type<tc>, window_params = [{transform_indices = @transform_0, window_bounds = array<i64: 8, 8192>}, {pipeline_mode = #tpu.pipeline_mode<synchronous>, transform_indices = @transform_1, window_bounds = array<i64: 1, 8192>}, {transform_indices = @transform_2, window_bounds = array<i64: 8, 1>}]} {
    %c0 = arith.constant 0 : index
    %c0_0 = arith.constant 0 : index
    %0 = vector.load %arg1[%c0, %c0_0] : memref<8x8192xbf16, #tpu.memory_space<vmem>>, vector<8x8192xbf16>
    %1 = arith.extf %0 : vector<8x8192xbf16> to vector<8x8192xf32>
    %c0_1 = arith.constant 0 : index
    %c0_2 = arith.constant 0 : index
    %2 = vector.load %arg2[%c0_1, %c0_2] : memref<1x8192xbf16, #tpu.memory_space<vmem>>, vector<1x8192xbf16>
    %3 = arith.extf %2 : vector<1x8192xbf16> to vector<1x8192xf32>
    %4 = vector.broadcast %3 : vector<1x8192xf32> to vector<8x8192xf32>
    %5 = arith.mulf %1, %4 : vector<8x8192xf32>
    %cst = arith.constant dense<0.000000e+00> : vector<8xf32>
    %6 = vector.multi_reduction <add>, %5, %cst [1] : vector<8x8192xf32> to vector<8xf32>
    %7 = vector.shape_cast %6 : vector<8xf32> to vector<8x1xf32>
    %c0_3 = arith.constant 0 : index
    %c0_4 = arith.constant 0 : index
    %8 = vector.load %arg3[%c0_3, %c0_4] : memref<8x1xf32, #tpu.memory_space<vmem>>, vector<8x1xf32>
    tpu.vector_store %arg3[%c0_3, %c0_4], %7 {strides = array<i32>} : memref<8x1xf32, #tpu.memory_space<vmem>>, vector<8x1xf32>,
    return
  }
  func.func @transform_0(%arg0: i32) -> (i32, i32) {
    %c0_i32 = arith.constant 0 : i32
    %c0_i32_0 = arith.constant 0 : i32
    return %arg0, %c0_i32 : i32, i32
  }
  func.func @transform_1(%arg0: i32) -> (i32, i32) {
    %c0_i32 = arith.constant 0 : i32
    %c0_i32_0 = arith.constant 0 : i32
    %c0_i32_1 = arith.constant 0 : i32
    return %c0_i32, %c0_i32_0 : i32, i32
  }
  func.func @transform_2(%arg0: i32) -> (i32, i32) {
    %c0_i32 = arith.constant 0 : i32
    %c0_i32_0 = arith.constant 0 : i32
    return %arg0, %c0_i32 : i32, i32
  }
}

</mosaic_0001>

<bundles_post_ra>
// kernel: normal_discriminator_forward.5
= control target key start
LH: loop header
LB: loop body
LE: loop exit
PB: predicated region body
PF: predicated region fallthrough
CT: control target
= control target key end

     0   :  { %8 = vsyncpa [#allocation3], 0  ;;  %s7125_s0 = inlined_call_operand.vmem [shape: bf16[2048,16], index: 0, kind: input, shape index: {}]   ;;  %s7126_s1 = inlined_call_operand.hbm [shape: bf16[16,64], index: 1, kind: input, shape index: {}]   ;;  %s7127_s2 = inlined_call_operand.hbm [shape: f32[1,64], index: 2, kind: input, shape index: {}]   ;;  %s7128_s3 = inlined_call_operand.vmem [shape: bf16[2048,64], index: 3, kind: output, shape index: {}]  }
   0x1   :  { %9 = vsyncpa [#allocation5], 0  ;;  %s5279_s12 = smov [#allocation2]   ;;  %s5231_s16 = scalar_lea.hbm %s7126_s1, 128 }
   0x2   :  { %s17_s13 = sshll.u32 %s5279_s12, 4  ;;  %p5232_p0 = scmp.ne.s32.totalorder %s7126_s1, %s5231_s16  ;;  %s18_s13 = int_to_ptr.vmem [resolvable:$true] %s17_s13 }
   0x3   :  { %p5235_p1 = scmp.lt.u32.totalorder %s5231_s16, %s7126_s1 }
   0x5   :  { %p5237_p2 = pnand %p5235_p1, %p5232_p0 }
   0x7   :  { %5240 = shalt.err (!%p5237_p2)
}
   0x8   :  { %s5241_s21 = scalar_lea.vmem %s18_s13, 128  ;;  %p5246_p4 = scmp.lt.s32.totalorder %s18_s13, %s18_s13 }
   0x9   :  { %p5242_p3 = scmp.ne.s32.totalorder %s18_s13, %s5241_s21  ;;  %p5247_p5 = scmp.lt.s32.totalorder %s5241_s21, %s5241_s21 }
   0xb   :  { %p5248_p6 = por %p5247_p5, %p5246_p4 }
   0xd   :  { %p5249_p7 = pnand %p5248_p6, %p5242_p3 }
   0xf   :  { %5252 = shalt.err (!%p5249_p7)
}
  0x10   :  { %s5280_s22 = smov 64   ;;  %s5281_s23 = smov 4  }
  0x11   :  { %23 = dma.hbm_to_vmem [thread:$0]  %s7126_s1, 128, %s18_s13, [#allocation3], %s5280_s22, %s5280_s22, %s5281_s23  }
  0x12   :  { %s5282_s26 = smov [#allocation4]   ;;  %s5253_s30 = scalar_lea.hbm %s7127_s2, 16 }
  0x13   :  { %s30_s27 = sshll.u32 %s5282_s26, 4  ;;  %p5254_p8 = scmp.ne.s32.totalorder %s7127_s2, %s5253_s30  ;;  %s31_s27 = int_to_ptr.vmem [resolvable:$true] %s30_s27 }
  0x14   :  { %p5257_p9 = scmp.lt.u32.totalorder %s5253_s30, %s7127_s2 }
  0x16   :  { %p5259_p10 = pnand %p5257_p9, %p5254_p8 }
  0x18   :  { %5262 = shalt.err (!%p5259_p10)
}
  0x19   :  { %s5263_s8 = scalar_lea.vmem %s31_s27, 16  ;;  %s5267_s1 = scalar_lea.vmem %s31_s27, 32 }
  0x1a   :  { %p5264_p11 = scmp.ne.s32.totalorder %s31_s27, %s5263_s8  ;;  %p5268_p12 = scmp.lt.s32.totalorder %s31_s27, %s31_s27 }
  0x1b   :  { %p5269_p13 = scmp.lt.s32.totalorder %s5267_s1, %s5263_s8 }
  0x1d   :  { %p5270_p0 = por %p5269_p13, %p5268_p12 }
  0x1f   :  { %p5271_p1 = pnand %p5270_p0, %p5264_p11 }
  0x21   :  { %5274 = shalt.err (!%p5271_p1)
}
  0x22   :  { %33 = dma.hbm_to_vmem [thread:$0]  %s7127_s2, 16, %s31_s27, [#allocation5]  }
  0x23   :  { %5275 = dma.done.wait [#allocation3], 128  }
  0x24   :  { %5276 = vsyncadd [#allocation3], 4294967168 }
  0x25   :  { %5277 = dma.done.wait [#allocation5], 16  }
  0x26   :  { %5278 = vsyncadd [#allocation5], 4294967280  ;;  %v5100_v0 = vld [vmem:[#allocation2] sm:$0xff]   ;;  %vm952_vm0 = vcmask 130048   ;;  %v5103_v3 = vld [vmem:[%s7125_s0 + $0x8] sm:$0xff]   ;;  %vm3674_vm1 = vcmask 519168  }
  0x27   :  { %v5101_v1 = vld [vmem:[%s7125_s0] sm:$0xff]   ;;  %4836 = vmatprep.subr.bf16.mxu0 %v5100_v0  ;;  %5094 = vmatprep.subr.bf16.mxu1 %v5100_v0  ;;  %v5104_v4 = vld [vmem:[%s7125_s0 + $0x208] sm:$0xff]   ;;  %v5105_v5 = vld [vmem:[%s7125_s0 + $0x10] sm:$0xff]  }
  0x28   :  { %v5102_v2 = vld [vmem:[%s7125_s0 + $0x200] sm:$0xff]   ;;  %4837 = vmatpush3.bf16.msra.mxu0 %v5100_v0  ;;  %5095 = vmatpush3.bf16.msra.mxu1 %v5100_v0  ;;  %v5106_v6 = vld [vmem:[%s7125_s0 + $0x210] sm:$0xff]   ;;  %v5107_v7 = vld [vmem:[%s7125_s0 + $0x18] sm:$0xff]  }
  0x29   :  { %4838 = vmatprep.mubr.msk.bf16.mxu0 %vm952_vm0, %v5101_v1  ;;  %4966 = vmatprep.mubr.msk.bf16.mxu1 %vm952_vm0, %v5102_v2  ;;  %v5108_v8 = vld [vmem:[%s7125_s0 + $0x218] sm:$0xff]   ;;  %v5109_v9 = vld [vmem:[%s7125_s0 + $0x20] sm:$0xff]   ;;  %v5111_v11 = vld [vmem:[%s7125_s0 + $0x28] sm:$0xff]  }
  0x2a   :  { %v5110_v10 = vld [vmem:[%s7125_s0 + $0x220] sm:$0xff]   ;;  %v5112_v12 = vld [vmem:[%s7125_s0 + $0x228] sm:$0xff]   ;;  %v5113_v13 = vld [vmem:[%s7125_s0 + $0x30] sm:$0xff]  }
  0x2b   :  { %4839 = vmatmul.mubr.msk.bf16.vlgmr.msra.gmra.mrb[0].mxu0 %vm952_vm0, %v5103_v3  ;;  %4967 = vmatmul.mubr.msk.bf16.vlgmr.msra.gmra.mrb[0].mxu1 %vm952_vm0, %v5104_v4  ;;  %v5114_v14 = vld [vmem:[%s7125_s0 + $0x230] sm:$0xff]   ;;  %v5115_v15 = vld [vmem:[%s7125_s0 + $0x38] sm:$0xff]   ;;  %v5117_v17 = vld [vmem:[%s7125_s0 + $0x40] sm:$0xff]  }
  0x2c   :  { %4842 = vmatprep.mubr.msk.bf16.mxu0 %vm952_vm0, %v5105_v5  ;;  %4970 = vmatprep.mubr.msk.bf16.mxu1 %vm952_vm0, %v5106_v6  ;;  %v5116_v16 = vld [vmem:[%s7125_s0 + $0x238] sm:$0xff]   ;;  %v5118_v18 = vld [vmem:[%s7125_s0 + $0x240] sm:$0xff]   ;;  %v5119_v19 = vld [vmem:[%s7125_s0 + $0x48] sm:$0xff]  }
  0x2d   :  { %v5120_v20 = vld [vmem:[%s7125_s0 + $0x248] sm:$0xff]   ;;  %v5121_v21 = vld [vmem:[%s7125_s0 + $0x50] sm:$0xff]   ;;  %v5123_v23 = vld [vmem:[%s7125_s0 + $0x58] sm:$0xff]  }
  0x2e   :  { %v5122_v22 = vld [vmem:[%s7125_s0 + $0x250] sm:$0xff]   ;;  %v5124_v24 = vld [vmem:[%s7125_s0 + $0x258] sm:$0xff]   ;;  %v5125_v25 = vld [vmem:[%s7125_s0 + $0x60] sm:$0xff]  }
  0x2f   :  { %v5126_v26 = vld [vmem:[%s7125_s0 + $0x260] sm:$0xff]   ;;  %v5127_v27 = vld [vmem:[%s7125_s0 + $0x68] sm:$0xff]   ;;  %v5129_v29 = vld [vmem:[%s7125_s0 + $0x70] sm:$0xff]  }
  0x30   :  { %v5128_v28 = vld [vmem:[%s7125_s0 + $0x268] sm:$0xff]   ;;  %v5130_v30 = vld [vmem:[%s7125_s0 + $0x270] sm:$0xff]   ;;  %v5131_v31 = vld [vmem:[%s7125_s0 + $0x78] sm:$0xff]  }
  0x31   :  { %v5132_v32 = vld [vmem:[%s7125_s0 + $0x278] sm:$0xff]   ;;  %v5133_v33 = vld [vmem:[%s7125_s0 + $0x80] sm:$0xff]   ;;  %v5135_v35 = vld [vmem:[%s7125_s0 + $0x88] sm:$0xff]  }
  0x32   :  { %v5134_v34 = vld [vmem:[%s7125_s0 + $0x280] sm:$0xff]   ;;  %v5136_v36 = vld [vmem:[%s7125_s0 + $0x288] sm:$0xff]   ;;  %v5137_v37 = vld [vmem:[%s7125_s0 + $0x90] sm:$0xff]  }
  0x33   :  { %4843 = vmatmul.mubr.msk.bf16.gmra.mrb[4].mxu0 %vm952_vm0, %v5107_v7  ;;  %4971 = vmatmul.mubr.msk.bf16.gmra.mrb[4].mxu1 %vm952_vm0, %v5108_v8  ;;  %v5138_v38 = vld [vmem:[%s7125_s0 + $0x290] sm:$0xff]   ;;  %v5139_v39 = vld [vmem:[%s7125_s0 + $0x98] sm:$0xff]   ;;  %v5141_v41 = vld [vmem:[%s7125_s0 + $0xa0] sm:$0xff]  }
  0x34   :  { %4846 = vmatprep.mubr.msk.bf16.mxu0 %vm952_vm0, %v5109_v9  ;;  %4974 = vmatprep.mubr.msk.bf16.mxu1 %vm952_vm0, %v5110_v10  ;;  %v5140_v40 = vld [vmem:[%s7125_s0 + $0x298] sm:$0xff]   ;;  %v5142_v42 = vld [vmem:[%s7125_s0 + $0x2a0] sm:$0xff]   ;;  %v5143_v43 = vld [vmem:[%s7125_s0 + $0xa8] sm:$0xff]  }
  0x35   :  { %v5144_v44 = vld [vmem:[%s7125_s0 + $0x2a8] sm:$0xff]   ;;  %v5145_v45 = vld [vmem:[%s7125_s0 + $0xb0] sm:$0xff]   ;;  %v5147_v47 = vld [vmem:[%s7125_s0 + $0xb8] sm:$0xff]  }
  0x36   :  { %v5146_v46 = vld [vmem:[%s7125_s0 + $0x2b0] sm:$0xff]   ;;  %v5148_v48 = vld [vmem:[%s7125_s0 + $0x2b8] sm:$0xff]   ;;  %v5149_v49 = vld [vmem:[%s7125_s0 + $0xc0] sm:$0xff]  }
  0x37   :  { %v5150_v50 = vld [vmem:[%s7125_s0 + $0x2c0] sm:$0xff]   ;;  %v5151_v51 = vld [vmem:[%s7125_s0 + $0xc8] sm:$0xff]   ;;  %v5153_v53 = vld [vmem:[%s7125_s0 + $0xd0] sm:$0xff]  }
  0x38   :  { %v5152_v52 = vld [vmem:[%s7125_s0 + $0x2c8] sm:$0xff]   ;;  %v5154_v54 = vld [vmem:[%s7125_s0 + $0x2d0] sm:$0xff]   ;;  %v5155_v55 = vld [vmem:[%s7125_s0 + $0xd8] sm:$0xff]  }
  0x39   :  { %v5156_v56 = vld [vmem:[%s7125_s0 + $0x2d8] sm:$0xff]   ;;  %v5157_v57 = vld [vmem:[%s7125_s0 + $0xe0] sm:$0xff]   ;;  %v5159_v59 = vld [vmem:[%s7125_s0 + $0xe8] sm:$0xff]  }
  0x3a   :  { %v5158_v58 = vld [vmem:[%s7125_s0 + $0x2e0] sm:$0xff]   ;;  %v5160_v60 = vld [vmem:[%s7125_s0 + $0x2e8] sm:$0xff]   ;;  %v5161_v61 = vld [vmem:[%s7125_s0 + $0xf0] sm:$0xff]  }
  0x3b   :  { %4847 = vmatmul.mubr.msk.bf16.gmra.mrb[8].mxu0 %vm952_vm0, %v5111_v11  ;;  %4975 = vmatmul.mubr.msk.bf16.gmra.mrb[8].mxu1 %vm952_vm0, %v5112_v12  ;;  %v5162_v62 = vld [vmem:[%s7125_s0 + $0x2f0] sm:$0xff]   ;;  %v5163_v63 = vld [vmem:[%s7125_s0 + $0xf8] sm:$0xff]   ;;  %v5165_v1 = vld [vmem:[%s7125_s0 + $0x100] sm:$0xff]  }
  0x3c   :  { %4850 = vmatprep.mubr.msk.bf16.mxu0 %vm952_vm0, %v5113_v13  ;;  %4978 = vmatprep.mubr.msk.bf16.mxu1 %vm952_vm0, %v5114_v14  ;;  %v5164_v0 = vld [vmem:[%s7125_s0 + $0x2f8] sm:$0xff]   ;;  %v5166_v2 = vld [vmem:[%s7125_s0 + $0x300] sm:$0xff]   ;;  %v5167_v3 = vld [vmem:[%s7125_s0 + $0x108] sm:$0xff]  }
  0x3d   :  { %v5168_v4 = vld [vmem:[%s7125_s0 + $0x308] sm:$0xff]   ;;  %v5169_v5 = vld [vmem:[%s7125_s0 + $0x110] sm:$0xff]   ;;  %v5171_v7 = vld [vmem:[%s7125_s0 + $0x118] sm:$0xff]  }
  0x3e   :  { %v5170_v6 = vld [vmem:[%s7125_s0 + $0x310] sm:$0xff]   ;;  %v5172_v8 = vld [vmem:[%s7125_s0 + $0x318] sm:$0xff]   ;;  %v5173_v9 = vld [vmem:[%s7125_s0 + $0x120] sm:$0xff]  }
  0x3f   :  { %v5174_v10 = vld [vmem:[%s7125_s0 + $0x320] sm:$0xff]   ;;  %v5175_v11 = vld [vmem:[%s7125_s0 + $0x128] sm:$0xff]   ;;  %v5177_v13 = vld [vmem:[%s7125_s0 + $0x130] sm:$0xff]  }
  0x40   :  { %v5176_v12 = vld [vmem:[%s7125_s0 + $0x328] sm:$0xff]   ;;  %v5178_v14 = vld [vmem:[%s7125_s0 + $0x330] sm:$0xff]  }
  0x43   :  { %4851 = vmatmul.mubr.msk.bf16.gmra.mrb[12].mxu0 %vm952_vm0, %v5115_v15  ;;  %4979 = vmatmul.mubr.msk.bf16.gmra.mrb[12].mxu1 %vm952_vm0, %v5116_v16  ;;  %v5179_v15 = vld [vmem:[%s7125_s0 + $0x138] sm:$0xff]  }
  0x44   :  { %4854 = vmatprep.mubr.msk.bf16.mxu0 %vm952_vm0, %v5117_v17  ;;  %4982 = vmatprep.mubr.msk.bf16.mxu1 %vm952_vm0, %v5118_v18  ;;  %v5180_v16 = vld [vmem:[%s7125_s0 + $0x338] sm:$0xff]   ;;  %v5181_v17 = vld [vmem:[%s7125_s0 + $0x140] sm:$0xff]  }
  0x45   :  { %v5182_v18 = vld [vmem:[%s7125_s0 + $0x340] sm:$0xff]  }
  0x4b   :  { %4855 = vmatmul.mubr.msk.bf16.gmra.mrb[16].mxu0 %vm952_vm0, %v5119_v19  ;;  %4983 = vmatmul.mubr.msk.bf16.gmra.mrb[16].mxu1 %vm952_vm0, %v5120_v20  ;;  %v5183_v19 = vld [vmem:[%s7125_s0 + $0x148] sm:$0xff]  }
  0x4c   :  { %4858 = vmatprep.mubr.msk.bf16.mxu0 %vm952_vm0, %v5121_v21  ;;  %4986 = vmatprep.mubr.msk.bf16.mxu1 %vm952_vm0, %v5122_v22  ;;  %v5184_v20 = vld [vmem:[%s7125_s0 + $0x348] sm:$0xff]   ;;  %v5185_v21 = vld [vmem:[%s7125_s0 + $0x150] sm:$0xff]  }
  0x4d   :  { %v5186_v22 = vld [vmem:[%s7125_s0 + $0x350] sm:$0xff]  }
  0x53   :  { %4859 = vmatmul.mubr.msk.bf16.gmra.mrb[20].mxu0 %vm952_vm0, %v5123_v23  ;;  %4987 = vmatmul.mubr.msk.bf16.gmra.mrb[20].mxu1 %vm952_vm0, %v5124_v24  ;;  %v5187_v23 = vld [vmem:[%s7125_s0 + $0x158] sm:$0xff]  }
  0x54   :  { %4862 = vmatprep.mubr.msk.bf16.mxu0 %vm952_vm0, %v5125_v25  ;;  %4990 = vmatprep.mubr.msk.bf16.mxu1 %vm952_vm0, %v5126_v26  ;;  %v5188_v24 = vld [vmem:[%s7125_s0 + $0x358] sm:$0xff]   ;;  %v5189_v25 = vld [vmem:[%s7125_s0 + $0x160] sm:$0xff]  }
  0x55   :  { %v5190_v26 = vld [vmem:[%s7125_s0 + $0x360] sm:$0xff]  }
  0x5b   :  { %4863 = vmatmul.mubr.msk.bf16.gmra.mrb[24].mxu0 %vm952_vm0, %v5127_v27  ;;  %4991 = vmatmul.mubr.msk.bf16.gmra.mrb[24].mxu1 %vm952_vm0, %v5128_v28  ;;  %v5191_v27 = vld [vmem:[%s7125_s0 + $0x168] sm:$0xff]  }
  0x5c   :  { %4866 = vmatprep.mubr.msk.bf16.mxu0 %vm952_vm0, %v5129_v29  ;;  %4994 = vmatprep.mubr.msk.bf16.mxu1 %vm952_vm0, %v5130_v30  ;;  %v5192_v28 = vld [vmem:[%s7125_s0 + $0x368] sm:$0xff]   ;;  %v5193_v29 = vld [vmem:[%s7125_s0 + $0x170] sm:$0xff]  }
  0x5d   :  { %v5194_v30 = vld [vmem:[%s7125_s0 + $0x370] sm:$0xff]  }
  0x63   :  { %4867 = vmatmul.mubr.msk.bf16.gmra.mrb[28].mxu0 %vm952_vm0, %v5131_v31  ;;  %4995 = vmatmul.mubr.msk.bf16.gmra.mrb[28].mxu1 %vm952_vm0, %v5132_v32  ;;  %v5195_v31 = vld [vmem:[%s7125_s0 + $0x178] sm:$0xff]  }
  0x64   :  { %4870 = vmatprep.mubr.msk.bf16.mxu0 %vm952_vm0, %v5133_v33  ;;  %4998 = vmatprep.mubr.msk.bf16.mxu1 %vm952_vm0, %v5134_v34  ;;  %v5196_v32 = vld [vmem:[%s7125_s0 + $0x378] sm:$0xff]   ;;  %v5197_v33 = vld [vmem:[%s7125_s0 + $0x180] sm:$0xff]  }
  0x65   :  { %v5198_v34 = vld [vmem:[%s7125_s0 + $0x380] sm:$0xff]  }
  0x6b   :  { %4871 = vmatmul.mubr.msk.bf16.gmra.mrb[32].mxu0 %vm952_vm0, %v5135_v35  ;;  %4999 = vmatmul.mubr.msk.bf16.gmra.mrb[32].mxu1 %vm952_vm0, %v5136_v36  ;;  %v5199_v35 = vld [vmem:[%s7125_s0 + $0x188] sm:$0xff]  }
  0x6c   :  { %4874 = vmatprep.mubr.msk.bf16.mxu0 %vm952_vm0, %v5137_v37  ;;  %5002 = vmatprep.mubr.msk.bf16.mxu1 %vm952_vm0, %v5138_v38  ;;  %v5200_v36 = vld [vmem:[%s7125_s0 + $0x388] sm:$0xff]   ;;  %v5201_v37 = vld [vmem:[%s7125_s0 + $0x190] sm:$0xff]  }
  0x6d   :  { %v5202_v38 = vld [vmem:[%s7125_s0 + $0x390] sm:$0xff]  }
  0x73   :  { %4875 = vmatmul.mubr.msk.bf16.gmra.mrb[36].mxu0 %vm952_vm0, %v5139_v39  ;;  %5003 = vmatmul.mubr.msk.bf16.gmra.mrb[36].mxu1 %vm952_vm0, %v5140_v40  ;;  %v5203_v39 = vld [vmem:[%s7125_s0 + $0x198] sm:$0xff]  }
  0x74   :  { %4878 = vmatprep.mubr.msk.bf16.mxu0 %vm952_vm0, %v5141_v41  ;;  %5006 = vmatprep.mubr.msk.bf16.mxu1 %vm952_vm0, %v5142_v42  ;;  %v5204_v40 = vld [vmem:[%s7125_s0 + $0x398] sm:$0xff]   ;;  %v5205_v41 = vld [vmem:[%s7125_s0 + $0x1a0] sm:$0xff]  }
  0x75   :  { %v5206_v42 = vld [vmem:[%s7125_s0 + $0x3a0] sm:$0xff]  }
  0x7b   :  { %4879 = vmatmul.mubr.msk.bf16.gmra.mrb[40].mxu0 %vm952_vm0, %v5143_v43  ;;  %5007 = vmatmul.mubr.msk.bf16.gmra.mrb[40].mxu1 %vm952_vm0, %v5144_v44  ;;  %v5207_v43 = vld [vmem:[%s7125_s0 + $0x1a8] sm:$0xff]  }
  0x7c   :  { %4882 = vmatprep.mubr.msk.bf16.mxu0 %vm952_vm0, %v5145_v45  ;;  %5010 = vmatprep.mubr.msk.bf16.mxu1 %vm952_vm0, %v5146_v46  ;;  %v5208_v44 = vld [vmem:[%s7125_s0 + $0x3a8] sm:$0xff]   ;;  %v5209_v45 = vld [vmem:[%s7125_s0 + $0x1b0] sm:$0xff]  }
  0x7d   :  { %v5210_v46 = vld [vmem:[%s7125_s0 + $0x3b0] sm:$0xff]  }
  0x83   :  { %4883 = vmatmul.mubr.msk.bf16.gmra.mrb[44].mxu0 %vm952_vm0, %v5147_v47  ;;  %5011 = vmatmul.mubr.msk.bf16.gmra.mrb[44].mxu1 %vm952_vm0, %v5148_v48  ;;  %v5765_v47 = vld [vmem:[#allocation4] ss:$0 sm:$0xff] }
  0x84   :  { %4886 = vmatprep.mubr.msk.bf16.mxu0 %vm952_vm0, %v5149_v49  ;;  %5014 = vmatprep.mubr.msk.bf16.mxu1 %vm952_vm0, %v5150_v50 }
  0x8b   :  { %4887 = vmatmul.mubr.msk.bf16.gmra.mrb[48].mxu0 %vm952_vm0, %v5151_v51  ;;  %5015 = vmatmul.mubr.msk.bf16.gmra.mrb[48].mxu1 %vm952_vm0, %v5152_v52 }
  0x8c   :  { %4890 = vmatprep.mubr.msk.bf16.mxu0 %vm952_vm0, %v5153_v53  ;;  %5018 = vmatprep.mubr.msk.bf16.mxu1 %vm952_vm0, %v5154_v54  ;;  %v5211_v54 = vld [vmem:[%s7125_s0 + $0x1b8] sm:$0xff]  }
  0x93   :  { %4891 = vmatmul.mubr.msk.bf16.gmra.mrb[52].mxu0 %vm952_vm0, %v5155_v55  ;;  %5019 = vmatmul.mubr.msk.bf16.gmra.mrb[52].mxu1 %vm952_vm0, %v5156_v56  ;;  %v5212_v55 = vld [vmem:[%s7125_s0 + $0x3b8] sm:$0xff]  }
  0x94   :  { %4894 = vmatprep.mubr.msk.bf16.mxu0 %vm952_vm0, %v5157_v57  ;;  %5022 = vmatprep.mubr.msk.bf16.mxu1 %vm952_vm0, %v5158_v58 }
  0x9b   :  { %4895 = vmatmul.mubr.msk.bf16.gmra.mrb[56].mxu0 %vm952_vm0, %v5159_v59  ;;  %5023 = vmatmul.mubr.msk.bf16.gmra.mrb[56].mxu1 %vm952_vm0, %v5160_v60  ;;  %v5213_v60 = vld [vmem:[%s7125_s0 + $0x1c0] sm:$0xff]  }
  0x9c   :  { %4898 = vmatprep.mubr.msk.bf16.mxu0 %vm952_vm0, %v5161_v61  ;;  %5026 = vmatprep.mubr.msk.bf16.mxu1 %vm952_vm0, %v5162_v62  ;;  %v5214_v61 = vld [vmem:[%s7125_s0 + $0x3c0] sm:$0xff]  }
  0xa3   :  { %4899 = vmatmul.mubr.msk.bf16.gmra.mrb[60].mxu0 %vm952_vm0, %v5163_v63  ;;  %5027 = vmatmul.mubr.msk.bf16.gmra.mrb[60].mxu1 %vm952_vm0, %v5164_v0 }
  0xa4   :  { %4902 = vmatprep.mubr.msk.bf16.mxu0 %vm952_vm0, %v5165_v1  ;;  %5030 = vmatprep.mubr.msk.bf16.mxu1 %vm952_vm0, %v5166_v2 }
  0xab   :  { %4903 = vmatmul.mubr.msk.bf16.gmra.mrb[64].mxu0 %vm952_vm0, %v5167_v3  ;;  %5031 = vmatmul.mubr.msk.bf16.gmra.mrb[64].mxu1 %vm952_vm0, %v5168_v4 }
  0xac   :  { %4906 = vmatprep.mubr.msk.bf16.mxu0 %vm952_vm0, %v5169_v5  ;;  %5034 = vmatprep.mubr.msk.bf16.mxu1 %vm952_vm0, %v5170_v6 }
  0xb3   :  { %4907 = vmatmul.mubr.msk.bf16.gmra.mrb[68].mxu0 %vm952_vm0, %v5171_v7  ;;  %5035 = vmatmul.mubr.msk.bf16.gmra.mrb[68].mxu1 %vm952_vm0, %v5172_v8 }
  0xb4   :  { %4910 = vmatprep.mubr.msk.bf16.mxu0 %vm952_vm0, %v5173_v9  ;;  %5038 = vmatprep.mubr.msk.bf16.mxu1 %vm952_vm0, %v5174_v10 }
  0xbb   :  { %4911 = vmatmul.mubr.msk.bf16.gmra.mrb[72].mxu0 %vm952_vm0, %v5175_v11  ;;  %5039 = vmatmul.mubr.msk.bf16.gmra.mrb[72].mxu1 %vm952_vm0, %v5176_v12 }
  0xbc   :  { %4914 = vmatprep.mubr.msk.bf16.mxu0 %vm952_vm0, %v5177_v13  ;;  %5042 = vmatprep.mubr.msk.bf16.mxu1 %vm952_vm0, %v5178_v14 }
  0xc3   :  { %4915 = vmatmul.mubr.msk.bf16.gmra.mrb[76].mxu0 %vm952_vm0, %v5179_v15  ;;  %5043 = vmatmul.mubr.msk.bf16.gmra.mrb[76].mxu1 %vm952_vm0, %v5180_v16 }
  0xc4   :  { %4918 = vmatprep.mubr.msk.bf16.mxu0 %vm952_vm0, %v5181_v17  ;;  %5046 = vmatprep.mubr.msk.bf16.mxu1 %vm952_vm0, %v5182_v18 }
  0xcb   :  { %4919 = vmatmul.mubr.msk.bf16.gmra.mrb[80].mxu0 %vm952_vm0, %v5183_v19  ;;  %5047 = vmatmul.mubr.msk.bf16.gmra.mrb[80].mxu1 %vm952_vm0, %v5184_v20 }
  0xcc   :  { %4922 = vmatprep.mubr.msk.bf16.mxu0 %vm952_vm0, %v5185_v21  ;;  %5050 = vmatprep.mubr.msk.bf16.mxu1 %vm952_vm0, %v5186_v22 }
  0xd3   :  { %4923 = vmatmul.mubr.msk.bf16.gmra.mrb[84].mxu0 %vm952_vm0, %v5187_v23  ;;  %5051 = vmatmul.mubr.msk.bf16.gmra.mrb[84].mxu1 %vm952_vm0, %v5188_v24 }
  0xd4   :  { %4926 = vmatprep.mubr.msk.bf16.mxu0 %vm952_vm0, %v5189_v25  ;;  %5054 = vmatprep.mubr.msk.bf16.mxu1 %vm952_vm0, %v5190_v26  ;;  %v5215_v26 = vld [vmem:[%s7125_s0 + $0x1c8] sm:$0xff]  }
  0xdb   :  { %4927 = vmatmul.mubr.msk.bf16.gmra.mrb[88].mxu0 %vm952_vm0, %v5191_v27  ;;  %5055 = vmatmul.mubr.msk.bf16.gmra.mrb[88].mxu1 %vm952_vm0, %v5192_v28  ;;  %v5216_v27 = vld [vmem:[%s7125_s0 + $0x3c8] sm:$0xff]  }
  0xdc   :  { %4930 = vmatprep.mubr.msk.bf16.mxu0 %vm952_vm0, %v5193_v29  ;;  %5058 = vmatprep.mubr.msk.bf16.mxu1 %vm952_vm0, %v5194_v30 }
  0xe3   :  { %4931 = vmatmul.mubr.msk.bf16.gmra.mrb[92].mxu0 %vm952_vm0, %v5195_v31  ;;  %5059 = vmatmul.mubr.msk.bf16.gmra.mrb[92].mxu1 %vm952_vm0, %v5196_v32  ;;  %v5217_v32 = vld [vmem:[%s7125_s0 + $0x1d0] sm:$0xff]  }
  0xe4   :  { %4934 = vmatprep.mubr.msk.bf16.mxu0 %vm952_vm0, %v5197_v33  ;;  %5062 = vmatprep.mubr.msk.bf16.mxu1 %vm952_vm0, %v5198_v34  ;;  %v5218_v33 = vld [vmem:[%s7125_s0 + $0x3d0] sm:$0xff]  }
  0xeb   :  { %4935 = vmatmul.mubr.msk.bf16.gmra.mrb[96].mxu0 %vm952_vm0, %v5199_v35  ;;  %5063 = vmatmul.mubr.msk.bf16.gmra.mrb[96].mxu1 %vm952_vm0, %v5200_v36 }
  0xec   :  { %4938 = vmatprep.mubr.msk.bf16.mxu0 %vm952_vm0, %v5201_v37  ;;  %5066 = vmatprep.mubr.msk.bf16.mxu1 %vm952_vm0, %v5202_v38 }
  0xf3   :  { %4939 = vmatmul.mubr.msk.bf16.gmra.mrb[100].mxu0 %vm952_vm0, %v5203_v39  ;;  %5067 = vmatmul.mubr.msk.bf16.gmra.mrb[100].mxu1 %vm952_vm0, %v5204_v40 }
  0xf4   :  { %4942 = vmatprep.mubr.msk.bf16.mxu0 %vm952_vm0, %v5205_v41  ;;  %5070 = vmatprep.mubr.msk.bf16.mxu1 %vm952_vm0, %v5206_v42 }
  0xfb   :  { %4943 = vmatmul.mubr.msk.bf16.gmra.mrb[104].mxu0 %vm952_vm0, %v5207_v43  ;;  %5071 = vmatmul.mubr.msk.bf16.gmra.mrb[104].mxu1 %vm952_vm0, %v5208_v44 }
  0xfc   :  { %4946 = vmatprep.mubr.msk.bf16.mxu0 %vm952_vm0, %v5209_v45  ;;  %5074 = vmatprep.mubr.msk.bf16.mxu1 %vm952_vm0, %v5210_v46 }
  0xfe   :  { %v4840_v48 = vpop.f32.mrb[0].mxu0  ;;  %v4968_v49 = vpop.f32.mrb[0].mxu1 }
  0xff   :  { %v1380_v50 = vadd.f32 %v4840_v48, %v5765_v47  ;;  %v1892_v51 = vadd.f32 %v4968_v49, %v5765_v47  ;;  %v1371_v52 = vpop.f32.mrb[1].mxu0  ;;  %v1883_v53 = vpop.f32.mrb[1].mxu1 }
 0x100   :  { %v1372_v56 = vadd.f32 %v5765_v47, %v1371_v52  ;;  %v1884_v57 = vadd.f32 %v5765_v47, %v1883_v53  ;;  %v4841_v58 = vpop.f32.mrb[2].mxu0  ;;  %v4969_v59 = vpop.f32.mrb[2].mxu1 }
 0x101   :  { %v2396_v62 = vmax.f32 %v1380_v50, 0.0  ;;  %v2524_v63 = vmax.f32 %v1892_v51, 0.0  ;;  %v1383_v0 = vadd.f32 %v4841_v58, %v5765_v47  ;;  %v1895_v1 = vadd.f32 %v4969_v59, %v5765_v47  ;;  %v1374_v2 = vpop.f32.mrb[3].mxu0  ;;  %v1886_v3 = vpop.f32.mrb[3].mxu1 }
 0x102   :  { %v2394_v4 = vmax.f32 %v1372_v56, 0.0  ;;  %v2522_v5 = vmax.f32 %v1884_v57, 0.0  ;;  %v1375_v6 = vadd.f32 %v5765_v47, %v1374_v2  ;;  %v1887_v7 = vadd.f32 %v5765_v47, %v1886_v3 }
 0x103   :  { %v4453_v8 = vpack.c.bf16 %v2396_v62, %v2396_v62  ;;  %v4581_v9 = vpack.c.bf16 %v2524_v63, %v2524_v63  ;;  %v2397_v10 = vmax.f32 %v1383_v0, 0.0  ;;  %v2525_v11 = vmax.f32 %v1895_v1, 0.0  ;;  %4947 = vmatmul.mubr.msk.bf16.gmra.mrb[108].mxu0 %vm952_vm0, %v5211_v54  ;;  %5075 = vmatmul.mubr.msk.bf16.gmra.mrb[108].mxu1 %vm952_vm0, %v5212_v55  ;;  %v5219_v63 = vld [vmem:[%s7125_s0 + $0x1d8] sm:$0xff]  }
 0x104   :  { %v4451_v12 = vpack.c.bf16 %v2394_v4, %v2394_v4  ;;  %v4579_v13 = vpack.c.bf16 %v2522_v5, %v2522_v5  ;;  %v2395_v14 = vmax.f32 %v1375_v6, 0.0  ;;  %v2523_v15 = vmax.f32 %v1887_v7, 0.0  ;;  %4950 = vmatprep.mubr.msk.bf16.mxu0 %vm952_vm0, %v5213_v60  ;;  %5078 = vmatprep.mubr.msk.bf16.mxu1 %vm952_vm0, %v5214_v61  ;;  %v5220_v0 = vld [vmem:[%s7125_s0 + $0x3d8] sm:$0xff]   ;;  %v5221_v5 = vld [vmem:[%s7125_s0 + $0x1e0] sm:$0xff]  }
 0x105   :  { %3677 = vst.msk [vmem:[%s7128_s3 + $0x8] sm:$0xf] %vm3674_vm1, %v4453_v8  ;;  %3805 = vst.msk [vmem:[%s7128_s3 + $0x208] sm:$0xf] %vm3674_vm1, %v4581_v9  ;;  %v4454_v16 = vpack.c.bf16 %v2397_v10, %v2397_v10  ;;  %v4582_v17 = vpack.c.bf16 %v2525_v11, %v2525_v11  ;;  %v5222_v6 = vld [vmem:[%s7125_s0 + $0x3e0] sm:$0xff]  }
 0x106   :  { %3675 = vst.msk [vmem:[%s7128_s3] sm:$0xf] %vm3674_vm1, %v4451_v12  ;;  %3803 = vst.msk [vmem:[%s7128_s3 + $0x200] sm:$0xf] %vm3674_vm1, %v4579_v13  ;;  %v4452_v18 = vpack.c.bf16 %v2395_v14, %v2395_v14  ;;  %v4580_v19 = vpack.c.bf16 %v2523_v15, %v2523_v15  ;;  %v4844_v20 = vpop.f32.mrb[4].mxu0  ;;  %v4972_v21 = vpop.f32.mrb[4].mxu1 }
 0x107   :  { %3678 = vst.msk [vmem:[%s7128_s3 + $0xc] sm:$0xf] %vm3674_vm1, %v4454_v16  ;;  %3806 = vst.msk [vmem:[%s7128_s3 + $0x20c] sm:$0xf] %vm3674_vm1, %v4582_v17  ;;  %v1396_v22 = vadd.f32 %v4844_v20, %v5765_v47  ;;  %v1908_v23 = vadd.f32 %v4972_v21, %v5765_v47  ;;  %v1387_v24 = vpop.f32.mrb[5].mxu0  ;;  %v1899_v25 = vpop.f32.mrb[5].mxu1 }
 0x108   :  { %3676 = vst.msk [vmem:[%s7128_s3 + $0x4] sm:$0xf] %vm3674_vm1, %v4452_v18  ;;  %3804 = vst.msk [vmem:[%s7128_s3 + $0x204] sm:$0xf] %vm3674_vm1, %v4580_v19  ;;  %v1388_v28 = vadd.f32 %v5765_v47, %v1387_v24  ;;  %v1900_v29 = vadd.f32 %v5765_v47, %v1899_v25  ;;  %v4845_v30 = vpop.f32.mrb[6].mxu0  ;;  %v4973_v31 = vpop.f32.mrb[6].mxu1 }
 0x109   :  { %v2400_v34 = vmax.f32 %v1396_v22, 0.0  ;;  %v2528_v35 = vmax.f32 %v1908_v23, 0.0  ;;  %v1399_v36 = vadd.f32 %v4845_v30, %v5765_v47  ;;  %v1911_v37 = vadd.f32 %v4973_v31, %v5765_v47  ;;  %v1390_v38 = vpop.f32.mrb[7].mxu0  ;;  %v1902_v39 = vpop.f32.mrb[7].mxu1 }
 0x10a   :  { %v2398_v40 = vmax.f32 %v1388_v28, 0.0  ;;  %v2526_v41 = vmax.f32 %v1900_v29, 0.0  ;;  %v1391_v42 = vadd.f32 %v5765_v47, %v1390_v38  ;;  %v1903_v43 = vadd.f32 %v5765_v47, %v1902_v39 }
 0x10b   :  { %v4457_v44 = vpack.c.bf16 %v2400_v34, %v2400_v34  ;;  %v4585_v45 = vpack.c.bf16 %v2528_v35, %v2528_v35  ;;  %v2401_v46 = vmax.f32 %v1399_v36, 0.0  ;;  %v2529_v48 = vmax.f32 %v1911_v37, 0.0  ;;  %4951 = vmatmul.mubr.msk.bf16.gmra.mrb[112].mxu0 %vm952_vm0, %v5215_v26  ;;  %5079 = vmatmul.mubr.msk.bf16.gmra.mrb[112].mxu1 %vm952_vm0, %v5216_v27  ;;  %v5223_v35 = vld [vmem:[%s7125_s0 + $0x1e8] sm:$0xff]  }
 0x10c   :  { %v4455_v49 = vpack.c.bf16 %v2398_v40, %v2398_v40  ;;  %v4583_v50 = vpack.c.bf16 %v2526_v41, %v2526_v41  ;;  %v2399_v51 = vmax.f32 %v1391_v42, 0.0  ;;  %v2527_v52 = vmax.f32 %v1903_v43, 0.0  ;;  %4954 = vmatprep.mubr.msk.bf16.mxu0 %vm952_vm0, %v5217_v32  ;;  %5082 = vmatprep.mubr.msk.bf16.mxu1 %vm952_vm0, %v5218_v33  ;;  %v5224_v36 = vld [vmem:[%s7125_s0 + $0x3e8] sm:$0xff]   ;;  %v5225_v41 = vld [vmem:[%s7125_s0 + $0x1f0] sm:$0xff]  }
 0x10d   :  { %3681 = vst.msk [vmem:[%s7128_s3 + $0x18] sm:$0xf] %vm3674_vm1, %v4457_v44  ;;  %3809 = vst.msk [vmem:[%s7128_s3 + $0x218] sm:$0xf] %vm3674_vm1, %v4585_v45  ;;  %v4458_v53 = vpack.c.bf16 %v2401_v46, %v2401_v46  ;;  %v4586_v54 = vpack.c.bf16 %v2529_v48, %v2529_v48  ;;  %v5226_v42 = vld [vmem:[%s7125_s0 + $0x3f0] sm:$0xff]  }
 0x10e   :  { %3679 = vst.msk [vmem:[%s7128_s3 + $0x10] sm:$0xf] %vm3674_vm1, %v4455_v49  ;;  %3807 = vst.msk [vmem:[%s7128_s3 + $0x210] sm:$0xf] %vm3674_vm1, %v4583_v50  ;;  %v4456_v55 = vpack.c.bf16 %v2399_v51, %v2399_v51  ;;  %v4584_v56 = vpack.c.bf16 %v2527_v52, %v2527_v52  ;;  %v4848_v57 = vpop.f32.mrb[8].mxu0  ;;  %v4976_v58 = vpop.f32.mrb[8].mxu1 }
 0x10f   :  { %3682 = vst.msk [vmem:[%s7128_s3 + $0x1c] sm:$0xf] %vm3674_vm1, %v4458_v53  ;;  %3810 = vst.msk [vmem:[%s7128_s3 + $0x21c] sm:$0xf] %vm3674_vm1, %v4586_v54  ;;  %v1412_v59 = vadd.f32 %v4848_v57, %v5765_v47  ;;  %v1924_v60 = vadd.f32 %v4976_v58, %v5765_v47  ;;  %v1403_v61 = vpop.f32.mrb[9].mxu0  ;;  %v1915_v62 = vpop.f32.mrb[9].mxu1 }
 0x110   :  { %3680 = vst.msk [vmem:[%s7128_s3 + $0x14] sm:$0xf] %vm3674_vm1, %v4456_v55  ;;  %3808 = vst.msk [vmem:[%s7128_s3 + $0x214] sm:$0xf] %vm3674_vm1, %v4584_v56  ;;  %v1404_v1 = vadd.f32 %v5765_v47, %v1403_v61  ;;  %v1916_v2 = vadd.f32 %v5765_v47, %v1915_v62  ;;  %v4849_v3 = vpop.f32.mrb[10].mxu0  ;;  %v4977_v4 = vpop.f32.mrb[10].mxu1 }
 0x111   :  { %v2404_v7 = vmax.f32 %v1412_v59, 0.0  ;;  %v2532_v8 = vmax.f32 %v1924_v60, 0.0  ;;  %v1415_v9 = vadd.f32 %v4849_v3, %v5765_v47  ;;  %v1927_v10 = vadd.f32 %v4977_v4, %v5765_v47  ;;  %v1406_v11 = vpop.f32.mrb[11].mxu0  ;;  %v1918_v12 = vpop.f32.mrb[11].mxu1 }
 0x112   :  { %v2402_v13 = vmax.f32 %v1404_v1, 0.0  ;;  %v2530_v14 = vmax.f32 %v1916_v2, 0.0  ;;  %v1407_v15 = vadd.f32 %v5765_v47, %v1406_v11  ;;  %v1919_v16 = vadd.f32 %v5765_v47, %v1918_v12 }
 0x113   :  { %v4461_v17 = vpack.c.bf16 %v2404_v7, %v2404_v7  ;;  %v4589_v18 = vpack.c.bf16 %v2532_v8, %v2532_v8  ;;  %v2405_v19 = vmax.f32 %v1415_v9, 0.0  ;;  %v2533_v20 = vmax.f32 %v1927_v10, 0.0  ;;  %4955 = vmatmul.mubr.msk.bf16.gmra.mrb[116].mxu0 %vm952_vm0, %v5219_v63  ;;  %5083 = vmatmul.mubr.msk.bf16.gmra.mrb[116].mxu1 %vm952_vm0, %v5220_v0  ;;  %v5227_v8 = vld [vmem:[%s7125_s0 + $0x1f8] sm:$0xff]  }
 0x114   :  { %v4459_v21 = vpack.c.bf16 %v2402_v13, %v2402_v13  ;;  %v4587_v22 = vpack.c.bf16 %v2530_v14, %v2530_v14  ;;  %v2403_v23 = vmax.f32 %v1407_v15, 0.0  ;;  %v2531_v24 = vmax.f32 %v1919_v16, 0.0  ;;  %4958 = vmatprep.mubr.msk.bf16.mxu0 %vm952_vm0, %v5221_v5  ;;  %5086 = vmatprep.mubr.msk.bf16.mxu1 %vm952_vm0, %v5222_v6  ;;  %v5228_v9 = vld [vmem:[%s7125_s0 + $0x3f8] sm:$0xff]  }
 0x115   :  { %3685 = vst.msk [vmem:[%s7128_s3 + $0x28] sm:$0xf] %vm3674_vm1, %v4461_v17  ;;  %3813 = vst.msk [vmem:[%s7128_s3 + $0x228] sm:$0xf] %vm3674_vm1, %v4589_v18  ;;  %v4462_v25 = vpack.c.bf16 %v2405_v19, %v2405_v19  ;;  %v4590_v26 = vpack.c.bf16 %v2533_v20, %v2533_v20 }
 0x116   :  { %3683 = vst.msk [vmem:[%s7128_s3 + $0x20] sm:$0xf] %vm3674_vm1, %v4459_v21  ;;  %3811 = vst.msk [vmem:[%s7128_s3 + $0x220] sm:$0xf] %vm3674_vm1, %v4587_v22  ;;  %v4460_v27 = vpack.c.bf16 %v2403_v23, %v2403_v23  ;;  %v4588_v28 = vpack.c.bf16 %v2531_v24, %v2531_v24  ;;  %v4852_v29 = vpop.f32.mrb[12].mxu0  ;;  %v4980_v30 = vpop.f32.mrb[12].mxu1 }
 0x117   :  { %3686 = vst.msk [vmem:[%s7128_s3 + $0x2c] sm:$0xf] %vm3674_vm1, %v4462_v25  ;;  %3814 = vst.msk [vmem:[%s7128_s3 + $0x22c] sm:$0xf] %vm3674_vm1, %v4590_v26  ;;  %v1428_v31 = vadd.f32 %v4852_v29, %v5765_v47  ;;  %v1940_v32 = vadd.f32 %v4980_v30, %v5765_v47  ;;  %v1419_v33 = vpop.f32.mrb[13].mxu0  ;;  %v1931_v34 = vpop.f32.mrb[13].mxu1 }
 0x118   :  { %3684 = vst.msk [vmem:[%s7128_s3 + $0x24] sm:$0xf] %vm3674_vm1, %v4460_v27  ;;  %3812 = vst.msk [vmem:[%s7128_s3 + $0x224] sm:$0xf] %vm3674_vm1, %v4588_v28  ;;  %v1420_v37 = vadd.f32 %v5765_v47, %v1419_v33  ;;  %v1932_v38 = vadd.f32 %v5765_v47, %v1931_v34  ;;  %v4853_v39 = vpop.f32.mrb[14].mxu0  ;;  %v4981_v40 = vpop.f32.mrb[14].mxu1 }
 0x119   :  { %v2408_v43 = vmax.f32 %v1428_v31, 0.0  ;;  %v2536_v44 = vmax.f32 %v1940_v32, 0.0  ;;  %v1431_v45 = vadd.f32 %v4853_v39, %v5765_v47  ;;  %v1943_v46 = vadd.f32 %v4981_v40, %v5765_v47  ;;  %v1422_v48 = vpop.f32.mrb[15].mxu0  ;;  %v1934_v49 = vpop.f32.mrb[15].mxu1 }
 0x11a   :  { %v2406_v50 = vmax.f32 %v1420_v37, 0.0  ;;  %v2534_v51 = vmax.f32 %v1932_v38, 0.0  ;;  %v1423_v52 = vadd.f32 %v5765_v47, %v1422_v48  ;;  %v1935_v53 = vadd.f32 %v5765_v47, %v1934_v49 }
 0x11b   :  { %v4465_v54 = vpack.c.bf16 %v2408_v43, %v2408_v43  ;;  %v4593_v55 = vpack.c.bf16 %v2536_v44, %v2536_v44  ;;  %v2409_v56 = vmax.f32 %v1431_v45, 0.0  ;;  %v2537_v57 = vmax.f32 %v1943_v46, 0.0  ;;  %4959 = vmatmul.mubr.msk.bf16.gmra.mrb[120].mxu0 %vm952_vm0, %v5223_v35  ;;  %5087 = vmatmul.mubr.msk.bf16.gmra.mrb[120].mxu1 %vm952_vm0, %v5224_v36 }
 0x11c   :  { %v4463_v58 = vpack.c.bf16 %v2406_v50, %v2406_v50  ;;  %v4591_v59 = vpack.c.bf16 %v2534_v51, %v2534_v51  ;;  %v2407_v60 = vmax.f32 %v1423_v52, 0.0  ;;  %v2535_v61 = vmax.f32 %v1935_v53, 0.0  ;;  %4962 = vmatprep.mubr.msk.bf16.mxu0 %vm952_vm0, %v5225_v41  ;;  %5090 = vmatprep.mubr.msk.bf16.mxu1 %vm952_vm0, %v5226_v42 }
 0x11d   :  { %3689 = vst.msk [vmem:[%s7128_s3 + $0x38] sm:$0xf] %vm3674_vm1, %v4465_v54  ;;  %3817 = vst.msk [vmem:[%s7128_s3 + $0x238] sm:$0xf] %vm3674_vm1, %v4593_v55  ;;  %v4466_v62 = vpack.c.bf16 %v2409_v56, %v2409_v56  ;;  %v4594_v63 = vpack.c.bf16 %v2537_v57, %v2537_v57 }
 0x11e   :  { %3687 = vst.msk [vmem:[%s7128_s3 + $0x30] sm:$0xf] %vm3674_vm1, %v4463_v58  ;;  %3815 = vst.msk [vmem:[%s7128_s3 + $0x230] sm:$0xf] %vm3674_vm1, %v4591_v59  ;;  %v4464_v0 = vpack.c.bf16 %v2407_v60, %v2407_v60  ;;  %v4592_v1 = vpack.c.bf16 %v2535_v61, %v2535_v61  ;;  %v4856_v2 = vpop.f32.mrb[16].mxu0  ;;  %v4984_v3 = vpop.f32.mrb[16].mxu1 }
 0x11f   :  { %3690 = vst.msk [vmem:[%s7128_s3 + $0x3c] sm:$0xf] %vm3674_vm1, %v4466_v62  ;;  %3818 = vst.msk [vmem:[%s7128_s3 + $0x23c] sm:$0xf] %vm3674_vm1, %v4594_v63  ;;  %v1444_v4 = vadd.f32 %v4856_v2, %v5765_v47  ;;  %v1956_v5 = vadd.f32 %v4984_v3, %v5765_v47  ;;  %v1435_v6 = vpop.f32.mrb[17].mxu0  ;;  %v1947_v7 = vpop.f32.mrb[17].mxu1 }
 0x120   :  { %3688 = vst.msk [vmem:[%s7128_s3 + $0x34] sm:$0xf] %vm3674_vm1, %v4464_v0  ;;  %3816 = vst.msk [vmem:[%s7128_s3 + $0x234] sm:$0xf] %vm3674_vm1, %v4592_v1  ;;  %v1436_v10 = vadd.f32 %v5765_v47, %v1435_v6  ;;  %v1948_v11 = vadd.f32 %v5765_v47, %v1947_v7  ;;  %v4857_v12 = vpop.f32.mrb[18].mxu0  ;;  %v4985_v13 = vpop.f32.mrb[18].mxu1 }
 0x121   :  { %v2412_v14 = vmax.f32 %v1444_v4, 0.0  ;;  %v2540_v15 = vmax.f32 %v1956_v5, 0.0  ;;  %v1447_v16 = vadd.f32 %v4857_v12, %v5765_v47  ;;  %v1959_v17 = vadd.f32 %v4985_v13, %v5765_v47  ;;  %v1438_v18 = vpop.f32.mrb[19].mxu0  ;;  %v1950_v19 = vpop.f32.mrb[19].mxu1 }
 0x122   :  { %v2410_v20 = vmax.f32 %v1436_v10, 0.0  ;;  %v2538_v21 = vmax.f32 %v1948_v11, 0.0  ;;  %v1439_v22 = vadd.f32 %v5765_v47, %v1438_v18  ;;  %v1951_v23 = vadd.f32 %v5765_v47, %v1950_v19 }
 0x123   :  { %v4469_v24 = vpack.c.bf16 %v2412_v14, %v2412_v14  ;;  %v4597_v25 = vpack.c.bf16 %v2540_v15, %v2540_v15  ;;  %v2413_v26 = vmax.f32 %v1447_v16, 0.0  ;;  %v2541_v27 = vmax.f32 %v1959_v17, 0.0  ;;  %4963 = vmatmul.mubr.msk.bf16.gmra.mrb[124].mxu0 %vm952_vm0, %v5227_v8  ;;  %5091 = vmatmul.mubr.msk.bf16.gmra.mrb[124].mxu1 %vm952_vm0, %v5228_v9 }
 0x124   :  { %v4467_v28 = vpack.c.bf16 %v2410_v20, %v2410_v20  ;;  %v4595_v29 = vpack.c.bf16 %v2538_v21, %v2538_v21  ;;  %v2411_v30 = vmax.f32 %v1439_v22, 0.0  ;;  %v2539_v31 = vmax.f32 %v1951_v23, 0.0 }
 0x125   :  { %3693 = vst.msk [vmem:[%s7128_s3 + $0x48] sm:$0xf] %vm3674_vm1, %v4469_v24  ;;  %3821 = vst.msk [vmem:[%s7128_s3 + $0x248] sm:$0xf] %vm3674_vm1, %v4597_v25  ;;  %v4470_v32 = vpack.c.bf16 %v2413_v26, %v2413_v26  ;;  %v4598_v33 = vpack.c.bf16 %v2541_v27, %v2541_v27 }
 0x126   :  { %3691 = vst.msk [vmem:[%s7128_s3 + $0x40] sm:$0xf] %vm3674_vm1, %v4467_v28  ;;  %3819 = vst.msk [vmem:[%s7128_s3 + $0x240] sm:$0xf] %vm3674_vm1, %v4595_v29  ;;  %v4468_v34 = vpack.c.bf16 %v2411_v30, %v2411_v30  ;;  %v4596_v35 = vpack.c.bf16 %v2539_v31, %v2539_v31  ;;  %v4860_v36 = vpop.f32.mrb[20].mxu0  ;;  %v4988_v37 = vpop.f32.mrb[20].mxu1 }
 0x127   :  { %3694 = vst.msk [vmem:[%s7128_s3 + $0x4c] sm:$0xf] %vm3674_vm1, %v4470_v32  ;;  %3822 = vst.msk [vmem:[%s7128_s3 + $0x24c] sm:$0xf] %vm3674_vm1, %v4598_v33  ;;  %v1460_v38 = vadd.f32 %v4860_v36, %v5765_v47  ;;  %v1972_v39 = vadd.f32 %v4988_v37, %v5765_v47  ;;  %v1451_v40 = vpop.f32.mrb[21].mxu0  ;;  %v1963_v41 = vpop.f32.mrb[21].mxu1 }
 0x128   :  { %3692 = vst.msk [vmem:[%s7128_s3 + $0x44] sm:$0xf] %vm3674_vm1, %v4468_v34  ;;  %3820 = vst.msk [vmem:[%s7128_s3 + $0x244] sm:$0xf] %vm3674_vm1, %v4596_v35  ;;  %v1452_v42 = vadd.f32 %v5765_v47, %v1451_v40  ;;  %v1964_v43 = vadd.f32 %v5765_v47, %v1963_v41  ;;  %v4861_v44 = vpop.f32.mrb[22].mxu0  ;;  %v4989_v45 = vpop.f32.mrb[22].mxu1 }
 0x129   :  { %v2416_v46 = vmax.f32 %v1460_v38, 0.0  ;;  %v2544_v48 = vmax.f32 %v1972_v39, 0.0  ;;  %v1463_v49 = vadd.f32 %v4861_v44, %v5765_v47  ;;  %v1975_v50 = vadd.f32 %v4989_v45, %v5765_v47  ;;  %v1454_v51 = vpop.f32.mrb[23].mxu0  ;;  %v1966_v52 = vpop.f32.mrb[23].mxu1 }
 0x12a   :  { %v2414_v53 = vmax.f32 %v1452_v42, 0.0  ;;  %v2542_v54 = vmax.f32 %v1964_v43, 0.0  ;;  %v1455_v55 = vadd.f32 %v5765_v47, %v1454_v51  ;;  %v1967_v56 = vadd.f32 %v5765_v47, %v1966_v52 }
 0x12b   :  { %v4473_v57 = vpack.c.bf16 %v2416_v46, %v2416_v46  ;;  %v4601_v58 = vpack.c.bf16 %v2544_v48, %v2544_v48  ;;  %v2417_v59 = vmax.f32 %v1463_v49, 0.0  ;;  %v2545_v60 = vmax.f32 %v1975_v50, 0.0 }
 0x12c   :  { %v4471_v61 = vpack.c.bf16 %v2414_v53, %v2414_v53  ;;  %v4599_v62 = vpack.c.bf16 %v2542_v54, %v2542_v54  ;;  %v2415_v63 = vmax.f32 %v1455_v55, 0.0  ;;  %v2543_v0 = vmax.f32 %v1967_v56, 0.0 }
 0x12d   :  { %3697 = vst.msk [vmem:[%s7128_s3 + $0x58] sm:$0xf] %vm3674_vm1, %v4473_v57  ;;  %3825 = vst.msk [vmem:[%s7128_s3 + $0x258] sm:$0xf] %vm3674_vm1, %v4601_v58  ;;  %v4474_v1 = vpack.c.bf16 %v2417_v59, %v2417_v59  ;;  %v4602_v2 = vpack.c.bf16 %v2545_v60, %v2545_v60 }
 0x12e   :  { %3695 = vst.msk [vmem:[%s7128_s3 + $0x50] sm:$0xf] %vm3674_vm1, %v4471_v61  ;;  %3823 = vst.msk [vmem:[%s7128_s3 + $0x250] sm:$0xf] %vm3674_vm1, %v4599_v62  ;;  %v4472_v3 = vpack.c.bf16 %v2415_v63, %v2415_v63  ;;  %v4600_v4 = vpack.c.bf16 %v2543_v0, %v2543_v0  ;;  %v4864_v5 = vpop.f32.mrb[24].mxu0  ;;  %v4992_v6 = vpop.f32.mrb[24].mxu1 }
 0x12f   :  { %3698 = vst.msk [vmem:[%s7128_s3 + $0x5c] sm:$0xf] %vm3674_vm1, %v4474_v1  ;;  %3826 = vst.msk [vmem:[%s7128_s3 + $0x25c] sm:$0xf] %vm3674_vm1, %v4602_v2  ;;  %v1476_v7 = vadd.f32 %v4864_v5, %v5765_v47  ;;  %v1988_v8 = vadd.f32 %v4992_v6, %v5765_v47  ;;  %v1467_v9 = vpop.f32.mrb[25].mxu0  ;;  %v1979_v10 = vpop.f32.mrb[25].mxu1 }
 0x130   :  { %3696 = vst.msk [vmem:[%s7128_s3 + $0x54] sm:$0xf] %vm3674_vm1, %v4472_v3  ;;  %3824 = vst.msk [vmem:[%s7128_s3 + $0x254] sm:$0xf] %vm3674_vm1, %v4600_v4  ;;  %v1468_v11 = vadd.f32 %v5765_v47, %v1467_v9  ;;  %v1980_v12 = vadd.f32 %v5765_v47, %v1979_v10  ;;  %v4865_v13 = vpop.f32.mrb[26].mxu0  ;;  %v4993_v14 = vpop.f32.mrb[26].mxu1 }
 0x131   :  { %v2420_v15 = vmax.f32 %v1476_v7, 0.0  ;;  %v2548_v16 = vmax.f32 %v1988_v8, 0.0  ;;  %v1479_v17 = vadd.f32 %v4865_v13, %v5765_v47  ;;  %v1991_v18 = vadd.f32 %v4993_v14, %v5765_v47  ;;  %v1470_v19 = vpop.f32.mrb[27].mxu0  ;;  %v1982_v20 = vpop.f32.mrb[27].mxu1 }
 0x132   :  { %v2418_v21 = vmax.f32 %v1468_v11, 0.0  ;;  %v2546_v22 = vmax.f32 %v1980_v12, 0.0  ;;  %v1471_v23 = vadd.f32 %v5765_v47, %v1470_v19  ;;  %v1983_v24 = vadd.f32 %v5765_v47, %v1982_v20 }
 0x133   :  { %v4477_v25 = vpack.c.bf16 %v2420_v15, %v2420_v15  ;;  %v4605_v26 = vpack.c.bf16 %v2548_v16, %v2548_v16  ;;  %v2421_v27 = vmax.f32 %v1479_v17, 0.0  ;;  %v2549_v28 = vmax.f32 %v1991_v18, 0.0 }
 0x134   :  { %v4475_v29 = vpack.c.bf16 %v2418_v21, %v2418_v21  ;;  %v4603_v30 = vpack.c.bf16 %v2546_v22, %v2546_v22  ;;  %v2419_v31 = vmax.f32 %v1471_v23, 0.0  ;;  %v2547_v32 = vmax.f32 %v1983_v24, 0.0 }
 0x135   :  { %3701 = vst.msk [vmem:[%s7128_s3 + $0x68] sm:$0xf] %vm3674_vm1, %v4477_v25  ;;  %3829 = vst.msk [vmem:[%s7128_s3 + $0x268] sm:$0xf] %vm3674_vm1, %v4605_v26  ;;  %v4478_v33 = vpack.c.bf16 %v2421_v27, %v2421_v27  ;;  %v4606_v34 = vpack.c.bf16 %v2549_v28, %v2549_v28 }
 0x136   :  { %3699 = vst.msk [vmem:[%s7128_s3 + $0x60] sm:$0xf] %vm3674_vm1, %v4475_v29  ;;  %3827 = vst.msk [vmem:[%s7128_s3 + $0x260] sm:$0xf] %vm3674_vm1, %v4603_v30  ;;  %v4476_v35 = vpack.c.bf16 %v2419_v31, %v2419_v31  ;;  %v4604_v36 = vpack.c.bf16 %v2547_v32, %v2547_v32  ;;  %v4868_v37 = vpop.f32.mrb[28].mxu0  ;;  %v4996_v38 = vpop.f32.mrb[28].mxu1 }
 0x137   :  { %3702 = vst.msk [vmem:[%s7128_s3 + $0x6c] sm:$0xf] %vm3674_vm1, %v4478_v33  ;;  %3830 = vst.msk [vmem:[%s7128_s3 + $0x26c] sm:$0xf] %vm3674_vm1, %v4606_v34  ;;  %v1492_v39 = vadd.f32 %v4868_v37, %v5765_v47  ;;  %v2004_v40 = vadd.f32 %v4996_v38, %v5765_v47  ;;  %v1483_v41 = vpop.f32.mrb[29].mxu0  ;;  %v1995_v42 = vpop.f32.mrb[29].mxu1 }
 0x138   :  { %3700 = vst.msk [vmem:[%s7128_s3 + $0x64] sm:$0xf] %vm3674_vm1, %v4476_v35  ;;  %3828 = vst.msk [vmem:[%s7128_s3 + $0x264] sm:$0xf] %vm3674_vm1, %v4604_v36  ;;  %v1484_v43 = vadd.f32 %v5765_v47, %v1483_v41  ;;  %v1996_v44 = vadd.f32 %v5765_v47, %v1995_v42  ;;  %v4869_v45 = vpop.f32.mrb[30].mxu0  ;;  %v4997_v46 = vpop.f32.mrb[30].mxu1 }
 0x139   :  { %v2424_v48 = vmax.f32 %v1492_v39, 0.0  ;;  %v2552_v49 = vmax.f32 %v2004_v40, 0.0  ;;  %v1495_v50 = vadd.f32 %v4869_v45, %v5765_v47  ;;  %v2007_v51 = vadd.f32 %v4997_v46, %v5765_v47  ;;  %v1486_v52 = vpop.f32.mrb[31].mxu0  ;;  %v1998_v53 = vpop.f32.mrb[31].mxu1 }
 0x13a   :  { %v2422_v54 = vmax.f32 %v1484_v43, 0.0  ;;  %v2550_v55 = vmax.f32 %v1996_v44, 0.0  ;;  %v1487_v56 = vadd.f32 %v5765_v47, %v1486_v52  ;;  %v1999_v57 = vadd.f32 %v5765_v47, %v1998_v53 }
 0x13b   :  { %v4481_v58 = vpack.c.bf16 %v2424_v48, %v2424_v48  ;;  %v4609_v59 = vpack.c.bf16 %v2552_v49, %v2552_v49  ;;  %v2425_v60 = vmax.f32 %v1495_v50, 0.0  ;;  %v2553_v61 = vmax.f32 %v2007_v51, 0.0 }
 0x13c   :  { %v4479_v62 = vpack.c.bf16 %v2422_v54, %v2422_v54  ;;  %v4607_v63 = vpack.c.bf16 %v2550_v55, %v2550_v55  ;;  %v2423_v0 = vmax.f32 %v1487_v56, 0.0  ;;  %v2551_v1 = vmax.f32 %v1999_v57, 0.0 }
 0x13d   :  { %3705 = vst.msk [vmem:[%s7128_s3 + $0x78] sm:$0xf] %vm3674_vm1, %v4481_v58  ;;  %3833 = vst.msk [vmem:[%s7128_s3 + $0x278] sm:$0xf] %vm3674_vm1, %v4609_v59  ;;  %v4482_v2 = vpack.c.bf16 %v2425_v60, %v2425_v60  ;;  %v4610_v3 = vpack.c.bf16 %v2553_v61, %v2553_v61 }
 0x13e   :  { %3703 = vst.msk [vmem:[%s7128_s3 + $0x70] sm:$0xf] %vm3674_vm1, %v4479_v62  ;;  %3831 = vst.msk [vmem:[%s7128_s3 + $0x270] sm:$0xf] %vm3674_vm1, %v4607_v63  ;;  %v4480_v4 = vpack.c.bf16 %v2423_v0, %v2423_v0  ;;  %v4608_v5 = vpack.c.bf16 %v2551_v1, %v2551_v1  ;;  %v4872_v6 = vpop.f32.mrb[32].mxu0  ;;  %v5000_v7 = vpop.f32.mrb[32].mxu1 }
 0x13f   :  { %3706 = vst.msk [vmem:[%s7128_s3 + $0x7c] sm:$0xf] %vm3674_vm1, %v4482_v2  ;;  %3834 = vst.msk [vmem:[%s7128_s3 + $0x27c] sm:$0xf] %vm3674_vm1, %v4610_v3  ;;  %v1508_v8 = vadd.f32 %v4872_v6, %v5765_v47  ;;  %v2020_v9 = vadd.f32 %v5000_v7, %v5765_v47  ;;  %v1499_v10 = vpop.f32.mrb[33].mxu0  ;;  %v2011_v11 = vpop.f32.mrb[33].mxu1 }
 0x140   :  { %3704 = vst.msk [vmem:[%s7128_s3 + $0x74] sm:$0xf] %vm3674_vm1, %v4480_v4  ;;  %3832 = vst.msk [vmem:[%s7128_s3 + $0x274] sm:$0xf] %vm3674_vm1, %v4608_v5  ;;  %v1500_v12 = vadd.f32 %v5765_v47, %v1499_v10  ;;  %v2012_v13 = vadd.f32 %v5765_v47, %v2011_v11  ;;  %v4873_v14 = vpop.f32.mrb[34].mxu0  ;;  %v5001_v15 = vpop.f32.mrb[34].mxu1 }
 0x141   :  { %v2428_v16 = vmax.f32 %v1508_v8, 0.0  ;;  %v2556_v17 = vmax.f32 %v2020_v9, 0.0  ;;  %v1511_v18 = vadd.f32 %v4873_v14, %v5765_v47  ;;  %v2023_v19 = vadd.f32 %v5001_v15, %v5765_v47  ;;  %v1502_v20 = vpop.f32.mrb[35].mxu0  ;;  %v2014_v21 = vpop.f32.mrb[35].mxu1 }
 0x142   :  { %v2426_v22 = vmax.f32 %v1500_v12, 0.0  ;;  %v2554_v23 = vmax.f32 %v2012_v13, 0.0  ;;  %v1503_v24 = vadd.f32 %v5765_v47, %v1502_v20  ;;  %v2015_v25 = vadd.f32 %v5765_v47, %v2014_v21 }
 0x143   :  { %v4485_v26 = vpack.c.bf16 %v2428_v16, %v2428_v16  ;;  %v4613_v27 = vpack.c.bf16 %v2556_v17, %v2556_v17  ;;  %v2429_v28 = vmax.f32 %v1511_v18, 0.0  ;;  %v2557_v29 = vmax.f32 %v2023_v19, 0.0 }
 0x144   :  { %v4483_v30 = vpack.c.bf16 %v2426_v22, %v2426_v22  ;;  %v4611_v31 = vpack.c.bf16 %v2554_v23, %v2554_v23  ;;  %v2427_v32 = vmax.f32 %v1503_v24, 0.0  ;;  %v2555_v33 = vmax.f32 %v2015_v25, 0.0 }
 0x145   :  { %3709 = vst.msk [vmem:[%s7128_s3 + $0x88] sm:$0xf] %vm3674_vm1, %v4485_v26  ;;  %3837 = vst.msk [vmem:[%s7128_s3 + $0x288] sm:$0xf] %vm3674_vm1, %v4613_v27  ;;  %v4486_v34 = vpack.c.bf16 %v2429_v28, %v2429_v28  ;;  %v4614_v35 = vpack.c.bf16 %v2557_v29, %v2557_v29 }
 0x146   :  { %3707 = vst.msk [vmem:[%s7128_s3 + $0x80] sm:$0xf] %vm3674_vm1, %v4483_v30  ;;  %3835 = vst.msk [vmem:[%s7128_s3 + $0x280] sm:$0xf] %vm3674_vm1, %v4611_v31  ;;  %v4484_v36 = vpack.c.bf16 %v2427_v32, %v2427_v32  ;;  %v4612_v37 = vpack.c.bf16 %v2555_v33, %v2555_v33  ;;  %v4876_v38 = vpop.f32.mrb[36].mxu0  ;;  %v5004_v39 = vpop.f32.mrb[36].mxu1 }
 0x147   :  { %3710 = vst.msk [vmem:[%s7128_s3 + $0x8c] sm:$0xf] %vm3674_vm1, %v4486_v34  ;;  %3838 = vst.msk [vmem:[%s7128_s3 + $0x28c] sm:$0xf] %vm3674_vm1, %v4614_v35  ;;  %v1524_v40 = vadd.f32 %v4876_v38, %v5765_v47  ;;  %v2036_v41 = vadd.f32 %v5004_v39, %v5765_v47  ;;  %v1515_v42 = vpop.f32.mrb[37].mxu0  ;;  %v2027_v43 = vpop.f32.mrb[37].mxu1 }
 0x148   :  { %3708 = vst.msk [vmem:[%s7128_s3 + $0x84] sm:$0xf] %vm3674_vm1, %v4484_v36  ;;  %3836 = vst.msk [vmem:[%s7128_s3 + $0x284] sm:$0xf] %vm3674_vm1, %v4612_v37  ;;  %v1516_v44 = vadd.f32 %v5765_v47, %v1515_v42  ;;  %v2028_v45 = vadd.f32 %v5765_v47, %v2027_v43  ;;  %v4877_v46 = vpop.f32.mrb[38].mxu0  ;;  %v5005_v48 = vpop.f32.mrb[38].mxu1 }
 0x149   :  { %v2432_v49 = vmax.f32 %v1524_v40, 0.0  ;;  %v2560_v50 = vmax.f32 %v2036_v41, 0.0  ;;  %v1527_v51 = vadd.f32 %v4877_v46, %v5765_v47  ;;  %v2039_v52 = vadd.f32 %v5005_v48, %v5765_v47  ;;  %v1518_v53 = vpop.f32.mrb[39].mxu0  ;;  %v2030_v54 = vpop.f32.mrb[39].mxu1 }
 0x14a   :  { %v2430_v55 = vmax.f32 %v1516_v44, 0.0  ;;  %v2558_v56 = vmax.f32 %v2028_v45, 0.0  ;;  %v1519_v57 = vadd.f32 %v5765_v47, %v1518_v53  ;;  %v2031_v58 = vadd.f32 %v5765_v47, %v2030_v54 }
 0x14b   :  { %v4489_v59 = vpack.c.bf16 %v2432_v49, %v2432_v49  ;;  %v4617_v60 = vpack.c.bf16 %v2560_v50, %v2560_v50  ;;  %v2433_v61 = vmax.f32 %v1527_v51, 0.0  ;;  %v2561_v62 = vmax.f32 %v2039_v52, 0.0 }
 0x14c   :  { %v4487_v63 = vpack.c.bf16 %v2430_v55, %v2430_v55  ;;  %v4615_v0 = vpack.c.bf16 %v2558_v56, %v2558_v56  ;;  %v2431_v1 = vmax.f32 %v1519_v57, 0.0  ;;  %v2559_v2 = vmax.f32 %v2031_v58, 0.0 }
 0x14d   :  { %3713 = vst.msk [vmem:[%s7128_s3 + $0x98] sm:$0xf] %vm3674_vm1, %v4489_v59  ;;  %3841 = vst.msk [vmem:[%s7128_s3 + $0x298] sm:$0xf] %vm3674_vm1, %v4617_v60  ;;  %v4490_v3 = vpack.c.bf16 %v2433_v61, %v2433_v61  ;;  %v4618_v4 = vpack.c.bf16 %v2561_v62, %v2561_v62 }
 0x14e   :  { %3711 = vst.msk [vmem:[%s7128_s3 + $0x90] sm:$0xf] %vm3674_vm1, %v4487_v63  ;;  %3839 = vst.msk [vmem:[%s7128_s3 + $0x290] sm:$0xf] %vm3674_vm1, %v4615_v0  ;;  %v4488_v5 = vpack.c.bf16 %v2431_v1, %v2431_v1  ;;  %v4616_v6 = vpack.c.bf16 %v2559_v2, %v2559_v2  ;;  %v4880_v7 = vpop.f32.mrb[40].mxu0  ;;  %v5008_v8 = vpop.f32.mrb[40].mxu1 }
 0x14f   :  { %3714 = vst.msk [vmem:[%s7128_s3 + $0x9c] sm:$0xf] %vm3674_vm1, %v4490_v3  ;;  %3842 = vst.msk [vmem:[%s7128_s3 + $0x29c] sm:$0xf] %vm3674_vm1, %v4618_v4  ;;  %v1540_v9 = vadd.f32 %v4880_v7, %v5765_v47  ;;  %v2052_v10 = vadd.f32 %v5008_v8, %v5765_v47  ;;  %v1531_v11 = vpop.f32.mrb[41].mxu0  ;;  %v2043_v12 = vpop.f32.mrb[41].mxu1 }
 0x150   :  { %3712 = vst.msk [vmem:[%s7128_s3 + $0x94] sm:$0xf] %vm3674_vm1, %v4488_v5  ;;  %3840 = vst.msk [vmem:[%s7128_s3 + $0x294] sm:$0xf] %vm3674_vm1, %v4616_v6  ;;  %v1532_v13 = vadd.f32 %v5765_v47, %v1531_v11  ;;  %v2044_v14 = vadd.f32 %v5765_v47, %v2043_v12  ;;  %v4881_v15 = vpop.f32.mrb[42].mxu0  ;;  %v5009_v16 = vpop.f32.mrb[42].mxu1 }
 0x151   :  { %v2436_v17 = vmax.f32 %v1540_v9, 0.0  ;;  %v2564_v18 = vmax.f32 %v2052_v10, 0.0  ;;  %v1543_v19 = vadd.f32 %v4881_v15, %v5765_v47  ;;  %v2055_v20 = vadd.f32 %v5009_v16, %v5765_v47  ;;  %v1534_v21 = vpop.f32.mrb[43].mxu0  ;;  %v2046_v22 = vpop.f32.mrb[43].mxu1  ;;  %v6313_v9 = vld [vmem:[#allocation4] ss:$0 sm:$0xff] }
 0x152   :  { %v2434_v23 = vmax.f32 %v1532_v13, 0.0  ;;  %v2562_v24 = vmax.f32 %v2044_v14, 0.0  ;;  %v1535_v25 = vadd.f32 %v5765_v47, %v1534_v21  ;;  %v2047_v26 = vadd.f32 %v5765_v47, %v2046_v22 }
 0x153   :  { %v4493_v27 = vpack.c.bf16 %v2436_v17, %v2436_v17  ;;  %v4621_v28 = vpack.c.bf16 %v2564_v18, %v2564_v18  ;;  %v2437_v29 = vmax.f32 %v1543_v19, 0.0  ;;  %v2565_v30 = vmax.f32 %v2055_v20, 0.0 }
 0x154   :  { %v4491_v31 = vpack.c.bf16 %v2434_v23, %v2434_v23  ;;  %v4619_v32 = vpack.c.bf16 %v2562_v24, %v2562_v24  ;;  %v2435_v33 = vmax.f32 %v1535_v25, 0.0  ;;  %v2563_v34 = vmax.f32 %v2047_v26, 0.0 }
 0x155   :  { %3717 = vst.msk [vmem:[%s7128_s3 + $0xa8] sm:$0xf] %vm3674_vm1, %v4493_v27  ;;  %3845 = vst.msk [vmem:[%s7128_s3 + $0x2a8] sm:$0xf] %vm3674_vm1, %v4621_v28  ;;  %v4494_v35 = vpack.c.bf16 %v2437_v29, %v2437_v29  ;;  %v4622_v36 = vpack.c.bf16 %v2565_v30, %v2565_v30 }
 0x156   :  { %3715 = vst.msk [vmem:[%s7128_s3 + $0xa0] sm:$0xf] %vm3674_vm1, %v4491_v31  ;;  %3843 = vst.msk [vmem:[%s7128_s3 + $0x2a0] sm:$0xf] %vm3674_vm1, %v4619_v32  ;;  %v4492_v37 = vpack.c.bf16 %v2435_v33, %v2435_v33  ;;  %v4620_v38 = vpack.c.bf16 %v2563_v34, %v2563_v34  ;;  %v4884_v39 = vpop.f32.mrb[44].mxu0  ;;  %v5012_v40 = vpop.f32.mrb[44].mxu1 }
 0x157   :  { %3718 = vst.msk [vmem:[%s7128_s3 + $0xac] sm:$0xf] %vm3674_vm1, %v4494_v35  ;;  %3846 = vst.msk [vmem:[%s7128_s3 + $0x2ac] sm:$0xf] %vm3674_vm1, %v4622_v36  ;;  %v1556_v41 = vadd.f32 %v4884_v39, %v5765_v47  ;;  %v2068_v42 = vadd.f32 %v5012_v40, %v5765_v47  ;;  %v1547_v43 = vpop.f32.mrb[45].mxu0  ;;  %v2059_v44 = vpop.f32.mrb[45].mxu1 }
 0x158   :  { %3716 = vst.msk [vmem:[%s7128_s3 + $0xa4] sm:$0xf] %vm3674_vm1, %v4492_v37  ;;  %3844 = vst.msk [vmem:[%s7128_s3 + $0x2a4] sm:$0xf] %vm3674_vm1, %v4620_v38  ;;  %v1548_v45 = vadd.f32 %v5765_v47, %v1547_v43  ;;  %v2060_v46 = vadd.f32 %v5765_v47, %v2059_v44  ;;  %v4885_v48 = vpop.f32.mrb[46].mxu0  ;;  %v5013_v49 = vpop.f32.mrb[46].mxu1 }
 0x159   :  { %v2440_v50 = vmax.f32 %v1556_v41, 0.0  ;;  %v2568_v51 = vmax.f32 %v2068_v42, 0.0  ;;  %v1559_v52 = vadd.f32 %v4885_v48, %v5765_v47  ;;  %v2071_v53 = vadd.f32 %v5013_v49, %v5765_v47  ;;  %v1550_v54 = vpop.f32.mrb[47].mxu0  ;;  %v2062_v55 = vpop.f32.mrb[47].mxu1 }
 0x15a   :  { %v2438_v56 = vmax.f32 %v1548_v45, 0.0  ;;  %v2566_v57 = vmax.f32 %v2060_v46, 0.0  ;;  %v1551_v58 = vadd.f32 %v5765_v47, %v1550_v54  ;;  %v2063_v59 = vadd.f32 %v5765_v47, %v2062_v55 }
 0x15b   :  { %v4497_v60 = vpack.c.bf16 %v2440_v50, %v2440_v50  ;;  %v4625_v61 = vpack.c.bf16 %v2568_v51, %v2568_v51  ;;  %v2441_v62 = vmax.f32 %v1559_v52, 0.0  ;;  %v2569_v63 = vmax.f32 %v2071_v53, 0.0 }
 0x15c   :  { %v4495_v0 = vpack.c.bf16 %v2438_v56, %v2438_v56  ;;  %v4623_v1 = vpack.c.bf16 %v2566_v57, %v2566_v57  ;;  %v2439_v2 = vmax.f32 %v1551_v58, 0.0  ;;  %v2567_v3 = vmax.f32 %v2063_v59, 0.0 }
 0x15d   :  { %3721 = vst.msk [vmem:[%s7128_s3 + $0xb8] sm:$0xf] %vm3674_vm1, %v4497_v60  ;;  %3849 = vst.msk [vmem:[%s7128_s3 + $0x2b8] sm:$0xf] %vm3674_vm1, %v4625_v61  ;;  %v4498_v4 = vpack.c.bf16 %v2441_v62, %v2441_v62  ;;  %v4626_v47 = vpack.c.bf16 %v2569_v63, %v2569_v63 }
 0x15e   :  { %3719 = vst.msk [vmem:[%s7128_s3 + $0xb0] sm:$0xf] %vm3674_vm1, %v4495_v0  ;;  %3847 = vst.msk [vmem:[%s7128_s3 + $0x2b0] sm:$0xf] %vm3674_vm1, %v4623_v1  ;;  %v4496_v5 = vpack.c.bf16 %v2439_v2, %v2439_v2  ;;  %v4624_v6 = vpack.c.bf16 %v2567_v3, %v2567_v3  ;;  %v4888_v7 = vpop.f32.mrb[48].mxu0  ;;  %v5016_v8 = vpop.f32.mrb[48].mxu1 }
 0x15f   :  { %3722 = vst.msk [vmem:[%s7128_s3 + $0xbc] sm:$0xf] %vm3674_vm1, %v4498_v4  ;;  %3850 = vst.msk [vmem:[%s7128_s3 + $0x2bc] sm:$0xf] %vm3674_vm1, %v4626_v47  ;;  %v1572_v10 = vadd.f32 %v6313_v9, %v4888_v7  ;;  %v2084_v11 = vadd.f32 %v6313_v9, %v5016_v8  ;;  %v1563_v12 = vpop.f32.mrb[49].mxu0  ;;  %v2075_v13 = vpop.f32.mrb[49].mxu1 }
 0x160   :  { %3720 = vst.msk [vmem:[%s7128_s3 + $0xb4] sm:$0xf] %vm3674_vm1, %v4496_v5  ;;  %3848 = vst.msk [vmem:[%s7128_s3 + $0x2b4] sm:$0xf] %vm3674_vm1, %v4624_v6  ;;  %v1564_v14 = vadd.f32 %v6313_v9, %v1563_v12  ;;  %v2076_v15 = vadd.f32 %v6313_v9, %v2075_v13  ;;  %v4889_v16 = vpop.f32.mrb[50].mxu0  ;;  %v5017_v17 = vpop.f32.mrb[50].mxu1 }
 0x161   :  { %v2444_v18 = vmax.f32 %v1572_v10, 0.0  ;;  %v2572_v19 = vmax.f32 %v2084_v11, 0.0  ;;  %v1575_v20 = vadd.f32 %v6313_v9, %v4889_v16  ;;  %v2087_v21 = vadd.f32 %v6313_v9, %v5017_v17  ;;  %v1566_v22 = vpop.f32.mrb[51].mxu0  ;;  %v2078_v23 = vpop.f32.mrb[51].mxu1 }
 0x162   :  { %v2442_v24 = vmax.f32 %v1564_v14, 0.0  ;;  %v2570_v25 = vmax.f32 %v2076_v15, 0.0  ;;  %v1567_v26 = vadd.f32 %v6313_v9, %v1566_v22  ;;  %v2079_v27 = vadd.f32 %v6313_v9, %v2078_v23 }
 0x163   :  { %v4501_v28 = vpack.c.bf16 %v2444_v18, %v2444_v18  ;;  %v4629_v29 = vpack.c.bf16 %v2572_v19, %v2572_v19  ;;  %v2445_v30 = vmax.f32 %v1575_v20, 0.0  ;;  %v2573_v31 = vmax.f32 %v2087_v21, 0.0 }
 0x164   :  { %v4499_v32 = vpack.c.bf16 %v2442_v24, %v2442_v24  ;;  %v4627_v33 = vpack.c.bf16 %v2570_v25, %v2570_v25  ;;  %v2443_v34 = vmax.f32 %v1567_v26, 0.0  ;;  %v2571_v35 = vmax.f32 %v2079_v27, 0.0 }
 0x165   :  { %3725 = vst.msk [vmem:[%s7128_s3 + $0xc8] sm:$0xf] %vm3674_vm1, %v4501_v28  ;;  %3853 = vst.msk [vmem:[%s7128_s3 + $0x2c8] sm:$0xf] %vm3674_vm1, %v4629_v29  ;;  %v4502_v36 = vpack.c.bf16 %v2445_v30, %v2445_v30  ;;  %v4630_v37 = vpack.c.bf16 %v2573_v31, %v2573_v31 }
 0x166   :  { %3723 = vst.msk [vmem:[%s7128_s3 + $0xc0] sm:$0xf] %vm3674_vm1, %v4499_v32  ;;  %3851 = vst.msk [vmem:[%s7128_s3 + $0x2c0] sm:$0xf] %vm3674_vm1, %v4627_v33  ;;  %v4500_v38 = vpack.c.bf16 %v2443_v34, %v2443_v34  ;;  %v4628_v39 = vpack.c.bf16 %v2571_v35, %v2571_v35  ;;  %v4892_v40 = vpop.f32.mrb[52].mxu0  ;;  %v5020_v41 = vpop.f32.mrb[52].mxu1 }
 0x167   :  { %3726 = vst.msk [vmem:[%s7128_s3 + $0xcc] sm:$0xf] %vm3674_vm1, %v4502_v36  ;;  %3854 = vst.msk [vmem:[%s7128_s3 + $0x2cc] sm:$0xf] %vm3674_vm1, %v4630_v37  ;;  %v1588_v42 = vadd.f32 %v6313_v9, %v4892_v40  ;;  %v2100_v43 = vadd.f32 %v6313_v9, %v5020_v41  ;;  %v1579_v44 = vpop.f32.mrb[53].mxu0  ;;  %v2091_v45 = vpop.f32.mrb[53].mxu1 }
 0x168   :  { %3724 = vst.msk [vmem:[%s7128_s3 + $0xc4] sm:$0xf] %vm3674_vm1, %v4500_v38  ;;  %3852 = vst.msk [vmem:[%s7128_s3 + $0x2c4] sm:$0xf] %vm3674_vm1, %v4628_v39  ;;  %v1580_v46 = vadd.f32 %v6313_v9, %v1579_v44  ;;  %v2092_v48 = vadd.f32 %v6313_v9, %v2091_v45  ;;  %v4893_v49 = vpop.f32.mrb[54].mxu0  ;;  %v5021_v50 = vpop.f32.mrb[54].mxu1 }
 0x169   :  { %v2448_v51 = vmax.f32 %v1588_v42, 0.0  ;;  %v2576_v52 = vmax.f32 %v2100_v43, 0.0  ;;  %v1591_v53 = vadd.f32 %v6313_v9, %v4893_v49  ;;  %v2103_v54 = vadd.f32 %v6313_v9, %v5021_v50  ;;  %v1582_v55 = vpop.f32.mrb[55].mxu0  ;;  %v2094_v56 = vpop.f32.mrb[55].mxu1 }
 0x16a   :  { %v2446_v57 = vmax.f32 %v1580_v46, 0.0  ;;  %v2574_v58 = vmax.f32 %v2092_v48, 0.0  ;;  %v1583_v59 = vadd.f32 %v6313_v9, %v1582_v55  ;;  %v2095_v60 = vadd.f32 %v6313_v9, %v2094_v56 }
 0x16b   :  { %v4505_v61 = vpack.c.bf16 %v2448_v51, %v2448_v51  ;;  %v4633_v62 = vpack.c.bf16 %v2576_v52, %v2576_v52  ;;  %v2449_v63 = vmax.f32 %v1591_v53, 0.0  ;;  %v2577_v0 = vmax.f32 %v2103_v54, 0.0 }
 0x16c   :  { %v4503_v1 = vpack.c.bf16 %v2446_v57, %v2446_v57  ;;  %v4631_v2 = vpack.c.bf16 %v2574_v58, %v2574_v58  ;;  %v2447_v3 = vmax.f32 %v1583_v59, 0.0  ;;  %v2575_v4 = vmax.f32 %v2095_v60, 0.0 }
 0x16d   :  { %3729 = vst.msk [vmem:[%s7128_s3 + $0xd8] sm:$0xf] %vm3674_vm1, %v4505_v61  ;;  %3857 = vst.msk [vmem:[%s7128_s3 + $0x2d8] sm:$0xf] %vm3674_vm1, %v4633_v62  ;;  %v4506_v47 = vpack.c.bf16 %v2449_v63, %v2449_v63  ;;  %v4634_v5 = vpack.c.bf16 %v2577_v0, %v2577_v0 }
 0x16e   :  { %3727 = vst.msk [vmem:[%s7128_s3 + $0xd0] sm:$0xf] %vm3674_vm1, %v4503_v1  ;;  %3855 = vst.msk [vmem:[%s7128_s3 + $0x2d0] sm:$0xf] %vm3674_vm1, %v4631_v2  ;;  %v4504_v6 = vpack.c.bf16 %v2447_v3, %v2447_v3  ;;  %v4632_v7 = vpack.c.bf16 %v2575_v4, %v2575_v4  ;;  %v4896_v8 = vpop.f32.mrb[56].mxu0  ;;  %v5024_v10 = vpop.f32.mrb[56].mxu1 }
 0x16f   :  { %3730 = vst.msk [vmem:[%s7128_s3 + $0xdc] sm:$0xf] %vm3674_vm1, %v4506_v47  ;;  %3858 = vst.msk [vmem:[%s7128_s3 + $0x2dc] sm:$0xf] %vm3674_vm1, %v4634_v5  ;;  %v1604_v11 = vadd.f32 %v6313_v9, %v4896_v8  ;;  %v2116_v12 = vadd.f32 %v6313_v9, %v5024_v10  ;;  %v1595_v13 = vpop.f32.mrb[57].mxu0  ;;  %v2107_v14 = vpop.f32.mrb[57].mxu1 }
 0x170   :  { %3728 = vst.msk [vmem:[%s7128_s3 + $0xd4] sm:$0xf] %vm3674_vm1, %v4504_v6  ;;  %3856 = vst.msk [vmem:[%s7128_s3 + $0x2d4] sm:$0xf] %vm3674_vm1, %v4632_v7  ;;  %v1596_v15 = vadd.f32 %v6313_v9, %v1595_v13  ;;  %v2108_v16 = vadd.f32 %v6313_v9, %v2107_v14  ;;  %v4897_v17 = vpop.f32.mrb[58].mxu0  ;;  %v5025_v18 = vpop.f32.mrb[58].mxu1 }
 0x171   :  { %v2452_v19 = vmax.f32 %v1604_v11, 0.0  ;;  %v2580_v20 = vmax.f32 %v2116_v12, 0.0  ;;  %v1607_v21 = vadd.f32 %v6313_v9, %v4897_v17  ;;  %v2119_v22 = vadd.f32 %v6313_v9, %v5025_v18  ;;  %v1598_v23 = vpop.f32.mrb[59].mxu0  ;;  %v2110_v24 = vpop.f32.mrb[59].mxu1 }
 0x172   :  { %v2450_v25 = vmax.f32 %v1596_v15, 0.0  ;;  %v2578_v26 = vmax.f32 %v2108_v16, 0.0  ;;  %v1599_v27 = vadd.f32 %v6313_v9, %v1598_v23  ;;  %v2111_v28 = vadd.f32 %v6313_v9, %v2110_v24 }
 0x173   :  { %v4509_v29 = vpack.c.bf16 %v2452_v19, %v2452_v19  ;;  %v4637_v30 = vpack.c.bf16 %v2580_v20, %v2580_v20  ;;  %v2453_v31 = vmax.f32 %v1607_v21, 0.0  ;;  %v2581_v32 = vmax.f32 %v2119_v22, 0.0 }
 0x174   :  { %v4507_v33 = vpack.c.bf16 %v2450_v25, %v2450_v25  ;;  %v4635_v34 = vpack.c.bf16 %v2578_v26, %v2578_v26  ;;  %v2451_v35 = vmax.f32 %v1599_v27, 0.0  ;;  %v2579_v36 = vmax.f32 %v2111_v28, 0.0 }
 0x175   :  { %3733 = vst.msk [vmem:[%s7128_s3 + $0xe8] sm:$0xf] %vm3674_vm1, %v4509_v29  ;;  %3861 = vst.msk [vmem:[%s7128_s3 + $0x2e8] sm:$0xf] %vm3674_vm1, %v4637_v30  ;;  %v4510_v37 = vpack.c.bf16 %v2453_v31, %v2453_v31  ;;  %v4638_v38 = vpack.c.bf16 %v2581_v32, %v2581_v32 }
 0x176   :  { %3731 = vst.msk [vmem:[%s7128_s3 + $0xe0] sm:$0xf] %vm3674_vm1, %v4507_v33  ;;  %3859 = vst.msk [vmem:[%s7128_s3 + $0x2e0] sm:$0xf] %vm3674_vm1, %v4635_v34  ;;  %v4508_v39 = vpack.c.bf16 %v2451_v35, %v2451_v35  ;;  %v4636_v40 = vpack.c.bf16 %v2579_v36, %v2579_v36  ;;  %v4900_v41 = vpop.f32.mrb[60].mxu0  ;;  %v5028_v42 = vpop.f32.mrb[60].mxu1 }
 0x177   :  { %3734 = vst.msk [vmem:[%s7128_s3 + $0xec] sm:$0xf] %vm3674_vm1, %v4510_v37  ;;  %3862 = vst.msk [vmem:[%s7128_s3 + $0x2ec] sm:$0xf] %vm3674_vm1, %v4638_v38  ;;  %v1620_v43 = vadd.f32 %v6313_v9, %v4900_v41  ;;  %v2132_v44 = vadd.f32 %v6313_v9, %v5028_v42  ;;  %v1611_v45 = vpop.f32.mrb[61].mxu0  ;;  %v2123_v46 = vpop.f32.mrb[61].mxu1 }
 0x178   :  { %3732 = vst.msk [vmem:[%s7128_s3 + $0xe4] sm:$0xf] %vm3674_vm1, %v4508_v39  ;;  %3860 = vst.msk [vmem:[%s7128_s3 + $0x2e4] sm:$0xf] %vm3674_vm1, %v4636_v40  ;;  %v1612_v48 = vadd.f32 %v6313_v9, %v1611_v45  ;;  %v2124_v49 = vadd.f32 %v6313_v9, %v2123_v46  ;;  %v4901_v50 = vpop.f32.mrb[62].mxu0  ;;  %v5029_v51 = vpop.f32.mrb[62].mxu1 }
 0x179   :  { %v2456_v52 = vmax.f32 %v1620_v43, 0.0  ;;  %v2584_v53 = vmax.f32 %v2132_v44, 0.0  ;;  %v1623_v54 = vadd.f32 %v6313_v9, %v4901_v50  ;;  %v2135_v55 = vadd.f32 %v6313_v9, %v5029_v51  ;;  %v1614_v56 = vpop.f32.mrb[63].mxu0  ;;  %v2126_v57 = vpop.f32.mrb[63].mxu1 }
 0x17a   :  { %v2454_v58 = vmax.f32 %v1612_v48, 0.0  ;;  %v2582_v59 = vmax.f32 %v2124_v49, 0.0  ;;  %v1615_v60 = vadd.f32 %v6313_v9, %v1614_v56  ;;  %v2127_v61 = vadd.f32 %v6313_v9, %v2126_v57 }
 0x17b   :  { %v4513_v62 = vpack.c.bf16 %v2456_v52, %v2456_v52  ;;  %v4641_v63 = vpack.c.bf16 %v2584_v53, %v2584_v53  ;;  %v2457_v0 = vmax.f32 %v1623_v54, 0.0  ;;  %v2585_v1 = vmax.f32 %v2135_v55, 0.0 }
 0x17c   :  { %v4511_v2 = vpack.c.bf16 %v2454_v58, %v2454_v58  ;;  %v4639_v3 = vpack.c.bf16 %v2582_v59, %v2582_v59  ;;  %v2455_v4 = vmax.f32 %v1615_v60, 0.0  ;;  %v2583_v47 = vmax.f32 %v2127_v61, 0.0 }
 0x17d   :  { %3737 = vst.msk [vmem:[%s7128_s3 + $0xf8] sm:$0xf] %vm3674_vm1, %v4513_v62  ;;  %3865 = vst.msk [vmem:[%s7128_s3 + $0x2f8] sm:$0xf] %vm3674_vm1, %v4641_v63  ;;  %v4514_v5 = vpack.c.bf16 %v2457_v0, %v2457_v0  ;;  %v4642_v6 = vpack.c.bf16 %v2585_v1, %v2585_v1 }
 0x17e   :  { %3735 = vst.msk [vmem:[%s7128_s3 + $0xf0] sm:$0xf] %vm3674_vm1, %v4511_v2  ;;  %3863 = vst.msk [vmem:[%s7128_s3 + $0x2f0] sm:$0xf] %vm3674_vm1, %v4639_v3  ;;  %v4512_v7 = vpack.c.bf16 %v2455_v4, %v2455_v4  ;;  %v4640_v8 = vpack.c.bf16 %v2583_v47, %v2583_v47  ;;  %v4904_v10 = vpop.f32.mrb[64].mxu0  ;;  %v5032_v11 = vpop.f32.mrb[64].mxu1 }
 0x17f   :  { %3738 = vst.msk [vmem:[%s7128_s3 + $0xfc] sm:$0xf] %vm3674_vm1, %v4514_v5  ;;  %3866 = vst.msk [vmem:[%s7128_s3 + $0x2fc] sm:$0xf] %vm3674_vm1, %v4642_v6  ;;  %v1636_v12 = vadd.f32 %v6313_v9, %v4904_v10  ;;  %v2148_v13 = vadd.f32 %v6313_v9, %v5032_v11  ;;  %v1627_v14 = vpop.f32.mrb[65].mxu0  ;;  %v2139_v15 = vpop.f32.mrb[65].mxu1 }
 0x180   :  { %3736 = vst.msk [vmem:[%s7128_s3 + $0xf4] sm:$0xf] %vm3674_vm1, %v4512_v7  ;;  %3864 = vst.msk [vmem:[%s7128_s3 + $0x2f4] sm:$0xf] %vm3674_vm1, %v4640_v8  ;;  %v1628_v16 = vadd.f32 %v6313_v9, %v1627_v14  ;;  %v2140_v17 = vadd.f32 %v6313_v9, %v2139_v15  ;;  %v4905_v18 = vpop.f32.mrb[66].mxu0  ;;  %v5033_v19 = vpop.f32.mrb[66].mxu1 }
 0x181   :  { %v2460_v20 = vmax.f32 %v1636_v12, 0.0  ;;  %v2588_v21 = vmax.f32 %v2148_v13, 0.0  ;;  %v1639_v22 = vadd.f32 %v6313_v9, %v4905_v18  ;;  %v2151_v23 = vadd.f32 %v6313_v9, %v5033_v19  ;;  %v1630_v24 = vpop.f32.mrb[67].mxu0  ;;  %v2142_v25 = vpop.f32.mrb[67].mxu1 }
 0x182   :  { %v2458_v26 = vmax.f32 %v1628_v16, 0.0  ;;  %v2586_v27 = vmax.f32 %v2140_v17, 0.0  ;;  %v1631_v28 = vadd.f32 %v6313_v9, %v1630_v24  ;;  %v2143_v29 = vadd.f32 %v6313_v9, %v2142_v25 }
 0x183   :  { %v4517_v30 = vpack.c.bf16 %v2460_v20, %v2460_v20  ;;  %v4645_v31 = vpack.c.bf16 %v2588_v21, %v2588_v21  ;;  %v2461_v32 = vmax.f32 %v1639_v22, 0.0  ;;  %v2589_v33 = vmax.f32 %v2151_v23, 0.0 }
 0x184   :  { %v4515_v34 = vpack.c.bf16 %v2458_v26, %v2458_v26  ;;  %v4643_v35 = vpack.c.bf16 %v2586_v27, %v2586_v27  ;;  %v2459_v36 = vmax.f32 %v1631_v28, 0.0  ;;  %v2587_v37 = vmax.f32 %v2143_v29, 0.0 }
 0x185   :  { %3741 = vst.msk [vmem:[%s7128_s3 + $0x108] sm:$0xf] %vm3674_vm1, %v4517_v30  ;;  %3869 = vst.msk [vmem:[%s7128_s3 + $0x308] sm:$0xf] %vm3674_vm1, %v4645_v31  ;;  %v4518_v38 = vpack.c.bf16 %v2461_v32, %v2461_v32  ;;  %v4646_v39 = vpack.c.bf16 %v2589_v33, %v2589_v33 }
 0x186   :  { %3739 = vst.msk [vmem:[%s7128_s3 + $0x100] sm:$0xf] %vm3674_vm1, %v4515_v34  ;;  %3867 = vst.msk [vmem:[%s7128_s3 + $0x300] sm:$0xf] %vm3674_vm1, %v4643_v35  ;;  %v4516_v40 = vpack.c.bf16 %v2459_v36, %v2459_v36  ;;  %v4644_v41 = vpack.c.bf16 %v2587_v37, %v2587_v37  ;;  %v4908_v42 = vpop.f32.mrb[68].mxu0  ;;  %v5036_v43 = vpop.f32.mrb[68].mxu1 }
 0x187   :  { %3742 = vst.msk [vmem:[%s7128_s3 + $0x10c] sm:$0xf] %vm3674_vm1, %v4518_v38  ;;  %3870 = vst.msk [vmem:[%s7128_s3 + $0x30c] sm:$0xf] %vm3674_vm1, %v4646_v39  ;;  %v1652_v44 = vadd.f32 %v6313_v9, %v4908_v42  ;;  %v2164_v45 = vadd.f32 %v6313_v9, %v5036_v43  ;;  %v1643_v46 = vpop.f32.mrb[69].mxu0  ;;  %v2155_v48 = vpop.f32.mrb[69].mxu1 }
 0x188   :  { %3740 = vst.msk [vmem:[%s7128_s3 + $0x104] sm:$0xf] %vm3674_vm1, %v4516_v40  ;;  %3868 = vst.msk [vmem:[%s7128_s3 + $0x304] sm:$0xf] %vm3674_vm1, %v4644_v41  ;;  %v1644_v49 = vadd.f32 %v6313_v9, %v1643_v46  ;;  %v2156_v50 = vadd.f32 %v6313_v9, %v2155_v48  ;;  %v4909_v51 = vpop.f32.mrb[70].mxu0  ;;  %v5037_v52 = vpop.f32.mrb[70].mxu1 }
 0x189   :  { %v2464_v53 = vmax.f32 %v1652_v44, 0.0  ;;  %v2592_v54 = vmax.f32 %v2164_v45, 0.0  ;;  %v1655_v55 = vadd.f32 %v6313_v9, %v4909_v51  ;;  %v2167_v56 = vadd.f32 %v6313_v9, %v5037_v52  ;;  %v1646_v57 = vpop.f32.mrb[71].mxu0  ;;  %v2158_v58 = vpop.f32.mrb[71].mxu1 }
 0x18a   :  { %v2462_v59 = vmax.f32 %v1644_v49, 0.0  ;;  %v2590_v60 = vmax.f32 %v2156_v50, 0.0  ;;  %v1647_v61 = vadd.f32 %v6313_v9, %v1646_v57  ;;  %v2159_v62 = vadd.f32 %v6313_v9, %v2158_v58 }
 0x18b   :  { %v4521_v63 = vpack.c.bf16 %v2464_v53, %v2464_v53  ;;  %v4649_v0 = vpack.c.bf16 %v2592_v54, %v2592_v54  ;;  %v2465_v1 = vmax.f32 %v1655_v55, 0.0  ;;  %v2593_v2 = vmax.f32 %v2167_v56, 0.0 }
 0x18c   :  { %v4519_v3 = vpack.c.bf16 %v2462_v59, %v2462_v59  ;;  %v4647_v4 = vpack.c.bf16 %v2590_v60, %v2590_v60  ;;  %v2463_v47 = vmax.f32 %v1647_v61, 0.0  ;;  %v2591_v5 = vmax.f32 %v2159_v62, 0.0 }
 0x18d   :  { %3745 = vst.msk [vmem:[%s7128_s3 + $0x118] sm:$0xf] %vm3674_vm1, %v4521_v63  ;;  %3873 = vst.msk [vmem:[%s7128_s3 + $0x318] sm:$0xf] %vm3674_vm1, %v4649_v0  ;;  %v4522_v6 = vpack.c.bf16 %v2465_v1, %v2465_v1  ;;  %v4650_v7 = vpack.c.bf16 %v2593_v2, %v2593_v2 }
 0x18e   :  { %3743 = vst.msk [vmem:[%s7128_s3 + $0x110] sm:$0xf] %vm3674_vm1, %v4519_v3  ;;  %3871 = vst.msk [vmem:[%s7128_s3 + $0x310] sm:$0xf] %vm3674_vm1, %v4647_v4  ;;  %v4520_v8 = vpack.c.bf16 %v2463_v47, %v2463_v47  ;;  %v4648_v10 = vpack.c.bf16 %v2591_v5, %v2591_v5  ;;  %v4912_v11 = vpop.f32.mrb[72].mxu0  ;;  %v5040_v12 = vpop.f32.mrb[72].mxu1 }
 0x18f   :  { %3746 = vst.msk [vmem:[%s7128_s3 + $0x11c] sm:$0xf] %vm3674_vm1, %v4522_v6  ;;  %3874 = vst.msk [vmem:[%s7128_s3 + $0x31c] sm:$0xf] %vm3674_vm1, %v4650_v7  ;;  %v1668_v13 = vadd.f32 %v6313_v9, %v4912_v11  ;;  %v2180_v14 = vadd.f32 %v6313_v9, %v5040_v12  ;;  %v1659_v15 = vpop.f32.mrb[73].mxu0  ;;  %v2171_v16 = vpop.f32.mrb[73].mxu1 }
 0x190   :  { %3744 = vst.msk [vmem:[%s7128_s3 + $0x114] sm:$0xf] %vm3674_vm1, %v4520_v8  ;;  %3872 = vst.msk [vmem:[%s7128_s3 + $0x314] sm:$0xf] %vm3674_vm1, %v4648_v10  ;;  %v1660_v17 = vadd.f32 %v6313_v9, %v1659_v15  ;;  %v2172_v18 = vadd.f32 %v6313_v9, %v2171_v16  ;;  %v4913_v19 = vpop.f32.mrb[74].mxu0  ;;  %v5041_v20 = vpop.f32.mrb[74].mxu1 }
 0x191   :  { %v2468_v21 = vmax.f32 %v1668_v13, 0.0  ;;  %v2596_v22 = vmax.f32 %v2180_v14, 0.0  ;;  %v1671_v23 = vadd.f32 %v6313_v9, %v4913_v19  ;;  %v2183_v24 = vadd.f32 %v6313_v9, %v5041_v20  ;;  %v1662_v25 = vpop.f32.mrb[75].mxu0  ;;  %v2174_v26 = vpop.f32.mrb[75].mxu1 }
 0x192   :  { %v2466_v27 = vmax.f32 %v1660_v17, 0.0  ;;  %v2594_v28 = vmax.f32 %v2172_v18, 0.0  ;;  %v1663_v29 = vadd.f32 %v6313_v9, %v1662_v25  ;;  %v2175_v30 = vadd.f32 %v6313_v9, %v2174_v26 }
 0x193   :  { %v4525_v31 = vpack.c.bf16 %v2468_v21, %v2468_v21  ;;  %v4653_v32 = vpack.c.bf16 %v2596_v22, %v2596_v22  ;;  %v2469_v33 = vmax.f32 %v1671_v23, 0.0  ;;  %v2597_v34 = vmax.f32 %v2183_v24, 0.0 }
 0x194   :  { %v4523_v35 = vpack.c.bf16 %v2466_v27, %v2466_v27  ;;  %v4651_v36 = vpack.c.bf16 %v2594_v28, %v2594_v28  ;;  %v2467_v37 = vmax.f32 %v1663_v29, 0.0  ;;  %v2595_v38 = vmax.f32 %v2175_v30, 0.0 }
 0x195   :  { %3749 = vst.msk [vmem:[%s7128_s3 + $0x128] sm:$0xf] %vm3674_vm1, %v4525_v31  ;;  %3877 = vst.msk [vmem:[%s7128_s3 + $0x328] sm:$0xf] %vm3674_vm1, %v4653_v32  ;;  %v4526_v39 = vpack.c.bf16 %v2469_v33, %v2469_v33  ;;  %v4654_v40 = vpack.c.bf16 %v2597_v34, %v2597_v34 }
 0x196   :  { %3747 = vst.msk [vmem:[%s7128_s3 + $0x120] sm:$0xf] %vm3674_vm1, %v4523_v35  ;;  %3875 = vst.msk [vmem:[%s7128_s3 + $0x320] sm:$0xf] %vm3674_vm1, %v4651_v36  ;;  %v4524_v41 = vpack.c.bf16 %v2467_v37, %v2467_v37  ;;  %v4652_v42 = vpack.c.bf16 %v2595_v38, %v2595_v38  ;;  %v4916_v43 = vpop.f32.mrb[76].mxu0  ;;  %v5044_v44 = vpop.f32.mrb[76].mxu1 }
 0x197   :  { %3750 = vst.msk [vmem:[%s7128_s3 + $0x12c] sm:$0xf] %vm3674_vm1, %v4526_v39  ;;  %3878 = vst.msk [vmem:[%s7128_s3 + $0x32c] sm:$0xf] %vm3674_vm1, %v4654_v40  ;;  %v1684_v45 = vadd.f32 %v6313_v9, %v4916_v43  ;;  %v2196_v46 = vadd.f32 %v6313_v9, %v5044_v44  ;;  %v1675_v48 = vpop.f32.mrb[77].mxu0  ;;  %v2187_v49 = vpop.f32.mrb[77].mxu1 }
 0x198   :  { %3748 = vst.msk [vmem:[%s7128_s3 + $0x124] sm:$0xf] %vm3674_vm1, %v4524_v41  ;;  %3876 = vst.msk [vmem:[%s7128_s3 + $0x324] sm:$0xf] %vm3674_vm1, %v4652_v42  ;;  %v1676_v50 = vadd.f32 %v6313_v9, %v1675_v48  ;;  %v2188_v51 = vadd.f32 %v6313_v9, %v2187_v49  ;;  %v4917_v52 = vpop.f32.mrb[78].mxu0  ;;  %v5045_v53 = vpop.f32.mrb[78].mxu1 }
 0x199   :  { %v2472_v54 = vmax.f32 %v1684_v45, 0.0  ;;  %v2600_v55 = vmax.f32 %v2196_v46, 0.0  ;;  %v1687_v56 = vadd.f32 %v6313_v9, %v4917_v52  ;;  %v2199_v57 = vadd.f32 %v6313_v9, %v5045_v53  ;;  %v1678_v58 = vpop.f32.mrb[79].mxu0  ;;  %v2190_v59 = vpop.f32.mrb[79].mxu1 }
 0x19a   :  { %v2470_v60 = vmax.f32 %v1676_v50, 0.0  ;;  %v2598_v61 = vmax.f32 %v2188_v51, 0.0  ;;  %v1679_v62 = vadd.f32 %v6313_v9, %v1678_v58  ;;  %v2191_v63 = vadd.f32 %v6313_v9, %v2190_v59 }
 0x19b   :  { %v4529_v0 = vpack.c.bf16 %v2472_v54, %v2472_v54  ;;  %v4657_v1 = vpack.c.bf16 %v2600_v55, %v2600_v55  ;;  %v2473_v2 = vmax.f32 %v1687_v56, 0.0  ;;  %v2601_v3 = vmax.f32 %v2199_v57, 0.0 }
 0x19c   :  { %v4527_v4 = vpack.c.bf16 %v2470_v60, %v2470_v60  ;;  %v4655_v47 = vpack.c.bf16 %v2598_v61, %v2598_v61  ;;  %v2471_v5 = vmax.f32 %v1679_v62, 0.0  ;;  %v2599_v6 = vmax.f32 %v2191_v63, 0.0 }
 0x19d   :  { %3753 = vst.msk [vmem:[%s7128_s3 + $0x138] sm:$0xf] %vm3674_vm1, %v4529_v0  ;;  %3881 = vst.msk [vmem:[%s7128_s3 + $0x338] sm:$0xf] %vm3674_vm1, %v4657_v1  ;;  %v4530_v7 = vpack.c.bf16 %v2473_v2, %v2473_v2  ;;  %v4658_v8 = vpack.c.bf16 %v2601_v3, %v2601_v3 }
 0x19e   :  { %3751 = vst.msk [vmem:[%s7128_s3 + $0x130] sm:$0xf] %vm3674_vm1, %v4527_v4  ;;  %3879 = vst.msk [vmem:[%s7128_s3 + $0x330] sm:$0xf] %vm3674_vm1, %v4655_v47  ;;  %v4528_v10 = vpack.c.bf16 %v2471_v5, %v2471_v5  ;;  %v4656_v11 = vpack.c.bf16 %v2599_v6, %v2599_v6  ;;  %v4920_v12 = vpop.f32.mrb[80].mxu0  ;;  %v5048_v13 = vpop.f32.mrb[80].mxu1 }
 0x19f   :  { %3754 = vst.msk [vmem:[%s7128_s3 + $0x13c] sm:$0xf] %vm3674_vm1, %v4530_v7  ;;  %3882 = vst.msk [vmem:[%s7128_s3 + $0x33c] sm:$0xf] %vm3674_vm1, %v4658_v8  ;;  %v1700_v14 = vadd.f32 %v6313_v9, %v4920_v12  ;;  %v2212_v15 = vadd.f32 %v6313_v9, %v5048_v13  ;;  %v1691_v16 = vpop.f32.mrb[81].mxu0  ;;  %v2203_v17 = vpop.f32.mrb[81].mxu1 }
 0x1a0   :  { %3752 = vst.msk [vmem:[%s7128_s3 + $0x134] sm:$0xf] %vm3674_vm1, %v4528_v10  ;;  %3880 = vst.msk [vmem:[%s7128_s3 + $0x334] sm:$0xf] %vm3674_vm1, %v4656_v11  ;;  %v1692_v18 = vadd.f32 %v6313_v9, %v1691_v16  ;;  %v2204_v19 = vadd.f32 %v6313_v9, %v2203_v17  ;;  %v4921_v20 = vpop.f32.mrb[82].mxu0  ;;  %v5049_v21 = vpop.f32.mrb[82].mxu1 }
 0x1a1   :  { %v2476_v22 = vmax.f32 %v1700_v14, 0.0  ;;  %v2604_v23 = vmax.f32 %v2212_v15, 0.0  ;;  %v1703_v24 = vadd.f32 %v6313_v9, %v4921_v20  ;;  %v2215_v25 = vadd.f32 %v6313_v9, %v5049_v21  ;;  %v1694_v26 = vpop.f32.mrb[83].mxu0  ;;  %v2206_v27 = vpop.f32.mrb[83].mxu1 }
 0x1a2   :  { %v2474_v28 = vmax.f32 %v1692_v18, 0.0  ;;  %v2602_v29 = vmax.f32 %v2204_v19, 0.0  ;;  %v1695_v30 = vadd.f32 %v6313_v9, %v1694_v26  ;;  %v2207_v31 = vadd.f32 %v6313_v9, %v2206_v27 }
 0x1a3   :  { %v4533_v32 = vpack.c.bf16 %v2476_v22, %v2476_v22  ;;  %v4661_v33 = vpack.c.bf16 %v2604_v23, %v2604_v23  ;;  %v2477_v34 = vmax.f32 %v1703_v24, 0.0  ;;  %v2605_v35 = vmax.f32 %v2215_v25, 0.0 }
 0x1a4   :  { %v4531_v36 = vpack.c.bf16 %v2474_v28, %v2474_v28  ;;  %v4659_v37 = vpack.c.bf16 %v2602_v29, %v2602_v29  ;;  %v2475_v38 = vmax.f32 %v1695_v30, 0.0  ;;  %v2603_v39 = vmax.f32 %v2207_v31, 0.0 }
 0x1a5   :  { %3757 = vst.msk [vmem:[%s7128_s3 + $0x148] sm:$0xf] %vm3674_vm1, %v4533_v32  ;;  %3885 = vst.msk [vmem:[%s7128_s3 + $0x348] sm:$0xf] %vm3674_vm1, %v4661_v33  ;;  %v4534_v40 = vpack.c.bf16 %v2477_v34, %v2477_v34  ;;  %v4662_v41 = vpack.c.bf16 %v2605_v35, %v2605_v35 }
 0x1a6   :  { %3755 = vst.msk [vmem:[%s7128_s3 + $0x140] sm:$0xf] %vm3674_vm1, %v4531_v36  ;;  %3883 = vst.msk [vmem:[%s7128_s3 + $0x340] sm:$0xf] %vm3674_vm1, %v4659_v37  ;;  %v4532_v42 = vpack.c.bf16 %v2475_v38, %v2475_v38  ;;  %v4660_v43 = vpack.c.bf16 %v2603_v39, %v2603_v39  ;;  %v4924_v44 = vpop.f32.mrb[84].mxu0  ;;  %v5052_v45 = vpop.f32.mrb[84].mxu1 }
 0x1a7   :  { %3758 = vst.msk [vmem:[%s7128_s3 + $0x14c] sm:$0xf] %vm3674_vm1, %v4534_v40  ;;  %3886 = vst.msk [vmem:[%s7128_s3 + $0x34c] sm:$0xf] %vm3674_vm1, %v4662_v41  ;;  %v1716_v46 = vadd.f32 %v6313_v9, %v4924_v44  ;;  %v2228_v48 = vadd.f32 %v6313_v9, %v5052_v45  ;;  %v1707_v49 = vpop.f32.mrb[85].mxu0  ;;  %v2219_v50 = vpop.f32.mrb[85].mxu1 }
 0x1a8   :  { %3756 = vst.msk [vmem:[%s7128_s3 + $0x144] sm:$0xf] %vm3674_vm1, %v4532_v42  ;;  %3884 = vst.msk [vmem:[%s7128_s3 + $0x344] sm:$0xf] %vm3674_vm1, %v4660_v43  ;;  %v1708_v51 = vadd.f32 %v6313_v9, %v1707_v49  ;;  %v2220_v52 = vadd.f32 %v6313_v9, %v2219_v50  ;;  %v4925_v53 = vpop.f32.mrb[86].mxu0  ;;  %v5053_v54 = vpop.f32.mrb[86].mxu1 }
 0x1a9   :  { %v2480_v55 = vmax.f32 %v1716_v46, 0.0  ;;  %v2608_v56 = vmax.f32 %v2228_v48, 0.0  ;;  %v1719_v57 = vadd.f32 %v6313_v9, %v4925_v53  ;;  %v2231_v58 = vadd.f32 %v6313_v9, %v5053_v54  ;;  %v1710_v59 = vpop.f32.mrb[87].mxu0  ;;  %v2222_v60 = vpop.f32.mrb[87].mxu1 }
 0x1aa   :  { %v2478_v61 = vmax.f32 %v1708_v51, 0.0  ;;  %v2606_v62 = vmax.f32 %v2220_v52, 0.0  ;;  %v1711_v63 = vadd.f32 %v6313_v9, %v1710_v59  ;;  %v2223_v0 = vadd.f32 %v6313_v9, %v2222_v60 }
 0x1ab   :  { %v4537_v1 = vpack.c.bf16 %v2480_v55, %v2480_v55  ;;  %v4665_v2 = vpack.c.bf16 %v2608_v56, %v2608_v56  ;;  %v2481_v3 = vmax.f32 %v1719_v57, 0.0  ;;  %v2609_v4 = vmax.f32 %v2231_v58, 0.0 }
 0x1ac   :  { %v4535_v47 = vpack.c.bf16 %v2478_v61, %v2478_v61  ;;  %v4663_v5 = vpack.c.bf16 %v2606_v62, %v2606_v62  ;;  %v2479_v6 = vmax.f32 %v1711_v63, 0.0  ;;  %v2607_v7 = vmax.f32 %v2223_v0, 0.0 }
 0x1ad   :  { %3761 = vst.msk [vmem:[%s7128_s3 + $0x158] sm:$0xf] %vm3674_vm1, %v4537_v1  ;;  %3889 = vst.msk [vmem:[%s7128_s3 + $0x358] sm:$0xf] %vm3674_vm1, %v4665_v2  ;;  %v4538_v8 = vpack.c.bf16 %v2481_v3, %v2481_v3  ;;  %v4666_v10 = vpack.c.bf16 %v2609_v4, %v2609_v4 }
 0x1ae   :  { %3759 = vst.msk [vmem:[%s7128_s3 + $0x150] sm:$0xf] %vm3674_vm1, %v4535_v47  ;;  %3887 = vst.msk [vmem:[%s7128_s3 + $0x350] sm:$0xf] %vm3674_vm1, %v4663_v5  ;;  %v4536_v11 = vpack.c.bf16 %v2479_v6, %v2479_v6  ;;  %v4664_v12 = vpack.c.bf16 %v2607_v7, %v2607_v7  ;;  %v4928_v13 = vpop.f32.mrb[88].mxu0  ;;  %v5056_v14 = vpop.f32.mrb[88].mxu1 }
 0x1af   :  { %3762 = vst.msk [vmem:[%s7128_s3 + $0x15c] sm:$0xf] %vm3674_vm1, %v4538_v8  ;;  %3890 = vst.msk [vmem:[%s7128_s3 + $0x35c] sm:$0xf] %vm3674_vm1, %v4666_v10  ;;  %v1732_v15 = vadd.f32 %v6313_v9, %v4928_v13  ;;  %v2244_v16 = vadd.f32 %v6313_v9, %v5056_v14  ;;  %v1723_v17 = vpop.f32.mrb[89].mxu0  ;;  %v2235_v18 = vpop.f32.mrb[89].mxu1 }
 0x1b0   :  { %3760 = vst.msk [vmem:[%s7128_s3 + $0x154] sm:$0xf] %vm3674_vm1, %v4536_v11  ;;  %3888 = vst.msk [vmem:[%s7128_s3 + $0x354] sm:$0xf] %vm3674_vm1, %v4664_v12  ;;  %v1724_v19 = vadd.f32 %v6313_v9, %v1723_v17  ;;  %v2236_v20 = vadd.f32 %v6313_v9, %v2235_v18  ;;  %v4929_v21 = vpop.f32.mrb[90].mxu0  ;;  %v5057_v22 = vpop.f32.mrb[90].mxu1 }
 0x1b1   :  { %v2484_v23 = vmax.f32 %v1732_v15, 0.0  ;;  %v2612_v24 = vmax.f32 %v2244_v16, 0.0  ;;  %v1735_v25 = vadd.f32 %v6313_v9, %v4929_v21  ;;  %v2247_v26 = vadd.f32 %v6313_v9, %v5057_v22  ;;  %v1726_v27 = vpop.f32.mrb[91].mxu0  ;;  %v2238_v28 = vpop.f32.mrb[91].mxu1 }
 0x1b2   :  { %v2482_v29 = vmax.f32 %v1724_v19, 0.0  ;;  %v2610_v30 = vmax.f32 %v2236_v20, 0.0  ;;  %v1727_v31 = vadd.f32 %v6313_v9, %v1726_v27  ;;  %v2239_v32 = vadd.f32 %v6313_v9, %v2238_v28 }
 0x1b3   :  { %v4541_v33 = vpack.c.bf16 %v2484_v23, %v2484_v23  ;;  %v4669_v34 = vpack.c.bf16 %v2612_v24, %v2612_v24  ;;  %v2485_v35 = vmax.f32 %v1735_v25, 0.0  ;;  %v2613_v36 = vmax.f32 %v2247_v26, 0.0 }
 0x1b4   :  { %v4539_v37 = vpack.c.bf16 %v2482_v29, %v2482_v29  ;;  %v4667_v38 = vpack.c.bf16 %v2610_v30, %v2610_v30  ;;  %v2483_v39 = vmax.f32 %v1727_v31, 0.0  ;;  %v2611_v40 = vmax.f32 %v2239_v32, 0.0 }
 0x1b5   :  { %3765 = vst.msk [vmem:[%s7128_s3 + $0x168] sm:$0xf] %vm3674_vm1, %v4541_v33  ;;  %3893 = vst.msk [vmem:[%s7128_s3 + $0x368] sm:$0xf] %vm3674_vm1, %v4669_v34  ;;  %v4542_v41 = vpack.c.bf16 %v2485_v35, %v2485_v35  ;;  %v4670_v42 = vpack.c.bf16 %v2613_v36, %v2613_v36 }
 0x1b6   :  { %3763 = vst.msk [vmem:[%s7128_s3 + $0x160] sm:$0xf] %vm3674_vm1, %v4539_v37  ;;  %3891 = vst.msk [vmem:[%s7128_s3 + $0x360] sm:$0xf] %vm3674_vm1, %v4667_v38  ;;  %v4540_v43 = vpack.c.bf16 %v2483_v39, %v2483_v39  ;;  %v4668_v44 = vpack.c.bf16 %v2611_v40, %v2611_v40  ;;  %v4932_v45 = vpop.f32.mrb[92].mxu0  ;;  %v5060_v46 = vpop.f32.mrb[92].mxu1 }
 0x1b7   :  { %3766 = vst.msk [vmem:[%s7128_s3 + $0x16c] sm:$0xf] %vm3674_vm1, %v4542_v41  ;;  %3894 = vst.msk [vmem:[%s7128_s3 + $0x36c] sm:$0xf] %vm3674_vm1, %v4670_v42  ;;  %v1748_v48 = vadd.f32 %v6313_v9, %v4932_v45  ;;  %v2260_v49 = vadd.f32 %v6313_v9, %v5060_v46  ;;  %v1739_v50 = vpop.f32.mrb[93].mxu0  ;;  %v2251_v51 = vpop.f32.mrb[93].mxu1 }
 0x1b8   :  { %3764 = vst.msk [vmem:[%s7128_s3 + $0x164] sm:$0xf] %vm3674_vm1, %v4540_v43  ;;  %3892 = vst.msk [vmem:[%s7128_s3 + $0x364] sm:$0xf] %vm3674_vm1, %v4668_v44  ;;  %v1740_v52 = vadd.f32 %v6313_v9, %v1739_v50  ;;  %v2252_v53 = vadd.f32 %v6313_v9, %v2251_v51  ;;  %v4933_v54 = vpop.f32.mrb[94].mxu0  ;;  %v5061_v55 = vpop.f32.mrb[94].mxu1 }
 0x1b9   :  { %v2488_v56 = vmax.f32 %v1748_v48, 0.0  ;;  %v2616_v57 = vmax.f32 %v2260_v49, 0.0  ;;  %v1751_v58 = vadd.f32 %v6313_v9, %v4933_v54  ;;  %v2263_v59 = vadd.f32 %v6313_v9, %v5061_v55  ;;  %v1742_v60 = vpop.f32.mrb[95].mxu0  ;;  %v2254_v61 = vpop.f32.mrb[95].mxu1  ;;  %v6835_v48 = vld [vmem:[#allocation4] ss:$0 sm:$0xff] }
 0x1ba   :  { %v2486_v62 = vmax.f32 %v1740_v52, 0.0  ;;  %v2614_v63 = vmax.f32 %v2252_v53, 0.0  ;;  %v1743_v0 = vadd.f32 %v6313_v9, %v1742_v60  ;;  %v2255_v1 = vadd.f32 %v6313_v9, %v2254_v61 }
 0x1bb   :  { %v4545_v2 = vpack.c.bf16 %v2488_v56, %v2488_v56  ;;  %v4673_v3 = vpack.c.bf16 %v2616_v57, %v2616_v57  ;;  %v2489_v4 = vmax.f32 %v1751_v58, 0.0  ;;  %v2617_v47 = vmax.f32 %v2263_v59, 0.0 }
 0x1bc   :  { %v4543_v5 = vpack.c.bf16 %v2486_v62, %v2486_v62  ;;  %v4671_v6 = vpack.c.bf16 %v2614_v63, %v2614_v63  ;;  %v2487_v7 = vmax.f32 %v1743_v0, 0.0  ;;  %v2615_v8 = vmax.f32 %v2255_v1, 0.0 }
 0x1bd   :  { %3769 = vst.msk [vmem:[%s7128_s3 + $0x178] sm:$0xf] %vm3674_vm1, %v4545_v2  ;;  %3897 = vst.msk [vmem:[%s7128_s3 + $0x378] sm:$0xf] %vm3674_vm1, %v4673_v3  ;;  %v4546_v10 = vpack.c.bf16 %v2489_v4, %v2489_v4  ;;  %v4674_v11 = vpack.c.bf16 %v2617_v47, %v2617_v47 }
 0x1be   :  { %3767 = vst.msk [vmem:[%s7128_s3 + $0x170] sm:$0xf] %vm3674_vm1, %v4543_v5  ;;  %3895 = vst.msk [vmem:[%s7128_s3 + $0x370] sm:$0xf] %vm3674_vm1, %v4671_v6  ;;  %v4544_v12 = vpack.c.bf16 %v2487_v7, %v2487_v7  ;;  %v4672_v13 = vpack.c.bf16 %v2615_v8, %v2615_v8  ;;  %v4936_v14 = vpop.f32.mrb[96].mxu0  ;;  %v5064_v15 = vpop.f32.mrb[96].mxu1 }
 0x1bf   :  { %3770 = vst.msk [vmem:[%s7128_s3 + $0x17c] sm:$0xf] %vm3674_vm1, %v4546_v10  ;;  %3898 = vst.msk [vmem:[%s7128_s3 + $0x37c] sm:$0xf] %vm3674_vm1, %v4674_v11  ;;  %v1764_v16 = vadd.f32 %v6313_v9, %v4936_v14  ;;  %v2276_v17 = vadd.f32 %v6313_v9, %v5064_v15  ;;  %v1755_v18 = vpop.f32.mrb[97].mxu0  ;;  %v2267_v19 = vpop.f32.mrb[97].mxu1 }
 0x1c0   :  { %3768 = vst.msk [vmem:[%s7128_s3 + $0x174] sm:$0xf] %vm3674_vm1, %v4544_v12  ;;  %3896 = vst.msk [vmem:[%s7128_s3 + $0x374] sm:$0xf] %vm3674_vm1, %v4672_v13  ;;  %v1756_v20 = vadd.f32 %v6313_v9, %v1755_v18  ;;  %v2268_v21 = vadd.f32 %v6313_v9, %v2267_v19  ;;  %v4937_v22 = vpop.f32.mrb[98].mxu0  ;;  %v5065_v23 = vpop.f32.mrb[98].mxu1 }
 0x1c1   :  { %v2492_v24 = vmax.f32 %v1764_v16, 0.0  ;;  %v2620_v25 = vmax.f32 %v2276_v17, 0.0  ;;  %v1767_v26 = vadd.f32 %v6313_v9, %v4937_v22  ;;  %v2279_v27 = vadd.f32 %v6313_v9, %v5065_v23  ;;  %v1758_v28 = vpop.f32.mrb[99].mxu0  ;;  %v2270_v29 = vpop.f32.mrb[99].mxu1 }
 0x1c2   :  { %v2490_v30 = vmax.f32 %v1756_v20, 0.0  ;;  %v2618_v31 = vmax.f32 %v2268_v21, 0.0  ;;  %v1759_v32 = vadd.f32 %v6313_v9, %v1758_v28  ;;  %v2271_v33 = vadd.f32 %v6313_v9, %v2270_v29 }
 0x1c3   :  { %v4549_v34 = vpack.c.bf16 %v2492_v24, %v2492_v24  ;;  %v4677_v35 = vpack.c.bf16 %v2620_v25, %v2620_v25  ;;  %v2493_v36 = vmax.f32 %v1767_v26, 0.0  ;;  %v2621_v37 = vmax.f32 %v2279_v27, 0.0 }
 0x1c4   :  { %v4547_v38 = vpack.c.bf16 %v2490_v30, %v2490_v30  ;;  %v4675_v39 = vpack.c.bf16 %v2618_v31, %v2618_v31  ;;  %v2491_v40 = vmax.f32 %v1759_v32, 0.0  ;;  %v2619_v41 = vmax.f32 %v2271_v33, 0.0 }
 0x1c5   :  { %3773 = vst.msk [vmem:[%s7128_s3 + $0x188] sm:$0xf] %vm3674_vm1, %v4549_v34  ;;  %3901 = vst.msk [vmem:[%s7128_s3 + $0x388] sm:$0xf] %vm3674_vm1, %v4677_v35  ;;  %v4550_v42 = vpack.c.bf16 %v2493_v36, %v2493_v36  ;;  %v4678_v9 = vpack.c.bf16 %v2621_v37, %v2621_v37 }
 0x1c6   :  { %3771 = vst.msk [vmem:[%s7128_s3 + $0x180] sm:$0xf] %vm3674_vm1, %v4547_v38  ;;  %3899 = vst.msk [vmem:[%s7128_s3 + $0x380] sm:$0xf] %vm3674_vm1, %v4675_v39  ;;  %v4548_v43 = vpack.c.bf16 %v2491_v40, %v2491_v40  ;;  %v4676_v44 = vpack.c.bf16 %v2619_v41, %v2619_v41  ;;  %v4940_v45 = vpop.f32.mrb[100].mxu0  ;;  %v5068_v46 = vpop.f32.mrb[100].mxu1 }
 0x1c7   :  { %3774 = vst.msk [vmem:[%s7128_s3 + $0x18c] sm:$0xf] %vm3674_vm1, %v4550_v42  ;;  %3902 = vst.msk [vmem:[%s7128_s3 + $0x38c] sm:$0xf] %vm3674_vm1, %v4678_v9  ;;  %v1780_v49 = vadd.f32 %v6835_v48, %v4940_v45  ;;  %v2292_v50 = vadd.f32 %v6835_v48, %v5068_v46  ;;  %v1771_v51 = vpop.f32.mrb[101].mxu0  ;;  %v2283_v52 = vpop.f32.mrb[101].mxu1 }
 0x1c8   :  { %3772 = vst.msk [vmem:[%s7128_s3 + $0x184] sm:$0xf] %vm3674_vm1, %v4548_v43  ;;  %3900 = vst.msk [vmem:[%s7128_s3 + $0x384] sm:$0xf] %vm3674_vm1, %v4676_v44  ;;  %v1772_v53 = vadd.f32 %v6835_v48, %v1771_v51  ;;  %v2284_v54 = vadd.f32 %v6835_v48, %v2283_v52  ;;  %v4941_v55 = vpop.f32.mrb[102].mxu0  ;;  %v5069_v56 = vpop.f32.mrb[102].mxu1 }
 0x1c9   :  { %v2496_v57 = vmax.f32 %v1780_v49, 0.0  ;;  %v2624_v58 = vmax.f32 %v2292_v50, 0.0  ;;  %v1783_v59 = vadd.f32 %v6835_v48, %v4941_v55  ;;  %v2295_v60 = vadd.f32 %v6835_v48, %v5069_v56  ;;  %v1774_v61 = vpop.f32.mrb[103].mxu0  ;;  %v2286_v62 = vpop.f32.mrb[103].mxu1 }
 0x1ca   :  { %v2494_v63 = vmax.f32 %v1772_v53, 0.0  ;;  %v2622_v0 = vmax.f32 %v2284_v54, 0.0  ;;  %v1775_v1 = vadd.f32 %v6835_v48, %v1774_v61  ;;  %v2287_v2 = vadd.f32 %v6835_v48, %v2286_v62 }
 0x1cb   :  { %v4553_v3 = vpack.c.bf16 %v2496_v57, %v2496_v57  ;;  %v4681_v4 = vpack.c.bf16 %v2624_v58, %v2624_v58  ;;  %v2497_v47 = vmax.f32 %v1783_v59, 0.0  ;;  %v2625_v5 = vmax.f32 %v2295_v60, 0.0 }
 0x1cc   :  { %v4551_v6 = vpack.c.bf16 %v2494_v63, %v2494_v63  ;;  %v4679_v7 = vpack.c.bf16 %v2622_v0, %v2622_v0  ;;  %v2495_v8 = vmax.f32 %v1775_v1, 0.0  ;;  %v2623_v10 = vmax.f32 %v2287_v2, 0.0 }
 0x1cd   :  { %3777 = vst.msk [vmem:[%s7128_s3 + $0x198] sm:$0xf] %vm3674_vm1, %v4553_v3  ;;  %3905 = vst.msk [vmem:[%s7128_s3 + $0x398] sm:$0xf] %vm3674_vm1, %v4681_v4  ;;  %v4554_v11 = vpack.c.bf16 %v2497_v47, %v2497_v47  ;;  %v4682_v12 = vpack.c.bf16 %v2625_v5, %v2625_v5 }
 0x1ce   :  { %3775 = vst.msk [vmem:[%s7128_s3 + $0x190] sm:$0xf] %vm3674_vm1, %v4551_v6  ;;  %3903 = vst.msk [vmem:[%s7128_s3 + $0x390] sm:$0xf] %vm3674_vm1, %v4679_v7  ;;  %v4552_v13 = vpack.c.bf16 %v2495_v8, %v2495_v8  ;;  %v4680_v14 = vpack.c.bf16 %v2623_v10, %v2623_v10  ;;  %v4944_v15 = vpop.f32.mrb[104].mxu0  ;;  %v5072_v16 = vpop.f32.mrb[104].mxu1 }
 0x1cf   :  { %3778 = vst.msk [vmem:[%s7128_s3 + $0x19c] sm:$0xf] %vm3674_vm1, %v4554_v11  ;;  %3906 = vst.msk [vmem:[%s7128_s3 + $0x39c] sm:$0xf] %vm3674_vm1, %v4682_v12  ;;  %v1796_v17 = vadd.f32 %v6835_v48, %v4944_v15  ;;  %v2308_v18 = vadd.f32 %v6835_v48, %v5072_v16  ;;  %v1787_v19 = vpop.f32.mrb[105].mxu0  ;;  %v2299_v20 = vpop.f32.mrb[105].mxu1 }
 0x1d0   :  { %3776 = vst.msk [vmem:[%s7128_s3 + $0x194] sm:$0xf] %vm3674_vm1, %v4552_v13  ;;  %3904 = vst.msk [vmem:[%s7128_s3 + $0x394] sm:$0xf] %vm3674_vm1, %v4680_v14  ;;  %v1788_v21 = vadd.f32 %v6835_v48, %v1787_v19  ;;  %v2300_v22 = vadd.f32 %v6835_v48, %v2299_v20  ;;  %v4945_v23 = vpop.f32.mrb[106].mxu0  ;;  %v5073_v24 = vpop.f32.mrb[106].mxu1 }
 0x1d1   :  { %v2500_v25 = vmax.f32 %v1796_v17, 0.0  ;;  %v2628_v26 = vmax.f32 %v2308_v18, 0.0  ;;  %v1799_v27 = vadd.f32 %v6835_v48, %v4945_v23  ;;  %v2311_v28 = vadd.f32 %v6835_v48, %v5073_v24  ;;  %v1790_v29 = vpop.f32.mrb[107].mxu0  ;;  %v2302_v30 = vpop.f32.mrb[107].mxu1 }
 0x1d2   :  { %v2498_v31 = vmax.f32 %v1788_v21, 0.0  ;;  %v2626_v32 = vmax.f32 %v2300_v22, 0.0  ;;  %v1791_v33 = vadd.f32 %v6835_v48, %v1790_v29  ;;  %v2303_v34 = vadd.f32 %v6835_v48, %v2302_v30 }
 0x1d3   :  { %v4557_v35 = vpack.c.bf16 %v2500_v25, %v2500_v25  ;;  %v4685_v36 = vpack.c.bf16 %v2628_v26, %v2628_v26  ;;  %v2501_v37 = vmax.f32 %v1799_v27, 0.0  ;;  %v2629_v38 = vmax.f32 %v2311_v28, 0.0 }
 0x1d4   :  { %v4555_v39 = vpack.c.bf16 %v2498_v31, %v2498_v31  ;;  %v4683_v40 = vpack.c.bf16 %v2626_v32, %v2626_v32  ;;  %v2499_v41 = vmax.f32 %v1791_v33, 0.0  ;;  %v2627_v42 = vmax.f32 %v2303_v34, 0.0 }
 0x1d5   :  { %3781 = vst.msk [vmem:[%s7128_s3 + $0x1a8] sm:$0xf] %vm3674_vm1, %v4557_v35  ;;  %3909 = vst.msk [vmem:[%s7128_s3 + $0x3a8] sm:$0xf] %vm3674_vm1, %v4685_v36  ;;  %v4558_v9 = vpack.c.bf16 %v2501_v37, %v2501_v37  ;;  %v4686_v43 = vpack.c.bf16 %v2629_v38, %v2629_v38 }
 0x1d6   :  { %3779 = vst.msk [vmem:[%s7128_s3 + $0x1a0] sm:$0xf] %vm3674_vm1, %v4555_v39  ;;  %3907 = vst.msk [vmem:[%s7128_s3 + $0x3a0] sm:$0xf] %vm3674_vm1, %v4683_v40  ;;  %v4556_v44 = vpack.c.bf16 %v2499_v41, %v2499_v41  ;;  %v4684_v45 = vpack.c.bf16 %v2627_v42, %v2627_v42  ;;  %v4948_v46 = vpop.f32.mrb[108].mxu0  ;;  %v5076_v49 = vpop.f32.mrb[108].mxu1 }
 0x1d7   :  { %3782 = vst.msk [vmem:[%s7128_s3 + $0x1ac] sm:$0xf] %vm3674_vm1, %v4558_v9  ;;  %3910 = vst.msk [vmem:[%s7128_s3 + $0x3ac] sm:$0xf] %vm3674_vm1, %v4686_v43  ;;  %v1812_v50 = vadd.f32 %v6835_v48, %v4948_v46  ;;  %v2324_v51 = vadd.f32 %v6835_v48, %v5076_v49  ;;  %v1803_v52 = vpop.f32.mrb[109].mxu0  ;;  %v2315_v53 = vpop.f32.mrb[109].mxu1 }
 0x1d8   :  { %3780 = vst.msk [vmem:[%s7128_s3 + $0x1a4] sm:$0xf] %vm3674_vm1, %v4556_v44  ;;  %3908 = vst.msk [vmem:[%s7128_s3 + $0x3a4] sm:$0xf] %vm3674_vm1, %v4684_v45  ;;  %v1804_v54 = vadd.f32 %v6835_v48, %v1803_v52  ;;  %v2316_v55 = vadd.f32 %v6835_v48, %v2315_v53  ;;  %v4949_v56 = vpop.f32.mrb[110].mxu0  ;;  %v5077_v57 = vpop.f32.mrb[110].mxu1 }
 0x1d9   :  { %v2504_v58 = vmax.f32 %v1812_v50, 0.0  ;;  %v2632_v59 = vmax.f32 %v2324_v51, 0.0  ;;  %v1815_v60 = vadd.f32 %v6835_v48, %v4949_v56  ;;  %v2327_v61 = vadd.f32 %v6835_v48, %v5077_v57  ;;  %v1806_v62 = vpop.f32.mrb[111].mxu0  ;;  %v2318_v63 = vpop.f32.mrb[111].mxu1 }
 0x1da   :  { %v2502_v0 = vmax.f32 %v1804_v54, 0.0  ;;  %v2630_v1 = vmax.f32 %v2316_v55, 0.0  ;;  %v1807_v2 = vadd.f32 %v6835_v48, %v1806_v62  ;;  %v2319_v3 = vadd.f32 %v6835_v48, %v2318_v63 }
 0x1db   :  { %v4561_v4 = vpack.c.bf16 %v2504_v58, %v2504_v58  ;;  %v4689_v47 = vpack.c.bf16 %v2632_v59, %v2632_v59  ;;  %v2505_v5 = vmax.f32 %v1815_v60, 0.0  ;;  %v2633_v6 = vmax.f32 %v2327_v61, 0.0 }
 0x1dc   :  { %v4559_v7 = vpack.c.bf16 %v2502_v0, %v2502_v0  ;;  %v4687_v8 = vpack.c.bf16 %v2630_v1, %v2630_v1  ;;  %v2503_v10 = vmax.f32 %v1807_v2, 0.0  ;;  %v2631_v11 = vmax.f32 %v2319_v3, 0.0 }
 0x1dd   :  { %3785 = vst.msk [vmem:[%s7128_s3 + $0x1b8] sm:$0xf] %vm3674_vm1, %v4561_v4  ;;  %3913 = vst.msk [vmem:[%s7128_s3 + $0x3b8] sm:$0xf] %vm3674_vm1, %v4689_v47  ;;  %v4562_v12 = vpack.c.bf16 %v2505_v5, %v2505_v5  ;;  %v4690_v13 = vpack.c.bf16 %v2633_v6, %v2633_v6 }
 0x1de   :  { %3783 = vst.msk [vmem:[%s7128_s3 + $0x1b0] sm:$0xf] %vm3674_vm1, %v4559_v7  ;;  %3911 = vst.msk [vmem:[%s7128_s3 + $0x3b0] sm:$0xf] %vm3674_vm1, %v4687_v8  ;;  %v4560_v14 = vpack.c.bf16 %v2503_v10, %v2503_v10  ;;  %v4688_v15 = vpack.c.bf16 %v2631_v11, %v2631_v11  ;;  %v4952_v16 = vpop.f32.mrb[112].mxu0  ;;  %v5080_v17 = vpop.f32.mrb[112].mxu1 }
 0x1df   :  { %3786 = vst.msk [vmem:[%s7128_s3 + $0x1bc] sm:$0xf] %vm3674_vm1, %v4562_v12  ;;  %3914 = vst.msk [vmem:[%s7128_s3 + $0x3bc] sm:$0xf] %vm3674_vm1, %v4690_v13  ;;  %v1828_v18 = vadd.f32 %v6835_v48, %v4952_v16  ;;  %v2340_v19 = vadd.f32 %v6835_v48, %v5080_v17  ;;  %v1819_v20 = vpop.f32.mrb[113].mxu0  ;;  %v2331_v21 = vpop.f32.mrb[113].mxu1 }
 0x1e0   :  { %3784 = vst.msk [vmem:[%s7128_s3 + $0x1b4] sm:$0xf] %vm3674_vm1, %v4560_v14  ;;  %3912 = vst.msk [vmem:[%s7128_s3 + $0x3b4] sm:$0xf] %vm3674_vm1, %v4688_v15  ;;  %v1820_v22 = vadd.f32 %v6835_v48, %v1819_v20  ;;  %v2332_v23 = vadd.f32 %v6835_v48, %v2331_v21  ;;  %v4953_v24 = vpop.f32.mrb[114].mxu0  ;;  %v5081_v25 = vpop.f32.mrb[114].mxu1 }
 0x1e1   :  { %v2508_v26 = vmax.f32 %v1828_v18, 0.0  ;;  %v2636_v27 = vmax.f32 %v2340_v19, 0.0  ;;  %v1831_v28 = vadd.f32 %v6835_v48, %v4953_v24  ;;  %v2343_v29 = vadd.f32 %v6835_v48, %v5081_v25  ;;  %v1822_v30 = vpop.f32.mrb[115].mxu0  ;;  %v2334_v31 = vpop.f32.mrb[115].mxu1 }
 0x1e2   :  { %v2506_v32 = vmax.f32 %v1820_v22, 0.0  ;;  %v2634_v33 = vmax.f32 %v2332_v23, 0.0  ;;  %v1823_v34 = vadd.f32 %v6835_v48, %v1822_v30  ;;  %v2335_v35 = vadd.f32 %v6835_v48, %v2334_v31 }
 0x1e3   :  { %v4565_v36 = vpack.c.bf16 %v2508_v26, %v2508_v26  ;;  %v4693_v37 = vpack.c.bf16 %v2636_v27, %v2636_v27  ;;  %v2509_v38 = vmax.f32 %v1831_v28, 0.0  ;;  %v2637_v39 = vmax.f32 %v2343_v29, 0.0 }
 0x1e4   :  { %v4563_v40 = vpack.c.bf16 %v2506_v32, %v2506_v32  ;;  %v4691_v41 = vpack.c.bf16 %v2634_v33, %v2634_v33  ;;  %v2507_v42 = vmax.f32 %v1823_v34, 0.0  ;;  %v2635_v9 = vmax.f32 %v2335_v35, 0.0 }
 0x1e5   :  { %3789 = vst.msk [vmem:[%s7128_s3 + $0x1c8] sm:$0xf] %vm3674_vm1, %v4565_v36  ;;  %3917 = vst.msk [vmem:[%s7128_s3 + $0x3c8] sm:$0xf] %vm3674_vm1, %v4693_v37  ;;  %v4566_v43 = vpack.c.bf16 %v2509_v38, %v2509_v38  ;;  %v4694_v44 = vpack.c.bf16 %v2637_v39, %v2637_v39 }
 0x1e6   :  { %3787 = vst.msk [vmem:[%s7128_s3 + $0x1c0] sm:$0xf] %vm3674_vm1, %v4563_v40  ;;  %3915 = vst.msk [vmem:[%s7128_s3 + $0x3c0] sm:$0xf] %vm3674_vm1, %v4691_v41  ;;  %v4564_v45 = vpack.c.bf16 %v2507_v42, %v2507_v42  ;;  %v4692_v46 = vpack.c.bf16 %v2635_v9, %v2635_v9  ;;  %v4956_v49 = vpop.f32.mrb[116].mxu0  ;;  %v5084_v50 = vpop.f32.mrb[116].mxu1 }
 0x1e7   :  { %3790 = vst.msk [vmem:[%s7128_s3 + $0x1cc] sm:$0xf] %vm3674_vm1, %v4566_v43  ;;  %3918 = vst.msk [vmem:[%s7128_s3 + $0x3cc] sm:$0xf] %vm3674_vm1, %v4694_v44  ;;  %v1844_v51 = vadd.f32 %v6835_v48, %v4956_v49  ;;  %v2356_v52 = vadd.f32 %v6835_v48, %v5084_v50  ;;  %v1835_v53 = vpop.f32.mrb[117].mxu0  ;;  %v2347_v54 = vpop.f32.mrb[117].mxu1 }
 0x1e8   :  { %3788 = vst.msk [vmem:[%s7128_s3 + $0x1c4] sm:$0xf] %vm3674_vm1, %v4564_v45  ;;  %3916 = vst.msk [vmem:[%s7128_s3 + $0x3c4] sm:$0xf] %vm3674_vm1, %v4692_v46  ;;  %v1836_v55 = vadd.f32 %v6835_v48, %v1835_v53  ;;  %v2348_v56 = vadd.f32 %v6835_v48, %v2347_v54  ;;  %v4957_v57 = vpop.f32.mrb[118].mxu0  ;;  %v5085_v58 = vpop.f32.mrb[118].mxu1 }
 0x1e9   :  { %v2512_v59 = vmax.f32 %v1844_v51, 0.0  ;;  %v2640_v60 = vmax.f32 %v2356_v52, 0.0  ;;  %v1847_v61 = vadd.f32 %v6835_v48, %v4957_v57  ;;  %v2359_v62 = vadd.f32 %v6835_v48, %v5085_v58  ;;  %v1838_v63 = vpop.f32.mrb[119].mxu0  ;;  %v2350_v0 = vpop.f32.mrb[119].mxu1 }
 0x1ea   :  { %v2510_v1 = vmax.f32 %v1836_v55, 0.0  ;;  %v2638_v2 = vmax.f32 %v2348_v56, 0.0  ;;  %v1839_v3 = vadd.f32 %v6835_v48, %v1838_v63  ;;  %v2351_v4 = vadd.f32 %v6835_v48, %v2350_v0 }
 0x1eb   :  { %v4569_v47 = vpack.c.bf16 %v2512_v59, %v2512_v59  ;;  %v4697_v5 = vpack.c.bf16 %v2640_v60, %v2640_v60  ;;  %v2513_v6 = vmax.f32 %v1847_v61, 0.0  ;;  %v2641_v7 = vmax.f32 %v2359_v62, 0.0 }
 0x1ec   :  { %v4567_v8 = vpack.c.bf16 %v2510_v1, %v2510_v1  ;;  %v4695_v10 = vpack.c.bf16 %v2638_v2, %v2638_v2  ;;  %v2511_v11 = vmax.f32 %v1839_v3, 0.0  ;;  %v2639_v12 = vmax.f32 %v2351_v4, 0.0 }
 0x1ed   :  { %3793 = vst.msk [vmem:[%s7128_s3 + $0x1d8] sm:$0xf] %vm3674_vm1, %v4569_v47  ;;  %3921 = vst.msk [vmem:[%s7128_s3 + $0x3d8] sm:$0xf] %vm3674_vm1, %v4697_v5  ;;  %v4570_v13 = vpack.c.bf16 %v2513_v6, %v2513_v6  ;;  %v4698_v14 = vpack.c.bf16 %v2641_v7, %v2641_v7 }
 0x1ee   :  { %3791 = vst.msk [vmem:[%s7128_s3 + $0x1d0] sm:$0xf] %vm3674_vm1, %v4567_v8  ;;  %3919 = vst.msk [vmem:[%s7128_s3 + $0x3d0] sm:$0xf] %vm3674_vm1, %v4695_v10  ;;  %v4568_v15 = vpack.c.bf16 %v2511_v11, %v2511_v11  ;;  %v4696_v16 = vpack.c.bf16 %v2639_v12, %v2639_v12  ;;  %v4960_v17 = vpop.f32.mrb[120].mxu0  ;;  %v5088_v18 = vpop.f32.mrb[120].mxu1 }
 0x1ef   :  { %3794 = vst.msk [vmem:[%s7128_s3 + $0x1dc] sm:$0xf] %vm3674_vm1, %v4570_v13  ;;  %3922 = vst.msk [vmem:[%s7128_s3 + $0x3dc] sm:$0xf] %vm3674_vm1, %v4698_v14  ;;  %v1860_v19 = vadd.f32 %v6835_v48, %v4960_v17  ;;  %v2372_v20 = vadd.f32 %v6835_v48, %v5088_v18  ;;  %v1851_v21 = vpop.f32.mrb[121].mxu0  ;;  %v2363_v22 = vpop.f32.mrb[121].mxu1 }
 0x1f0   :  { %3792 = vst.msk [vmem:[%s7128_s3 + $0x1d4] sm:$0xf] %vm3674_vm1, %v4568_v15  ;;  %3920 = vst.msk [vmem:[%s7128_s3 + $0x3d4] sm:$0xf] %vm3674_vm1, %v4696_v16  ;;  %v1852_v23 = vadd.f32 %v6835_v48, %v1851_v21  ;;  %v2364_v24 = vadd.f32 %v6835_v48, %v2363_v22  ;;  %v4961_v25 = vpop.f32.mrb[122].mxu0  ;;  %v5089_v26 = vpop.f32.mrb[122].mxu1 }
 0x1f1   :  { %v2516_v27 = vmax.f32 %v1860_v19, 0.0  ;;  %v2644_v28 = vmax.f32 %v2372_v20, 0.0  ;;  %v1863_v29 = vadd.f32 %v6835_v48, %v4961_v25  ;;  %v2375_v30 = vadd.f32 %v6835_v48, %v5089_v26  ;;  %v1854_v31 = vpop.f32.mrb[123].mxu0  ;;  %v2366_v32 = vpop.f32.mrb[123].mxu1 }
 0x1f2   :  { %v2514_v33 = vmax.f32 %v1852_v23, 0.0  ;;  %v2642_v34 = vmax.f32 %v2364_v24, 0.0  ;;  %v1855_v35 = vadd.f32 %v6835_v48, %v1854_v31  ;;  %v2367_v36 = vadd.f32 %v6835_v48, %v2366_v32 }
 0x1f3   :  { %v4573_v37 = vpack.c.bf16 %v2516_v27, %v2516_v27  ;;  %v4701_v38 = vpack.c.bf16 %v2644_v28, %v2644_v28  ;;  %v2517_v39 = vmax.f32 %v1863_v29, 0.0  ;;  %v2645_v40 = vmax.f32 %v2375_v30, 0.0 }
 0x1f4   :  { %v4571_v41 = vpack.c.bf16 %v2514_v33, %v2514_v33  ;;  %v4699_v42 = vpack.c.bf16 %v2642_v34, %v2642_v34  ;;  %v2515_v9 = vmax.f32 %v1855_v35, 0.0  ;;  %v2643_v43 = vmax.f32 %v2367_v36, 0.0 }
 0x1f5   :  { %3797 = vst.msk [vmem:[%s7128_s3 + $0x1e8] sm:$0xf] %vm3674_vm1, %v4573_v37  ;;  %3925 = vst.msk [vmem:[%s7128_s3 + $0x3e8] sm:$0xf] %vm3674_vm1, %v4701_v38  ;;  %v4574_v44 = vpack.c.bf16 %v2517_v39, %v2517_v39  ;;  %v4702_v45 = vpack.c.bf16 %v2645_v40, %v2645_v40 }
 0x1f6   :  { %3795 = vst.msk [vmem:[%s7128_s3 + $0x1e0] sm:$0xf] %vm3674_vm1, %v4571_v41  ;;  %3923 = vst.msk [vmem:[%s7128_s3 + $0x3e0] sm:$0xf] %vm3674_vm1, %v4699_v42  ;;  %v4572_v46 = vpack.c.bf16 %v2515_v9, %v2515_v9  ;;  %v4700_v49 = vpack.c.bf16 %v2643_v43, %v2643_v43  ;;  %v4964_v50 = vpop.f32.mrb[124].mxu0  ;;  %v5092_v51 = vpop.f32.mrb[124].mxu1 }
 0x1f7   :  { %3798 = vst.msk [vmem:[%s7128_s3 + $0x1ec] sm:$0xf] %vm3674_vm1, %v4574_v44  ;;  %3926 = vst.msk [vmem:[%s7128_s3 + $0x3ec] sm:$0xf] %vm3674_vm1, %v4702_v45  ;;  %v1876_v52 = vadd.f32 %v6835_v48, %v4964_v50  ;;  %v2388_v53 = vadd.f32 %v6835_v48, %v5092_v51  ;;  %v1867_v54 = vpop.f32.mrb[125].mxu0  ;;  %v2379_v55 = vpop.f32.mrb[125].mxu1 }
 0x1f8   :  { %3796 = vst.msk [vmem:[%s7128_s3 + $0x1e4] sm:$0xf] %vm3674_vm1, %v4572_v46  ;;  %3924 = vst.msk [vmem:[%s7128_s3 + $0x3e4] sm:$0xf] %vm3674_vm1, %v4700_v49  ;;  %v1868_v56 = vadd.f32 %v6835_v48, %v1867_v54  ;;  %v2380_v57 = vadd.f32 %v6835_v48, %v2379_v55  ;;  %v4965_v58 = vpop.f32.mrb[126].mxu0  ;;  %v5093_v59 = vpop.f32.mrb[126].mxu1 }
 0x1f9   :  { %v2520_v60 = vmax.f32 %v1876_v52, 0.0  ;;  %v2648_v61 = vmax.f32 %v2388_v53, 0.0  ;;  %v1879_v62 = vadd.f32 %v6835_v48, %v4965_v58  ;;  %v2391_v63 = vadd.f32 %v6835_v48, %v5093_v59  ;;  %v1870_v0 = vpop.f32.mrb[127].mxu0  ;;  %v2382_v1 = vpop.f32.mrb[127].mxu1 }
 0x1fa   :  { %v2518_v2 = vmax.f32 %v1868_v56, 0.0  ;;  %v2646_v3 = vmax.f32 %v2380_v57, 0.0  ;;  %v1871_v4 = vadd.f32 %v6835_v48, %v1870_v0  ;;  %v2383_v47 = vadd.f32 %v6835_v48, %v2382_v1 }
 0x1fb   :  { %v4577_v5 = vpack.c.bf16 %v2520_v60, %v2520_v60  ;;  %v4705_v6 = vpack.c.bf16 %v2648_v61, %v2648_v61  ;;  %v2521_v7 = vmax.f32 %v1879_v62, 0.0  ;;  %v2649_v8 = vmax.f32 %v2391_v63, 0.0 }
 0x1fc   :  { %v4575_v10 = vpack.c.bf16 %v2518_v2, %v2518_v2  ;;  %v4703_v11 = vpack.c.bf16 %v2646_v3, %v2646_v3  ;;  %v2519_v12 = vmax.f32 %v1871_v4, 0.0  ;;  %v2647_v13 = vmax.f32 %v2383_v47, 0.0 }
 0x1fd   :  { %3801 = vst.msk [vmem:[%s7128_s3 + $0x1f8] sm:$0xf] %vm3674_vm1, %v4577_v5  ;;  %3929 = vst.msk [vmem:[%s7128_s3 + $0x3f8] sm:$0xf] %vm3674_vm1, %v4705_v6  ;;  %v4578_v14 = vpack.c.bf16 %v2521_v7, %v2521_v7  ;;  %v4706_v48 = vpack.c.bf16 %v2649_v8, %v2649_v8 }
 0x1fe   :  { %3799 = vst.msk [vmem:[%s7128_s3 + $0x1f0] sm:$0xf] %vm3674_vm1, %v4575_v10  ;;  %3927 = vst.msk [vmem:[%s7128_s3 + $0x3f0] sm:$0xf] %vm3674_vm1, %v4703_v11  ;;  %v4576_v15 = vpack.c.bf16 %v2519_v12, %v2519_v12  ;;  %v4704_v16 = vpack.c.bf16 %v2647_v13, %v2647_v13 }
 0x1ff   :  { %3802 = vst.msk [vmem:[%s7128_s3 + $0x1fc] sm:$0xf] %vm3674_vm1, %v4578_v14  ;;  %3930 = vst.msk [vmem:[%s7128_s3 + $0x3fc] sm:$0xf] %vm3674_vm1, %v4706_v48 }
 0x200   :  { %3800 = vst.msk [vmem:[%s7128_s3 + $0x1f4] sm:$0xf] %vm3674_vm1, %v4576_v15  ;;  %3928 = vst.msk [vmem:[%s7128_s3 + $0x3f4] sm:$0xf] %vm3674_vm1, %v4704_v16 }
 0x201   :  { %3935 = vsyncpa [#allocation3], 1 }
 0x202   :  { %3936 = vsyncpa [#allocation5], 1 }

// kernel: normal_discriminator_forward.6
= control target key start
LH: loop header
LB: loop body
LE: loop exit
PB: predicated region body
PF: predicated region fallthrough
CT: control target
= control target key end

     0   :  { %v4704_v0 = vmov 0   ;;  %s5927_s1 = inlined_call_operand.vmem [shape: bf16[1024,128], index: 1, kind: input, shape index: {}]   ;;  %s5928_s0 = inlined_call_operand.vmem [shape: bf16[512,1024], index: 0, kind: input, shape index: {}]   ;;  %s5929_s2 = inlined_call_operand.vmem [shape: f32[1,128], index: 2, kind: input, shape index: {}]   ;;  %s5930_s3 = inlined_call_operand.vmem [shape: bf16[512,128], index: 3, kind: output, shape index: {}]  }
   0x1   :  { %2070 = vmatprep.subr.bf16.mxu1 %v4704_v0  ;;  %2648 = vmatprep.subr.bf16.mxu0 %v4704_v0  ;;  %v4639_v1 = vld [vmem:[%s5927_s1] sm:$0xff]   ;;  %v4641_v3 = vld [vmem:[%s5927_s1 + $0x8] sm:$0xff]   ;;  %v4643_v5 = vld [vmem:[%s5927_s1 + $0x10] sm:$0xff]  }
   0x2   :  { %v4640_v2 = vld [vmem:[%s5927_s1 + $0x100] sm:$0xff]   ;;  %2071 = vmatpush1.bf16.msra.mxu1 %v4639_v1  ;;  %v4642_v4 = vld [vmem:[%s5927_s1 + $0x108] sm:$0xff]   ;;  %v4644_v6 = vld [vmem:[%s5927_s1 + $0x110] sm:$0xff]  }
   0x3   :  { %2649 = vmatpush1.bf16.msra.mxu0 %v4640_v2  ;;  %2072 = vmatprep.subr.bf16.mxu1 %v4704_v0  ;;  %v4645_v7 = vld [vmem:[%s5927_s1 + $0x18] sm:$0xff]   ;;  %v4647_v9 = vld [vmem:[%s5927_s1 + $0x20] sm:$0xff]   ;;  %v4649_v11 = vld [vmem:[%s5927_s1 + $0x28] sm:$0xff]  }
   0x4   :  { %2650 = vmatprep.subr.bf16.mxu0 %v4704_v0  ;;  %v4646_v8 = vld [vmem:[%s5927_s1 + $0x118] sm:$0xff]   ;;  %v4648_v10 = vld [vmem:[%s5927_s1 + $0x120] sm:$0xff]   ;;  %v4650_v12 = vld [vmem:[%s5927_s1 + $0x128] sm:$0xff]  }
   0x5   :  { %v4651_v13 = vld [vmem:[%s5927_s1 + $0x30] sm:$0xff]   ;;  %v4653_v15 = vld [vmem:[%s5927_s1 + $0x38] sm:$0xff]   ;;  %v4655_v17 = vld [vmem:[%s5927_s1 + $0x40] sm:$0xff]  }
   0x6   :  { %2073 = vmatpush1.bf16.msra.mxu1 %v4641_v3  ;;  %v4652_v14 = vld [vmem:[%s5927_s1 + $0x130] sm:$0xff]   ;;  %v4654_v16 = vld [vmem:[%s5927_s1 + $0x138] sm:$0xff]   ;;  %v4656_v18 = vld [vmem:[%s5927_s1 + $0x140] sm:$0xff]  }
   0x7   :  { %2651 = vmatpush1.bf16.msra.mxu0 %v4642_v4  ;;  %2074 = vmatprep.subr.bf16.mxu1 %v4704_v0  ;;  %v4800_v19 = vld [vmem:[%s5928_s0] sm:$0xff]  ;;  %v4810_v21 = vld [vmem:[%s5928_s0 + $0x10] sm:$0xff]  ;;  %v4657_v24 = vld [vmem:[%s5927_s1 + $0x48] sm:$0xff]  }
   0x8   :  { %2652 = vmatprep.subr.bf16.mxu0 %v4704_v0  ;;  %v4805_v20 = vld [vmem:[%s5928_s0 + $0x20] sm:$0xff]  ;;  %v4817_v23 = vld [vmem:[%s5928_s0 + $0x30] sm:$0xff]  ;;  %v4658_v26 = vld [vmem:[%s5927_s1 + $0x148] sm:$0xff]  }
   0x9   :  { %v3616_v22 = vcombine.high %v4800_v19, %v4805_v20  ;;  %v3620_v25 = vcombine.high %v4810_v21, %v4817_v23  ;;  %v4659_v27 = vld [vmem:[%s5927_s1 + $0x50] sm:$0xff]   ;;  %v4661_v29 = vld [vmem:[%s5927_s1 + $0x58] sm:$0xff]   ;;  %v4663_v31 = vld [vmem:[%s5927_s1 + $0x60] sm:$0xff]   ;;  %v3615_v42 = vcombine.low %v4800_v19, %v4805_v20  ;;  %v3619_v44 = vcombine.low %v4810_v21, %v4817_v23 }
   0xa   :  { %2075 = vmatpush1.bf16.msra.mxu1 %v4643_v5  ;;  %v4660_v28 = vld [vmem:[%s5927_s1 + $0x150] sm:$0xff]   ;;  %v4662_v30 = vld [vmem:[%s5927_s1 + $0x158] sm:$0xff]   ;;  %v4664_v32 = vld [vmem:[%s5927_s1 + $0x160] sm:$0xff]  }
   0xb   :  { %2653 = vmatpush1.bf16.msra.mxu0 %v4644_v6  ;;  %2076 = vmatprep.subr.bf16.mxu1 %v4704_v0  ;;  %v4665_v33 = vld [vmem:[%s5927_s1 + $0x68] sm:$0xff]   ;;  %v4667_v35 = vld [vmem:[%s5927_s1 + $0x70] sm:$0xff]   ;;  %v4669_v37 = vld [vmem:[%s5927_s1 + $0x78] sm:$0xff]  }
   0xc   :  { %2654 = vmatprep.subr.bf16.mxu0 %v4704_v0  ;;  %2102 = vmatprep.mubr.bf16.mxu1 %v3616_v22  ;;  %v4666_v34 = vld [vmem:[%s5927_s1 + $0x168] sm:$0xff]   ;;  %v4668_v36 = vld [vmem:[%s5927_s1 + $0x170] sm:$0xff]   ;;  %v4670_v38 = vld [vmem:[%s5927_s1 + $0x178] sm:$0xff]  }
   0xd   :  { %2680 = vmatprep.mubr.bf16.mxu0 %v3620_v25  ;;  %v23_v39 = vld [vmem:[%s5928_s0 + $0x40] sm:$0xff]  ;;  %v25_v41 = vld [vmem:[%s5928_s0 + $0x50] sm:$0xff]  ;;  %v4673_v51 = vld [vmem:[%s5927_s1 + $0x88] sm:$0xff]  }
   0xe   :  { %2077 = vmatpush1.bf16.msra.mxu1 %v4645_v7  ;;  %v27_v40 = vld [vmem:[%s5928_s0 + $0x60] sm:$0xff]  ;;  %v29_v43 = vld [vmem:[%s5928_s0 + $0x70] sm:$0xff]  ;;  %v4674_v52 = vld [vmem:[%s5927_s1 + $0x188] sm:$0xff]  }
   0xf   :  { %2655 = vmatpush1.bf16.msra.mxu0 %v4646_v8  ;;  %2078 = vmatprep.subr.bf16.mxu1 %v4704_v0  ;;  %v4671_v45 = vld [vmem:[%s5927_s1 + $0x80] sm:$0xff]   ;;  %v3624_v47 = vcombine.high %v23_v39, %v27_v40  ;;  %v3628_v48 = vcombine.high %v25_v41, %v29_v43  ;;  %v33_v53 = vld [vmem:[%s5928_s0 + $0x90] sm:$0xff]  ;;  %v3623_v55 = vcombine.low %v23_v39, %v27_v40  ;;  %v4677_v2 = vld [vmem:[%s5927_s1 + $0x98] sm:$0xff]  }
  0x10   :  { %2656 = vmatprep.subr.bf16.mxu0 %v4704_v0  ;;  %v4672_v46 = vld [vmem:[%s5927_s1 + $0x180] sm:$0xff]   ;;  %v37_v54 = vld [vmem:[%s5928_s0 + $0xb0] sm:$0xff]  ;;  %v3627_v56 = vcombine.low %v25_v41, %v29_v43  ;;  %v4678_v3 = vld [vmem:[%s5927_s1 + $0x198] sm:$0xff]  }
  0x11   :  { %v31_v49 = vld [vmem:[%s5928_s0 + $0x80] sm:$0xff]  ;;  %v3636_v58 = vcombine.high %v33_v53, %v37_v54  ;;  %v4675_v59 = vld [vmem:[%s5927_s1 + $0x90] sm:$0xff]   ;;  %v3635_v6 = vcombine.low %v33_v53, %v37_v54  ;;  %v4690_v39 = vld [vmem:[%s5927_s1 + $0x1c8] sm:$0xff]  }
  0x12   :  { %2079 = vmatpush1.bf16.msra.mxu1 %v4647_v9  ;;  %v35_v50 = vld [vmem:[%s5928_s0 + $0xa0] sm:$0xff]  ;;  %v4676_v60 = vld [vmem:[%s5927_s1 + $0x190] sm:$0xff]   ;;  %v4693_v54 = vld [vmem:[%s5927_s1 + $0xd8] sm:$0xff]  }
  0x13   :  { %2657 = vmatpush1.bf16.msra.mxu0 %v4648_v10  ;;  %2080 = vmatprep.subr.bf16.mxu1 %v4704_v0  ;;  %v3632_v57 = vcombine.high %v31_v49, %v35_v50  ;;  %v39_v61 = vld [vmem:[%s5928_s0 + $0xc0] sm:$0xff]  ;;  %v41_v63 = vld [vmem:[%s5928_s0 + $0xd0] sm:$0xff]  ;;  %v3631_v4 = vcombine.low %v31_v49, %v35_v50 }
  0x14   :  { %2658 = vmatprep.subr.bf16.mxu0 %v4704_v0  ;;  %v43_v62 = vld [vmem:[%s5928_s0 + $0xe0] sm:$0xff]  ;;  %v45_v1 = vld [vmem:[%s5928_s0 + $0xf0] sm:$0xff] }
  0x15   :  { %v4679_v5 = vld [vmem:[%s5927_s1 + $0xa0] sm:$0xff]   ;;  %v3640_v7 = vcombine.high %v39_v61, %v43_v62  ;;  %v3644_v9 = vcombine.high %v41_v63, %v45_v1  ;;  %v4683_v20 = vld [vmem:[%s5927_s1 + $0xb0] sm:$0xff]  }
  0x16   :  { %2081 = vmatpush1.bf16.msra.mxu1 %v4649_v11  ;;  %v4680_v8 = vld [vmem:[%s5927_s1 + $0x1a0] sm:$0xff]   ;;  %v4684_v21 = vld [vmem:[%s5927_s1 + $0x1b0] sm:$0xff]  }
  0x17   :  { %2659 = vmatpush1.bf16.msra.mxu0 %v4650_v12  ;;  %2082 = vmatprep.subr.bf16.mxu1 %v4704_v0  ;;  %v47_v10 = vld [vmem:[%s5928_s0 + $0x100] sm:$0xff]  ;;  %v49_v12 = vld [vmem:[%s5928_s0 + $0x110] sm:$0xff] }
  0x18   :  { %2660 = vmatprep.subr.bf16.mxu0 %v4704_v0  ;;  %v51_v11 = vld [vmem:[%s5928_s0 + $0x120] sm:$0xff]  ;;  %v57_v25 = vld [vmem:[%s5928_s0 + $0x150] sm:$0xff] }
  0x19   :  { %v55_v22 = vld [vmem:[%s5928_s0 + $0x140] sm:$0xff]  ;;  %v77_v49 = vld [vmem:[%s5928_s0 + $0x1f0] sm:$0xff] }
  0x1a   :  { %2083 = vmatpush1.bf16.msra.mxu1 %v4651_v13  ;;  %v53_v13 = vld [vmem:[%s5928_s0 + $0x130] sm:$0xff]  ;;  %v59_v23 = vld [vmem:[%s5928_s0 + $0x160] sm:$0xff] }
  0x1b   :  { %2661 = vmatpush1.bf16.msra.mxu0 %v4652_v14  ;;  %2084 = vmatprep.subr.bf16.mxu1 %v4704_v0  ;;  %v4681_v14 = vld [vmem:[%s5927_s1 + $0xa8] sm:$0xff]   ;;  %v3652_v19 = vcombine.high %v49_v12, %v53_v13  ;;  %v3655_v40 = vcombine.low %v55_v22, %v59_v23 }
  0x1c   :  { %2662 = vmatprep.subr.bf16.mxu0 %v4704_v0 }
  0x1e   :  { %2085 = vmatpush1.bf16.msra.mxu1 %v4653_v15  ;;  %v4682_v15 = vld [vmem:[%s5927_s1 + $0x1a8] sm:$0xff]  }
  0x1f   :  { %2663 = vmatpush1.bf16.msra.mxu0 %v4654_v16  ;;  %2086 = vmatprep.subr.bf16.mxu1 %v4704_v0  ;;  %v3639_v16 = vcombine.low %v39_v61, %v43_v62 }
  0x20   :  { %2664 = vmatprep.subr.bf16.mxu0 %v4704_v0 }
  0x22   :  { %2087 = vmatpush1.bf16.msra.mxu1 %v4655_v17  ;;  %v3643_v17 = vcombine.low %v41_v63, %v45_v1  ;;  %v87_v1 = vld [vmem:[%s5928_s0 + $0x240] sm:$0xff] }
  0x23   :  { %2665 = vmatpush1.bf16.msra.mxu0 %v4656_v18  ;;  %2088 = vmatprep.subr.bf16.mxu1 %v4704_v0  ;;  %v3648_v18 = vcombine.high %v47_v10, %v51_v11 }
  0x24   :  { %2666 = vmatprep.subr.bf16.mxu0 %v4704_v0 }
  0x26   :  { %2089 = vmatpush1.bf16.msra.mxu1 %v4657_v24  ;;  %v4685_v24 = vld [vmem:[%s5927_s1 + $0xb8] sm:$0xff]  }
  0x27   :  { %2667 = vmatpush1.bf16.msra.mxu0 %v4658_v26  ;;  %2090 = vmatprep.subr.bf16.mxu1 %v4704_v0  ;;  %v61_v26 = vld [vmem:[%s5928_s0 + $0x170] sm:$0xff] }
  0x28   :  { %2668 = vmatprep.subr.bf16.mxu0 %v4704_v0  ;;  %v3659_v41 = vcombine.low %v57_v25, %v61_v26 }
  0x2a   :  { %2091 = vmatpush1.bf16.msra.mxu1 %v4659_v27  ;;  %v4686_v27 = vld [vmem:[%s5927_s1 + $0x1b8] sm:$0xff]  }
  0x2b   :  { %2669 = vmatpush1.bf16.msra.mxu0 %v4660_v28  ;;  %2092 = vmatprep.subr.bf16.mxu1 %v4704_v0  ;;  %v3647_v28 = vcombine.low %v47_v10, %v51_v11  ;;  %v4696_v10 = vld [vmem:[%s5927_s1 + $0x1e0] sm:$0xff]  }
  0x2c   :  { %2670 = vmatprep.subr.bf16.mxu0 %v4704_v0  ;;  %v95_v11 = vld [vmem:[%s5928_s0 + $0x280] sm:$0xff] }
  0x2e   :  { %2093 = vmatpush1.bf16.msra.mxu1 %v4661_v29  ;;  %v3651_v29 = vcombine.low %v49_v12, %v53_v13  ;;  %v99_v12 = vld [vmem:[%s5928_s0 + $0x2a0] sm:$0xff]  ;;  %v97_v13 = vld [vmem:[%s5928_s0 + $0x290] sm:$0xff] }
  0x2f   :  { %2671 = vmatpush1.bf16.msra.mxu0 %v4662_v30  ;;  %2094 = vmatprep.subr.bf16.mxu1 %v4704_v0  ;;  %v3656_v30 = vcombine.high %v55_v22, %v59_v23  ;;  %v109_v22 = vld [vmem:[%s5928_s0 + $0x2f0] sm:$0xff]  ;;  %v3695_v23 = vcombine.low %v95_v11, %v99_v12 }
  0x30   :  { %2672 = vmatprep.subr.bf16.mxu0 %v4704_v0 }
  0x32   :  { %2095 = vmatpush1.bf16.msra.mxu1 %v4663_v31  ;;  %v3660_v31 = vcombine.high %v57_v25, %v61_v26 }
  0x33   :  { %2673 = vmatpush1.bf16.msra.mxu0 %v4664_v32  ;;  %2096 = vmatprep.subr.bf16.mxu1 %v4704_v0  ;;  %v4687_v32 = vld [vmem:[%s5927_s1 + $0xc0] sm:$0xff]  }
  0x34   :  { %2674 = vmatprep.subr.bf16.mxu0 %v4704_v0 }
  0x36   :  { %2097 = vmatpush1.bf16.msra.mxu1 %v4665_v33  ;;  %v4688_v33 = vld [vmem:[%s5927_s1 + $0x1c0] sm:$0xff]  }
  0x37   :  { %2675 = vmatpush1.bf16.msra.mxu0 %v4666_v34  ;;  %2098 = vmatprep.subr.bf16.mxu1 %v4704_v0  ;;  %v63_v34 = vld [vmem:[%s5928_s0 + $0x180] sm:$0xff] }
  0x38   :  { %2676 = vmatprep.subr.bf16.mxu0 %v4704_v0 }
  0x3a   :  { %2099 = vmatpush1.bf16.msra.mxu1 %v4667_v35  ;;  %v67_v35 = vld [vmem:[%s5928_s0 + $0x1a0] sm:$0xff] }
  0x3b   :  { %2677 = vmatpush1.bf16.msra.mxu0 %v4668_v36  ;;  %2100 = vmatprep.subr.bf16.mxu1 %v4704_v0  ;;  %v4689_v36 = vld [vmem:[%s5927_s1 + $0xc8] sm:$0xff]   ;;  %v3663_v50 = vcombine.low %v63_v34, %v67_v35 }
  0x3c   :  { %2678 = vmatprep.subr.bf16.mxu0 %v4704_v0 }
  0x3e   :  { %2101 = vmatpush1.bf16.msra.mxu1 %v4669_v37  ;;  %v65_v37 = vld [vmem:[%s5928_s0 + $0x190] sm:$0xff] }
  0x3f   :  { %2679 = vmatpush1.bf16.msra.mxu0 %v4670_v38  ;;  %2359 = vmatprep.subr.bf16.mxu1 %v4704_v0  ;;  %v69_v38 = vld [vmem:[%s5928_s0 + $0x1b0] sm:$0xff] }
  0x40   :  { %2937 = vmatprep.subr.bf16.mxu0 %v4704_v0  ;;  %v3668_v43 = vcombine.high %v65_v37, %v69_v38 }
  0x41   :  { %2103 = vmatmul.mubr.bf16.vlgmr.msra.gmra.mrb[0].mxu1 %v3615_v42  ;;  %v3664_v42 = vcombine.high %v63_v34, %v67_v35 }
  0x42   :  { %2681 = vmatmul.mubr.bf16.vlgmr.msra.gmra.mrb[0].mxu0 %v3619_v44  ;;  %2360 = vmatpush1.bf16.msra.mxu1 %v4671_v45  ;;  %v4691_v44 = vld [vmem:[%s5927_s1 + $0xd0] sm:$0xff]  }
  0x43   :  { %2938 = vmatpush1.bf16.msra.mxu0 %v4672_v46  ;;  %2110 = vmatprep.mubr.bf16.mxu1 %v3624_v47  ;;  %v4692_v45 = vld [vmem:[%s5927_s1 + $0x1d0] sm:$0xff]   ;;  %v71_v46 = vld [vmem:[%s5928_s0 + $0x1c0] sm:$0xff] }
  0x44   :  { %2688 = vmatprep.mubr.bf16.mxu0 %v3628_v48  ;;  %2361 = vmatprep.subr.bf16.mxu1 %v4704_v0  ;;  %v75_v47 = vld [vmem:[%s5928_s0 + $0x1e0] sm:$0xff]  ;;  %v73_v48 = vld [vmem:[%s5928_s0 + $0x1d0] sm:$0xff] }
  0x45   :  { %2939 = vmatprep.subr.bf16.mxu0 %v4704_v0  ;;  %v3676_v53 = vcombine.high %v73_v48, %v77_v49  ;;  %v3675_v61 = vcombine.low %v73_v48, %v77_v49  ;;  %v131_v48 = vld [vmem:[%s5928_s0 + $0x3a0] sm:$0xff]  ;;  %v129_v49 = vld [vmem:[%s5928_s0 + $0x390] sm:$0xff] }
  0x46   :  { %2362 = vmatpush1.bf16.msra.mxu1 %v4673_v51  ;;  %v3667_v51 = vcombine.low %v65_v37, %v69_v38  ;;  %v119_v37 = vld [vmem:[%s5928_s0 + $0x340] sm:$0xff] }
  0x47   :  { %2940 = vmatpush1.bf16.msra.mxu0 %v4674_v52  ;;  %2363 = vmatprep.subr.bf16.mxu1 %v4704_v0  ;;  %v3672_v52 = vcombine.high %v71_v46, %v75_v47  ;;  %v123_v38 = vld [vmem:[%s5928_s0 + $0x360] sm:$0xff] }
  0x48   :  { %2941 = vmatprep.subr.bf16.mxu0 %v4704_v0 }
  0x49   :  { %2111 = vmatmul.mubr.bf16.gmra.mrb[4].mxu1 %v3623_v55  ;;  %v4694_v55 = vld [vmem:[%s5927_s1 + $0x1d8] sm:$0xff]  }
  0x4a   :  { %2689 = vmatmul.mubr.bf16.gmra.mrb[4].mxu0 %v3627_v56  ;;  %2118 = vmatprep.mubr.bf16.mxu1 %v3632_v57  ;;  %v79_v56 = vld [vmem:[%s5928_s0 + $0x200] sm:$0xff] }
  0x4b   :  { %2696 = vmatprep.mubr.bf16.mxu0 %v3636_v58  ;;  %2364 = vmatpush1.bf16.msra.mxu1 %v4675_v59  ;;  %v83_v57 = vld [vmem:[%s5928_s0 + $0x220] sm:$0xff]  ;;  %v81_v58 = vld [vmem:[%s5928_s0 + $0x210] sm:$0xff] }
  0x4c   :  { %2942 = vmatpush1.bf16.msra.mxu0 %v4676_v60  ;;  %2365 = vmatprep.subr.bf16.mxu1 %v4704_v0  ;;  %v85_v59 = vld [vmem:[%s5928_s0 + $0x230] sm:$0xff]  ;;  %v3671_v60 = vcombine.low %v71_v46, %v75_v47  ;;  %v3680_v62 = vcombine.high %v79_v56, %v83_v57  ;;  %v127_v47 = vld [vmem:[%s5928_s0 + $0x380] sm:$0xff] }
  0x4d   :  { %2943 = vmatprep.subr.bf16.mxu0 %v4704_v0  ;;  %v3684_v63 = vcombine.high %v81_v58, %v85_v59  ;;  %v4700_v46 = vld [vmem:[%s5927_s1 + $0x1f0] sm:$0xff]  }
  0x4f   :  { %2366 = vmatpush1.bf16.msra.mxu1 %v4677_v2  ;;  %v91_v2 = vld [vmem:[%s5928_s0 + $0x260] sm:$0xff] }
  0x50   :  { %2944 = vmatpush1.bf16.msra.mxu0 %v4678_v3  ;;  %2367 = vmatprep.subr.bf16.mxu1 %v4704_v0  ;;  %v89_v3 = vld [vmem:[%s5928_s0 + $0x250] sm:$0xff] }
  0x51   :  { %2119 = vmatmul.mubr.bf16.gmra.mrb[8].mxu1 %v3631_v4  ;;  %2945 = vmatprep.subr.bf16.mxu0 %v4704_v0  ;;  %v93_v4 = vld [vmem:[%s5928_s0 + $0x270] sm:$0xff] }
  0x52   :  { %2697 = vmatmul.mubr.bf16.gmra.mrb[8].mxu0 %v3635_v6  ;;  %2126 = vmatprep.mubr.bf16.mxu1 %v3640_v7  ;;  %v3683_v6 = vcombine.low %v81_v58, %v85_v59  ;;  %v3688_v7 = vcombine.high %v87_v1, %v91_v2  ;;  %v3727_v58 = vcombine.low %v127_v47, %v131_v48 }
  0x53   :  { %2704 = vmatprep.mubr.bf16.mxu0 %v3644_v9  ;;  %2368 = vmatpush1.bf16.msra.mxu1 %v4679_v5  ;;  %v3679_v5 = vcombine.low %v79_v56, %v83_v57  ;;  %v4695_v9 = vld [vmem:[%s5927_s1 + $0xe0] sm:$0xff]   ;;  %v137_v57 = vld [vmem:[%s5928_s0 + $0x3d0] sm:$0xff] }
  0x54   :  { %2946 = vmatpush1.bf16.msra.mxu0 %v4680_v8  ;;  %2369 = vmatprep.subr.bf16.mxu1 %v4704_v0  ;;  %v3692_v8 = vcombine.high %v89_v3, %v93_v4  ;;  %v139_v56 = vld [vmem:[%s5928_s0 + $0x3e0] sm:$0xff] }
  0x55   :  { %2947 = vmatprep.subr.bf16.mxu0 %v4704_v0 }
  0x57   :  { %2370 = vmatpush1.bf16.msra.mxu1 %v4681_v14  ;;  %v101_v14 = vld [vmem:[%s5928_s0 + $0x2b0] sm:$0xff] }
  0x58   :  { %2948 = vmatpush1.bf16.msra.mxu0 %v4682_v15  ;;  %2371 = vmatprep.subr.bf16.mxu1 %v4704_v0  ;;  %v3687_v15 = vcombine.low %v87_v1, %v91_v2  ;;  %v143_v1 = vld [vmem:[%s5928_s0 + $0x400] sm:$0xff] }
  0x59   :  { %2127 = vmatmul.mubr.bf16.gmra.mrb[12].mxu1 %v3639_v16  ;;  %2949 = vmatprep.subr.bf16.mxu0 %v4704_v0  ;;  %v3691_v16 = vcombine.low %v89_v3, %v93_v4  ;;  %v147_v2 = vld [vmem:[%s5928_s0 + $0x420] sm:$0xff]  ;;  %v145_v3 = vld [vmem:[%s5928_s0 + $0x410] sm:$0xff] }
  0x5a   :  { %2705 = vmatmul.mubr.bf16.gmra.mrb[12].mxu0 %v3643_v17  ;;  %2134 = vmatprep.mubr.bf16.mxu1 %v3648_v18  ;;  %v3696_v17 = vcombine.high %v95_v11, %v99_v12  ;;  %v3700_v18 = vcombine.high %v97_v13, %v101_v14  ;;  %v149_v4 = vld [vmem:[%s5928_s0 + $0x430] sm:$0xff] }
  0x5b   :  { %2712 = vmatprep.mubr.bf16.mxu0 %v3652_v19  ;;  %2372 = vmatpush1.bf16.msra.mxu1 %v4683_v20  ;;  %v103_v19 = vld [vmem:[%s5928_s0 + $0x2c0] sm:$0xff]  ;;  %v153_v11 = vld [vmem:[%s5928_s0 + $0x450] sm:$0xff] }
  0x5c   :  { %2950 = vmatpush1.bf16.msra.mxu0 %v4684_v21  ;;  %2373 = vmatprep.subr.bf16.mxu1 %v4704_v0  ;;  %v107_v20 = vld [vmem:[%s5928_s0 + $0x2e0] sm:$0xff]  ;;  %v105_v21 = vld [vmem:[%s5928_s0 + $0x2d0] sm:$0xff] }
  0x5d   :  { %2951 = vmatprep.subr.bf16.mxu0 %v4704_v0  ;;  %v3704_v25 = vcombine.high %v103_v19, %v107_v20  ;;  %v3708_v26 = vcombine.high %v105_v21, %v109_v22  ;;  %v3707_v34 = vcombine.low %v105_v21, %v109_v22  ;;  %v157_v12 = vld [vmem:[%s5928_s0 + $0x470] sm:$0xff] }
  0x5e   :  { %v3755_v22 = vcombine.low %v153_v11, %v157_v12 }
  0x5f   :  { %2374 = vmatpush1.bf16.msra.mxu1 %v4685_v24  ;;  %v3699_v24 = vcombine.low %v97_v13, %v101_v14  ;;  %v3743_v13 = vcombine.low %v143_v1, %v147_v2  ;;  %v3747_v14 = vcombine.low %v145_v3, %v149_v4 }
  0x60   :  { %2952 = vmatpush1.bf16.msra.mxu0 %v4686_v27  ;;  %2375 = vmatprep.subr.bf16.mxu1 %v4704_v0  ;;  %v4697_v27 = vld [vmem:[%s5927_s1 + $0xe8] sm:$0xff]  }
  0x61   :  { %2135 = vmatmul.mubr.bf16.gmra.mrb[16].mxu1 %v3647_v28  ;;  %2953 = vmatprep.subr.bf16.mxu0 %v4704_v0  ;;  %v4698_v28 = vld [vmem:[%s5927_s1 + $0x1e8] sm:$0xff]  }
  0x62   :  { %2713 = vmatmul.mubr.bf16.gmra.mrb[16].mxu0 %v3651_v29  ;;  %2142 = vmatprep.mubr.bf16.mxu1 %v3656_v30  ;;  %v111_v29 = vld [vmem:[%s5928_s0 + $0x300] sm:$0xff] }
  0x63   :  { %2720 = vmatprep.mubr.bf16.mxu0 %v3660_v31  ;;  %2376 = vmatpush1.bf16.msra.mxu1 %v4687_v32  ;;  %v115_v30 = vld [vmem:[%s5928_s0 + $0x320] sm:$0xff]  ;;  %v113_v31 = vld [vmem:[%s5928_s0 + $0x310] sm:$0xff] }
  0x64   :  { %2954 = vmatpush1.bf16.msra.mxu0 %v4688_v33  ;;  %2377 = vmatprep.subr.bf16.mxu1 %v4704_v0  ;;  %v117_v32 = vld [vmem:[%s5928_s0 + $0x330] sm:$0xff]  ;;  %v3703_v33 = vcombine.low %v103_v19, %v107_v20  ;;  %v3712_v35 = vcombine.high %v111_v29, %v115_v30 }
  0x65   :  { %2955 = vmatprep.subr.bf16.mxu0 %v4704_v0  ;;  %v161_v19 = vld [vmem:[%s5928_s0 + $0x490] sm:$0xff] }
  0x66   :  { %v165_v20 = vld [vmem:[%s5928_s0 + $0x4b0] sm:$0xff] }
  0x67   :  { %2378 = vmatpush1.bf16.msra.mxu1 %v4689_v36  ;;  %v3716_v36 = vcombine.high %v113_v31, %v117_v32 }
  0x68   :  { %2956 = vmatpush1.bf16.msra.mxu0 %v4690_v39  ;;  %2379 = vmatprep.subr.bf16.mxu1 %v4704_v0  ;;  %v121_v39 = vld [vmem:[%s5928_s0 + $0x350] sm:$0xff] }
  0x69   :  { %2143 = vmatmul.mubr.bf16.gmra.mrb[20].mxu1 %v3655_v40  ;;  %2957 = vmatprep.subr.bf16.mxu0 %v4704_v0  ;;  %v125_v40 = vld [vmem:[%s5928_s0 + $0x370] sm:$0xff] }
  0x6a   :  { %2721 = vmatmul.mubr.bf16.gmra.mrb[20].mxu0 %v3659_v41  ;;  %2150 = vmatprep.mubr.bf16.mxu1 %v3664_v42  ;;  %v3711_v41 = vcombine.low %v111_v29, %v115_v30  ;;  %v3715_v42 = vcombine.low %v113_v31, %v117_v32  ;;  %v3763_v30 = vcombine.low %v161_v19, %v165_v20 }
  0x6b   :  { %2728 = vmatprep.mubr.bf16.mxu0 %v3668_v43  ;;  %2380 = vmatpush1.bf16.msra.mxu1 %v4691_v44  ;;  %v3720_v43 = vcombine.high %v119_v37, %v123_v38  ;;  %v3724_v44 = vcombine.high %v121_v39, %v125_v40 }
  0x6c   :  { %2958 = vmatpush1.bf16.msra.mxu0 %v4692_v45  ;;  %2381 = vmatprep.subr.bf16.mxu1 %v4704_v0  ;;  %v4699_v45 = vld [vmem:[%s5927_s1 + $0xf0] sm:$0xff]  }
  0x6d   :  { %2959 = vmatprep.subr.bf16.mxu0 %v4704_v0 }
  0x6f   :  { %2382 = vmatpush1.bf16.msra.mxu1 %v4693_v54 }
  0x70   :  { %2960 = vmatpush1.bf16.msra.mxu0 %v4694_v55  ;;  %2383 = vmatprep.subr.bf16.mxu1 %v4704_v0  ;;  %v135_v55 = vld [vmem:[%s5928_s0 + $0x3c0] sm:$0xff] }
  0x71   :  { %2151 = vmatmul.mubr.bf16.gmra.mrb[24].mxu1 %v3663_v50  ;;  %2961 = vmatprep.subr.bf16.mxu0 %v4704_v0  ;;  %v133_v50 = vld [vmem:[%s5928_s0 + $0x3b0] sm:$0xff] }
  0x72   :  { %2729 = vmatmul.mubr.bf16.gmra.mrb[24].mxu0 %v3667_v51  ;;  %2158 = vmatprep.mubr.bf16.mxu1 %v3672_v52  ;;  %v3719_v51 = vcombine.low %v119_v37, %v123_v38  ;;  %v3723_v52 = vcombine.low %v121_v39, %v125_v40  ;;  %v3732_v54 = vcombine.high %v129_v49, %v133_v50 }
  0x73   :  { %2736 = vmatprep.mubr.bf16.mxu0 %v3676_v53  ;;  %2384 = vmatpush1.bf16.msra.mxu1 %v4695_v9  ;;  %v3728_v53 = vcombine.high %v127_v47, %v131_v48  ;;  %v3731_v59 = vcombine.low %v129_v49, %v133_v50  ;;  %v151_v9 = vld [vmem:[%s5928_s0 + $0x440] sm:$0xff] }
  0x74   :  { %2962 = vmatpush1.bf16.msra.mxu0 %v4696_v10  ;;  %2385 = vmatprep.subr.bf16.mxu1 %v4704_v0  ;;  %v155_v10 = vld [vmem:[%s5928_s0 + $0x460] sm:$0xff] }
  0x75   :  { %2963 = vmatprep.subr.bf16.mxu0 %v4704_v0  ;;  %v3751_v21 = vcombine.low %v151_v9, %v155_v10  ;;  %v191_v49 = vld [vmem:[%s5928_s0 + $0x580] sm:$0xff] }
  0x76   :  { %v195_v50 = vld [vmem:[%s5928_s0 + $0x5a0] sm:$0xff] }
  0x77   :  { %2386 = vmatpush1.bf16.msra.mxu1 %v4697_v27  ;;  %v169_v27 = vld [vmem:[%s5928_s0 + $0x4d0] sm:$0xff] }
  0x78   :  { %2964 = vmatpush1.bf16.msra.mxu0 %v4698_v28  ;;  %2387 = vmatprep.subr.bf16.mxu1 %v4704_v0  ;;  %v173_v28 = vld [vmem:[%s5928_s0 + $0x4f0] sm:$0xff] }
  0x79   :  { %2159 = vmatmul.mubr.bf16.gmra.mrb[28].mxu1 %v3671_v60  ;;  %2965 = vmatprep.subr.bf16.mxu0 %v4704_v0  ;;  %v3736_v60 = vcombine.high %v135_v55, %v139_v56  ;;  %v3772_v32 = vcombine.high %v169_v27, %v173_v28  ;;  %v3771_v38 = vcombine.low %v169_v27, %v173_v28  ;;  %v233_v27 = vld [vmem:[%s5928_s0 + $0x6d0] sm:$0xff] }
  0x7a   :  { %2737 = vmatmul.mubr.bf16.gmra.mrb[28].mxu0 %v3675_v61  ;;  %2166 = vmatprep.mubr.bf16.mxu1 %v3680_v62  ;;  %v4701_v62 = vld [vmem:[%s5927_s1 + $0xf8] sm:$0xff]   ;;  %v237_v28 = vld [vmem:[%s5928_s0 + $0x6f0] sm:$0xff] }
  0x7b   :  { %2744 = vmatprep.mubr.bf16.mxu0 %v3684_v63  ;;  %2388 = vmatpush1.bf16.msra.mxu1 %v4699_v45  ;;  %v4702_v63 = vld [vmem:[%s5927_s1 + $0x1f8] sm:$0xff]  }
  0x7c   :  { %2966 = vmatpush1.bf16.msra.mxu0 %v4700_v46  ;;  %2389 = vmatprep.subr.bf16.mxu1 %v4704_v0 }
  0x7d   :  { %2967 = vmatprep.subr.bf16.mxu0 %v4704_v0  ;;  %v141_v0 = vld [vmem:[%s5928_s0 + $0x3f0] sm:$0xff] }
  0x7e   :  { %v3740_v61 = vcombine.high %v137_v57, %v141_v0 }
  0x7f   :  { %2390 = vmatpush1.bf16.msra.mxu1 %v4701_v62 }
  0x80   :  { %2968 = vmatpush1.bf16.msra.mxu0 %v4702_v63 }
  0x81   :  { %2167 = vmatmul.mubr.bf16.gmra.mrb[32].mxu1 %v3679_v5  ;;  %v3735_v5 = vcombine.low %v135_v55, %v139_v56  ;;  %v3792_v55 = vcombine.high %v191_v49, %v195_v50 }
  0x82   :  { %2745 = vmatmul.mubr.bf16.gmra.mrb[32].mxu0 %v3683_v6  ;;  %2174 = vmatprep.mubr.bf16.mxu1 %v3688_v7  ;;  %v3739_v6 = vcombine.low %v137_v57, %v141_v0  ;;  %v3744_v7 = vcombine.high %v143_v1, %v147_v2  ;;  %v199_v57 = vld [vmem:[%s5928_s0 + $0x5c0] sm:$0xff] }
  0x83   :  { %2752 = vmatprep.mubr.bf16.mxu0 %v3692_v8  ;;  %v3748_v8 = vcombine.high %v145_v3, %v149_v4  ;;  %v203_v0 = vld [vmem:[%s5928_s0 + $0x5e0] sm:$0xff]  ;;  %v209_v3 = vld [vmem:[%s5928_s0 + $0x610] sm:$0xff] }
  0x84   :  { %v3800_v62 = vcombine.high %v199_v57, %v203_v0  ;;  %v207_v1 = vld [vmem:[%s5928_s0 + $0x600] sm:$0xff]  ;;  %v213_v4 = vld [vmem:[%s5928_s0 + $0x630] sm:$0xff] }
  0x85   :  { %v211_v2 = vld [vmem:[%s5928_s0 + $0x620] sm:$0xff] }
  0x89   :  { %2175 = vmatmul.mubr.bf16.gmra.mrb[36].mxu1 %v3687_v15  ;;  %v3752_v15 = vcombine.high %v151_v9, %v155_v10  ;;  %v215_v9 = vld [vmem:[%s5928_s0 + $0x640] sm:$0xff] }
  0x8a   :  { %2753 = vmatmul.mubr.bf16.gmra.mrb[36].mxu0 %v3691_v16  ;;  %2182 = vmatprep.mubr.bf16.mxu1 %v3696_v17  ;;  %v3756_v16 = vcombine.high %v153_v11, %v157_v12  ;;  %v159_v17 = vld [vmem:[%s5928_s0 + $0x480] sm:$0xff]  ;;  %v217_v11 = vld [vmem:[%s5928_s0 + $0x650] sm:$0xff] }
  0x8b   :  { %2760 = vmatprep.mubr.bf16.mxu0 %v3700_v18  ;;  %v163_v18 = vld [vmem:[%s5928_s0 + $0x4a0] sm:$0xff]  ;;  %v221_v12 = vld [vmem:[%s5928_s0 + $0x670] sm:$0xff] }
  0x8c   :  { %v3759_v29 = vcombine.low %v159_v17, %v163_v18  ;;  %v219_v10 = vld [vmem:[%s5928_s0 + $0x660] sm:$0xff] }
  0x91   :  { %2183 = vmatmul.mubr.bf16.gmra.mrb[40].mxu1 %v3695_v23  ;;  %v3760_v23 = vcombine.high %v159_v17, %v163_v18  ;;  %v223_v17 = vld [vmem:[%s5928_s0 + $0x680] sm:$0xff] }
  0x92   :  { %2761 = vmatmul.mubr.bf16.gmra.mrb[40].mxu0 %v3699_v24  ;;  %2190 = vmatprep.mubr.bf16.mxu1 %v3704_v25  ;;  %v3764_v24 = vcombine.high %v161_v19, %v165_v20  ;;  %v167_v25 = vld [vmem:[%s5928_s0 + $0x4c0] sm:$0xff]  ;;  %v225_v19 = vld [vmem:[%s5928_s0 + $0x690] sm:$0xff] }
  0x93   :  { %2768 = vmatprep.mubr.bf16.mxu0 %v3708_v26  ;;  %v171_v26 = vld [vmem:[%s5928_s0 + $0x4e0] sm:$0xff]  ;;  %v229_v20 = vld [vmem:[%s5928_s0 + $0x6b0] sm:$0xff] }
  0x94   :  { %v3768_v31 = vcombine.high %v167_v25, %v171_v26  ;;  %v3767_v37 = vcombine.low %v167_v25, %v171_v26  ;;  %v227_v18 = vld [vmem:[%s5928_s0 + $0x6a0] sm:$0xff] }
  0x95   :  { %v231_v25 = vld [vmem:[%s5928_s0 + $0x6c0] sm:$0xff] }
  0x96   :  { %v235_v26 = vld [vmem:[%s5928_s0 + $0x6e0] sm:$0xff] }
  0x99   :  { %2191 = vmatmul.mubr.bf16.gmra.mrb[44].mxu1 %v3703_v33  ;;  %v175_v33 = vld [vmem:[%s5928_s0 + $0x500] sm:$0xff] }
  0x9a   :  { %2769 = vmatmul.mubr.bf16.gmra.mrb[44].mxu0 %v3707_v34  ;;  %2198 = vmatprep.mubr.bf16.mxu1 %v3712_v35  ;;  %v179_v34 = vld [vmem:[%s5928_s0 + $0x520] sm:$0xff]  ;;  %v177_v35 = vld [vmem:[%s5928_s0 + $0x510] sm:$0xff] }
  0x9b   :  { %2776 = vmatprep.mubr.bf16.mxu0 %v3716_v36  ;;  %v181_v36 = vld [vmem:[%s5928_s0 + $0x530] sm:$0xff]  ;;  %v3776_v39 = vcombine.high %v175_v33, %v179_v34  ;;  %v3775_v45 = vcombine.low %v175_v33, %v179_v34  ;;  %v239_v33 = vld [vmem:[%s5928_s0 + $0x700] sm:$0xff] }
  0x9c   :  { %v3780_v40 = vcombine.high %v177_v35, %v181_v36  ;;  %v3779_v46 = vcombine.low %v177_v35, %v181_v36  ;;  %v243_v34 = vld [vmem:[%s5928_s0 + $0x720] sm:$0xff]  ;;  %v241_v35 = vld [vmem:[%s5928_s0 + $0x710] sm:$0xff] }
  0x9d   :  { %v245_v36 = vld [vmem:[%s5928_s0 + $0x730] sm:$0xff] }
  0xa1   :  { %2199 = vmatmul.mubr.bf16.gmra.mrb[48].mxu1 %v3711_v41  ;;  %v183_v41 = vld [vmem:[%s5928_s0 + $0x540] sm:$0xff] }
  0xa2   :  { %2777 = vmatmul.mubr.bf16.gmra.mrb[48].mxu0 %v3715_v42  ;;  %2206 = vmatprep.mubr.bf16.mxu1 %v3720_v43  ;;  %v187_v42 = vld [vmem:[%s5928_s0 + $0x560] sm:$0xff]  ;;  %v185_v43 = vld [vmem:[%s5928_s0 + $0x550] sm:$0xff] }
  0xa3   :  { %2784 = vmatprep.mubr.bf16.mxu0 %v3724_v44  ;;  %v189_v44 = vld [vmem:[%s5928_s0 + $0x570] sm:$0xff]  ;;  %v3784_v47 = vcombine.high %v183_v41, %v187_v42 }
  0xa4   :  { %v3788_v48 = vcombine.high %v185_v43, %v189_v44 }
  0xa9   :  { %2207 = vmatmul.mubr.bf16.gmra.mrb[52].mxu1 %v3719_v51  ;;  %v193_v51 = vld [vmem:[%s5928_s0 + $0x590] sm:$0xff] }
  0xaa   :  { %2785 = vmatmul.mubr.bf16.gmra.mrb[52].mxu0 %v3723_v52  ;;  %2214 = vmatprep.mubr.bf16.mxu1 %v3728_v53  ;;  %v197_v52 = vld [vmem:[%s5928_s0 + $0x5b0] sm:$0xff]  ;;  %v3783_v53 = vcombine.low %v183_v41, %v187_v42  ;;  %v247_v41 = vld [vmem:[%s5928_s0 + $0x740] sm:$0xff] }
  0xab   :  { %2792 = vmatprep.mubr.bf16.mxu0 %v3732_v54  ;;  %v3787_v54 = vcombine.low %v185_v43, %v189_v44  ;;  %v3796_v56 = vcombine.high %v193_v51, %v197_v52  ;;  %v251_v42 = vld [vmem:[%s5928_s0 + $0x760] sm:$0xff]  ;;  %v249_v43 = vld [vmem:[%s5928_s0 + $0x750] sm:$0xff] }
  0xac   :  { %v253_v44 = vld [vmem:[%s5928_s0 + $0x770] sm:$0xff] }
  0xb1   :  { %2215 = vmatmul.mubr.bf16.gmra.mrb[56].mxu1 %v3727_v58  ;;  %v201_v58 = vld [vmem:[%s5928_s0 + $0x5d0] sm:$0xff] }
  0xb2   :  { %2793 = vmatmul.mubr.bf16.gmra.mrb[56].mxu0 %v3731_v59  ;;  %2222 = vmatprep.mubr.bf16.mxu1 %v3736_v60  ;;  %v205_v59 = vld [vmem:[%s5928_s0 + $0x5f0] sm:$0xff]  ;;  %v3791_v60 = vcombine.low %v191_v49, %v195_v50  ;;  %v255_v49 = vld [vmem:[%s5928_s0 + $0x780] sm:$0xff] }
  0xb3   :  { %2800 = vmatprep.mubr.bf16.mxu0 %v3740_v61  ;;  %v3795_v61 = vcombine.low %v193_v51, %v197_v52  ;;  %v3804_v63 = vcombine.high %v201_v58, %v205_v59  ;;  %v259_v50 = vld [vmem:[%s5928_s0 + $0x7a0] sm:$0xff]  ;;  %v257_v51 = vld [vmem:[%s5928_s0 + $0x790] sm:$0xff] }
  0xb4   :  { %v261_v52 = vld [vmem:[%s5928_s0 + $0x7b0] sm:$0xff] }
  0xb9   :  { %2223 = vmatmul.mubr.bf16.gmra.mrb[60].mxu1 %v3735_v5  ;;  %v3799_v5 = vcombine.low %v199_v57, %v203_v0  ;;  %v263_v57 = vld [vmem:[%s5928_s0 + $0x7c0] sm:$0xff] }
  0xba   :  { %2801 = vmatmul.mubr.bf16.gmra.mrb[60].mxu0 %v3739_v6  ;;  %2230 = vmatprep.mubr.bf16.mxu1 %v3744_v7  ;;  %v3803_v6 = vcombine.low %v201_v58, %v205_v59  ;;  %v3808_v7 = vcombine.high %v207_v1, %v211_v2  ;;  %v267_v0 = vld [vmem:[%s5928_s0 + $0x7e0] sm:$0xff]  ;;  %v265_v58 = vld [vmem:[%s5928_s0 + $0x7d0] sm:$0xff] }
  0xbb   :  { %2808 = vmatprep.mubr.bf16.mxu0 %v3748_v8  ;;  %v3812_v8 = vcombine.high %v209_v3, %v213_v4  ;;  %v269_v59 = vld [vmem:[%s5928_s0 + $0x7f0] sm:$0xff] }
  0xc1   :  { %2231 = vmatmul.mubr.bf16.gmra.mrb[64].mxu1 %v3743_v13  ;;  %v3807_v13 = vcombine.low %v207_v1, %v211_v2  ;;  %v16_v1 = vld [vmem:[%s5928_s0 + $0x8] sm:$0xff] }
  0xc2   :  { %2809 = vmatmul.mubr.bf16.gmra.mrb[64].mxu0 %v3747_v14  ;;  %2238 = vmatprep.mubr.bf16.mxu1 %v3752_v15  ;;  %v3811_v14 = vcombine.low %v209_v3, %v213_v4  ;;  %v3816_v15 = vcombine.high %v215_v9, %v219_v10  ;;  %v20_v2 = vld [vmem:[%s5928_s0 + $0x28] sm:$0xff]  ;;  %v18_v3 = vld [vmem:[%s5928_s0 + $0x18] sm:$0xff] }
  0xc3   :  { %2816 = vmatprep.mubr.bf16.mxu0 %v3756_v16  ;;  %v3820_v16 = vcombine.high %v217_v11, %v221_v12  ;;  %v22_v4 = vld [vmem:[%s5928_s0 + $0x38] sm:$0xff] }
  0xc9   :  { %2239 = vmatmul.mubr.bf16.gmra.mrb[68].mxu1 %v3751_v21  ;;  %v3815_v21 = vcombine.low %v215_v9, %v219_v10  ;;  %v24_v9 = vld [vmem:[%s5928_s0 + $0x48] sm:$0xff] }
  0xca   :  { %2817 = vmatmul.mubr.bf16.gmra.mrb[68].mxu0 %v3755_v22  ;;  %2246 = vmatprep.mubr.bf16.mxu1 %v3760_v23  ;;  %v3819_v22 = vcombine.low %v217_v11, %v221_v12  ;;  %v3824_v23 = vcombine.high %v223_v17, %v227_v18  ;;  %v28_v10 = vld [vmem:[%s5928_s0 + $0x68] sm:$0xff]  ;;  %v26_v11 = vld [vmem:[%s5928_s0 + $0x58] sm:$0xff] }
  0xcb   :  { %2824 = vmatprep.mubr.bf16.mxu0 %v3764_v24  ;;  %v3828_v24 = vcombine.high %v225_v19, %v229_v20  ;;  %v30_v12 = vld [vmem:[%s5928_s0 + $0x78] sm:$0xff] }
  0xd1   :  { %2247 = vmatmul.mubr.bf16.gmra.mrb[72].mxu1 %v3759_v29  ;;  %v3823_v29 = vcombine.low %v223_v17, %v227_v18  ;;  %v32_v17 = vld [vmem:[%s5928_s0 + $0x88] sm:$0xff] }
  0xd2   :  { %2825 = vmatmul.mubr.bf16.gmra.mrb[72].mxu0 %v3763_v30  ;;  %2254 = vmatprep.mubr.bf16.mxu1 %v3768_v31  ;;  %v3827_v30 = vcombine.low %v225_v19, %v229_v20  ;;  %v3832_v31 = vcombine.high %v231_v25, %v235_v26  ;;  %v36_v18 = vld [vmem:[%s5928_s0 + $0xa8] sm:$0xff]  ;;  %v34_v19 = vld [vmem:[%s5928_s0 + $0x98] sm:$0xff] }
  0xd3   :  { %2832 = vmatprep.mubr.bf16.mxu0 %v3772_v32  ;;  %v3836_v32 = vcombine.high %v233_v27, %v237_v28  ;;  %v38_v20 = vld [vmem:[%s5928_s0 + $0xb8] sm:$0xff] }
  0xd9   :  { %2255 = vmatmul.mubr.bf16.gmra.mrb[76].mxu1 %v3767_v37  ;;  %v3831_v37 = vcombine.low %v231_v25, %v235_v26  ;;  %v40_v25 = vld [vmem:[%s5928_s0 + $0xc8] sm:$0xff] }
  0xda   :  { %2833 = vmatmul.mubr.bf16.gmra.mrb[76].mxu0 %v3771_v38  ;;  %2262 = vmatprep.mubr.bf16.mxu1 %v3776_v39  ;;  %v3835_v38 = vcombine.low %v233_v27, %v237_v28  ;;  %v3840_v39 = vcombine.high %v239_v33, %v243_v34  ;;  %v44_v26 = vld [vmem:[%s5928_s0 + $0xe8] sm:$0xff]  ;;  %v42_v27 = vld [vmem:[%s5928_s0 + $0xd8] sm:$0xff] }
  0xdb   :  { %2840 = vmatprep.mubr.bf16.mxu0 %v3780_v40  ;;  %v3844_v40 = vcombine.high %v241_v35, %v245_v36  ;;  %v46_v28 = vld [vmem:[%s5928_s0 + $0xf8] sm:$0xff] }
  0xe1   :  { %2263 = vmatmul.mubr.bf16.gmra.mrb[80].mxu1 %v3775_v45  ;;  %v3839_v45 = vcombine.low %v239_v33, %v243_v34  ;;  %v48_v33 = vld [vmem:[%s5928_s0 + $0x108] sm:$0xff] }
  0xe2   :  { %2841 = vmatmul.mubr.bf16.gmra.mrb[80].mxu0 %v3779_v46  ;;  %2270 = vmatprep.mubr.bf16.mxu1 %v3784_v47  ;;  %v3843_v46 = vcombine.low %v241_v35, %v245_v36  ;;  %v3848_v47 = vcombine.high %v247_v41, %v251_v42  ;;  %v52_v34 = vld [vmem:[%s5928_s0 + $0x128] sm:$0xff]  ;;  %v50_v35 = vld [vmem:[%s5928_s0 + $0x118] sm:$0xff] }
  0xe3   :  { %2848 = vmatprep.mubr.bf16.mxu0 %v3788_v48  ;;  %v3852_v48 = vcombine.high %v249_v43, %v253_v44  ;;  %v54_v36 = vld [vmem:[%s5928_s0 + $0x138] sm:$0xff] }
  0xe9   :  { %2271 = vmatmul.mubr.bf16.gmra.mrb[84].mxu1 %v3783_v53  ;;  %v3847_v53 = vcombine.low %v247_v41, %v251_v42  ;;  %v56_v41 = vld [vmem:[%s5928_s0 + $0x148] sm:$0xff] }
  0xea   :  { %2849 = vmatmul.mubr.bf16.gmra.mrb[84].mxu0 %v3787_v54  ;;  %2278 = vmatprep.mubr.bf16.mxu1 %v3792_v55  ;;  %v3851_v54 = vcombine.low %v249_v43, %v253_v44  ;;  %v3856_v55 = vcombine.high %v255_v49, %v259_v50  ;;  %v60_v42 = vld [vmem:[%s5928_s0 + $0x168] sm:$0xff]  ;;  %v58_v43 = vld [vmem:[%s5928_s0 + $0x158] sm:$0xff] }
  0xeb   :  { %2856 = vmatprep.mubr.bf16.mxu0 %v3796_v56  ;;  %v3860_v56 = vcombine.high %v257_v51, %v261_v52  ;;  %v62_v44 = vld [vmem:[%s5928_s0 + $0x178] sm:$0xff] }
  0xf1   :  { %2279 = vmatmul.mubr.bf16.gmra.mrb[88].mxu1 %v3791_v60  ;;  %v3855_v60 = vcombine.low %v255_v49, %v259_v50  ;;  %v64_v49 = vld [vmem:[%s5928_s0 + $0x188] sm:$0xff] }
  0xf2   :  { %2857 = vmatmul.mubr.bf16.gmra.mrb[88].mxu0 %v3795_v61  ;;  %2286 = vmatprep.mubr.bf16.mxu1 %v3800_v62  ;;  %v3859_v61 = vcombine.low %v257_v51, %v261_v52  ;;  %v3864_v62 = vcombine.high %v263_v57, %v267_v0  ;;  %v68_v50 = vld [vmem:[%s5928_s0 + $0x1a8] sm:$0xff]  ;;  %v66_v51 = vld [vmem:[%s5928_s0 + $0x198] sm:$0xff] }
  0xf3   :  { %2864 = vmatprep.mubr.bf16.mxu0 %v3804_v63  ;;  %v3868_v63 = vcombine.high %v265_v58, %v269_v59  ;;  %v70_v52 = vld [vmem:[%s5928_s0 + $0x1b8] sm:$0xff] }
  0xf9   :  { %2287 = vmatmul.mubr.bf16.gmra.mrb[92].mxu1 %v3799_v5  ;;  %v3863_v5 = vcombine.low %v263_v57, %v267_v0  ;;  %v72_v57 = vld [vmem:[%s5928_s0 + $0x1c8] sm:$0xff] }
  0xfa   :  { %2865 = vmatmul.mubr.bf16.gmra.mrb[92].mxu0 %v3803_v6  ;;  %2294 = vmatprep.mubr.bf16.mxu1 %v3808_v7  ;;  %v3867_v6 = vcombine.low %v265_v58, %v269_v59  ;;  %v3618_v7 = vcombine.high %v16_v1, %v20_v2  ;;  %v76_v0 = vld [vmem:[%s5928_s0 + $0x1e8] sm:$0xff]  ;;  %v74_v58 = vld [vmem:[%s5928_s0 + $0x1d8] sm:$0xff] }
  0xfb   :  { %2872 = vmatprep.mubr.bf16.mxu0 %v3812_v8  ;;  %v3622_v8 = vcombine.high %v18_v3, %v22_v4  ;;  %v78_v59 = vld [vmem:[%s5928_s0 + $0x1f8] sm:$0xff] }
 0x101   :  { %2295 = vmatmul.mubr.bf16.gmra.mrb[96].mxu1 %v3807_v13  ;;  %v3617_v13 = vcombine.low %v16_v1, %v20_v2  ;;  %v80_v1 = vld [vmem:[%s5928_s0 + $0x208] sm:$0xff] }
 0x102   :  { %2873 = vmatmul.mubr.bf16.gmra.mrb[96].mxu0 %v3811_v14  ;;  %2302 = vmatprep.mubr.bf16.mxu1 %v3816_v15  ;;  %v3621_v14 = vcombine.low %v18_v3, %v22_v4  ;;  %v3626_v15 = vcombine.high %v24_v9, %v28_v10  ;;  %v84_v2 = vld [vmem:[%s5928_s0 + $0x228] sm:$0xff]  ;;  %v82_v3 = vld [vmem:[%s5928_s0 + $0x218] sm:$0xff] }
 0x103   :  { %2880 = vmatprep.mubr.bf16.mxu0 %v3820_v16  ;;  %v3630_v16 = vcombine.high %v26_v11, %v30_v12  ;;  %v86_v4 = vld [vmem:[%s5928_s0 + $0x238] sm:$0xff] }
 0x109   :  { %2303 = vmatmul.mubr.bf16.gmra.mrb[100].mxu1 %v3815_v21  ;;  %v3625_v21 = vcombine.low %v24_v9, %v28_v10  ;;  %v88_v9 = vld [vmem:[%s5928_s0 + $0x248] sm:$0xff] }
 0x10a   :  { %2881 = vmatmul.mubr.bf16.gmra.mrb[100].mxu0 %v3819_v22  ;;  %2310 = vmatprep.mubr.bf16.mxu1 %v3824_v23  ;;  %v3629_v22 = vcombine.low %v26_v11, %v30_v12  ;;  %v3634_v23 = vcombine.high %v32_v17, %v36_v18  ;;  %v92_v10 = vld [vmem:[%s5928_s0 + $0x268] sm:$0xff]  ;;  %v90_v11 = vld [vmem:[%s5928_s0 + $0x258] sm:$0xff] }
 0x10b   :  { %2888 = vmatprep.mubr.bf16.mxu0 %v3828_v24  ;;  %v3638_v24 = vcombine.high %v34_v19, %v38_v20  ;;  %v94_v12 = vld [vmem:[%s5928_s0 + $0x278] sm:$0xff] }
 0x111   :  { %2311 = vmatmul.mubr.bf16.gmra.mrb[104].mxu1 %v3823_v29  ;;  %v3633_v29 = vcombine.low %v32_v17, %v36_v18  ;;  %v96_v17 = vld [vmem:[%s5928_s0 + $0x288] sm:$0xff] }
 0x112   :  { %2889 = vmatmul.mubr.bf16.gmra.mrb[104].mxu0 %v3827_v30  ;;  %2318 = vmatprep.mubr.bf16.mxu1 %v3832_v31  ;;  %v3637_v30 = vcombine.low %v34_v19, %v38_v20  ;;  %v3642_v31 = vcombine.high %v40_v25, %v44_v26  ;;  %v100_v18 = vld [vmem:[%s5928_s0 + $0x2a8] sm:$0xff]  ;;  %v98_v19 = vld [vmem:[%s5928_s0 + $0x298] sm:$0xff] }
 0x113   :  { %2896 = vmatprep.mubr.bf16.mxu0 %v3836_v32  ;;  %v3646_v32 = vcombine.high %v42_v27, %v46_v28  ;;  %v102_v20 = vld [vmem:[%s5928_s0 + $0x2b8] sm:$0xff] }
 0x119   :  { %2319 = vmatmul.mubr.bf16.gmra.mrb[108].mxu1 %v3831_v37  ;;  %v3641_v37 = vcombine.low %v40_v25, %v44_v26  ;;  %v104_v25 = vld [vmem:[%s5928_s0 + $0x2c8] sm:$0xff] }
 0x11a   :  { %2897 = vmatmul.mubr.bf16.gmra.mrb[108].mxu0 %v3835_v38  ;;  %2326 = vmatprep.mubr.bf16.mxu1 %v3840_v39  ;;  %v3645_v38 = vcombine.low %v42_v27, %v46_v28  ;;  %v3650_v39 = vcombine.high %v48_v33, %v52_v34  ;;  %v108_v26 = vld [vmem:[%s5928_s0 + $0x2e8] sm:$0xff]  ;;  %v106_v27 = vld [vmem:[%s5928_s0 + $0x2d8] sm:$0xff] }
 0x11b   :  { %2904 = vmatprep.mubr.bf16.mxu0 %v3844_v40  ;;  %v3654_v40 = vcombine.high %v50_v35, %v54_v36  ;;  %v110_v28 = vld [vmem:[%s5928_s0 + $0x2f8] sm:$0xff] }
 0x121   :  { %2327 = vmatmul.mubr.bf16.gmra.mrb[112].mxu1 %v3839_v45  ;;  %v3649_v45 = vcombine.low %v48_v33, %v52_v34  ;;  %v112_v33 = vld [vmem:[%s5928_s0 + $0x308] sm:$0xff] }
 0x122   :  { %2905 = vmatmul.mubr.bf16.gmra.mrb[112].mxu0 %v3843_v46  ;;  %2334 = vmatprep.mubr.bf16.mxu1 %v3848_v47  ;;  %v3653_v46 = vcombine.low %v50_v35, %v54_v36  ;;  %v3658_v47 = vcombine.high %v56_v41, %v60_v42  ;;  %v116_v34 = vld [vmem:[%s5928_s0 + $0x328] sm:$0xff]  ;;  %v114_v35 = vld [vmem:[%s5928_s0 + $0x318] sm:$0xff] }
 0x123   :  { %2912 = vmatprep.mubr.bf16.mxu0 %v3852_v48  ;;  %v3662_v48 = vcombine.high %v58_v43, %v62_v44  ;;  %v118_v36 = vld [vmem:[%s5928_s0 + $0x338] sm:$0xff] }
 0x129   :  { %2335 = vmatmul.mubr.bf16.gmra.mrb[116].mxu1 %v3847_v53  ;;  %v3657_v53 = vcombine.low %v56_v41, %v60_v42  ;;  %v120_v41 = vld [vmem:[%s5928_s0 + $0x348] sm:$0xff] }
 0x12a   :  { %2913 = vmatmul.mubr.bf16.gmra.mrb[116].mxu0 %v3851_v54  ;;  %2342 = vmatprep.mubr.bf16.mxu1 %v3856_v55  ;;  %v3661_v54 = vcombine.low %v58_v43, %v62_v44  ;;  %v3666_v55 = vcombine.high %v64_v49, %v68_v50  ;;  %v124_v42 = vld [vmem:[%s5928_s0 + $0x368] sm:$0xff]  ;;  %v122_v43 = vld [vmem:[%s5928_s0 + $0x358] sm:$0xff] }
 0x12b   :  { %2920 = vmatprep.mubr.bf16.mxu0 %v3860_v56  ;;  %v3670_v56 = vcombine.high %v66_v51, %v70_v52  ;;  %v126_v44 = vld [vmem:[%s5928_s0 + $0x378] sm:$0xff] }
 0x131   :  { %2343 = vmatmul.mubr.bf16.gmra.mrb[120].mxu1 %v3855_v60  ;;  %v3665_v60 = vcombine.low %v64_v49, %v68_v50  ;;  %v128_v49 = vld [vmem:[%s5928_s0 + $0x388] sm:$0xff] }
 0x132   :  { %2921 = vmatmul.mubr.bf16.gmra.mrb[120].mxu0 %v3859_v61  ;;  %2350 = vmatprep.mubr.bf16.mxu1 %v3864_v62  ;;  %v3669_v61 = vcombine.low %v66_v51, %v70_v52  ;;  %v3674_v62 = vcombine.high %v72_v57, %v76_v0  ;;  %v132_v50 = vld [vmem:[%s5928_s0 + $0x3a8] sm:$0xff]  ;;  %v130_v51 = vld [vmem:[%s5928_s0 + $0x398] sm:$0xff] }
 0x133   :  { %2928 = vmatprep.mubr.bf16.mxu0 %v3868_v63  ;;  %v3678_v63 = vcombine.high %v74_v58, %v78_v59  ;;  %v134_v52 = vld [vmem:[%s5928_s0 + $0x3b8] sm:$0xff] }
 0x139   :  { %2351 = vmatmul.mubr.bf16.gmra.mrb[124].mxu1 %v3863_v5  ;;  %v3673_v5 = vcombine.low %v72_v57, %v76_v0  ;;  %v136_v57 = vld [vmem:[%s5928_s0 + $0x3c8] sm:$0xff] }
 0x13a   :  { %2929 = vmatmul.mubr.bf16.gmra.mrb[124].mxu0 %v3867_v6  ;;  %2391 = vmatprep.mubr.bf16.mxu1 %v3618_v7  ;;  %v3677_v6 = vcombine.low %v74_v58, %v78_v59  ;;  %v3682_v7 = vcombine.high %v80_v1, %v84_v2  ;;  %v140_v0 = vld [vmem:[%s5928_s0 + $0x3e8] sm:$0xff]  ;;  %v138_v58 = vld [vmem:[%s5928_s0 + $0x3d8] sm:$0xff] }
 0x13b   :  { %2969 = vmatprep.mubr.bf16.mxu0 %v3622_v8  ;;  %v3686_v8 = vcombine.high %v82_v3, %v86_v4  ;;  %v142_v59 = vld [vmem:[%s5928_s0 + $0x3f8] sm:$0xff] }
 0x141   :  { %2392 = vmatmul.mubr.bf16.vlgmr.msra.gmra.mrb[0].mxu1 %v3617_v13  ;;  %v3681_v13 = vcombine.low %v80_v1, %v84_v2  ;;  %v144_v1 = vld [vmem:[%s5928_s0 + $0x408] sm:$0xff] }
 0x142   :  { %2970 = vmatmul.mubr.bf16.vlgmr.msra.gmra.mrb[0].mxu0 %v3621_v14  ;;  %2399 = vmatprep.mubr.bf16.mxu1 %v3626_v15  ;;  %v3685_v14 = vcombine.low %v82_v3, %v86_v4  ;;  %v3690_v15 = vcombine.high %v88_v9, %v92_v10  ;;  %v148_v2 = vld [vmem:[%s5928_s0 + $0x428] sm:$0xff]  ;;  %v146_v3 = vld [vmem:[%s5928_s0 + $0x418] sm:$0xff] }
 0x143   :  { %2977 = vmatprep.mubr.bf16.mxu0 %v3630_v16  ;;  %v3694_v16 = vcombine.high %v90_v11, %v94_v12  ;;  %v150_v4 = vld [vmem:[%s5928_s0 + $0x438] sm:$0xff] }
 0x149   :  { %2400 = vmatmul.mubr.bf16.gmra.mrb[4].mxu1 %v3625_v21  ;;  %v3689_v21 = vcombine.low %v88_v9, %v92_v10  ;;  %v152_v9 = vld [vmem:[%s5928_s0 + $0x448] sm:$0xff] }
 0x14a   :  { %2978 = vmatmul.mubr.bf16.gmra.mrb[4].mxu0 %v3629_v22  ;;  %2407 = vmatprep.mubr.bf16.mxu1 %v3634_v23  ;;  %v3693_v22 = vcombine.low %v90_v11, %v94_v12  ;;  %v3698_v23 = vcombine.high %v96_v17, %v100_v18  ;;  %v156_v10 = vld [vmem:[%s5928_s0 + $0x468] sm:$0xff]  ;;  %v154_v11 = vld [vmem:[%s5928_s0 + $0x458] sm:$0xff] }
 0x14b   :  { %2985 = vmatprep.mubr.bf16.mxu0 %v3638_v24  ;;  %v3702_v24 = vcombine.high %v98_v19, %v102_v20  ;;  %v158_v12 = vld [vmem:[%s5928_s0 + $0x478] sm:$0xff] }
 0x151   :  { %2408 = vmatmul.mubr.bf16.gmra.mrb[8].mxu1 %v3633_v29  ;;  %v3697_v29 = vcombine.low %v96_v17, %v100_v18  ;;  %v160_v17 = vld [vmem:[%s5928_s0 + $0x488] sm:$0xff] }
 0x152   :  { %2986 = vmatmul.mubr.bf16.gmra.mrb[8].mxu0 %v3637_v30  ;;  %2415 = vmatprep.mubr.bf16.mxu1 %v3642_v31  ;;  %v3701_v30 = vcombine.low %v98_v19, %v102_v20  ;;  %v3706_v31 = vcombine.high %v104_v25, %v108_v26  ;;  %v164_v18 = vld [vmem:[%s5928_s0 + $0x4a8] sm:$0xff]  ;;  %v162_v19 = vld [vmem:[%s5928_s0 + $0x498] sm:$0xff] }
 0x153   :  { %2993 = vmatprep.mubr.bf16.mxu0 %v3646_v32  ;;  %v3710_v32 = vcombine.high %v106_v27, %v110_v28  ;;  %v166_v20 = vld [vmem:[%s5928_s0 + $0x4b8] sm:$0xff] }
 0x159   :  { %2416 = vmatmul.mubr.bf16.gmra.mrb[12].mxu1 %v3641_v37  ;;  %v3705_v37 = vcombine.low %v104_v25, %v108_v26  ;;  %v168_v25 = vld [vmem:[%s5928_s0 + $0x4c8] sm:$0xff] }
 0x15a   :  { %2994 = vmatmul.mubr.bf16.gmra.mrb[12].mxu0 %v3645_v38  ;;  %2423 = vmatprep.mubr.bf16.mxu1 %v3650_v39  ;;  %v3709_v38 = vcombine.low %v106_v27, %v110_v28  ;;  %v3714_v39 = vcombine.high %v112_v33, %v116_v34  ;;  %v172_v26 = vld [vmem:[%s5928_s0 + $0x4e8] sm:$0xff]  ;;  %v170_v27 = vld [vmem:[%s5928_s0 + $0x4d8] sm:$0xff] }
 0x15b   :  { %3001 = vmatprep.mubr.bf16.mxu0 %v3654_v40  ;;  %v3718_v40 = vcombine.high %v114_v35, %v118_v36  ;;  %v174_v28 = vld [vmem:[%s5928_s0 + $0x4f8] sm:$0xff] }
 0x161   :  { %2424 = vmatmul.mubr.bf16.gmra.mrb[16].mxu1 %v3649_v45  ;;  %v3713_v45 = vcombine.low %v112_v33, %v116_v34  ;;  %v176_v33 = vld [vmem:[%s5928_s0 + $0x508] sm:$0xff] }
 0x162   :  { %3002 = vmatmul.mubr.bf16.gmra.mrb[16].mxu0 %v3653_v46  ;;  %2431 = vmatprep.mubr.bf16.mxu1 %v3658_v47  ;;  %v3717_v46 = vcombine.low %v114_v35, %v118_v36  ;;  %v3722_v47 = vcombine.high %v120_v41, %v124_v42  ;;  %v180_v34 = vld [vmem:[%s5928_s0 + $0x528] sm:$0xff]  ;;  %v178_v35 = vld [vmem:[%s5928_s0 + $0x518] sm:$0xff] }
 0x163   :  { %3009 = vmatprep.mubr.bf16.mxu0 %v3662_v48  ;;  %v3726_v48 = vcombine.high %v122_v43, %v126_v44  ;;  %v182_v36 = vld [vmem:[%s5928_s0 + $0x538] sm:$0xff] }
 0x169   :  { %2432 = vmatmul.mubr.bf16.gmra.mrb[20].mxu1 %v3657_v53  ;;  %v3721_v53 = vcombine.low %v120_v41, %v124_v42  ;;  %v184_v41 = vld [vmem:[%s5928_s0 + $0x548] sm:$0xff] }
 0x16a   :  { %3010 = vmatmul.mubr.bf16.gmra.mrb[20].mxu0 %v3661_v54  ;;  %2439 = vmatprep.mubr.bf16.mxu1 %v3666_v55  ;;  %v3725_v54 = vcombine.low %v122_v43, %v126_v44  ;;  %v3730_v55 = vcombine.high %v128_v49, %v132_v50  ;;  %v188_v42 = vld [vmem:[%s5928_s0 + $0x568] sm:$0xff]  ;;  %v186_v43 = vld [vmem:[%s5928_s0 + $0x558] sm:$0xff] }
 0x16b   :  { %3017 = vmatprep.mubr.bf16.mxu0 %v3670_v56  ;;  %v3734_v56 = vcombine.high %v130_v51, %v134_v52  ;;  %v190_v44 = vld [vmem:[%s5928_s0 + $0x578] sm:$0xff] }
 0x171   :  { %2440 = vmatmul.mubr.bf16.gmra.mrb[24].mxu1 %v3665_v60  ;;  %v3729_v60 = vcombine.low %v128_v49, %v132_v50  ;;  %v192_v49 = vld [vmem:[%s5928_s0 + $0x588] sm:$0xff] }
 0x172   :  { %3018 = vmatmul.mubr.bf16.gmra.mrb[24].mxu0 %v3669_v61  ;;  %2447 = vmatprep.mubr.bf16.mxu1 %v3674_v62  ;;  %v3733_v61 = vcombine.low %v130_v51, %v134_v52  ;;  %v3738_v62 = vcombine.high %v136_v57, %v140_v0  ;;  %v196_v50 = vld [vmem:[%s5928_s0 + $0x5a8] sm:$0xff]  ;;  %v194_v51 = vld [vmem:[%s5928_s0 + $0x598] sm:$0xff] }
 0x173   :  { %3025 = vmatprep.mubr.bf16.mxu0 %v3678_v63  ;;  %v3742_v63 = vcombine.high %v138_v58, %v142_v59  ;;  %v198_v52 = vld [vmem:[%s5928_s0 + $0x5b8] sm:$0xff] }
 0x179   :  { %2448 = vmatmul.mubr.bf16.gmra.mrb[28].mxu1 %v3673_v5  ;;  %v3737_v5 = vcombine.low %v136_v57, %v140_v0  ;;  %v200_v57 = vld [vmem:[%s5928_s0 + $0x5c8] sm:$0xff] }
 0x17a   :  { %3026 = vmatmul.mubr.bf16.gmra.mrb[28].mxu0 %v3677_v6  ;;  %2455 = vmatprep.mubr.bf16.mxu1 %v3682_v7  ;;  %v3741_v6 = vcombine.low %v138_v58, %v142_v59  ;;  %v3746_v7 = vcombine.high %v144_v1, %v148_v2  ;;  %v204_v0 = vld [vmem:[%s5928_s0 + $0x5e8] sm:$0xff]  ;;  %v202_v58 = vld [vmem:[%s5928_s0 + $0x5d8] sm:$0xff] }
 0x17b   :  { %3033 = vmatprep.mubr.bf16.mxu0 %v3686_v8  ;;  %v3750_v8 = vcombine.high %v146_v3, %v150_v4  ;;  %v206_v59 = vld [vmem:[%s5928_s0 + $0x5f8] sm:$0xff] }
 0x181   :  { %2456 = vmatmul.mubr.bf16.gmra.mrb[32].mxu1 %v3681_v13  ;;  %v3745_v13 = vcombine.low %v144_v1, %v148_v2  ;;  %v208_v1 = vld [vmem:[%s5928_s0 + $0x608] sm:$0xff] }
 0x182   :  { %3034 = vmatmul.mubr.bf16.gmra.mrb[32].mxu0 %v3685_v14  ;;  %2463 = vmatprep.mubr.bf16.mxu1 %v3690_v15  ;;  %v3749_v14 = vcombine.low %v146_v3, %v150_v4  ;;  %v3754_v15 = vcombine.high %v152_v9, %v156_v10  ;;  %v212_v2 = vld [vmem:[%s5928_s0 + $0x628] sm:$0xff]  ;;  %v210_v3 = vld [vmem:[%s5928_s0 + $0x618] sm:$0xff] }
 0x183   :  { %3041 = vmatprep.mubr.bf16.mxu0 %v3694_v16  ;;  %v3758_v16 = vcombine.high %v154_v11, %v158_v12  ;;  %v214_v4 = vld [vmem:[%s5928_s0 + $0x638] sm:$0xff] }
 0x189   :  { %2464 = vmatmul.mubr.bf16.gmra.mrb[36].mxu1 %v3689_v21  ;;  %v3753_v21 = vcombine.low %v152_v9, %v156_v10  ;;  %v216_v9 = vld [vmem:[%s5928_s0 + $0x648] sm:$0xff] }
 0x18a   :  { %3042 = vmatmul.mubr.bf16.gmra.mrb[36].mxu0 %v3693_v22  ;;  %2471 = vmatprep.mubr.bf16.mxu1 %v3698_v23  ;;  %v3757_v22 = vcombine.low %v154_v11, %v158_v12  ;;  %v3762_v23 = vcombine.high %v160_v17, %v164_v18  ;;  %v220_v10 = vld [vmem:[%s5928_s0 + $0x668] sm:$0xff]  ;;  %v218_v11 = vld [vmem:[%s5928_s0 + $0x658] sm:$0xff] }
 0x18b   :  { %3049 = vmatprep.mubr.bf16.mxu0 %v3702_v24  ;;  %v3766_v24 = vcombine.high %v162_v19, %v166_v20  ;;  %v222_v12 = vld [vmem:[%s5928_s0 + $0x678] sm:$0xff] }
 0x191   :  { %2472 = vmatmul.mubr.bf16.gmra.mrb[40].mxu1 %v3697_v29  ;;  %v3761_v29 = vcombine.low %v160_v17, %v164_v18  ;;  %v224_v17 = vld [vmem:[%s5928_s0 + $0x688] sm:$0xff] }
 0x192   :  { %3050 = vmatmul.mubr.bf16.gmra.mrb[40].mxu0 %v3701_v30  ;;  %2479 = vmatprep.mubr.bf16.mxu1 %v3706_v31  ;;  %v3765_v30 = vcombine.low %v162_v19, %v166_v20  ;;  %v3770_v31 = vcombine.high %v168_v25, %v172_v26  ;;  %v228_v18 = vld [vmem:[%s5928_s0 + $0x6a8] sm:$0xff]  ;;  %v226_v19 = vld [vmem:[%s5928_s0 + $0x698] sm:$0xff] }
 0x193   :  { %3057 = vmatprep.mubr.bf16.mxu0 %v3710_v32  ;;  %v3774_v32 = vcombine.high %v170_v27, %v174_v28  ;;  %v230_v20 = vld [vmem:[%s5928_s0 + $0x6b8] sm:$0xff] }
 0x199   :  { %2480 = vmatmul.mubr.bf16.gmra.mrb[44].mxu1 %v3705_v37  ;;  %v3769_v37 = vcombine.low %v168_v25, %v172_v26  ;;  %v232_v25 = vld [vmem:[%s5928_s0 + $0x6c8] sm:$0xff] }
 0x19a   :  { %3058 = vmatmul.mubr.bf16.gmra.mrb[44].mxu0 %v3709_v38  ;;  %2487 = vmatprep.mubr.bf16.mxu1 %v3714_v39  ;;  %v3773_v38 = vcombine.low %v170_v27, %v174_v28  ;;  %v3778_v39 = vcombine.high %v176_v33, %v180_v34  ;;  %v236_v26 = vld [vmem:[%s5928_s0 + $0x6e8] sm:$0xff]  ;;  %v234_v27 = vld [vmem:[%s5928_s0 + $0x6d8] sm:$0xff] }
 0x19b   :  { %3065 = vmatprep.mubr.bf16.mxu0 %v3718_v40  ;;  %v3782_v40 = vcombine.high %v178_v35, %v182_v36  ;;  %v238_v28 = vld [vmem:[%s5928_s0 + $0x6f8] sm:$0xff] }
 0x1a1   :  { %2488 = vmatmul.mubr.bf16.gmra.mrb[48].mxu1 %v3713_v45  ;;  %v3777_v45 = vcombine.low %v176_v33, %v180_v34  ;;  %v5720_v33 = vld [vmem:[%s5929_s2] ss:$0 sm:$0xff]  ;;  %v240_v34 = vld [vmem:[%s5928_s0 + $0x708] sm:$0xff] }
 0x1a2   :  { %3066 = vmatmul.mubr.bf16.gmra.mrb[48].mxu0 %v3717_v46  ;;  %2495 = vmatprep.mubr.bf16.mxu1 %v3722_v47  ;;  %v3781_v46 = vcombine.low %v178_v35, %v182_v36  ;;  %v3786_v47 = vcombine.high %v184_v41, %v188_v42  ;;  %v244_v35 = vld [vmem:[%s5928_s0 + $0x728] sm:$0xff] }
 0x1a3   :  { %3073 = vmatprep.mubr.bf16.mxu0 %v3726_v48  ;;  %v3790_v48 = vcombine.high %v186_v43, %v190_v44 }
 0x1a9   :  { %2496 = vmatmul.mubr.bf16.gmra.mrb[52].mxu1 %v3721_v53  ;;  %v3785_v53 = vcombine.low %v184_v41, %v188_v42  ;;  %v3833_v42 = vcombine.low %v232_v25, %v236_v26 }
 0x1aa   :  { %3074 = vmatmul.mubr.bf16.gmra.mrb[52].mxu0 %v3725_v54  ;;  %2503 = vmatprep.mubr.bf16.mxu1 %v3730_v55  ;;  %v3789_v54 = vcombine.low %v186_v43, %v190_v44  ;;  %v3794_v55 = vcombine.high %v192_v49, %v196_v50 }
 0x1ab   :  { %3081 = vmatprep.mubr.bf16.mxu0 %v3734_v56  ;;  %v3798_v56 = vcombine.high %v194_v51, %v198_v52 }
 0x1b1   :  { %2504 = vmatmul.mubr.bf16.gmra.mrb[56].mxu1 %v3729_v60  ;;  %v3793_v60 = vcombine.low %v192_v49, %v196_v50 }
 0x1b2   :  { %3082 = vmatmul.mubr.bf16.gmra.mrb[56].mxu0 %v3733_v61  ;;  %2511 = vmatprep.mubr.bf16.mxu1 %v3738_v62  ;;  %v3797_v61 = vcombine.low %v194_v51, %v198_v52  ;;  %v3802_v62 = vcombine.high %v200_v57, %v204_v0 }
 0x1b3   :  { %3089 = vmatprep.mubr.bf16.mxu0 %v3742_v63  ;;  %v3806_v63 = vcombine.high %v202_v58, %v206_v59 }
 0x1b9   :  { %2512 = vmatmul.mubr.bf16.gmra.mrb[60].mxu1 %v3737_v5  ;;  %v3801_v5 = vcombine.low %v200_v57, %v204_v0  ;;  %v252_v57 = vld [vmem:[%s5928_s0 + $0x768] sm:$0xff] }
 0x1ba   :  { %3090 = vmatmul.mubr.bf16.gmra.mrb[60].mxu0 %v3741_v6  ;;  %2519 = vmatprep.mubr.bf16.mxu1 %v3746_v7  ;;  %v3805_v6 = vcombine.low %v202_v58, %v206_v59  ;;  %v3810_v7 = vcombine.high %v208_v1, %v212_v2  ;;  %v250_v58 = vld [vmem:[%s5928_s0 + $0x758] sm:$0xff] }
 0x1bb   :  { %3097 = vmatprep.mubr.bf16.mxu0 %v3750_v8  ;;  %v3814_v8 = vcombine.high %v210_v3, %v214_v4  ;;  %v254_v59 = vld [vmem:[%s5928_s0 + $0x778] sm:$0xff] }
 0x1c1   :  { %2520 = vmatmul.mubr.bf16.gmra.mrb[64].mxu1 %v3745_v13  ;;  %v3809_v13 = vcombine.low %v208_v1, %v212_v2  ;;  %v3841_v1 = vcombine.low %v240_v34, %v244_v35 }
 0x1c2   :  { %3098 = vmatmul.mubr.bf16.gmra.mrb[64].mxu0 %v3749_v14  ;;  %2527 = vmatprep.mubr.bf16.mxu1 %v3754_v15  ;;  %v3813_v14 = vcombine.low %v210_v3, %v214_v4  ;;  %v3818_v15 = vcombine.high %v216_v9, %v220_v10 }
 0x1c3   :  { %3105 = vmatprep.mubr.bf16.mxu0 %v3758_v16  ;;  %v3822_v16 = vcombine.high %v218_v11, %v222_v12 }
 0x1c9   :  { %2528 = vmatmul.mubr.bf16.gmra.mrb[68].mxu1 %v3753_v21  ;;  %v3817_v21 = vcombine.low %v216_v9, %v220_v10  ;;  %v3854_v10 = vcombine.high %v250_v58, %v254_v59 }
 0x1ca   :  { %3106 = vmatmul.mubr.bf16.gmra.mrb[68].mxu0 %v3757_v22  ;;  %2535 = vmatprep.mubr.bf16.mxu1 %v3762_v23  ;;  %v3821_v22 = vcombine.low %v218_v11, %v222_v12  ;;  %v3826_v23 = vcombine.high %v224_v17, %v228_v18 }
 0x1cb   :  { %3113 = vmatprep.mubr.bf16.mxu0 %v3766_v24  ;;  %v3830_v24 = vcombine.high %v226_v19, %v230_v20 }
 0x1d1   :  { %2536 = vmatmul.mubr.bf16.gmra.mrb[72].mxu1 %v3761_v29  ;;  %v3825_v29 = vcombine.low %v224_v17, %v228_v18  ;;  %v258_v18 = vld [vmem:[%s5928_s0 + $0x798] sm:$0xff] }
 0x1d2   :  { %3114 = vmatmul.mubr.bf16.gmra.mrb[72].mxu0 %v3765_v30  ;;  %2543 = vmatprep.mubr.bf16.mxu1 %v3770_v31  ;;  %v3829_v30 = vcombine.low %v226_v19, %v230_v20  ;;  %v3834_v31 = vcombine.high %v232_v25, %v236_v26  ;;  %v262_v19 = vld [vmem:[%s5928_s0 + $0x7b8] sm:$0xff] }
 0x1d3   :  { %3121 = vmatprep.mubr.bf16.mxu0 %v3774_v32  ;;  %v3838_v32 = vcombine.high %v234_v27, %v238_v28 }
 0x1d9   :  { %2544 = vmatmul.mubr.bf16.gmra.mrb[76].mxu1 %v3769_v37  ;;  %v242_v37 = vld [vmem:[%s5928_s0 + $0x718] sm:$0xff] }
 0x1da   :  { %3122 = vmatmul.mubr.bf16.gmra.mrb[76].mxu0 %v3773_v38  ;;  %2551 = vmatprep.mubr.bf16.mxu1 %v3778_v39  ;;  %v246_v38 = vld [vmem:[%s5928_s0 + $0x738] sm:$0xff] }
 0x1db   :  { %3129 = vmatprep.mubr.bf16.mxu0 %v3782_v40  ;;  %v3846_v51 = vcombine.high %v242_v37, %v246_v38  ;;  %v3845_v4 = vcombine.low %v242_v37, %v246_v38 }
 0x1e1   :  { %2552 = vmatmul.mubr.bf16.gmra.mrb[80].mxu1 %v3777_v45  ;;  %v3837_v45 = vcombine.low %v234_v27, %v238_v28  ;;  %v3853_v27 = vcombine.low %v250_v58, %v254_v59 }
 0x1e2   :  { %3130 = vmatmul.mubr.bf16.gmra.mrb[80].mxu0 %v3781_v46  ;;  %2559 = vmatprep.mubr.bf16.mxu1 %v3786_v47  ;;  %v3842_v46 = vcombine.high %v240_v34, %v244_v35  ;;  %v3862_v34 = vcombine.high %v258_v18, %v262_v19 }
 0x1e3   :  { %3137 = vmatprep.mubr.bf16.mxu0 %v3790_v48 }
 0x1e9   :  { %2560 = vmatmul.mubr.bf16.gmra.mrb[84].mxu1 %v3785_v53 }
 0x1ea   :  { %3138 = vmatmul.mubr.bf16.gmra.mrb[84].mxu0 %v3789_v54  ;;  %2567 = vmatprep.mubr.bf16.mxu1 %v3794_v55 }
 0x1eb   :  { %3145 = vmatprep.mubr.bf16.mxu0 %v3798_v56  ;;  %v248_v56 = vld [vmem:[%s5928_s0 + $0x748] sm:$0xff] }
 0x1f1   :  { %2568 = vmatmul.mubr.bf16.gmra.mrb[88].mxu1 %v3793_v60 }
 0x1f2   :  { %3146 = vmatmul.mubr.bf16.gmra.mrb[88].mxu0 %v3797_v61  ;;  %2575 = vmatprep.mubr.bf16.mxu1 %v3802_v62 }
 0x1f3   :  { %3153 = vmatprep.mubr.bf16.mxu0 %v3806_v63 }
 0x1f9   :  { %2576 = vmatmul.mubr.bf16.gmra.mrb[92].mxu1 %v3801_v5  ;;  %v3850_v5 = vcombine.high %v248_v56, %v252_v57 }
 0x1fa   :  { %3154 = vmatmul.mubr.bf16.gmra.mrb[92].mxu0 %v3805_v6  ;;  %2583 = vmatprep.mubr.bf16.mxu1 %v3810_v7 }
 0x1fb   :  { %3161 = vmatprep.mubr.bf16.mxu0 %v3814_v8 }
 0x201   :  { %2584 = vmatmul.mubr.bf16.gmra.mrb[96].mxu1 %v3809_v13 }
 0x202   :  { %3162 = vmatmul.mubr.bf16.gmra.mrb[96].mxu0 %v3813_v14  ;;  %2591 = vmatprep.mubr.bf16.mxu1 %v3818_v15  ;;  %v256_v15 = vld [vmem:[%s5928_s0 + $0x788] sm:$0xff] }
 0x203   :  { %3169 = vmatprep.mubr.bf16.mxu0 %v3822_v16  ;;  %v260_v16 = vld [vmem:[%s5928_s0 + $0x7a8] sm:$0xff] }
 0x204   :  { %v3858_v28 = vcombine.high %v256_v15, %v260_v16 }
 0x209   :  { %2592 = vmatmul.mubr.bf16.gmra.mrb[100].mxu1 %v3817_v21 }
 0x20a   :  { %3170 = vmatmul.mubr.bf16.gmra.mrb[100].mxu0 %v3821_v22  ;;  %2599 = vmatprep.mubr.bf16.mxu1 %v3826_v23 }
 0x20b   :  { %3177 = vmatprep.mubr.bf16.mxu0 %v3830_v24  ;;  %v3849_v24 = vcombine.low %v248_v56, %v252_v57 }
 0x211   :  { %2600 = vmatmul.mubr.bf16.gmra.mrb[104].mxu1 %v3825_v29 }
 0x212   :  { %3178 = vmatmul.mubr.bf16.gmra.mrb[104].mxu0 %v3829_v30  ;;  %2607 = vmatprep.mubr.bf16.mxu1 %v3834_v31 }
 0x213   :  { %3185 = vmatprep.mubr.bf16.mxu0 %v3838_v32 }
 0x214   :  { %v2393_v36 = vpop.f32.mrb[0].mxu1 }
 0x215   :  { %v4254_v39 = vadd.f32 %v5720_v33, %v2393_v36  ;;  %v2971_v40 = vpop.f32.mrb[0].mxu0  ;;  %v2395_v41 = vpop.f32.mrb[1].mxu1 }
 0x216   :  { %v2973_v43 = vpop.f32.mrb[1].mxu0  ;;  %v2396_v44 = vpop.f32.mrb[2].mxu1 }
 0x217   :  { %v4255_v47 = vadd.f32 %v4254_v39, %v2971_v40  ;;  %v4256_v48 = vadd.f32 %v5720_v33, %v2396_v44  ;;  %v2974_v49 = vpop.f32.mrb[2].mxu0  ;;  %v2398_v50 = vpop.f32.mrb[3].mxu1  ;;  %v264_v39 = vld [vmem:[%s5928_s0 + $0x7c8] sm:$0xff]  ;;  %v270_v43 = vld [vmem:[%s5928_s0 + $0x7f8] sm:$0xff] }
 0x218   :  { %v2976_v52 = vpop.f32.mrb[3].mxu0  ;;  %v268_v40 = vld [vmem:[%s5928_s0 + $0x7e8] sm:$0xff] }
 0x219   :  { %v4257_v53 = vadd.f32 %v4256_v48, %v2974_v49  ;;  %2608 = vmatmul.mubr.bf16.gmra.mrb[108].mxu1 %v3833_v42  ;;  %v3226_v54 = vmax.f32 %v4255_v47, 0.0  ;;  %v266_v42 = vld [vmem:[%s5928_s0 + $0x7d8] sm:$0xff]  ;;  %v3857_v48 = vcombine.low %v256_v15, %v260_v16  ;;  %v3866_v52 = vcombine.high %v264_v39, %v268_v40 }
 0x21a   :  { %3186 = vmatmul.mubr.bf16.gmra.mrb[108].mxu0 %v3837_v45  ;;  %2615 = vmatprep.mubr.bf16.mxu1 %v3842_v46  ;;  %v3870_v57 = vcombine.high %v266_v42, %v270_v43 }
 0x21b   :  { %v3227_v55 = vmax.f32 %v4257_v53, 0.0  ;;  %3193 = vmatprep.mubr.bf16.mxu0 %v3846_v51  ;;  %v3861_v51 = vcombine.low %v258_v18, %v262_v19 }
 0x21c   :  { %v2401_v0 = vpop.f32.mrb[4].mxu1 }
 0x21d   :  { %v4066_v60 = vpack.c.bf16 %v3227_v55, %v3226_v54  ;;  %v4258_v61 = vadd.f32 %v5720_v33, %v2401_v0  ;;  %v2979_v62 = vpop.f32.mrb[4].mxu0  ;;  %v2403_v63 = vpop.f32.mrb[5].mxu1 }
 0x21e   :  { %v2981_v2 = vpop.f32.mrb[5].mxu0  ;;  %v2404_v3 = vpop.f32.mrb[6].mxu1 }
 0x21f   :  { %4067 = vst [vmem:[%s5930_s3] sm:$0xff] %v4066_v60   ;;  %v4259_v6 = vadd.f32 %v4258_v61, %v2979_v62  ;;  %v4260_v7 = vadd.f32 %v5720_v33, %v2404_v3  ;;  %v2982_v8 = vpop.f32.mrb[6].mxu0  ;;  %v2406_v9 = vpop.f32.mrb[7].mxu1  ;;  %v3865_v3 = vcombine.low %v264_v39, %v268_v40 }
 0x220   :  { %v2984_v11 = vpop.f32.mrb[7].mxu0 }
 0x221   :  { %v4261_v12 = vadd.f32 %v4260_v7, %v2982_v8  ;;  %2616 = vmatmul.mubr.bf16.gmra.mrb[112].mxu1 %v3841_v1  ;;  %v3228_v13 = vmax.f32 %v4259_v6, 0.0  ;;  %v3869_v6 = vcombine.low %v266_v42, %v270_v43 }
 0x222   :  { %3194 = vmatmul.mubr.bf16.gmra.mrb[112].mxu0 %v3845_v4  ;;  %2623 = vmatprep.mubr.bf16.mxu1 %v3850_v5 }
 0x223   :  { %v3229_v14 = vmax.f32 %v4261_v12, 0.0  ;;  %3201 = vmatprep.mubr.bf16.mxu0 %v3854_v10 }
 0x224   :  { %v2409_v17 = vpop.f32.mrb[8].mxu1 }
 0x225   :  { %v4071_v20 = vpack.c.bf16 %v3229_v14, %v3228_v13  ;;  %v4262_v21 = vadd.f32 %v5720_v33, %v2409_v17  ;;  %v2987_v22 = vpop.f32.mrb[8].mxu0  ;;  %v2411_v23 = vpop.f32.mrb[9].mxu1 }
 0x226   :  { %v2989_v25 = vpop.f32.mrb[9].mxu0  ;;  %v2412_v26 = vpop.f32.mrb[10].mxu1 }
 0x227   :  { %4223 = vst [vmem:[%s5930_s3 + $0x8] sm:$0xff] %v4071_v20   ;;  %v4263_v29 = vadd.f32 %v4262_v21, %v2987_v22  ;;  %v4264_v30 = vadd.f32 %v5720_v33, %v2412_v26  ;;  %v2990_v31 = vpop.f32.mrb[10].mxu0  ;;  %v2414_v32 = vpop.f32.mrb[11].mxu1 }
 0x228   :  { %v2992_v35 = vpop.f32.mrb[11].mxu0 }
 0x229   :  { %v4265_v36 = vadd.f32 %v4264_v30, %v2990_v31  ;;  %2624 = vmatmul.mubr.bf16.gmra.mrb[116].mxu1 %v3849_v24  ;;  %v3230_v37 = vmax.f32 %v4263_v29, 0.0 }
 0x22a   :  { %3202 = vmatmul.mubr.bf16.gmra.mrb[116].mxu0 %v3853_v27  ;;  %2631 = vmatprep.mubr.bf16.mxu1 %v3858_v28 }
 0x22b   :  { %v3231_v38 = vmax.f32 %v4265_v36, 0.0  ;;  %3209 = vmatprep.mubr.bf16.mxu0 %v3862_v34 }
 0x22c   :  { %v2417_v41 = vpop.f32.mrb[12].mxu1 }
 0x22d   :  { %v4076_v44 = vpack.c.bf16 %v3231_v38, %v3230_v37  ;;  %v4266_v45 = vadd.f32 %v5720_v33, %v2417_v41  ;;  %v2995_v46 = vpop.f32.mrb[12].mxu0  ;;  %v2419_v47 = vpop.f32.mrb[13].mxu1 }
 0x22e   :  { %v2997_v49 = vpop.f32.mrb[13].mxu0  ;;  %v2420_v50 = vpop.f32.mrb[14].mxu1 }
 0x22f   :  { %4224 = vst [vmem:[%s5930_s3 + $0x10] sm:$0xff] %v4076_v44   ;;  %v4267_v53 = vadd.f32 %v4266_v45, %v2995_v46  ;;  %v4268_v54 = vadd.f32 %v5720_v33, %v2420_v50  ;;  %v2998_v55 = vpop.f32.mrb[14].mxu0  ;;  %v2422_v56 = vpop.f32.mrb[15].mxu1 }
 0x230   :  { %v3000_v0 = vpop.f32.mrb[15].mxu0 }
 0x231   :  { %v4269_v58 = vadd.f32 %v4268_v54, %v2998_v55  ;;  %2632 = vmatmul.mubr.bf16.gmra.mrb[120].mxu1 %v3857_v48  ;;  %v3232_v59 = vmax.f32 %v4267_v53, 0.0 }
 0x232   :  { %3210 = vmatmul.mubr.bf16.gmra.mrb[120].mxu0 %v3861_v51  ;;  %2639 = vmatprep.mubr.bf16.mxu1 %v3866_v52 }
 0x233   :  { %v3233_v60 = vmax.f32 %v4269_v58, 0.0  ;;  %3217 = vmatprep.mubr.bf16.mxu0 %v3870_v57 }
 0x234   :  { %v2425_v61 = vpop.f32.mrb[16].mxu1 }
 0x235   :  { %v4081_v62 = vpack.c.bf16 %v3233_v60, %v3232_v59  ;;  %v4270_v63 = vadd.f32 %v5720_v33, %v2425_v61  ;;  %v3003_v1 = vpop.f32.mrb[16].mxu0  ;;  %v2427_v2 = vpop.f32.mrb[17].mxu1 }
 0x236   :  { %v3005_v4 = vpop.f32.mrb[17].mxu0  ;;  %v2428_v5 = vpop.f32.mrb[18].mxu1 }
 0x237   :  { %4225 = vst [vmem:[%s5930_s3 + $0x18] sm:$0xff] %v4081_v62   ;;  %v4271_v7 = vadd.f32 %v4270_v63, %v3003_v1  ;;  %v4272_v8 = vadd.f32 %v5720_v33, %v2428_v5  ;;  %v3006_v9 = vpop.f32.mrb[18].mxu0  ;;  %v2430_v10 = vpop.f32.mrb[19].mxu1 }
 0x238   :  { %v3008_v11 = vpop.f32.mrb[19].mxu0 }
 0x239   :  { %v4273_v12 = vadd.f32 %v4272_v8, %v3006_v9  ;;  %2640 = vmatmul.mubr.bf16.gmra.mrb[124].mxu1 %v3865_v3  ;;  %v3234_v13 = vmax.f32 %v4271_v7, 0.0 }
 0x23a   :  { %3218 = vmatmul.mubr.bf16.gmra.mrb[124].mxu0 %v3869_v6 }
 0x23b   :  { %v3235_v14 = vmax.f32 %v4273_v12, 0.0 }
 0x23c   :  { %v2433_v15 = vpop.f32.mrb[20].mxu1 }
 0x23d   :  { %v4086_v16 = vpack.c.bf16 %v3235_v14, %v3234_v13  ;;  %v4274_v17 = vadd.f32 %v5720_v33, %v2433_v15  ;;  %v3011_v18 = vpop.f32.mrb[20].mxu0  ;;  %v2435_v19 = vpop.f32.mrb[21].mxu1 }
 0x23e   :  { %v3013_v20 = vpop.f32.mrb[21].mxu0  ;;  %v2436_v21 = vpop.f32.mrb[22].mxu1 }
 0x23f   :  { %4226 = vst [vmem:[%s5930_s3 + $0x20] sm:$0xff] %v4086_v16   ;;  %v4275_v22 = vadd.f32 %v4274_v17, %v3011_v18  ;;  %v4276_v23 = vadd.f32 %v5720_v33, %v2436_v21  ;;  %v3014_v24 = vpop.f32.mrb[22].mxu0  ;;  %v2438_v25 = vpop.f32.mrb[23].mxu1 }
 0x240   :  { %v3016_v26 = vpop.f32.mrb[23].mxu0 }
 0x241   :  { %v4277_v27 = vadd.f32 %v4276_v23, %v3014_v24  ;;  %v3236_v28 = vmax.f32 %v4275_v22, 0.0 }
 0x243   :  { %v3237_v29 = vmax.f32 %v4277_v27, 0.0 }
 0x244   :  { %v2441_v30 = vpop.f32.mrb[24].mxu1 }
 0x245   :  { %v4091_v31 = vpack.c.bf16 %v3237_v29, %v3236_v28  ;;  %v4278_v32 = vadd.f32 %v5720_v33, %v2441_v30  ;;  %v3019_v34 = vpop.f32.mrb[24].mxu0  ;;  %v2443_v35 = vpop.f32.mrb[25].mxu1 }
 0x246   :  { %v3021_v36 = vpop.f32.mrb[25].mxu0  ;;  %v2444_v37 = vpop.f32.mrb[26].mxu1 }
 0x247   :  { %4227 = vst [vmem:[%s5930_s3 + $0x28] sm:$0xff] %v4091_v31   ;;  %v4279_v38 = vadd.f32 %v4278_v32, %v3019_v34  ;;  %v4280_v39 = vadd.f32 %v5720_v33, %v2444_v37  ;;  %v3022_v40 = vpop.f32.mrb[26].mxu0  ;;  %v2446_v41 = vpop.f32.mrb[27].mxu1 }
 0x248   :  { %v3024_v42 = vpop.f32.mrb[27].mxu0 }
 0x249   :  { %v4281_v43 = vadd.f32 %v4280_v39, %v3022_v40  ;;  %v3238_v44 = vmax.f32 %v4279_v38, 0.0 }
 0x24b   :  { %v3239_v45 = vmax.f32 %v4281_v43, 0.0 }
 0x24c   :  { %v2449_v46 = vpop.f32.mrb[28].mxu1 }
 0x24d   :  { %v4096_v47 = vpack.c.bf16 %v3239_v45, %v3238_v44  ;;  %v4282_v48 = vadd.f32 %v5720_v33, %v2449_v46  ;;  %v3027_v49 = vpop.f32.mrb[28].mxu0  ;;  %v2451_v50 = vpop.f32.mrb[29].mxu1 }
 0x24e   :  { %v3029_v51 = vpop.f32.mrb[29].mxu0  ;;  %v2452_v52 = vpop.f32.mrb[30].mxu1 }
 0x24f   :  { %4228 = vst [vmem:[%s5930_s3 + $0x30] sm:$0xff] %v4096_v47   ;;  %v4283_v53 = vadd.f32 %v4282_v48, %v3027_v49  ;;  %v4284_v54 = vadd.f32 %v5720_v33, %v2452_v52  ;;  %v3030_v55 = vpop.f32.mrb[30].mxu0  ;;  %v2454_v56 = vpop.f32.mrb[31].mxu1 }
 0x250   :  { %v3032_v57 = vpop.f32.mrb[31].mxu0 }
 0x251   :  { %v4285_v0 = vadd.f32 %v4284_v54, %v3030_v55  ;;  %v3240_v58 = vmax.f32 %v4283_v53, 0.0 }
 0x253   :  { %v3241_v59 = vmax.f32 %v4285_v0, 0.0 }
 0x254   :  { %v2457_v60 = vpop.f32.mrb[32].mxu1 }
 0x255   :  { %v4101_v61 = vpack.c.bf16 %v3241_v59, %v3240_v58  ;;  %v4286_v62 = vadd.f32 %v5720_v33, %v2457_v60  ;;  %v3035_v63 = vpop.f32.mrb[32].mxu0  ;;  %v2459_v1 = vpop.f32.mrb[33].mxu1 }
 0x256   :  { %v3037_v2 = vpop.f32.mrb[33].mxu0  ;;  %v2460_v3 = vpop.f32.mrb[34].mxu1 }
 0x257   :  { %4229 = vst [vmem:[%s5930_s3 + $0x38] sm:$0xff] %v4101_v61   ;;  %v4287_v4 = vadd.f32 %v4286_v62, %v3035_v63  ;;  %v4288_v5 = vadd.f32 %v5720_v33, %v2460_v3  ;;  %v3038_v6 = vpop.f32.mrb[34].mxu0  ;;  %v2462_v7 = vpop.f32.mrb[35].mxu1 }
 0x258   :  { %v3040_v8 = vpop.f32.mrb[35].mxu0 }
 0x259   :  { %v4289_v9 = vadd.f32 %v4288_v5, %v3038_v6  ;;  %v3242_v10 = vmax.f32 %v4287_v4, 0.0 }
 0x25b   :  { %v3243_v11 = vmax.f32 %v4289_v9, 0.0 }
 0x25c   :  { %v2465_v12 = vpop.f32.mrb[36].mxu1 }
 0x25d   :  { %v4106_v13 = vpack.c.bf16 %v3243_v11, %v3242_v10  ;;  %v4290_v14 = vadd.f32 %v5720_v33, %v2465_v12  ;;  %v3043_v15 = vpop.f32.mrb[36].mxu0  ;;  %v2467_v16 = vpop.f32.mrb[37].mxu1 }
 0x25e   :  { %v3045_v17 = vpop.f32.mrb[37].mxu0  ;;  %v2468_v18 = vpop.f32.mrb[38].mxu1 }
 0x25f   :  { %4230 = vst [vmem:[%s5930_s3 + $0x40] sm:$0xff] %v4106_v13   ;;  %v4291_v19 = vadd.f32 %v4290_v14, %v3043_v15  ;;  %v4292_v20 = vadd.f32 %v5720_v33, %v2468_v18  ;;  %v3046_v21 = vpop.f32.mrb[38].mxu0  ;;  %v2470_v22 = vpop.f32.mrb[39].mxu1 }
 0x260   :  { %v3048_v23 = vpop.f32.mrb[39].mxu0 }
 0x261   :  { %v4293_v24 = vadd.f32 %v4292_v20, %v3046_v21  ;;  %v3244_v25 = vmax.f32 %v4291_v19, 0.0 }
 0x263   :  { %v3245_v26 = vmax.f32 %v4293_v24, 0.0 }
 0x264   :  { %v2473_v27 = vpop.f32.mrb[40].mxu1 }
 0x265   :  { %v4111_v28 = vpack.c.bf16 %v3245_v26, %v3244_v25  ;;  %v4294_v29 = vadd.f32 %v5720_v33, %v2473_v27  ;;  %v3051_v30 = vpop.f32.mrb[40].mxu0  ;;  %v2475_v31 = vpop.f32.mrb[41].mxu1 }
 0x266   :  { %v3053_v32 = vpop.f32.mrb[41].mxu0  ;;  %v2476_v34 = vpop.f32.mrb[42].mxu1 }
 0x267   :  { %4231 = vst [vmem:[%s5930_s3 + $0x48] sm:$0xff] %v4111_v28   ;;  %v4295_v35 = vadd.f32 %v4294_v29, %v3051_v30  ;;  %v4296_v36 = vadd.f32 %v5720_v33, %v2476_v34  ;;  %v3054_v37 = vpop.f32.mrb[42].mxu0  ;;  %v2478_v38 = vpop.f32.mrb[43].mxu1 }
 0x268   :  { %v3056_v39 = vpop.f32.mrb[43].mxu0 }
 0x269   :  { %v4297_v40 = vadd.f32 %v4296_v36, %v3054_v37  ;;  %v3246_v41 = vmax.f32 %v4295_v35, 0.0 }
 0x26b   :  { %v3247_v42 = vmax.f32 %v4297_v40, 0.0 }
 0x26c   :  { %v2481_v43 = vpop.f32.mrb[44].mxu1 }
 0x26d   :  { %v4116_v44 = vpack.c.bf16 %v3247_v42, %v3246_v41  ;;  %v4298_v45 = vadd.f32 %v5720_v33, %v2481_v43  ;;  %v3059_v46 = vpop.f32.mrb[44].mxu0  ;;  %v2483_v47 = vpop.f32.mrb[45].mxu1 }
 0x26e   :  { %v3061_v48 = vpop.f32.mrb[45].mxu0  ;;  %v2484_v49 = vpop.f32.mrb[46].mxu1 }
 0x26f   :  { %4232 = vst [vmem:[%s5930_s3 + $0x50] sm:$0xff] %v4116_v44   ;;  %v4299_v50 = vadd.f32 %v4298_v45, %v3059_v46  ;;  %v4300_v51 = vadd.f32 %v5720_v33, %v2484_v49  ;;  %v3062_v52 = vpop.f32.mrb[46].mxu0  ;;  %v2486_v53 = vpop.f32.mrb[47].mxu1 }
 0x270   :  { %v3064_v54 = vpop.f32.mrb[47].mxu0 }
 0x271   :  { %v4301_v55 = vadd.f32 %v4300_v51, %v3062_v52  ;;  %v3248_v56 = vmax.f32 %v4299_v50, 0.0 }
 0x273   :  { %v3249_v57 = vmax.f32 %v4301_v55, 0.0 }
 0x274   :  { %v2489_v0 = vpop.f32.mrb[48].mxu1 }
 0x275   :  { %v4121_v58 = vpack.c.bf16 %v3249_v57, %v3248_v56  ;;  %v4302_v59 = vadd.f32 %v5720_v33, %v2489_v0  ;;  %v3067_v60 = vpop.f32.mrb[48].mxu0  ;;  %v2491_v61 = vpop.f32.mrb[49].mxu1 }
 0x276   :  { %v3069_v62 = vpop.f32.mrb[49].mxu0  ;;  %v2492_v63 = vpop.f32.mrb[50].mxu1 }
 0x277   :  { %4233 = vst [vmem:[%s5930_s3 + $0x58] sm:$0xff] %v4121_v58   ;;  %v4303_v1 = vadd.f32 %v4302_v59, %v3067_v60  ;;  %v4304_v2 = vadd.f32 %v5720_v33, %v2492_v63  ;;  %v3070_v3 = vpop.f32.mrb[50].mxu0  ;;  %v2494_v4 = vpop.f32.mrb[51].mxu1 }
 0x278   :  { %v3072_v5 = vpop.f32.mrb[51].mxu0 }
 0x279   :  { %v4305_v6 = vadd.f32 %v4304_v2, %v3070_v3  ;;  %v3250_v7 = vmax.f32 %v4303_v1, 0.0 }
 0x27b   :  { %v3251_v8 = vmax.f32 %v4305_v6, 0.0 }
 0x27c   :  { %v2497_v9 = vpop.f32.mrb[52].mxu1 }
 0x27d   :  { %v4126_v10 = vpack.c.bf16 %v3251_v8, %v3250_v7  ;;  %v4306_v11 = vadd.f32 %v5720_v33, %v2497_v9  ;;  %v3075_v12 = vpop.f32.mrb[52].mxu0  ;;  %v2499_v13 = vpop.f32.mrb[53].mxu1 }
 0x27e   :  { %v3077_v14 = vpop.f32.mrb[53].mxu0  ;;  %v2500_v15 = vpop.f32.mrb[54].mxu1 }
 0x27f   :  { %4234 = vst [vmem:[%s5930_s3 + $0x60] sm:$0xff] %v4126_v10   ;;  %v4307_v16 = vadd.f32 %v4306_v11, %v3075_v12  ;;  %v4308_v17 = vadd.f32 %v5720_v33, %v2500_v15  ;;  %v3078_v18 = vpop.f32.mrb[54].mxu0  ;;  %v2502_v19 = vpop.f32.mrb[55].mxu1 }
 0x280   :  { %v3080_v20 = vpop.f32.mrb[55].mxu0 }
 0x281   :  { %v4309_v21 = vadd.f32 %v4308_v17, %v3078_v18  ;;  %v3252_v22 = vmax.f32 %v4307_v16, 0.0 }
 0x283   :  { %v3253_v23 = vmax.f32 %v4309_v21, 0.0 }
 0x284   :  { %v2505_v24 = vpop.f32.mrb[56].mxu1 }
 0x285   :  { %v4131_v25 = vpack.c.bf16 %v3253_v23, %v3252_v22  ;;  %v4310_v26 = vadd.f32 %v5720_v33, %v2505_v24  ;;  %v3083_v27 = vpop.f32.mrb[56].mxu0  ;;  %v2507_v28 = vpop.f32.mrb[57].mxu1 }
 0x286   :  { %v3085_v29 = vpop.f32.mrb[57].mxu0  ;;  %v2508_v30 = vpop.f32.mrb[58].mxu1 }
 0x287   :  { %4235 = vst [vmem:[%s5930_s3 + $0x68] sm:$0xff] %v4131_v25   ;;  %v4311_v31 = vadd.f32 %v4310_v26, %v3083_v27  ;;  %v4312_v32 = vadd.f32 %v5720_v33, %v2508_v30  ;;  %v3086_v34 = vpop.f32.mrb[58].mxu0  ;;  %v2510_v35 = vpop.f32.mrb[59].mxu1 }
 0x288   :  { %v3088_v36 = vpop.f32.mrb[59].mxu0 }
 0x289   :  { %v4313_v37 = vadd.f32 %v4312_v32, %v3086_v34  ;;  %v3254_v38 = vmax.f32 %v4311_v31, 0.0 }
 0x28b   :  { %v3255_v39 = vmax.f32 %v4313_v37, 0.0 }
 0x28c   :  { %v2513_v40 = vpop.f32.mrb[60].mxu1 }
 0x28d   :  { %v4136_v41 = vpack.c.bf16 %v3255_v39, %v3254_v38  ;;  %v4314_v42 = vadd.f32 %v5720_v33, %v2513_v40  ;;  %v3091_v43 = vpop.f32.mrb[60].mxu0  ;;  %v2515_v44 = vpop.f32.mrb[61].mxu1 }
 0x28e   :  { %v3093_v45 = vpop.f32.mrb[61].mxu0  ;;  %v2516_v46 = vpop.f32.mrb[62].mxu1 }
 0x28f   :  { %4236 = vst [vmem:[%s5930_s3 + $0x70] sm:$0xff] %v4136_v41   ;;  %v4315_v47 = vadd.f32 %v4314_v42, %v3091_v43  ;;  %v4316_v48 = vadd.f32 %v5720_v33, %v2516_v46  ;;  %v3094_v49 = vpop.f32.mrb[62].mxu0  ;;  %v2518_v50 = vpop.f32.mrb[63].mxu1 }
 0x290   :  { %v3096_v51 = vpop.f32.mrb[63].mxu0 }
 0x291   :  { %v4317_v52 = vadd.f32 %v4316_v48, %v3094_v49  ;;  %v3256_v53 = vmax.f32 %v4315_v47, 0.0 }
 0x293   :  { %v3257_v54 = vmax.f32 %v4317_v52, 0.0 }
 0x294   :  { %v2521_v55 = vpop.f32.mrb[64].mxu1 }
 0x295   :  { %v4141_v56 = vpack.c.bf16 %v3257_v54, %v3256_v53  ;;  %v4318_v57 = vadd.f32 %v5720_v33, %v2521_v55  ;;  %v3099_v0 = vpop.f32.mrb[64].mxu0  ;;  %v2523_v58 = vpop.f32.mrb[65].mxu1 }
 0x296   :  { %v3101_v59 = vpop.f32.mrb[65].mxu0  ;;  %v2524_v60 = vpop.f32.mrb[66].mxu1 }
 0x297   :  { %4237 = vst [vmem:[%s5930_s3 + $0x78] sm:$0xff] %v4141_v56   ;;  %v4319_v61 = vadd.f32 %v4318_v57, %v3099_v0  ;;  %v4320_v62 = vadd.f32 %v5720_v33, %v2524_v60  ;;  %v3102_v63 = vpop.f32.mrb[66].mxu0  ;;  %v2526_v1 = vpop.f32.mrb[67].mxu1 }
 0x298   :  { %v3104_v2 = vpop.f32.mrb[67].mxu0 }
 0x299   :  { %v4321_v3 = vadd.f32 %v4320_v62, %v3102_v63  ;;  %v3258_v4 = vmax.f32 %v4319_v61, 0.0 }
 0x29b   :  { %v3259_v5 = vmax.f32 %v4321_v3, 0.0 }
 0x29c   :  { %v2529_v6 = vpop.f32.mrb[68].mxu1 }
 0x29d   :  { %v4146_v7 = vpack.c.bf16 %v3259_v5, %v3258_v4  ;;  %v4322_v8 = vadd.f32 %v5720_v33, %v2529_v6  ;;  %v3107_v9 = vpop.f32.mrb[68].mxu0  ;;  %v2531_v10 = vpop.f32.mrb[69].mxu1 }
 0x29e   :  { %v3109_v11 = vpop.f32.mrb[69].mxu0  ;;  %v2532_v12 = vpop.f32.mrb[70].mxu1 }
 0x29f   :  { %4238 = vst [vmem:[%s5930_s3 + $0x80] sm:$0xff] %v4146_v7   ;;  %v4323_v13 = vadd.f32 %v4322_v8, %v3107_v9  ;;  %v4324_v14 = vadd.f32 %v5720_v33, %v2532_v12  ;;  %v3110_v15 = vpop.f32.mrb[70].mxu0  ;;  %v2534_v16 = vpop.f32.mrb[71].mxu1 }
 0x2a0   :  { %v3112_v17 = vpop.f32.mrb[71].mxu0 }
 0x2a1   :  { %v4325_v18 = vadd.f32 %v4324_v14, %v3110_v15  ;;  %v3260_v19 = vmax.f32 %v4323_v13, 0.0 }
 0x2a3   :  { %v3261_v20 = vmax.f32 %v4325_v18, 0.0 }
 0x2a4   :  { %v2537_v21 = vpop.f32.mrb[72].mxu1 }
 0x2a5   :  { %v4151_v22 = vpack.c.bf16 %v3261_v20, %v3260_v19  ;;  %v4326_v23 = vadd.f32 %v5720_v33, %v2537_v21  ;;  %v3115_v24 = vpop.f32.mrb[72].mxu0  ;;  %v2539_v25 = vpop.f32.mrb[73].mxu1 }
 0x2a6   :  { %v3117_v26 = vpop.f32.mrb[73].mxu0  ;;  %v2540_v27 = vpop.f32.mrb[74].mxu1 }
 0x2a7   :  { %4239 = vst [vmem:[%s5930_s3 + $0x88] sm:$0xff] %v4151_v22   ;;  %v4327_v28 = vadd.f32 %v4326_v23, %v3115_v24  ;;  %v4328_v29 = vadd.f32 %v5720_v33, %v2540_v27  ;;  %v3118_v30 = vpop.f32.mrb[74].mxu0  ;;  %v2542_v31 = vpop.f32.mrb[75].mxu1 }
 0x2a8   :  { %v3120_v32 = vpop.f32.mrb[75].mxu0 }
 0x2a9   :  { %v4329_v34 = vadd.f32 %v4328_v29, %v3118_v30  ;;  %v3262_v35 = vmax.f32 %v4327_v28, 0.0 }
 0x2ab   :  { %v3263_v36 = vmax.f32 %v4329_v34, 0.0 }
 0x2ac   :  { %v2545_v37 = vpop.f32.mrb[76].mxu1 }
 0x2ad   :  { %v4156_v38 = vpack.c.bf16 %v3263_v36, %v3262_v35  ;;  %v4330_v39 = vadd.f32 %v5720_v33, %v2545_v37  ;;  %v3123_v40 = vpop.f32.mrb[76].mxu0  ;;  %v2547_v41 = vpop.f32.mrb[77].mxu1 }
 0x2ae   :  { %v3125_v42 = vpop.f32.mrb[77].mxu0  ;;  %v2548_v43 = vpop.f32.mrb[78].mxu1 }
 0x2af   :  { %4240 = vst [vmem:[%s5930_s3 + $0x90] sm:$0xff] %v4156_v38   ;;  %v4331_v44 = vadd.f32 %v4330_v39, %v3123_v40  ;;  %v4332_v45 = vadd.f32 %v5720_v33, %v2548_v43  ;;  %v3126_v46 = vpop.f32.mrb[78].mxu0  ;;  %v2550_v47 = vpop.f32.mrb[79].mxu1 }
 0x2b0   :  { %v3128_v48 = vpop.f32.mrb[79].mxu0 }
 0x2b1   :  { %v4333_v49 = vadd.f32 %v4332_v45, %v3126_v46  ;;  %v3264_v50 = vmax.f32 %v4331_v44, 0.0 }
 0x2b3   :  { %v3265_v51 = vmax.f32 %v4333_v49, 0.0 }
 0x2b4   :  { %v2553_v52 = vpop.f32.mrb[80].mxu1 }
 0x2b5   :  { %v4161_v53 = vpack.c.bf16 %v3265_v51, %v3264_v50  ;;  %v4334_v54 = vadd.f32 %v5720_v33, %v2553_v52  ;;  %v3131_v55 = vpop.f32.mrb[80].mxu0  ;;  %v2555_v56 = vpop.f32.mrb[81].mxu1 }
 0x2b6   :  { %v3133_v57 = vpop.f32.mrb[81].mxu0  ;;  %v2556_v0 = vpop.f32.mrb[82].mxu1 }
 0x2b7   :  { %4241 = vst [vmem:[%s5930_s3 + $0x98] sm:$0xff] %v4161_v53   ;;  %v4335_v58 = vadd.f32 %v4334_v54, %v3131_v55  ;;  %v4336_v59 = vadd.f32 %v5720_v33, %v2556_v0  ;;  %v3134_v60 = vpop.f32.mrb[82].mxu0  ;;  %v2558_v61 = vpop.f32.mrb[83].mxu1 }
 0x2b8   :  { %v3136_v62 = vpop.f32.mrb[83].mxu0 }
 0x2b9   :  { %v4337_v63 = vadd.f32 %v4336_v59, %v3134_v60  ;;  %v3266_v1 = vmax.f32 %v4335_v58, 0.0 }
 0x2bb   :  { %v3267_v2 = vmax.f32 %v4337_v63, 0.0 }
 0x2bc   :  { %v2561_v3 = vpop.f32.mrb[84].mxu1 }
 0x2bd   :  { %v4166_v4 = vpack.c.bf16 %v3267_v2, %v3266_v1  ;;  %v4338_v5 = vadd.f32 %v5720_v33, %v2561_v3  ;;  %v3139_v6 = vpop.f32.mrb[84].mxu0  ;;  %v2563_v7 = vpop.f32.mrb[85].mxu1 }
 0x2be   :  { %v3141_v8 = vpop.f32.mrb[85].mxu0  ;;  %v2564_v9 = vpop.f32.mrb[86].mxu1 }
 0x2bf   :  { %4242 = vst [vmem:[%s5930_s3 + $0xa0] sm:$0xff] %v4166_v4   ;;  %v4339_v10 = vadd.f32 %v4338_v5, %v3139_v6  ;;  %v4340_v11 = vadd.f32 %v5720_v33, %v2564_v9  ;;  %v3142_v12 = vpop.f32.mrb[86].mxu0  ;;  %v2566_v13 = vpop.f32.mrb[87].mxu1 }
 0x2c0   :  { %v3144_v14 = vpop.f32.mrb[87].mxu0 }
 0x2c1   :  { %v4341_v15 = vadd.f32 %v4340_v11, %v3142_v12  ;;  %v3268_v16 = vmax.f32 %v4339_v10, 0.0 }
 0x2c3   :  { %v3269_v17 = vmax.f32 %v4341_v15, 0.0 }
 0x2c4   :  { %v2569_v18 = vpop.f32.mrb[88].mxu1 }
 0x2c5   :  { %v4171_v19 = vpack.c.bf16 %v3269_v17, %v3268_v16  ;;  %v4342_v20 = vadd.f32 %v5720_v33, %v2569_v18  ;;  %v3147_v21 = vpop.f32.mrb[88].mxu0  ;;  %v2571_v22 = vpop.f32.mrb[89].mxu1 }
 0x2c6   :  { %v3149_v23 = vpop.f32.mrb[89].mxu0  ;;  %v2572_v24 = vpop.f32.mrb[90].mxu1 }
 0x2c7   :  { %4243 = vst [vmem:[%s5930_s3 + $0xa8] sm:$0xff] %v4171_v19   ;;  %v4343_v25 = vadd.f32 %v4342_v20, %v3147_v21  ;;  %v4344_v26 = vadd.f32 %v5720_v33, %v2572_v24  ;;  %v3150_v27 = vpop.f32.mrb[90].mxu0  ;;  %v2574_v28 = vpop.f32.mrb[91].mxu1 }
 0x2c8   :  { %v3152_v29 = vpop.f32.mrb[91].mxu0 }
 0x2c9   :  { %v4345_v30 = vadd.f32 %v4344_v26, %v3150_v27  ;;  %v3270_v31 = vmax.f32 %v4343_v25, 0.0 }
 0x2cb   :  { %v3271_v32 = vmax.f32 %v4345_v30, 0.0 }
 0x2cc   :  { %v2577_v34 = vpop.f32.mrb[92].mxu1 }
 0x2cd   :  { %v4176_v35 = vpack.c.bf16 %v3271_v32, %v3270_v31  ;;  %v4346_v36 = vadd.f32 %v5720_v33, %v2577_v34  ;;  %v3155_v37 = vpop.f32.mrb[92].mxu0  ;;  %v2579_v38 = vpop.f32.mrb[93].mxu1 }
 0x2ce   :  { %v3157_v39 = vpop.f32.mrb[93].mxu0  ;;  %v2580_v40 = vpop.f32.mrb[94].mxu1 }
 0x2cf   :  { %4244 = vst [vmem:[%s5930_s3 + $0xb0] sm:$0xff] %v4176_v35   ;;  %v4347_v41 = vadd.f32 %v4346_v36, %v3155_v37  ;;  %v4348_v42 = vadd.f32 %v5720_v33, %v2580_v40  ;;  %v3158_v43 = vpop.f32.mrb[94].mxu0  ;;  %v2582_v44 = vpop.f32.mrb[95].mxu1 }
 0x2d0   :  { %v3160_v45 = vpop.f32.mrb[95].mxu0 }
 0x2d1   :  { %v4349_v46 = vadd.f32 %v4348_v42, %v3158_v43  ;;  %v3272_v47 = vmax.f32 %v4347_v41, 0.0 }
 0x2d3   :  { %v3273_v48 = vmax.f32 %v4349_v46, 0.0 }
 0x2d4   :  { %v2585_v49 = vpop.f32.mrb[96].mxu1 }
 0x2d5   :  { %v4181_v50 = vpack.c.bf16 %v3273_v48, %v3272_v47  ;;  %v4350_v51 = vadd.f32 %v5720_v33, %v2585_v49  ;;  %v3163_v52 = vpop.f32.mrb[96].mxu0  ;;  %v2587_v53 = vpop.f32.mrb[97].mxu1 }
 0x2d6   :  { %v3165_v54 = vpop.f32.mrb[97].mxu0  ;;  %v2588_v55 = vpop.f32.mrb[98].mxu1 }
 0x2d7   :  { %4245 = vst [vmem:[%s5930_s3 + $0xb8] sm:$0xff] %v4181_v50   ;;  %v4351_v56 = vadd.f32 %v4350_v51, %v3163_v52  ;;  %v4352_v57 = vadd.f32 %v5720_v33, %v2588_v55  ;;  %v3166_v0 = vpop.f32.mrb[98].mxu0  ;;  %v2590_v58 = vpop.f32.mrb[99].mxu1 }
 0x2d8   :  { %v3168_v59 = vpop.f32.mrb[99].mxu0 }
 0x2d9   :  { %v4353_v60 = vadd.f32 %v4352_v57, %v3166_v0  ;;  %v3274_v61 = vmax.f32 %v4351_v56, 0.0 }
 0x2db   :  { %v3275_v62 = vmax.f32 %v4353_v60, 0.0 }
 0x2dc   :  { %v2593_v63 = vpop.f32.mrb[100].mxu1 }
 0x2dd   :  { %v4186_v1 = vpack.c.bf16 %v3275_v62, %v3274_v61  ;;  %v4354_v2 = vadd.f32 %v5720_v33, %v2593_v63  ;;  %v3171_v3 = vpop.f32.mrb[100].mxu0  ;;  %v2595_v4 = vpop.f32.mrb[101].mxu1  ;;  %v4703_v62 = vld [vmem:[%s5929_s2] ss:$0 sm:$0xff] }
 0x2de   :  { %v3173_v5 = vpop.f32.mrb[101].mxu0  ;;  %v2596_v6 = vpop.f32.mrb[102].mxu1 }
 0x2df   :  { %4246 = vst [vmem:[%s5930_s3 + $0xc0] sm:$0xff] %v4186_v1   ;;  %v4355_v7 = vadd.f32 %v4354_v2, %v3171_v3  ;;  %v4356_v8 = vadd.f32 %v5720_v33, %v2596_v6  ;;  %v3174_v9 = vpop.f32.mrb[102].mxu0  ;;  %v2598_v10 = vpop.f32.mrb[103].mxu1 }
 0x2e0   :  { %v3176_v11 = vpop.f32.mrb[103].mxu0 }
 0x2e1   :  { %v4357_v12 = vadd.f32 %v4356_v8, %v3174_v9  ;;  %v3276_v13 = vmax.f32 %v4355_v7, 0.0 }
 0x2e3   :  { %v3277_v14 = vmax.f32 %v4357_v12, 0.0 }
 0x2e4   :  { %v2601_v15 = vpop.f32.mrb[104].mxu1 }
 0x2e5   :  { %v4191_v16 = vpack.c.bf16 %v3277_v14, %v3276_v13  ;;  %v4358_v17 = vadd.f32 %v5720_v33, %v2601_v15  ;;  %v3179_v18 = vpop.f32.mrb[104].mxu0  ;;  %v2603_v19 = vpop.f32.mrb[105].mxu1 }
 0x2e6   :  { %v3181_v20 = vpop.f32.mrb[105].mxu0  ;;  %v2604_v21 = vpop.f32.mrb[106].mxu1 }
 0x2e7   :  { %4247 = vst [vmem:[%s5930_s3 + $0xc8] sm:$0xff] %v4191_v16   ;;  %v4359_v22 = vadd.f32 %v4358_v17, %v3179_v18  ;;  %v4360_v23 = vadd.f32 %v5720_v33, %v2604_v21  ;;  %v3182_v24 = vpop.f32.mrb[106].mxu0  ;;  %v2606_v25 = vpop.f32.mrb[107].mxu1 }
 0x2e8   :  { %v3184_v26 = vpop.f32.mrb[107].mxu0 }
 0x2e9   :  { %v4361_v27 = vadd.f32 %v4360_v23, %v3182_v24  ;;  %v3278_v28 = vmax.f32 %v4359_v22, 0.0 }
 0x2eb   :  { %v3279_v29 = vmax.f32 %v4361_v27, 0.0 }
 0x2ec   :  { %v2609_v30 = vpop.f32.mrb[108].mxu1 }
 0x2ed   :  { %v4196_v31 = vpack.c.bf16 %v3279_v29, %v3278_v28  ;;  %v4362_v32 = vadd.f32 %v5720_v33, %v2609_v30  ;;  %v3187_v34 = vpop.f32.mrb[108].mxu0  ;;  %v2611_v35 = vpop.f32.mrb[109].mxu1 }
 0x2ee   :  { %v3189_v36 = vpop.f32.mrb[109].mxu0  ;;  %v2612_v37 = vpop.f32.mrb[110].mxu1 }
 0x2ef   :  { %4248 = vst [vmem:[%s5930_s3 + $0xd0] sm:$0xff] %v4196_v31   ;;  %v4363_v38 = vadd.f32 %v4362_v32, %v3187_v34  ;;  %v4364_v39 = vadd.f32 %v5720_v33, %v2612_v37  ;;  %v3190_v40 = vpop.f32.mrb[110].mxu0  ;;  %v2614_v41 = vpop.f32.mrb[111].mxu1 }
 0x2f0   :  { %v3192_v42 = vpop.f32.mrb[111].mxu0 }
 0x2f1   :  { %v4365_v43 = vadd.f32 %v4364_v39, %v3190_v40  ;;  %v3280_v44 = vmax.f32 %v4363_v38, 0.0 }
 0x2f3   :  { %v3281_v45 = vmax.f32 %v4365_v43, 0.0 }
 0x2f4   :  { %v2617_v46 = vpop.f32.mrb[112].mxu1 }
 0x2f5   :  { %v4201_v47 = vpack.c.bf16 %v3281_v45, %v3280_v44  ;;  %v4366_v48 = vadd.f32 %v5720_v33, %v2617_v46  ;;  %v3195_v49 = vpop.f32.mrb[112].mxu0  ;;  %v2619_v50 = vpop.f32.mrb[113].mxu1 }
 0x2f6   :  { %v3197_v51 = vpop.f32.mrb[113].mxu0  ;;  %v2620_v52 = vpop.f32.mrb[114].mxu1 }
 0x2f7   :  { %4249 = vst [vmem:[%s5930_s3 + $0xd8] sm:$0xff] %v4201_v47   ;;  %v4367_v53 = vadd.f32 %v4366_v48, %v3195_v49  ;;  %v4368_v54 = vadd.f32 %v5720_v33, %v2620_v52  ;;  %v3198_v55 = vpop.f32.mrb[114].mxu0  ;;  %v2622_v56 = vpop.f32.mrb[115].mxu1 }
 0x2f8   :  { %v3200_v57 = vpop.f32.mrb[115].mxu0 }
 0x2f9   :  { %v4369_v0 = vadd.f32 %v4368_v54, %v3198_v55  ;;  %v3282_v58 = vmax.f32 %v4367_v53, 0.0 }
 0x2fb   :  { %v3283_v59 = vmax.f32 %v4369_v0, 0.0 }
 0x2fc   :  { %v2625_v60 = vpop.f32.mrb[116].mxu1 }
 0x2fd   :  { %v4206_v61 = vpack.c.bf16 %v3283_v59, %v3282_v58  ;;  %v4370_v63 = vadd.f32 %v4703_v62, %v2625_v60  ;;  %v3203_v1 = vpop.f32.mrb[116].mxu0  ;;  %v2627_v2 = vpop.f32.mrb[117].mxu1 }
 0x2fe   :  { %v3205_v3 = vpop.f32.mrb[117].mxu0  ;;  %v2628_v4 = vpop.f32.mrb[118].mxu1 }
 0x2ff   :  { %4250 = vst [vmem:[%s5930_s3 + $0xe0] sm:$0xff] %v4206_v61   ;;  %v4371_v33 = vadd.f32 %v4370_v63, %v3203_v1  ;;  %v4372_v5 = vadd.f32 %v4703_v62, %v2628_v4  ;;  %v3206_v6 = vpop.f32.mrb[118].mxu0  ;;  %v2630_v7 = vpop.f32.mrb[119].mxu1 }
 0x300   :  { %v3208_v8 = vpop.f32.mrb[119].mxu0 }
 0x301   :  { %v4373_v9 = vadd.f32 %v4372_v5, %v3206_v6  ;;  %v3284_v10 = vmax.f32 %v4371_v33, 0.0 }
 0x303   :  { %v3285_v11 = vmax.f32 %v4373_v9, 0.0 }
 0x304   :  { %v2633_v12 = vpop.f32.mrb[120].mxu1 }
 0x305   :  { %v4211_v13 = vpack.c.bf16 %v3285_v11, %v3284_v10  ;;  %v4374_v14 = vadd.f32 %v4703_v62, %v2633_v12  ;;  %v3211_v15 = vpop.f32.mrb[120].mxu0  ;;  %v2635_v16 = vpop.f32.mrb[121].mxu1 }
 0x306   :  { %v3213_v17 = vpop.f32.mrb[121].mxu0  ;;  %v2636_v18 = vpop.f32.mrb[122].mxu1 }
 0x307   :  { %4251 = vst [vmem:[%s5930_s3 + $0xe8] sm:$0xff] %v4211_v13   ;;  %v4375_v19 = vadd.f32 %v4374_v14, %v3211_v15  ;;  %v4376_v20 = vadd.f32 %v4703_v62, %v2636_v18  ;;  %v3214_v21 = vpop.f32.mrb[122].mxu0  ;;  %v2638_v22 = vpop.f32.mrb[123].mxu1 }
 0x308   :  { %v3216_v23 = vpop.f32.mrb[123].mxu0 }
 0x309   :  { %v4377_v24 = vadd.f32 %v4376_v20, %v3214_v21  ;;  %v3286_v25 = vmax.f32 %v4375_v19, 0.0 }
 0x30b   :  { %v3287_v26 = vmax.f32 %v4377_v24, 0.0 }
 0x30c   :  { %v2641_v27 = vpop.f32.mrb[124].mxu1 }
 0x30d   :  { %v4216_v28 = vpack.c.bf16 %v3287_v26, %v3286_v25  ;;  %v4378_v29 = vadd.f32 %v4703_v62, %v2641_v27  ;;  %v3219_v30 = vpop.f32.mrb[124].mxu0  ;;  %v2643_v31 = vpop.f32.mrb[125].mxu1 }
 0x30e   :  { %v3221_v32 = vpop.f32.mrb[125].mxu0  ;;  %v2644_v34 = vpop.f32.mrb[126].mxu1 }
 0x30f   :  { %4252 = vst [vmem:[%s5930_s3 + $0xf0] sm:$0xff] %v4216_v28   ;;  %v4379_v35 = vadd.f32 %v4378_v29, %v3219_v30  ;;  %v4380_v36 = vadd.f32 %v4703_v62, %v2644_v34  ;;  %v3222_v37 = vpop.f32.mrb[126].mxu0  ;;  %v2646_v38 = vpop.f32.mrb[127].mxu1 }
 0x310   :  { %v3224_v39 = vpop.f32.mrb[127].mxu0 }
 0x311   :  { %v4381_v40 = vadd.f32 %v4380_v36, %v3222_v37  ;;  %v3288_v41 = vmax.f32 %v4379_v35, 0.0 }
 0x313   :  { %v3289_v42 = vmax.f32 %v4381_v40, 0.0 }
 0x315   :  { %v4221_v43 = vpack.c.bf16 %v3289_v42, %v3288_v41 }
 0x317   :  { %4253 = vst [vmem:[%s5930_s3 + $0xf8] sm:$0xff] %v4221_v43  }

// kernel: normal_discriminator_forward.7
= control target key start
LH: loop header
LB: loop body
LE: loop exit
PB: predicated region body
PF: predicated region fallthrough
CT: control target
= control target key end

     0   :  { %s5697_s1 = inlined_call_operand.vmem [shape: bf16[2048,256], index: 1, kind: input, shape index: {}]   ;;  %s5698_s0 = inlined_call_operand.vmem [shape: bf16[128,2048], index: 0, kind: input, shape index: {}]   ;;  %s5699_s2 = inlined_call_operand.vmem [shape: f32[1,256], index: 2, kind: input, shape index: {}]   ;;  %s5700_s3 = inlined_call_operand.vmem [shape: bf16[128,256], index: 3, kind: output, shape index: {}]  }
   0x1   :  { %v4054_v0 = vld [vmem:[%s5697_s1 + $0x4] ss:$8 sps:$4 sm:$0xff]   ;;  %v4058_v2 = vld [vmem:[%s5697_s1] ss:$8 sps:$4 sm:$0xff]   ;;  %v4060_v4 = vld [vmem:[%s5697_s1 + $0x14] ss:$8 sps:$4 sm:$0xff]  }
   0x2   :  { %v4056_v1 = vld [vmem:[%s5697_s1 + $0x404] ss:$8 sps:$4 sm:$0xff]   ;;  %2330 = vmatprep.subr.bf16.mxu1 %v4054_v0  ;;  %v4059_v3 = vld [vmem:[%s5697_s1 + $0x400] ss:$8 sps:$4 sm:$0xff]   ;;  %v4062_v5 = vld [vmem:[%s5697_s1 + $0x414] ss:$8 sps:$4 sm:$0xff]  }
   0x3   :  { %2782 = vmatprep.subr.bf16.mxu0 %v4056_v1  ;;  %2331 = vmatpush1.bf16.msra.mxu1 %v4058_v2  ;;  %v4064_v6 = vld [vmem:[%s5697_s1 + $0x10] ss:$8 sps:$4 sm:$0xff]   ;;  %v4066_v8 = vld [vmem:[%s5697_s1 + $0x24] ss:$8 sps:$4 sm:$0xff]   ;;  %v4070_v10 = vld [vmem:[%s5697_s1 + $0x20] ss:$8 sps:$4 sm:$0xff]  }
   0x4   :  { %2783 = vmatpush1.bf16.msra.mxu0 %v4059_v3  ;;  %2332 = vmatprep.subr.bf16.mxu1 %v4060_v4  ;;  %v4065_v7 = vld [vmem:[%s5697_s1 + $0x410] ss:$8 sps:$4 sm:$0xff]   ;;  %v4068_v9 = vld [vmem:[%s5697_s1 + $0x424] ss:$8 sps:$4 sm:$0xff]   ;;  %v4071_v11 = vld [vmem:[%s5697_s1 + $0x420] ss:$8 sps:$4 sm:$0xff]  }
   0x5   :  { %2784 = vmatprep.subr.bf16.mxu0 %v4062_v5  ;;  %v4072_v12 = vld [vmem:[%s5697_s1 + $0x34] ss:$8 sps:$4 sm:$0xff]   ;;  %v4076_v14 = vld [vmem:[%s5697_s1 + $0x30] ss:$8 sps:$4 sm:$0xff]   ;;  %v4078_v16 = vld [vmem:[%s5697_s1 + $0x44] ss:$8 sps:$4 sm:$0xff]  }
   0x6   :  { %v4074_v13 = vld [vmem:[%s5697_s1 + $0x434] ss:$8 sps:$4 sm:$0xff]   ;;  %v4077_v15 = vld [vmem:[%s5697_s1 + $0x430] ss:$8 sps:$4 sm:$0xff]   ;;  %v4080_v17 = vld [vmem:[%s5697_s1 + $0x444] ss:$8 sps:$4 sm:$0xff]  }
   0x7   :  { %2333 = vmatpush1.bf16.msra.mxu1 %v4064_v6  ;;  %v4082_v18 = vld [vmem:[%s5697_s1 + $0x40] ss:$8 sps:$4 sm:$0xff]   ;;  %v4084_v20 = vld [vmem:[%s5697_s1 + $0x54] ss:$8 sps:$4 sm:$0xff]   ;;  %v4088_v22 = vld [vmem:[%s5697_s1 + $0x50] ss:$8 sps:$4 sm:$0xff]  }
   0x8   :  { %2785 = vmatpush1.bf16.msra.mxu0 %v4065_v7  ;;  %2334 = vmatprep.subr.bf16.mxu1 %v4066_v8  ;;  %v4083_v19 = vld [vmem:[%s5697_s1 + $0x440] ss:$8 sps:$4 sm:$0xff]   ;;  %v4086_v21 = vld [vmem:[%s5697_s1 + $0x454] ss:$8 sps:$4 sm:$0xff]   ;;  %v4089_v23 = vld [vmem:[%s5697_s1 + $0x450] ss:$8 sps:$4 sm:$0xff]  }
   0x9   :  { %2786 = vmatprep.subr.bf16.mxu0 %v4068_v9  ;;  %v4090_v24 = vld [vmem:[%s5697_s1 + $0x64] ss:$8 sps:$4 sm:$0xff]   ;;  %v4094_v26 = vld [vmem:[%s5697_s1 + $0x60] ss:$8 sps:$4 sm:$0xff]   ;;  %v4096_v28 = vld [vmem:[%s5697_s1 + $0x74] ss:$8 sps:$4 sm:$0xff]  }
   0xa   :  { %v4092_v25 = vld [vmem:[%s5697_s1 + $0x464] ss:$8 sps:$4 sm:$0xff]   ;;  %v4095_v27 = vld [vmem:[%s5697_s1 + $0x460] ss:$8 sps:$4 sm:$0xff]   ;;  %v4098_v29 = vld [vmem:[%s5697_s1 + $0x474] ss:$8 sps:$4 sm:$0xff]  }
   0xb   :  { %2335 = vmatpush1.bf16.msra.mxu1 %v4070_v10  ;;  %v4100_v30 = vld [vmem:[%s5697_s1 + $0x70] ss:$8 sps:$4 sm:$0xff]   ;;  %v4102_v32 = vld [vmem:[%s5697_s1 + $0x84] ss:$8 sps:$4 sm:$0xff]   ;;  %v4106_v34 = vld [vmem:[%s5697_s1 + $0x80] ss:$8 sps:$4 sm:$0xff]  }
   0xc   :  { %2787 = vmatpush1.bf16.msra.mxu0 %v4071_v11  ;;  %2336 = vmatprep.subr.bf16.mxu1 %v4072_v12  ;;  %v4101_v31 = vld [vmem:[%s5697_s1 + $0x470] ss:$8 sps:$4 sm:$0xff]   ;;  %v4104_v33 = vld [vmem:[%s5697_s1 + $0x484] ss:$8 sps:$4 sm:$0xff]   ;;  %v4107_v35 = vld [vmem:[%s5697_s1 + $0x480] ss:$8 sps:$4 sm:$0xff]  }
   0xd   :  { %2788 = vmatprep.subr.bf16.mxu0 %v4074_v13  ;;  %v4108_v36 = vld [vmem:[%s5697_s1 + $0x94] ss:$8 sps:$4 sm:$0xff]   ;;  %v4112_v38 = vld [vmem:[%s5697_s1 + $0x90] ss:$8 sps:$4 sm:$0xff]   ;;  %v4114_v40 = vld [vmem:[%s5697_s1 + $0xa4] ss:$8 sps:$4 sm:$0xff]  }
   0xe   :  { %v4110_v37 = vld [vmem:[%s5697_s1 + $0x494] ss:$8 sps:$4 sm:$0xff]   ;;  %v4113_v39 = vld [vmem:[%s5697_s1 + $0x490] ss:$8 sps:$4 sm:$0xff]   ;;  %v4116_v41 = vld [vmem:[%s5697_s1 + $0x4a4] ss:$8 sps:$4 sm:$0xff]  }
   0xf   :  { %2337 = vmatpush1.bf16.msra.mxu1 %v4076_v14  ;;  %v4118_v42 = vld [vmem:[%s5697_s1 + $0xa0] ss:$8 sps:$4 sm:$0xff]   ;;  %v4120_v44 = vld [vmem:[%s5697_s1 + $0xb4] ss:$8 sps:$4 sm:$0xff]   ;;  %v4124_v46 = vld [vmem:[%s5697_s1 + $0xb0] ss:$8 sps:$4 sm:$0xff]  }
  0x10   :  { %2789 = vmatpush1.bf16.msra.mxu0 %v4077_v15  ;;  %2338 = vmatprep.subr.bf16.mxu1 %v4078_v16  ;;  %v4119_v43 = vld [vmem:[%s5697_s1 + $0x4a0] ss:$8 sps:$4 sm:$0xff]   ;;  %v4122_v45 = vld [vmem:[%s5697_s1 + $0x4b4] ss:$8 sps:$4 sm:$0xff]   ;;  %v4125_v47 = vld [vmem:[%s5697_s1 + $0x4b0] ss:$8 sps:$4 sm:$0xff]  }
  0x11   :  { %2790 = vmatprep.subr.bf16.mxu0 %v4080_v17  ;;  %v14_v48 = vld [vmem:[%s5698_s0] sm:$0xff]  ;;  %v4132_v58 = vld [vmem:[%s5697_s1 + $0xd4] ss:$8 sps:$4 sm:$0xff]   ;;  %v4136_v60 = vld [vmem:[%s5697_s1 + $0xd0] ss:$8 sps:$4 sm:$0xff]  }
  0x12   :  { %v22_v49 = vld [vmem:[%s5698_s0 + $0x40] sm:$0xff]  ;;  %v4134_v59 = vld [vmem:[%s5697_s1 + $0x4d4] ss:$8 sps:$4 sm:$0xff]   ;;  %v4137_v61 = vld [vmem:[%s5697_s1 + $0x4d0] ss:$8 sps:$4 sm:$0xff]  }
  0x13   :  { %2339 = vmatpush1.bf16.msra.mxu1 %v4082_v18  ;;  %v18_v50 = vld [vmem:[%s5698_s0 + $0x20] sm:$0xff]  ;;  %v3383_v53 = vcombine.high %v14_v48, %v22_v49  ;;  %v4144_v2 = vld [vmem:[%s5697_s1 + $0xf4] ss:$8 sps:$4 sm:$0xff]   ;;  %v4148_v4 = vld [vmem:[%s5697_s1 + $0xf0] ss:$8 sps:$4 sm:$0xff]   ;;  %v3382_v11 = vcombine.low %v14_v48, %v22_v49 }
  0x14   :  { %2791 = vmatpush1.bf16.msra.mxu0 %v4083_v19  ;;  %2340 = vmatprep.subr.bf16.mxu1 %v4084_v20  ;;  %v26_v51 = vld [vmem:[%s5698_s0 + $0x60] sm:$0xff]  ;;  %v4146_v3 = vld [vmem:[%s5697_s1 + $0x4f4] ss:$8 sps:$4 sm:$0xff]   ;;  %v4149_v5 = vld [vmem:[%s5697_s1 + $0x4f0] ss:$8 sps:$4 sm:$0xff]  }
  0x15   :  { %2792 = vmatprep.subr.bf16.mxu0 %v4086_v21  ;;  %v4126_v52 = vld [vmem:[%s5697_s1 + $0xc4] ss:$8 sps:$4 sm:$0xff]   ;;  %v3391_v55 = vcombine.high %v18_v50, %v26_v51  ;;  %2362 = vmatprep.mubr.bf16.mxu1 %v3383_v53  ;;  %v4130_v56 = vld [vmem:[%s5697_s1 + $0xc0] ss:$8 sps:$4 sm:$0xff]   ;;  %v3390_v12 = vcombine.low %v18_v50, %v26_v51  ;;  %v4158_v16 = vld [vmem:[%s5697_s1 + $0x114] ss:$8 sps:$4 sm:$0xff]  }
  0x16   :  { %v4128_v54 = vld [vmem:[%s5697_s1 + $0x4c4] ss:$8 sps:$4 sm:$0xff]   ;;  %v4131_v57 = vld [vmem:[%s5697_s1 + $0x4c0] ss:$8 sps:$4 sm:$0xff]   ;;  %v4161_v17 = vld [vmem:[%s5697_s1 + $0x514] ss:$8 sps:$4 sm:$0xff]  }
  0x17   :  { %2341 = vmatpush1.bf16.msra.mxu1 %v4088_v22  ;;  %2814 = vmatprep.mubr.bf16.mxu0 %v3391_v55  ;;  %v4138_v62 = vld [vmem:[%s5697_s1 + $0xe4] ss:$8 sps:$4 sm:$0xff]   ;;  %v4142_v0 = vld [vmem:[%s5697_s1 + $0xe0] ss:$8 sps:$4 sm:$0xff]   ;;  %v4156_v20 = vld [vmem:[%s5697_s1 + $0x110] ss:$8 sps:$4 sm:$0xff]  }
  0x18   :  { %2793 = vmatpush1.bf16.msra.mxu0 %v4089_v23  ;;  %2342 = vmatprep.subr.bf16.mxu1 %v4090_v24  ;;  %v4140_v63 = vld [vmem:[%s5697_s1 + $0x4e4] ss:$8 sps:$4 sm:$0xff]   ;;  %v4143_v1 = vld [vmem:[%s5697_s1 + $0x4e0] ss:$8 sps:$4 sm:$0xff]   ;;  %v4159_v21 = vld [vmem:[%s5697_s1 + $0x510] ss:$8 sps:$4 sm:$0xff]  }
  0x19   :  { %2794 = vmatprep.subr.bf16.mxu0 %v4092_v25  ;;  %v4152_v6 = vld [vmem:[%s5697_s1 + $0x104] ss:$8 sps:$4 sm:$0xff]   ;;  %v4150_v8 = vld [vmem:[%s5697_s1 + $0x100] ss:$8 sps:$4 sm:$0xff]   ;;  %v4182_v48 = vld [vmem:[%s5697_s1 + $0x154] ss:$8 sps:$4 sm:$0xff]  }
  0x1a   :  { %v4155_v7 = vld [vmem:[%s5697_s1 + $0x504] ss:$8 sps:$4 sm:$0xff]   ;;  %v4153_v9 = vld [vmem:[%s5697_s1 + $0x500] ss:$8 sps:$4 sm:$0xff]   ;;  %v4185_v49 = vld [vmem:[%s5697_s1 + $0x554] ss:$8 sps:$4 sm:$0xff]  }
  0x1b   :  { %2343 = vmatpush1.bf16.msra.mxu1 %v4094_v26  ;;  %v30_v10 = vld [vmem:[%s5698_s0 + $0x80] sm:$0xff]  ;;  %v4183_v53 = vld [vmem:[%s5697_s1 + $0x550] ss:$8 sps:$4 sm:$0xff]  }
  0x1c   :  { %2795 = vmatpush1.bf16.msra.mxu0 %v4095_v27  ;;  %2344 = vmatprep.subr.bf16.mxu1 %v4096_v28  ;;  %v38_v13 = vld [vmem:[%s5698_s0 + $0xc0] sm:$0xff] }
  0x1d   :  { %2796 = vmatprep.subr.bf16.mxu0 %v4098_v29  ;;  %v34_v14 = vld [vmem:[%s5698_s0 + $0xa0] sm:$0xff]  ;;  %v3399_v18 = vcombine.high %v30_v10, %v38_v13  ;;  %v3398_v28 = vcombine.low %v30_v10, %v38_v13 }
  0x1e   :  { %v42_v15 = vld [vmem:[%s5698_s0 + $0xe0] sm:$0xff] }
  0x1f   :  { %2345 = vmatpush1.bf16.msra.mxu1 %v4100_v30  ;;  %v3407_v19 = vcombine.high %v34_v14, %v42_v15  ;;  %v4164_v22 = vld [vmem:[%s5697_s1 + $0x124] ss:$8 sps:$4 sm:$0xff]   ;;  %v4162_v24 = vld [vmem:[%s5697_s1 + $0x120] ss:$8 sps:$4 sm:$0xff]   ;;  %v3406_v29 = vcombine.low %v34_v14, %v42_v15 }
  0x20   :  { %2797 = vmatpush1.bf16.msra.mxu0 %v4101_v31  ;;  %2346 = vmatprep.subr.bf16.mxu1 %v4102_v32  ;;  %v4167_v23 = vld [vmem:[%s5697_s1 + $0x524] ss:$8 sps:$4 sm:$0xff]   ;;  %v4165_v25 = vld [vmem:[%s5697_s1 + $0x520] ss:$8 sps:$4 sm:$0xff]   ;;  %v4170_v32 = vld [vmem:[%s5697_s1 + $0x134] ss:$8 sps:$4 sm:$0xff]  }
  0x21   :  { %2798 = vmatprep.subr.bf16.mxu0 %v4104_v33  ;;  %v46_v26 = vld [vmem:[%s5698_s0 + $0x100] sm:$0xff]  ;;  %v4173_v33 = vld [vmem:[%s5697_s1 + $0x534] ss:$8 sps:$4 sm:$0xff]  }
  0x22   :  { %v54_v27 = vld [vmem:[%s5698_s0 + $0x140] sm:$0xff] }
  0x23   :  { %2347 = vmatpush1.bf16.msra.mxu1 %v4106_v34  ;;  %v50_v30 = vld [vmem:[%s5698_s0 + $0x120] sm:$0xff]  ;;  %v3415_v34 = vcombine.high %v46_v26, %v54_v27 }
  0x24   :  { %2799 = vmatpush1.bf16.msra.mxu0 %v4107_v35  ;;  %2348 = vmatprep.subr.bf16.mxu1 %v4108_v36  ;;  %v58_v31 = vld [vmem:[%s5698_s0 + $0x160] sm:$0xff]  ;;  %v4168_v36 = vld [vmem:[%s5697_s1 + $0x130] ss:$8 sps:$4 sm:$0xff]  }
  0x25   :  { %2800 = vmatprep.subr.bf16.mxu0 %v4110_v37  ;;  %v3423_v35 = vcombine.high %v50_v30, %v58_v31  ;;  %v4171_v37 = vld [vmem:[%s5697_s1 + $0x530] ss:$8 sps:$4 sm:$0xff]   ;;  %v4191_v55 = vld [vmem:[%s5697_s1 + $0x564] ss:$8 sps:$4 sm:$0xff]   ;;  %v4198_v14 = vld [vmem:[%s5697_s1 + $0x180] ss:$8 sps:$4 sm:$0xff]  }
  0x26   :  { %v106_v13 = vld [vmem:[%s5698_s0 + $0x2e0] sm:$0xff] }
  0x27   :  { %2349 = vmatpush1.bf16.msra.mxu1 %v4112_v38  ;;  %v4176_v38 = vld [vmem:[%s5697_s1 + $0x144] ss:$8 sps:$4 sm:$0xff]   ;;  %v4201_v15 = vld [vmem:[%s5697_s1 + $0x580] ss:$8 sps:$4 sm:$0xff]  }
  0x28   :  { %2801 = vmatpush1.bf16.msra.mxu0 %v4113_v39  ;;  %2350 = vmatprep.subr.bf16.mxu1 %v4114_v40  ;;  %v4179_v39 = vld [vmem:[%s5697_s1 + $0x544] ss:$8 sps:$4 sm:$0xff]   ;;  %v4174_v40 = vld [vmem:[%s5697_s1 + $0x140] ss:$8 sps:$4 sm:$0xff]  }
  0x29   :  { %2802 = vmatprep.subr.bf16.mxu0 %v4116_v41  ;;  %v4177_v41 = vld [vmem:[%s5697_s1 + $0x540] ss:$8 sps:$4 sm:$0xff]  }
  0x2b   :  { %2351 = vmatpush1.bf16.msra.mxu1 %v4118_v42  ;;  %v62_v42 = vld [vmem:[%s5698_s0 + $0x180] sm:$0xff] }
  0x2c   :  { %2803 = vmatpush1.bf16.msra.mxu0 %v4119_v43  ;;  %2352 = vmatprep.subr.bf16.mxu1 %v4120_v44  ;;  %v70_v43 = vld [vmem:[%s5698_s0 + $0x1c0] sm:$0xff]  ;;  %v3414_v44 = vcombine.low %v46_v26, %v54_v27 }
  0x2d   :  { %2804 = vmatprep.subr.bf16.mxu0 %v4122_v45  ;;  %v3422_v45 = vcombine.low %v50_v30, %v58_v31  ;;  %v3431_v50 = vcombine.high %v62_v42, %v70_v43  ;;  %v110_v26 = vld [vmem:[%s5698_s0 + $0x300] sm:$0xff] }
  0x2e   :  { %v114_v30 = vld [vmem:[%s5698_s0 + $0x320] sm:$0xff] }
  0x2f   :  { %2353 = vmatpush1.bf16.msra.mxu1 %v4124_v46  ;;  %v66_v46 = vld [vmem:[%s5698_s0 + $0x1a0] sm:$0xff] }
  0x30   :  { %2805 = vmatpush1.bf16.msra.mxu0 %v4125_v47  ;;  %2354 = vmatprep.subr.bf16.mxu1 %v4126_v52  ;;  %v74_v47 = vld [vmem:[%s5698_s0 + $0x1e0] sm:$0xff]  ;;  %v4180_v52 = vld [vmem:[%s5697_s1 + $0x150] ss:$8 sps:$4 sm:$0xff]  }
  0x31   :  { %2806 = vmatprep.subr.bf16.mxu0 %v4128_v54  ;;  %v3439_v51 = vcombine.high %v66_v46, %v74_v47  ;;  %v4188_v54 = vld [vmem:[%s5697_s1 + $0x164] ss:$8 sps:$4 sm:$0xff]  }
  0x32   :  { %v122_v31 = vld [vmem:[%s5698_s0 + $0x360] sm:$0xff] }
  0x33   :  { %2355 = vmatpush1.bf16.msra.mxu1 %v4130_v56  ;;  %v4186_v56 = vld [vmem:[%s5697_s1 + $0x160] ss:$8 sps:$4 sm:$0xff]  }
  0x34   :  { %2807 = vmatpush1.bf16.msra.mxu0 %v4131_v57  ;;  %2356 = vmatprep.subr.bf16.mxu1 %v4132_v58  ;;  %v78_v57 = vld [vmem:[%s5698_s0 + $0x200] sm:$0xff] }
  0x35   :  { %2808 = vmatprep.subr.bf16.mxu0 %v4134_v59  ;;  %v86_v58 = vld [vmem:[%s5698_s0 + $0x240] sm:$0xff]  ;;  %v3430_v59 = vcombine.low %v62_v42, %v70_v43 }
  0x36   :  { %v3446_v10 = vcombine.low %v78_v57, %v86_v58  ;;  %v126_v42 = vld [vmem:[%s5698_s0 + $0x380] sm:$0xff] }
  0x37   :  { %2357 = vmatpush1.bf16.msra.mxu1 %v4136_v60  ;;  %v3438_v60 = vcombine.low %v66_v46, %v74_v47  ;;  %v134_v43 = vld [vmem:[%s5698_s0 + $0x3c0] sm:$0xff] }
  0x38   :  { %2809 = vmatpush1.bf16.msra.mxu0 %v4137_v61  ;;  %2358 = vmatprep.subr.bf16.mxu1 %v4138_v62  ;;  %v82_v61 = vld [vmem:[%s5698_s0 + $0x220] sm:$0xff] }
  0x39   :  { %2810 = vmatprep.subr.bf16.mxu0 %v4140_v63  ;;  %v90_v62 = vld [vmem:[%s5698_s0 + $0x260] sm:$0xff] }
  0x3a   :  { %v4189_v63 = vld [vmem:[%s5697_s1 + $0x560] ss:$8 sps:$4 sm:$0xff]  }
  0x3b   :  { %2359 = vmatpush1.bf16.msra.mxu1 %v4142_v0  ;;  %v4194_v0 = vld [vmem:[%s5697_s1 + $0x174] ss:$8 sps:$4 sm:$0xff]   ;;  %v130_v46 = vld [vmem:[%s5698_s0 + $0x3a0] sm:$0xff] }
  0x3c   :  { %2811 = vmatpush1.bf16.msra.mxu0 %v4143_v1  ;;  %2360 = vmatprep.subr.bf16.mxu1 %v4144_v2  ;;  %v4197_v1 = vld [vmem:[%s5697_s1 + $0x574] ss:$8 sps:$4 sm:$0xff]   ;;  %v3447_v2 = vcombine.high %v78_v57, %v86_v58  ;;  %v138_v47 = vld [vmem:[%s5698_s0 + $0x3e0] sm:$0xff]  ;;  %v15_v58 = vld [vmem:[%s5698_s0 + $0x8] sm:$0xff] }
  0x3d   :  { %2812 = vmatprep.subr.bf16.mxu0 %v4146_v3  ;;  %v3455_v3 = vcombine.high %v82_v61, %v90_v62  ;;  %v4237_v57 = vld [vmem:[%s5697_s1 + $0x5e0] ss:$8 sps:$4 sm:$0xff]  }
  0x3f   :  { %2361 = vmatpush1.bf16.msra.mxu1 %v4148_v4  ;;  %v4192_v4 = vld [vmem:[%s5697_s1 + $0x170] ss:$8 sps:$4 sm:$0xff]  }
  0x40   :  { %2813 = vmatpush1.bf16.msra.mxu0 %v4149_v5  ;;  %2443 = vmatprep.subr.bf16.mxu1 %v4152_v6  ;;  %v4195_v5 = vld [vmem:[%s5697_s1 + $0x570] ss:$8 sps:$4 sm:$0xff]   ;;  %v4200_v6 = vld [vmem:[%s5697_s1 + $0x184] ss:$8 sps:$4 sm:$0xff]  }
  0x41   :  { %2895 = vmatprep.subr.bf16.mxu0 %v4155_v7  ;;  %v4203_v7 = vld [vmem:[%s5697_s1 + $0x584] ss:$8 sps:$4 sm:$0xff]  }
  0x42   :  { %2363 = vmatmul.mubr.bf16.vlgmr.msra.gmra.mrb[0].mxu1 %v3382_v11  ;;  %v3454_v11 = vcombine.low %v82_v61, %v90_v62  ;;  %v3502_v61 = vcombine.low %v130_v46, %v138_v47  ;;  %v19_v62 = vld [vmem:[%s5698_s0 + $0x28] sm:$0xff] }
  0x43   :  { %2815 = vmatmul.mubr.bf16.vlgmr.msra.gmra.mrb[0].mxu0 %v3390_v12  ;;  %2444 = vmatpush1.bf16.msra.mxu1 %v4150_v8  ;;  %v94_v8 = vld [vmem:[%s5698_s0 + $0x280] sm:$0xff] }
  0x44   :  { %2896 = vmatpush1.bf16.msra.mxu0 %v4153_v9  ;;  %2445 = vmatprep.subr.bf16.mxu1 %v4158_v16  ;;  %v102_v9 = vld [vmem:[%s5698_s0 + $0x2c0] sm:$0xff]  ;;  %v4206_v16 = vld [vmem:[%s5697_s1 + $0x194] ss:$8 sps:$4 sm:$0xff]  }
  0x45   :  { %2897 = vmatprep.subr.bf16.mxu0 %v4161_v17  ;;  %2372 = vmatprep.mubr.bf16.mxu1 %v3399_v18  ;;  %v98_v12 = vld [vmem:[%s5698_s0 + $0x2a0] sm:$0xff]  ;;  %v4209_v17 = vld [vmem:[%s5697_s1 + $0x594] ss:$8 sps:$4 sm:$0xff]   ;;  %v3463_v18 = vcombine.high %v94_v8, %v102_v9  ;;  %v3462_v27 = vcombine.low %v94_v8, %v102_v9  ;;  %v31_v9 = vld [vmem:[%s5698_s0 + $0x88] sm:$0xff] }
  0x46   :  { %2824 = vmatprep.mubr.bf16.mxu0 %v3407_v19  ;;  %v3471_v19 = vcombine.high %v98_v12, %v106_v13  ;;  %v4246_v8 = vld [vmem:[%s5697_s1 + $0x200] ss:$8 sps:$4 sm:$0xff]  }
  0x47   :  { %2446 = vmatpush1.bf16.msra.mxu1 %v4156_v20  ;;  %v4204_v20 = vld [vmem:[%s5697_s1 + $0x190] ss:$8 sps:$4 sm:$0xff]  }
  0x48   :  { %2898 = vmatpush1.bf16.msra.mxu0 %v4159_v21  ;;  %2447 = vmatprep.subr.bf16.mxu1 %v4164_v22  ;;  %v4207_v21 = vld [vmem:[%s5697_s1 + $0x590] ss:$8 sps:$4 sm:$0xff]   ;;  %v4212_v22 = vld [vmem:[%s5697_s1 + $0x1a4] ss:$8 sps:$4 sm:$0xff]  }
  0x49   :  { %2899 = vmatprep.subr.bf16.mxu0 %v4167_v23  ;;  %v4215_v23 = vld [vmem:[%s5697_s1 + $0x5a4] ss:$8 sps:$4 sm:$0xff]  }
  0x4a   :  { %2373 = vmatmul.mubr.bf16.gmra.mrb[4].mxu1 %v3398_v28  ;;  %v3470_v28 = vcombine.low %v98_v12, %v106_v13  ;;  %v35_v13 = vld [vmem:[%s5698_s0 + $0xa8] sm:$0xff] }
  0x4b   :  { %2825 = vmatmul.mubr.bf16.gmra.mrb[4].mxu0 %v3406_v29  ;;  %2448 = vmatpush1.bf16.msra.mxu1 %v4162_v24  ;;  %v4210_v24 = vld [vmem:[%s5697_s1 + $0x1a0] ss:$8 sps:$4 sm:$0xff]  }
  0x4c   :  { %2900 = vmatpush1.bf16.msra.mxu0 %v4165_v25  ;;  %2449 = vmatprep.subr.bf16.mxu1 %v4170_v32  ;;  %v4213_v25 = vld [vmem:[%s5697_s1 + $0x5a0] ss:$8 sps:$4 sm:$0xff]   ;;  %v4218_v32 = vld [vmem:[%s5697_s1 + $0x1b4] ss:$8 sps:$4 sm:$0xff]  }
  0x4d   :  { %2901 = vmatprep.subr.bf16.mxu0 %v4173_v33  ;;  %2382 = vmatprep.mubr.bf16.mxu1 %v3415_v34  ;;  %v118_v29 = vld [vmem:[%s5698_s0 + $0x340] sm:$0xff]  ;;  %v4221_v33 = vld [vmem:[%s5697_s1 + $0x5b4] ss:$8 sps:$4 sm:$0xff]  }
  0x4e   :  { %2834 = vmatprep.mubr.bf16.mxu0 %v3423_v35  ;;  %v3479_v34 = vcombine.high %v110_v26, %v118_v29  ;;  %v3487_v35 = vcombine.high %v114_v30, %v122_v31 }
  0x4f   :  { %2450 = vmatpush1.bf16.msra.mxu1 %v4168_v36  ;;  %v4216_v36 = vld [vmem:[%s5697_s1 + $0x1b0] ss:$8 sps:$4 sm:$0xff]  }
  0x50   :  { %2902 = vmatpush1.bf16.msra.mxu0 %v4171_v37  ;;  %2451 = vmatprep.subr.bf16.mxu1 %v4176_v38  ;;  %v4219_v37 = vld [vmem:[%s5697_s1 + $0x5b0] ss:$8 sps:$4 sm:$0xff]   ;;  %v4224_v38 = vld [vmem:[%s5697_s1 + $0x1c4] ss:$8 sps:$4 sm:$0xff]  }
  0x51   :  { %2903 = vmatprep.subr.bf16.mxu0 %v4179_v39  ;;  %v4227_v39 = vld [vmem:[%s5697_s1 + $0x5c4] ss:$8 sps:$4 sm:$0xff]  }
  0x52   :  { %2383 = vmatmul.mubr.bf16.gmra.mrb[8].mxu1 %v3414_v44  ;;  %v3478_v44 = vcombine.low %v110_v26, %v118_v29  ;;  %v59_v29 = vld [vmem:[%s5698_s0 + $0x168] sm:$0xff] }
  0x53   :  { %2835 = vmatmul.mubr.bf16.gmra.mrb[8].mxu0 %v3422_v45  ;;  %2452 = vmatpush1.bf16.msra.mxu1 %v4174_v40  ;;  %v4222_v40 = vld [vmem:[%s5697_s1 + $0x1c0] ss:$8 sps:$4 sm:$0xff]   ;;  %v3486_v45 = vcombine.low %v114_v30, %v122_v31 }
  0x54   :  { %2904 = vmatpush1.bf16.msra.mxu0 %v4177_v41  ;;  %2453 = vmatprep.subr.bf16.mxu1 %v4182_v48  ;;  %v4225_v41 = vld [vmem:[%s5697_s1 + $0x5c0] ss:$8 sps:$4 sm:$0xff]   ;;  %v4230_v48 = vld [vmem:[%s5697_s1 + $0x1d4] ss:$8 sps:$4 sm:$0xff]  }
  0x55   :  { %2905 = vmatprep.subr.bf16.mxu0 %v4185_v49  ;;  %2392 = vmatprep.mubr.bf16.mxu1 %v3431_v50  ;;  %v4233_v49 = vld [vmem:[%s5697_s1 + $0x5d4] ss:$8 sps:$4 sm:$0xff]   ;;  %v3495_v50 = vcombine.high %v126_v42, %v134_v43  ;;  %v4258_v30 = vld [vmem:[%s5697_s1 + $0x220] ss:$8 sps:$4 sm:$0xff]  }
  0x56   :  { %2844 = vmatprep.mubr.bf16.mxu0 %v3439_v51  ;;  %v3503_v51 = vcombine.high %v130_v46, %v138_v47  ;;  %v4261_v31 = vld [vmem:[%s5697_s1 + $0x620] ss:$8 sps:$4 sm:$0xff]  }
  0x57   :  { %2454 = vmatpush1.bf16.msra.mxu1 %v4180_v52  ;;  %v4228_v52 = vld [vmem:[%s5697_s1 + $0x1d0] ss:$8 sps:$4 sm:$0xff]   ;;  %v67_v46 = vld [vmem:[%s5698_s0 + $0x1a8] sm:$0xff] }
  0x58   :  { %2906 = vmatpush1.bf16.msra.mxu0 %v4183_v53  ;;  %2455 = vmatprep.subr.bf16.mxu1 %v4188_v54  ;;  %v4231_v53 = vld [vmem:[%s5697_s1 + $0x5d0] ss:$8 sps:$4 sm:$0xff]   ;;  %v4236_v54 = vld [vmem:[%s5697_s1 + $0x1e4] ss:$8 sps:$4 sm:$0xff]  }
  0x59   :  { %2907 = vmatprep.subr.bf16.mxu0 %v4191_v55  ;;  %v4239_v55 = vld [vmem:[%s5697_s1 + $0x5e4] ss:$8 sps:$4 sm:$0xff]  }
  0x5a   :  { %2393 = vmatmul.mubr.bf16.gmra.mrb[12].mxu1 %v3430_v59  ;;  %v23_v59 = vld [vmem:[%s5698_s0 + $0x48] sm:$0xff] }
  0x5b   :  { %2845 = vmatmul.mubr.bf16.gmra.mrb[12].mxu0 %v3438_v60  ;;  %2456 = vmatpush1.bf16.msra.mxu1 %v4186_v56  ;;  %v4234_v56 = vld [vmem:[%s5697_s1 + $0x1e0] ss:$8 sps:$4 sm:$0xff]   ;;  %v3494_v60 = vcombine.low %v126_v42, %v134_v43 }
  0x5c   :  { %2908 = vmatpush1.bf16.msra.mxu0 %v4189_v63  ;;  %2457 = vmatprep.subr.bf16.mxu1 %v4194_v0  ;;  %v27_v63 = vld [vmem:[%s5698_s0 + $0x68] sm:$0xff]  ;;  %v4242_v0 = vld [vmem:[%s5697_s1 + $0x1f4] ss:$8 sps:$4 sm:$0xff]  }
  0x5d   :  { %2909 = vmatprep.subr.bf16.mxu0 %v4197_v1  ;;  %2402 = vmatprep.mubr.bf16.mxu1 %v3447_v2  ;;  %v4245_v1 = vld [vmem:[%s5697_s1 + $0x5f4] ss:$8 sps:$4 sm:$0xff]   ;;  %v3385_v2 = vcombine.high %v15_v58, %v23_v59  ;;  %v3392_v12 = vcombine.low %v19_v62, %v27_v63  ;;  %v63_v42 = vld [vmem:[%s5698_s0 + $0x188] sm:$0xff] }
  0x5e   :  { %2854 = vmatprep.mubr.bf16.mxu0 %v3455_v3  ;;  %v3393_v3 = vcombine.high %v19_v62, %v27_v63  ;;  %v75_v47 = vld [vmem:[%s5698_s0 + $0x1e8] sm:$0xff] }
  0x5f   :  { %2458 = vmatpush1.bf16.msra.mxu1 %v4192_v4  ;;  %v4240_v4 = vld [vmem:[%s5697_s1 + $0x1f0] ss:$8 sps:$4 sm:$0xff]   ;;  %v83_v62 = vld [vmem:[%s5698_s0 + $0x228] sm:$0xff] }
  0x60   :  { %2910 = vmatpush1.bf16.msra.mxu0 %v4195_v5  ;;  %2459 = vmatprep.subr.bf16.mxu1 %v4200_v6  ;;  %v4243_v5 = vld [vmem:[%s5697_s1 + $0x5f0] ss:$8 sps:$4 sm:$0xff]   ;;  %v4248_v6 = vld [vmem:[%s5697_s1 + $0x204] ss:$8 sps:$4 sm:$0xff]  }
  0x61   :  { %2911 = vmatprep.subr.bf16.mxu0 %v4203_v7  ;;  %v4251_v7 = vld [vmem:[%s5697_s1 + $0x604] ss:$8 sps:$4 sm:$0xff]  }
  0x62   :  { %2403 = vmatmul.mubr.bf16.gmra.mrb[16].mxu1 %v3446_v10  ;;  %v39_v10 = vld [vmem:[%s5698_s0 + $0xc8] sm:$0xff] }
  0x63   :  { %2855 = vmatmul.mubr.bf16.gmra.mrb[16].mxu0 %v3454_v11  ;;  %2460 = vmatpush1.bf16.msra.mxu1 %v4198_v14  ;;  %v3384_v11 = vcombine.low %v15_v58, %v23_v59  ;;  %v43_v14 = vld [vmem:[%s5698_s0 + $0xe8] sm:$0xff]  ;;  %v3400_v26 = vcombine.low %v31_v9, %v39_v10 }
  0x64   :  { %2912 = vmatpush1.bf16.msra.mxu0 %v4201_v15  ;;  %2461 = vmatprep.subr.bf16.mxu1 %v4206_v16  ;;  %v4249_v15 = vld [vmem:[%s5697_s1 + $0x600] ss:$8 sps:$4 sm:$0xff]   ;;  %v4254_v16 = vld [vmem:[%s5697_s1 + $0x214] ss:$8 sps:$4 sm:$0xff]  }
  0x65   :  { %2913 = vmatprep.subr.bf16.mxu0 %v4209_v17  ;;  %2412 = vmatprep.mubr.bf16.mxu1 %v3463_v18  ;;  %v4257_v17 = vld [vmem:[%s5697_s1 + $0x614] ss:$8 sps:$4 sm:$0xff]   ;;  %v3401_v18 = vcombine.high %v31_v9, %v39_v10  ;;  %v79_v58 = vld [vmem:[%s5698_s0 + $0x208] sm:$0xff] }
  0x66   :  { %2864 = vmatprep.mubr.bf16.mxu0 %v3471_v19  ;;  %v3409_v19 = vcombine.high %v35_v13, %v43_v14  ;;  %v87_v59 = vld [vmem:[%s5698_s0 + $0x248] sm:$0xff] }
  0x67   :  { %2462 = vmatpush1.bf16.msra.mxu1 %v4204_v20  ;;  %v4252_v20 = vld [vmem:[%s5697_s1 + $0x210] ss:$8 sps:$4 sm:$0xff]   ;;  %v91_v63 = vld [vmem:[%s5698_s0 + $0x268] sm:$0xff] }
  0x68   :  { %2914 = vmatpush1.bf16.msra.mxu0 %v4207_v21  ;;  %2463 = vmatprep.subr.bf16.mxu1 %v4212_v22  ;;  %v4255_v21 = vld [vmem:[%s5697_s1 + $0x610] ss:$8 sps:$4 sm:$0xff]   ;;  %v4260_v22 = vld [vmem:[%s5697_s1 + $0x224] ss:$8 sps:$4 sm:$0xff]   ;;  %v4297_v9 = vld [vmem:[%s5697_s1 + $0x680] ss:$8 sps:$4 sm:$0xff]  }
  0x69   :  { %2915 = vmatprep.subr.bf16.mxu0 %v4215_v23  ;;  %v4263_v23 = vld [vmem:[%s5697_s1 + $0x624] ss:$8 sps:$4 sm:$0xff]  }
  0x6a   :  { %2413 = vmatmul.mubr.bf16.gmra.mrb[20].mxu1 %v3462_v27  ;;  %v3408_v27 = vcombine.low %v35_v13, %v43_v14  ;;  %v95_v10 = vld [vmem:[%s5698_s0 + $0x288] sm:$0xff]  ;;  %v3456_v13 = vcombine.low %v83_v62, %v91_v63 }
  0x6b   :  { %2865 = vmatmul.mubr.bf16.gmra.mrb[20].mxu0 %v3470_v28  ;;  %2464 = vmatpush1.bf16.msra.mxu1 %v4210_v24  ;;  %v47_v24 = vld [vmem:[%s5698_s0 + $0x108] sm:$0xff] }
  0x6c   :  { %2916 = vmatpush1.bf16.msra.mxu0 %v4213_v25  ;;  %2465 = vmatprep.subr.bf16.mxu1 %v4218_v32  ;;  %v55_v25 = vld [vmem:[%s5698_s0 + $0x148] sm:$0xff]  ;;  %v4266_v32 = vld [vmem:[%s5697_s1 + $0x234] ss:$8 sps:$4 sm:$0xff]  }
  0x6d   :  { %2917 = vmatprep.subr.bf16.mxu0 %v4221_v33  ;;  %2422 = vmatprep.mubr.bf16.mxu1 %v3479_v34  ;;  %v51_v28 = vld [vmem:[%s5698_s0 + $0x128] sm:$0xff]  ;;  %v4269_v33 = vld [vmem:[%s5697_s1 + $0x634] ss:$8 sps:$4 sm:$0xff]   ;;  %v3417_v34 = vcombine.high %v47_v24, %v55_v25  ;;  %v3416_v43 = vcombine.low %v47_v24, %v55_v25 }
  0x6e   :  { %2874 = vmatprep.mubr.bf16.mxu0 %v3487_v35  ;;  %v3425_v35 = vcombine.high %v51_v28, %v59_v29  ;;  %v99_v14 = vld [vmem:[%s5698_s0 + $0x2a8] sm:$0xff] }
  0x6f   :  { %2466 = vmatpush1.bf16.msra.mxu1 %v4216_v36  ;;  %v4264_v36 = vld [vmem:[%s5697_s1 + $0x230] ss:$8 sps:$4 sm:$0xff]   ;;  %v4306_v24 = vld [vmem:[%s5697_s1 + $0x2a0] ss:$8 sps:$4 sm:$0xff]  }
  0x70   :  { %2918 = vmatpush1.bf16.msra.mxu0 %v4219_v37  ;;  %2467 = vmatprep.subr.bf16.mxu1 %v4224_v38  ;;  %v4267_v37 = vld [vmem:[%s5697_s1 + $0x630] ss:$8 sps:$4 sm:$0xff]   ;;  %v4272_v38 = vld [vmem:[%s5697_s1 + $0x244] ss:$8 sps:$4 sm:$0xff]  }
  0x71   :  { %2919 = vmatprep.subr.bf16.mxu0 %v4227_v39  ;;  %v4275_v39 = vld [vmem:[%s5697_s1 + $0x644] ss:$8 sps:$4 sm:$0xff]  }
  0x72   :  { %2423 = vmatmul.mubr.bf16.gmra.mrb[24].mxu1 %v3478_v44  ;;  %v3424_v44 = vcombine.low %v51_v28, %v59_v29  ;;  %v111_v25 = vld [vmem:[%s5698_s0 + $0x308] sm:$0xff] }
  0x73   :  { %2875 = vmatmul.mubr.bf16.gmra.mrb[24].mxu0 %v3486_v45  ;;  %2468 = vmatpush1.bf16.msra.mxu1 %v4222_v40  ;;  %v4270_v40 = vld [vmem:[%s5697_s1 + $0x240] ss:$8 sps:$4 sm:$0xff]  }
  0x74   :  { %2920 = vmatpush1.bf16.msra.mxu0 %v4225_v41  ;;  %2469 = vmatprep.subr.bf16.mxu1 %v4230_v48  ;;  %v4273_v41 = vld [vmem:[%s5697_s1 + $0x640] ss:$8 sps:$4 sm:$0xff]   ;;  %v4278_v48 = vld [vmem:[%s5697_s1 + $0x254] ss:$8 sps:$4 sm:$0xff]  }
  0x75   :  { %2921 = vmatprep.subr.bf16.mxu0 %v4233_v49  ;;  %2432 = vmatprep.mubr.bf16.mxu1 %v3495_v50  ;;  %v71_v45 = vld [vmem:[%s5698_s0 + $0x1c8] sm:$0xff]  ;;  %v4281_v49 = vld [vmem:[%s5697_s1 + $0x654] ss:$8 sps:$4 sm:$0xff]  }
  0x76   :  { %2884 = vmatprep.mubr.bf16.mxu0 %v3503_v51  ;;  %v3433_v50 = vcombine.high %v63_v42, %v71_v45  ;;  %v3441_v51 = vcombine.high %v67_v46, %v75_v47  ;;  %v115_v29 = vld [vmem:[%s5698_s0 + $0x328] sm:$0xff] }
  0x77   :  { %2470 = vmatpush1.bf16.msra.mxu1 %v4228_v52  ;;  %v4276_v52 = vld [vmem:[%s5697_s1 + $0x250] ss:$8 sps:$4 sm:$0xff]  }
  0x78   :  { %2922 = vmatpush1.bf16.msra.mxu0 %v4231_v53  ;;  %2471 = vmatprep.subr.bf16.mxu1 %v4236_v54  ;;  %v4279_v53 = vld [vmem:[%s5697_s1 + $0x650] ss:$8 sps:$4 sm:$0xff]   ;;  %v4284_v54 = vld [vmem:[%s5697_s1 + $0x264] ss:$8 sps:$4 sm:$0xff]  }
  0x79   :  { %2923 = vmatprep.subr.bf16.mxu0 %v4239_v55  ;;  %v4287_v55 = vld [vmem:[%s5697_s1 + $0x664] ss:$8 sps:$4 sm:$0xff]  }
  0x7a   :  { %2433 = vmatmul.mubr.bf16.gmra.mrb[28].mxu1 %v3494_v60  ;;  %v3432_v60 = vcombine.low %v63_v42, %v71_v45  ;;  %v139_v45 = vld [vmem:[%s5698_s0 + $0x3e8] sm:$0xff] }
  0x7b   :  { %2885 = vmatmul.mubr.bf16.gmra.mrb[28].mxu0 %v3502_v61  ;;  %2472 = vmatpush1.bf16.msra.mxu1 %v4234_v56  ;;  %v4282_v56 = vld [vmem:[%s5697_s1 + $0x260] ss:$8 sps:$4 sm:$0xff]   ;;  %v3440_v61 = vcombine.low %v67_v46, %v75_v47 }
  0x7c   :  { %2924 = vmatpush1.bf16.msra.mxu0 %v4237_v57  ;;  %2473 = vmatprep.subr.bf16.mxu1 %v4242_v0  ;;  %v4285_v57 = vld [vmem:[%s5697_s1 + $0x660] ss:$8 sps:$4 sm:$0xff]   ;;  %v4290_v0 = vld [vmem:[%s5697_s1 + $0x274] ss:$8 sps:$4 sm:$0xff]  }
  0x7d   :  { %2925 = vmatprep.subr.bf16.mxu0 %v4245_v1  ;;  %2475 = vmatprep.mubr.bf16.mxu1 %v3385_v2  ;;  %v4293_v1 = vld [vmem:[%s5697_s1 + $0x674] ss:$8 sps:$4 sm:$0xff]   ;;  %v3449_v2 = vcombine.high %v79_v58, %v87_v59  ;;  %v4318_v46 = vld [vmem:[%s5697_s1 + $0x2c0] ss:$8 sps:$4 sm:$0xff]  }
  0x7e   :  { %2927 = vmatprep.mubr.bf16.mxu0 %v3393_v3  ;;  %v3457_v3 = vcombine.high %v83_v62, %v91_v63  ;;  %v4321_v47 = vld [vmem:[%s5697_s1 + $0x6c0] ss:$8 sps:$4 sm:$0xff]   ;;  %v20_v62 = vld [vmem:[%s5698_s0 + $0x30] sm:$0xff] }
  0x7f   :  { %2474 = vmatpush1.bf16.msra.mxu1 %v4240_v4  ;;  %v4288_v4 = vld [vmem:[%s5697_s1 + $0x270] ss:$8 sps:$4 sm:$0xff]  }
  0x80   :  { %2926 = vmatpush1.bf16.msra.mxu0 %v4243_v5  ;;  %2556 = vmatprep.subr.bf16.mxu1 %v4248_v6  ;;  %v4291_v5 = vld [vmem:[%s5697_s1 + $0x670] ss:$8 sps:$4 sm:$0xff]   ;;  %v4296_v6 = vld [vmem:[%s5697_s1 + $0x284] ss:$8 sps:$4 sm:$0xff]  }
  0x81   :  { %3008 = vmatprep.subr.bf16.mxu0 %v4251_v7  ;;  %v4299_v7 = vld [vmem:[%s5697_s1 + $0x684] ss:$8 sps:$4 sm:$0xff]   ;;  %v28_v63 = vld [vmem:[%s5698_s0 + $0x70] sm:$0xff] }
  0x82   :  { %2476 = vmatmul.mubr.bf16.vlgmr.msra.gmra.mrb[0].mxu1 %v3384_v11  ;;  %v103_v11 = vld [vmem:[%s5698_s0 + $0x2c8] sm:$0xff] }
  0x83   :  { %2928 = vmatmul.mubr.bf16.vlgmr.msra.gmra.mrb[0].mxu0 %v3392_v12  ;;  %2557 = vmatpush1.bf16.msra.mxu1 %v4246_v8  ;;  %v4294_v8 = vld [vmem:[%s5697_s1 + $0x280] ss:$8 sps:$4 sm:$0xff]   ;;  %v3448_v12 = vcombine.low %v79_v58, %v87_v59  ;;  %v16_v58 = vld [vmem:[%s5698_s0 + $0x10] sm:$0xff] }
  0x84   :  { %3009 = vmatpush1.bf16.msra.mxu0 %v4249_v15  ;;  %2558 = vmatprep.subr.bf16.mxu1 %v4254_v16  ;;  %v107_v15 = vld [vmem:[%s5698_s0 + $0x2e8] sm:$0xff]  ;;  %v4302_v16 = vld [vmem:[%s5697_s1 + $0x294] ss:$8 sps:$4 sm:$0xff]  }
  0x85   :  { %3010 = vmatprep.subr.bf16.mxu0 %v4257_v17  ;;  %2485 = vmatprep.mubr.bf16.mxu1 %v3401_v18  ;;  %v4305_v17 = vld [vmem:[%s5697_s1 + $0x694] ss:$8 sps:$4 sm:$0xff]   ;;  %v3465_v18 = vcombine.high %v95_v10, %v103_v11  ;;  %v3472_v28 = vcombine.low %v99_v14, %v107_v15 }
  0x86   :  { %2937 = vmatprep.mubr.bf16.mxu0 %v3409_v19  ;;  %v3473_v19 = vcombine.high %v99_v14, %v107_v15  ;;  %v36_v14 = vld [vmem:[%s5698_s0 + $0xb0] sm:$0xff] }
  0x87   :  { %2559 = vmatpush1.bf16.msra.mxu1 %v4252_v20  ;;  %v4300_v20 = vld [vmem:[%s5697_s1 + $0x290] ss:$8 sps:$4 sm:$0xff]  }
  0x88   :  { %3011 = vmatpush1.bf16.msra.mxu0 %v4255_v21  ;;  %2560 = vmatprep.subr.bf16.mxu1 %v4260_v22  ;;  %v4303_v21 = vld [vmem:[%s5697_s1 + $0x690] ss:$8 sps:$4 sm:$0xff]   ;;  %v4308_v22 = vld [vmem:[%s5697_s1 + $0x2a4] ss:$8 sps:$4 sm:$0xff]  }
  0x89   :  { %3012 = vmatprep.subr.bf16.mxu0 %v4263_v23  ;;  %v4311_v23 = vld [vmem:[%s5697_s1 + $0x6a4] ss:$8 sps:$4 sm:$0xff]   ;;  %v44_v15 = vld [vmem:[%s5698_s0 + $0xf0] sm:$0xff] }
  0x8a   :  { %2486 = vmatmul.mubr.bf16.gmra.mrb[4].mxu1 %v3400_v26  ;;  %v119_v26 = vld [vmem:[%s5698_s0 + $0x348] sm:$0xff] }
  0x8b   :  { %2938 = vmatmul.mubr.bf16.gmra.mrb[4].mxu0 %v3408_v27  ;;  %2561 = vmatpush1.bf16.msra.mxu1 %v4258_v30  ;;  %v3464_v27 = vcombine.low %v95_v10, %v103_v11  ;;  %v123_v30 = vld [vmem:[%s5698_s0 + $0x368] sm:$0xff]  ;;  %v3480_v42 = vcombine.low %v111_v25, %v119_v26  ;;  %v32_v10 = vld [vmem:[%s5698_s0 + $0x90] sm:$0xff] }
  0x8c   :  { %3013 = vmatpush1.bf16.msra.mxu0 %v4261_v31  ;;  %2562 = vmatprep.subr.bf16.mxu1 %v4266_v32  ;;  %v4309_v31 = vld [vmem:[%s5697_s1 + $0x6a0] ss:$8 sps:$4 sm:$0xff]   ;;  %v4314_v32 = vld [vmem:[%s5697_s1 + $0x2b4] ss:$8 sps:$4 sm:$0xff]  }
  0x8d   :  { %3014 = vmatprep.subr.bf16.mxu0 %v4269_v33  ;;  %2495 = vmatprep.mubr.bf16.mxu1 %v3417_v34  ;;  %v4317_v33 = vld [vmem:[%s5697_s1 + $0x6b4] ss:$8 sps:$4 sm:$0xff]   ;;  %v3481_v34 = vcombine.high %v111_v25, %v119_v26  ;;  %v4357_v25 = vld [vmem:[%s5697_s1 + $0x720] ss:$8 sps:$4 sm:$0xff]  }
  0x8e   :  { %2947 = vmatprep.mubr.bf16.mxu0 %v3425_v35  ;;  %v3489_v35 = vcombine.high %v115_v29, %v123_v30  ;;  %v40_v11 = vld [vmem:[%s5698_s0 + $0xd0] sm:$0xff] }
  0x8f   :  { %2563 = vmatpush1.bf16.msra.mxu1 %v4264_v36  ;;  %v4312_v36 = vld [vmem:[%s5697_s1 + $0x2b0] ss:$8 sps:$4 sm:$0xff]  }
  0x90   :  { %3015 = vmatpush1.bf16.msra.mxu0 %v4267_v37  ;;  %2564 = vmatprep.subr.bf16.mxu1 %v4272_v38  ;;  %v4315_v37 = vld [vmem:[%s5697_s1 + $0x6b0] ss:$8 sps:$4 sm:$0xff]   ;;  %v4320_v38 = vld [vmem:[%s5697_s1 + $0x2c4] ss:$8 sps:$4 sm:$0xff]  }
  0x91   :  { %3016 = vmatprep.subr.bf16.mxu0 %v4275_v39  ;;  %v4323_v39 = vld [vmem:[%s5697_s1 + $0x6c4] ss:$8 sps:$4 sm:$0xff]   ;;  %v48_v26 = vld [vmem:[%s5698_s0 + $0x110] sm:$0xff] }
  0x92   :  { %2496 = vmatmul.mubr.bf16.gmra.mrb[8].mxu1 %v3416_v43  ;;  %v3488_v43 = vcombine.low %v115_v29, %v123_v30  ;;  %v3410_v29 = vcombine.low %v36_v14, %v44_v15  ;;  %v52_v30 = vld [vmem:[%s5698_s0 + $0x130] sm:$0xff] }
  0x93   :  { %2948 = vmatmul.mubr.bf16.gmra.mrb[8].mxu0 %v3424_v44  ;;  %2565 = vmatpush1.bf16.msra.mxu1 %v4270_v40  ;;  %v127_v40 = vld [vmem:[%s5698_s0 + $0x388] sm:$0xff] }
  0x94   :  { %3017 = vmatpush1.bf16.msra.mxu0 %v4273_v41  ;;  %2566 = vmatprep.subr.bf16.mxu1 %v4278_v48  ;;  %v135_v41 = vld [vmem:[%s5698_s0 + $0x3c8] sm:$0xff]  ;;  %v4326_v48 = vld [vmem:[%s5697_s1 + $0x2d4] ss:$8 sps:$4 sm:$0xff]  }
  0x95   :  { %3018 = vmatprep.subr.bf16.mxu0 %v4281_v49  ;;  %2505 = vmatprep.mubr.bf16.mxu1 %v3433_v50  ;;  %v131_v44 = vld [vmem:[%s5698_s0 + $0x3a8] sm:$0xff]  ;;  %v4329_v49 = vld [vmem:[%s5697_s1 + $0x6d4] ss:$8 sps:$4 sm:$0xff]   ;;  %v3497_v50 = vcombine.high %v127_v40, %v135_v41  ;;  %v3496_v59 = vcombine.low %v127_v40, %v135_v41 }
  0x96   :  { %2957 = vmatprep.mubr.bf16.mxu0 %v3441_v51  ;;  %v3505_v51 = vcombine.high %v131_v44, %v139_v45  ;;  %v64_v40 = vld [vmem:[%s5698_s0 + $0x190] sm:$0xff] }
  0x97   :  { %2567 = vmatpush1.bf16.msra.mxu1 %v4276_v52  ;;  %v4324_v52 = vld [vmem:[%s5697_s1 + $0x2d0] ss:$8 sps:$4 sm:$0xff]  }
  0x98   :  { %3019 = vmatpush1.bf16.msra.mxu0 %v4279_v53  ;;  %2568 = vmatprep.subr.bf16.mxu1 %v4284_v54  ;;  %v4327_v53 = vld [vmem:[%s5697_s1 + $0x6d0] ss:$8 sps:$4 sm:$0xff]   ;;  %v4332_v54 = vld [vmem:[%s5697_s1 + $0x2e4] ss:$8 sps:$4 sm:$0xff]  }
  0x99   :  { %3020 = vmatprep.subr.bf16.mxu0 %v4287_v55  ;;  %v4335_v55 = vld [vmem:[%s5697_s1 + $0x6e4] ss:$8 sps:$4 sm:$0xff]  }
  0x9a   :  { %2506 = vmatmul.mubr.bf16.gmra.mrb[12].mxu1 %v3432_v60  ;;  %v3504_v60 = vcombine.low %v131_v44, %v139_v45  ;;  %v68_v44 = vld [vmem:[%s5698_s0 + $0x1b0] sm:$0xff] }
  0x9b   :  { %2958 = vmatmul.mubr.bf16.gmra.mrb[12].mxu0 %v3440_v61  ;;  %2569 = vmatpush1.bf16.msra.mxu1 %v4282_v56  ;;  %v4330_v56 = vld [vmem:[%s5697_s1 + $0x2e0] ss:$8 sps:$4 sm:$0xff]   ;;  %v24_v61 = vld [vmem:[%s5698_s0 + $0x50] sm:$0xff] }
  0x9c   :  { %3021 = vmatpush1.bf16.msra.mxu0 %v4285_v57  ;;  %2570 = vmatprep.subr.bf16.mxu1 %v4290_v0  ;;  %v4333_v57 = vld [vmem:[%s5697_s1 + $0x6e0] ss:$8 sps:$4 sm:$0xff]   ;;  %v4338_v0 = vld [vmem:[%s5697_s1 + $0x2f4] ss:$8 sps:$4 sm:$0xff]  }
  0x9d   :  { %3022 = vmatprep.subr.bf16.mxu0 %v4293_v1  ;;  %2515 = vmatprep.mubr.bf16.mxu1 %v3449_v2  ;;  %v4341_v1 = vld [vmem:[%s5697_s1 + $0x6f4] ss:$8 sps:$4 sm:$0xff]   ;;  %v3387_v2 = vcombine.high %v16_v58, %v24_v61 }
  0x9e   :  { %2967 = vmatprep.mubr.bf16.mxu0 %v3457_v3  ;;  %v3395_v3 = vcombine.high %v20_v62, %v28_v63  ;;  %v76_v45 = vld [vmem:[%s5698_s0 + $0x1f0] sm:$0xff] }
  0x9f   :  { %2571 = vmatpush1.bf16.msra.mxu1 %v4288_v4  ;;  %v4336_v4 = vld [vmem:[%s5697_s1 + $0x2f0] ss:$8 sps:$4 sm:$0xff]  }
  0xa0   :  { %3023 = vmatpush1.bf16.msra.mxu0 %v4291_v5  ;;  %2572 = vmatprep.subr.bf16.mxu1 %v4296_v6  ;;  %v4339_v5 = vld [vmem:[%s5697_s1 + $0x6f0] ss:$8 sps:$4 sm:$0xff]   ;;  %v4344_v6 = vld [vmem:[%s5697_s1 + $0x304] ss:$8 sps:$4 sm:$0xff]  }
  0xa1   :  { %3024 = vmatprep.subr.bf16.mxu0 %v4299_v7  ;;  %v4347_v7 = vld [vmem:[%s5697_s1 + $0x704] ss:$8 sps:$4 sm:$0xff]  }
  0xa2   :  { %2516 = vmatmul.mubr.bf16.gmra.mrb[16].mxu1 %v3448_v12  ;;  %v3386_v12 = vcombine.low %v16_v58, %v24_v61  ;;  %v3442_v58 = vcombine.low %v68_v44, %v76_v45  ;;  %v92_v61 = vld [vmem:[%s5698_s0 + $0x270] sm:$0xff] }
  0xa3   :  { %2968 = vmatmul.mubr.bf16.gmra.mrb[16].mxu0 %v3456_v13  ;;  %2573 = vmatpush1.bf16.msra.mxu1 %v4294_v8  ;;  %v4342_v8 = vld [vmem:[%s5697_s1 + $0x300] ss:$8 sps:$4 sm:$0xff]   ;;  %v3394_v13 = vcombine.low %v20_v62, %v28_v63 }
  0xa4   :  { %3025 = vmatpush1.bf16.msra.mxu0 %v4297_v9  ;;  %2574 = vmatprep.subr.bf16.mxu1 %v4302_v16  ;;  %v4345_v9 = vld [vmem:[%s5697_s1 + $0x700] ss:$8 sps:$4 sm:$0xff]   ;;  %v4350_v16 = vld [vmem:[%s5697_s1 + $0x314] ss:$8 sps:$4 sm:$0xff]  }
  0xa5   :  { %3026 = vmatprep.subr.bf16.mxu0 %v4305_v17  ;;  %2525 = vmatprep.mubr.bf16.mxu1 %v3465_v18  ;;  %v4353_v17 = vld [vmem:[%s5697_s1 + $0x714] ss:$8 sps:$4 sm:$0xff]   ;;  %v3403_v18 = vcombine.high %v32_v10, %v40_v11  ;;  %v4378_v62 = vld [vmem:[%s5697_s1 + $0x360] ss:$8 sps:$4 sm:$0xff]  }
  0xa6   :  { %2977 = vmatprep.mubr.bf16.mxu0 %v3473_v19  ;;  %v3411_v19 = vcombine.high %v36_v14, %v44_v15  ;;  %v4381_v63 = vld [vmem:[%s5697_s1 + $0x760] ss:$8 sps:$4 sm:$0xff]  }
  0xa7   :  { %2575 = vmatpush1.bf16.msra.mxu1 %v4300_v20  ;;  %v4348_v20 = vld [vmem:[%s5697_s1 + $0x310] ss:$8 sps:$4 sm:$0xff]   ;;  %v4390_v14 = vld [vmem:[%s5697_s1 + $0x380] ss:$8 sps:$4 sm:$0xff]  }
  0xa8   :  { %3027 = vmatpush1.bf16.msra.mxu0 %v4303_v21  ;;  %2576 = vmatprep.subr.bf16.mxu1 %v4308_v22  ;;  %v4351_v21 = vld [vmem:[%s5697_s1 + $0x710] ss:$8 sps:$4 sm:$0xff]   ;;  %v4356_v22 = vld [vmem:[%s5697_s1 + $0x324] ss:$8 sps:$4 sm:$0xff]   ;;  %v4393_v15 = vld [vmem:[%s5697_s1 + $0x780] ss:$8 sps:$4 sm:$0xff]  }
  0xa9   :  { %3028 = vmatprep.subr.bf16.mxu0 %v4311_v23  ;;  %v4359_v23 = vld [vmem:[%s5697_s1 + $0x724] ss:$8 sps:$4 sm:$0xff]  }
  0xaa   :  { %2526 = vmatmul.mubr.bf16.gmra.mrb[20].mxu1 %v3464_v27  ;;  %v56_v27 = vld [vmem:[%s5698_s0 + $0x150] sm:$0xff] }
  0xab   :  { %2978 = vmatmul.mubr.bf16.gmra.mrb[20].mxu0 %v3472_v28  ;;  %2577 = vmatpush1.bf16.msra.mxu1 %v4306_v24  ;;  %v4354_v24 = vld [vmem:[%s5697_s1 + $0x320] ss:$8 sps:$4 sm:$0xff]   ;;  %v3402_v28 = vcombine.low %v32_v10, %v40_v11  ;;  %v3418_v41 = vcombine.low %v48_v26, %v56_v27  ;;  %v104_v11 = vld [vmem:[%s5698_s0 + $0x2d0] sm:$0xff] }
  0xac   :  { %3029 = vmatpush1.bf16.msra.mxu0 %v4309_v31  ;;  %2578 = vmatprep.subr.bf16.mxu1 %v4314_v32  ;;  %v60_v31 = vld [vmem:[%s5698_s0 + $0x170] sm:$0xff] }
  0xad   :  { %3030 = vmatprep.subr.bf16.mxu0 %v4317_v33  ;;  %2535 = vmatprep.mubr.bf16.mxu1 %v3481_v34  ;;  %v4362_v32 = vld [vmem:[%s5697_s1 + $0x334] ss:$8 sps:$4 sm:$0xff]   ;;  %v3419_v34 = vcombine.high %v48_v26, %v56_v27 }
  0xae   :  { %2987 = vmatprep.mubr.bf16.mxu0 %v3489_v35  ;;  %v4365_v33 = vld [vmem:[%s5697_s1 + $0x734] ss:$8 sps:$4 sm:$0xff]   ;;  %v3427_v35 = vcombine.high %v52_v30, %v60_v31 }
  0xaf   :  { %2579 = vmatpush1.bf16.msra.mxu1 %v4312_v36  ;;  %v4360_v36 = vld [vmem:[%s5697_s1 + $0x330] ss:$8 sps:$4 sm:$0xff]  }
  0xb0   :  { %3031 = vmatpush1.bf16.msra.mxu0 %v4315_v37  ;;  %2580 = vmatprep.subr.bf16.mxu1 %v4320_v38  ;;  %v4363_v37 = vld [vmem:[%s5697_s1 + $0x730] ss:$8 sps:$4 sm:$0xff]   ;;  %v4368_v38 = vld [vmem:[%s5697_s1 + $0x344] ss:$8 sps:$4 sm:$0xff]  }
  0xb1   :  { %3032 = vmatprep.subr.bf16.mxu0 %v4323_v39  ;;  %v4371_v39 = vld [vmem:[%s5697_s1 + $0x744] ss:$8 sps:$4 sm:$0xff]   ;;  %v120_v27 = vld [vmem:[%s5698_s0 + $0x350] sm:$0xff] }
  0xb2   :  { %2536 = vmatmul.mubr.bf16.gmra.mrb[24].mxu1 %v3480_v42  ;;  %v3426_v42 = vcombine.low %v52_v30, %v60_v31  ;;  %v4402_v30 = vld [vmem:[%s5697_s1 + $0x3a0] ss:$8 sps:$4 sm:$0xff]  }
  0xb3   :  { %2988 = vmatmul.mubr.bf16.gmra.mrb[24].mxu0 %v3488_v43  ;;  %2581 = vmatpush1.bf16.msra.mxu1 %v4318_v46  ;;  %v72_v43 = vld [vmem:[%s5698_s0 + $0x1d0] sm:$0xff]  ;;  %v4366_v46 = vld [vmem:[%s5697_s1 + $0x340] ss:$8 sps:$4 sm:$0xff]  }
  0xb4   :  { %3033 = vmatpush1.bf16.msra.mxu0 %v4321_v47  ;;  %2582 = vmatprep.subr.bf16.mxu1 %v4326_v48  ;;  %v4369_v47 = vld [vmem:[%s5697_s1 + $0x740] ss:$8 sps:$4 sm:$0xff]   ;;  %v4374_v48 = vld [vmem:[%s5697_s1 + $0x354] ss:$8 sps:$4 sm:$0xff]  }
  0xb5   :  { %3034 = vmatprep.subr.bf16.mxu0 %v4329_v49  ;;  %2545 = vmatprep.mubr.bf16.mxu1 %v3497_v50  ;;  %v4377_v49 = vld [vmem:[%s5697_s1 + $0x754] ss:$8 sps:$4 sm:$0xff]   ;;  %v3435_v50 = vcombine.high %v64_v40, %v72_v43  ;;  %v4405_v31 = vld [vmem:[%s5697_s1 + $0x7a0] ss:$8 sps:$4 sm:$0xff]  }
  0xb6   :  { %2997 = vmatprep.mubr.bf16.mxu0 %v3505_v51  ;;  %v3443_v51 = vcombine.high %v68_v44, %v76_v45  ;;  %v132_v44 = vld [vmem:[%s5698_s0 + $0x3b0] sm:$0xff] }
  0xb7   :  { %2583 = vmatpush1.bf16.msra.mxu1 %v4324_v52  ;;  %v4372_v52 = vld [vmem:[%s5697_s1 + $0x350] ss:$8 sps:$4 sm:$0xff]  }
  0xb8   :  { %3035 = vmatpush1.bf16.msra.mxu0 %v4327_v53  ;;  %2584 = vmatprep.subr.bf16.mxu1 %v4332_v54  ;;  %v4375_v53 = vld [vmem:[%s5697_s1 + $0x750] ss:$8 sps:$4 sm:$0xff]   ;;  %v4380_v54 = vld [vmem:[%s5697_s1 + $0x364] ss:$8 sps:$4 sm:$0xff]  }
  0xb9   :  { %3036 = vmatprep.subr.bf16.mxu0 %v4335_v55  ;;  %v4383_v55 = vld [vmem:[%s5697_s1 + $0x764] ss:$8 sps:$4 sm:$0xff]   ;;  %v140_v45 = vld [vmem:[%s5698_s0 + $0x3f0] sm:$0xff] }
  0xba   :  { %2546 = vmatmul.mubr.bf16.gmra.mrb[28].mxu1 %v3496_v59  ;;  %v88_v59 = vld [vmem:[%s5698_s0 + $0x250] sm:$0xff] }
  0xbb   :  { %2998 = vmatmul.mubr.bf16.gmra.mrb[28].mxu0 %v3504_v60  ;;  %2585 = vmatpush1.bf16.msra.mxu1 %v4330_v56  ;;  %v80_v56 = vld [vmem:[%s5698_s0 + $0x210] sm:$0xff] }
  0xbc   :  { %3037 = vmatpush1.bf16.msra.mxu0 %v4333_v57  ;;  %2586 = vmatprep.subr.bf16.mxu1 %v4338_v0  ;;  %v3434_v57 = vcombine.low %v64_v40, %v72_v43  ;;  %v84_v60 = vld [vmem:[%s5698_s0 + $0x230] sm:$0xff] }
  0xbd   :  { %3038 = vmatprep.subr.bf16.mxu0 %v4341_v1  ;;  %2588 = vmatprep.mubr.bf16.mxu1 %v3387_v2  ;;  %v4386_v0 = vld [vmem:[%s5697_s1 + $0x374] ss:$8 sps:$4 sm:$0xff]   ;;  %v3451_v2 = vcombine.high %v80_v56, %v88_v59  ;;  %v3458_v10 = vcombine.low %v84_v60, %v92_v61 }
  0xbe   :  { %3040 = vmatprep.mubr.bf16.mxu0 %v3395_v3  ;;  %v4389_v1 = vld [vmem:[%s5697_s1 + $0x774] ss:$8 sps:$4 sm:$0xff]   ;;  %v3459_v3 = vcombine.high %v84_v60, %v92_v61 }
  0xbf   :  { %2587 = vmatpush1.bf16.msra.mxu1 %v4336_v4  ;;  %v4384_v4 = vld [vmem:[%s5697_s1 + $0x370] ss:$8 sps:$4 sm:$0xff]  }
  0xc0   :  { %3039 = vmatpush1.bf16.msra.mxu0 %v4339_v5  ;;  %2669 = vmatprep.subr.bf16.mxu1 %v4344_v6  ;;  %v4387_v5 = vld [vmem:[%s5697_s1 + $0x770] ss:$8 sps:$4 sm:$0xff]   ;;  %v4392_v6 = vld [vmem:[%s5697_s1 + $0x384] ss:$8 sps:$4 sm:$0xff]  }
  0xc1   :  { %3121 = vmatprep.subr.bf16.mxu0 %v4347_v7  ;;  %v4395_v7 = vld [vmem:[%s5697_s1 + $0x784] ss:$8 sps:$4 sm:$0xff]   ;;  %v128_v40 = vld [vmem:[%s5698_s0 + $0x390] sm:$0xff]  ;;  %v21_v60 = vld [vmem:[%s5698_s0 + $0x38] sm:$0xff] }
  0xc2   :  { %2589 = vmatmul.mubr.bf16.vlgmr.msra.gmra.mrb[0].mxu1 %v3386_v12  ;;  %v100_v12 = vld [vmem:[%s5698_s0 + $0x2b0] sm:$0xff]  ;;  %v29_v61 = vld [vmem:[%s5698_s0 + $0x78] sm:$0xff] }
  0xc3   :  { %3041 = vmatmul.mubr.bf16.vlgmr.msra.gmra.mrb[0].mxu0 %v3394_v13  ;;  %2670 = vmatpush1.bf16.msra.mxu1 %v4342_v8  ;;  %v96_v8 = vld [vmem:[%s5698_s0 + $0x290] sm:$0xff] }
  0xc4   :  { %3122 = vmatpush1.bf16.msra.mxu0 %v4345_v9  ;;  %2671 = vmatprep.subr.bf16.mxu1 %v4350_v16  ;;  %v3450_v9 = vcombine.low %v80_v56, %v88_v59  ;;  %v108_v13 = vld [vmem:[%s5698_s0 + $0x2f0] sm:$0xff]  ;;  %v17_v56 = vld [vmem:[%s5698_s0 + $0x18] sm:$0xff] }
  0xc5   :  { %3123 = vmatprep.subr.bf16.mxu0 %v4353_v17  ;;  %2598 = vmatprep.mubr.bf16.mxu1 %v3403_v18  ;;  %v4398_v16 = vld [vmem:[%s5697_s1 + $0x394] ss:$8 sps:$4 sm:$0xff]   ;;  %v3467_v18 = vcombine.high %v96_v8, %v104_v11  ;;  %v3474_v26 = vcombine.low %v100_v12, %v108_v13 }
  0xc6   :  { %3050 = vmatprep.mubr.bf16.mxu0 %v3411_v19  ;;  %v4401_v17 = vld [vmem:[%s5697_s1 + $0x794] ss:$8 sps:$4 sm:$0xff]   ;;  %v3475_v19 = vcombine.high %v100_v12, %v108_v13 }
  0xc7   :  { %2672 = vmatpush1.bf16.msra.mxu1 %v4348_v20  ;;  %v4396_v20 = vld [vmem:[%s5697_s1 + $0x390] ss:$8 sps:$4 sm:$0xff]  }
  0xc8   :  { %3124 = vmatpush1.bf16.msra.mxu0 %v4351_v21  ;;  %2673 = vmatprep.subr.bf16.mxu1 %v4356_v22  ;;  %v4399_v21 = vld [vmem:[%s5697_s1 + $0x790] ss:$8 sps:$4 sm:$0xff]   ;;  %v4404_v22 = vld [vmem:[%s5697_s1 + $0x3a4] ss:$8 sps:$4 sm:$0xff]  }
  0xc9   :  { %3125 = vmatprep.subr.bf16.mxu0 %v4359_v23  ;;  %v4407_v23 = vld [vmem:[%s5697_s1 + $0x7a4] ss:$8 sps:$4 sm:$0xff]   ;;  %v136_v43 = vld [vmem:[%s5698_s0 + $0x3d0] sm:$0xff]  ;;  %v25_v59 = vld [vmem:[%s5698_s0 + $0x58] sm:$0xff] }
  0xca   :  { %2599 = vmatmul.mubr.bf16.gmra.mrb[4].mxu1 %v3402_v28  ;;  %v116_v28 = vld [vmem:[%s5698_s0 + $0x330] sm:$0xff] }
  0xcb   :  { %3051 = vmatmul.mubr.bf16.gmra.mrb[4].mxu0 %v3410_v29  ;;  %2674 = vmatpush1.bf16.msra.mxu1 %v4354_v24  ;;  %v112_v24 = vld [vmem:[%s5698_s0 + $0x310] sm:$0xff] }
  0xcc   :  { %3126 = vmatpush1.bf16.msra.mxu0 %v4357_v25  ;;  %2675 = vmatprep.subr.bf16.mxu1 %v4362_v32  ;;  %v3466_v25 = vcombine.low %v96_v8, %v104_v11  ;;  %v124_v29 = vld [vmem:[%s5698_s0 + $0x370] sm:$0xff]  ;;  %v37_v8 = vld [vmem:[%s5698_s0 + $0xb8] sm:$0xff]  ;;  %v3396_v11 = vcombine.low %v21_v60, %v29_v61 }
  0xcd   :  { %3127 = vmatprep.subr.bf16.mxu0 %v4365_v33  ;;  %2608 = vmatprep.mubr.bf16.mxu1 %v3419_v34  ;;  %v4410_v32 = vld [vmem:[%s5697_s1 + $0x3b4] ss:$8 sps:$4 sm:$0xff]   ;;  %v3483_v34 = vcombine.high %v112_v24, %v120_v27 }
  0xce   :  { %3060 = vmatprep.mubr.bf16.mxu0 %v3427_v35  ;;  %v4413_v33 = vld [vmem:[%s5697_s1 + $0x7b4] ss:$8 sps:$4 sm:$0xff]   ;;  %v3491_v35 = vcombine.high %v116_v28, %v124_v29 }
  0xcf   :  { %2676 = vmatpush1.bf16.msra.mxu1 %v4360_v36  ;;  %v4408_v36 = vld [vmem:[%s5697_s1 + $0x3b0] ss:$8 sps:$4 sm:$0xff]  }
  0xd0   :  { %3128 = vmatpush1.bf16.msra.mxu0 %v4363_v37  ;;  %2677 = vmatprep.subr.bf16.mxu1 %v4368_v38  ;;  %v4411_v37 = vld [vmem:[%s5697_s1 + $0x7b0] ss:$8 sps:$4 sm:$0xff]   ;;  %v4416_v38 = vld [vmem:[%s5697_s1 + $0x3c4] ss:$8 sps:$4 sm:$0xff]  }
  0xd1   :  { %3129 = vmatprep.subr.bf16.mxu0 %v4371_v39  ;;  %v4419_v39 = vld [vmem:[%s5697_s1 + $0x7c4] ss:$8 sps:$4 sm:$0xff]  }
  0xd2   :  { %2609 = vmatmul.mubr.bf16.gmra.mrb[8].mxu1 %v3418_v41  ;;  %v3482_v41 = vcombine.low %v112_v24, %v120_v27  ;;  %v69_v24 = vld [vmem:[%s5698_s0 + $0x1b8] sm:$0xff] }
  0xd3   :  { %3061 = vmatmul.mubr.bf16.gmra.mrb[8].mxu0 %v3426_v42  ;;  %2678 = vmatpush1.bf16.msra.mxu1 %v4366_v46  ;;  %v3490_v42 = vcombine.low %v116_v28, %v124_v29  ;;  %v4414_v46 = vld [vmem:[%s5697_s1 + $0x3c0] ss:$8 sps:$4 sm:$0xff]  }
  0xd4   :  { %3130 = vmatpush1.bf16.msra.mxu0 %v4369_v47  ;;  %2679 = vmatprep.subr.bf16.mxu1 %v4374_v48  ;;  %v4417_v47 = vld [vmem:[%s5697_s1 + $0x7c0] ss:$8 sps:$4 sm:$0xff]   ;;  %v4422_v48 = vld [vmem:[%s5697_s1 + $0x3d4] ss:$8 sps:$4 sm:$0xff]  }
  0xd5   :  { %3131 = vmatprep.subr.bf16.mxu0 %v4377_v49  ;;  %2618 = vmatprep.mubr.bf16.mxu1 %v3435_v50  ;;  %v4425_v49 = vld [vmem:[%s5697_s1 + $0x7d4] ss:$8 sps:$4 sm:$0xff]   ;;  %v3499_v50 = vcombine.high %v128_v40, %v136_v43 }
  0xd6   :  { %3070 = vmatprep.mubr.bf16.mxu0 %v3443_v51  ;;  %v3507_v51 = vcombine.high %v132_v44, %v140_v45 }
  0xd7   :  { %2680 = vmatpush1.bf16.msra.mxu1 %v4372_v52  ;;  %v4420_v52 = vld [vmem:[%s5697_s1 + $0x3d0] ss:$8 sps:$4 sm:$0xff]  }
  0xd8   :  { %3132 = vmatpush1.bf16.msra.mxu0 %v4375_v53  ;;  %2681 = vmatprep.subr.bf16.mxu1 %v4380_v54  ;;  %v4423_v53 = vld [vmem:[%s5697_s1 + $0x7d0] ss:$8 sps:$4 sm:$0xff]   ;;  %v4428_v54 = vld [vmem:[%s5697_s1 + $0x3e4] ss:$8 sps:$4 sm:$0xff]  }
  0xd9   :  { %3133 = vmatprep.subr.bf16.mxu0 %v4383_v55  ;;  %v4431_v55 = vld [vmem:[%s5697_s1 + $0x7e4] ss:$8 sps:$4 sm:$0xff]  }
  0xda   :  { %2619 = vmatmul.mubr.bf16.gmra.mrb[12].mxu1 %v3434_v57  ;;  %v3498_v57 = vcombine.low %v128_v40, %v136_v43  ;;  %v101_v40 = vld [vmem:[%s5698_s0 + $0x2b8] sm:$0xff] }
  0xdb   :  { %3071 = vmatmul.mubr.bf16.gmra.mrb[12].mxu0 %v3442_v58  ;;  %2682 = vmatpush1.bf16.msra.mxu1 %v4378_v62  ;;  %v3506_v58 = vcombine.low %v132_v44, %v140_v45  ;;  %v4426_v62 = vld [vmem:[%s5697_s1 + $0x3e0] ss:$8 sps:$4 sm:$0xff]  }
  0xdc   :  { %3134 = vmatpush1.bf16.msra.mxu0 %v4381_v63  ;;  %2683 = vmatprep.subr.bf16.mxu1 %v4386_v0  ;;  %v4429_v63 = vld [vmem:[%s5697_s1 + $0x7e0] ss:$8 sps:$4 sm:$0xff]   ;;  %v4434_v0 = vld [vmem:[%s5697_s1 + $0x3f4] ss:$8 sps:$4 sm:$0xff]  }
  0xdd   :  { %3135 = vmatprep.subr.bf16.mxu0 %v4389_v1  ;;  %2628 = vmatprep.mubr.bf16.mxu1 %v3451_v2  ;;  %v4437_v1 = vld [vmem:[%s5697_s1 + $0x7f4] ss:$8 sps:$4 sm:$0xff]   ;;  %v3389_v2 = vcombine.high %v17_v56, %v25_v59 }
  0xde   :  { %3080 = vmatprep.mubr.bf16.mxu0 %v3459_v3  ;;  %v3397_v3 = vcombine.high %v21_v60, %v29_v61 }
  0xdf   :  { %2684 = vmatpush1.bf16.msra.mxu1 %v4384_v4  ;;  %v4432_v4 = vld [vmem:[%s5697_s1 + $0x3f0] ss:$8 sps:$4 sm:$0xff]  }
  0xe0   :  { %3136 = vmatpush1.bf16.msra.mxu0 %v4387_v5  ;;  %2685 = vmatprep.subr.bf16.mxu1 %v4392_v6  ;;  %v4435_v5 = vld [vmem:[%s5697_s1 + $0x7f0] ss:$8 sps:$4 sm:$0xff]  }
  0xe1   :  { %3137 = vmatprep.subr.bf16.mxu0 %v4395_v7  ;;  %v33_v6 = vld [vmem:[%s5698_s0 + $0x98] sm:$0xff] }
  0xe2   :  { %2629 = vmatmul.mubr.bf16.gmra.mrb[16].mxu1 %v3450_v9  ;;  %v41_v7 = vld [vmem:[%s5698_s0 + $0xd8] sm:$0xff] }
  0xe3   :  { %3081 = vmatmul.mubr.bf16.gmra.mrb[16].mxu0 %v3458_v10  ;;  %2686 = vmatpush1.bf16.msra.mxu1 %v4390_v14  ;;  %v45_v9 = vld [vmem:[%s5698_s0 + $0xf8] sm:$0xff]  ;;  %v3388_v10 = vcombine.low %v17_v56, %v25_v59  ;;  %v3405_v12 = vcombine.high %v33_v6, %v41_v7 }
  0xe4   :  { %3138 = vmatpush1.bf16.msra.mxu0 %v4393_v15  ;;  %2687 = vmatprep.subr.bf16.mxu1 %v4398_v16  ;;  %v3413_v13 = vcombine.high %v37_v8, %v45_v9  ;;  %v49_v14 = vld [vmem:[%s5698_s0 + $0x118] sm:$0xff] }
  0xe5   :  { %3139 = vmatprep.subr.bf16.mxu0 %v4401_v17  ;;  %2638 = vmatprep.mubr.bf16.mxu1 %v3467_v18  ;;  %v57_v15 = vld [vmem:[%s5698_s0 + $0x158] sm:$0xff]  ;;  %v3404_v18 = vcombine.low %v33_v6, %v41_v7 }
  0xe6   :  { %3090 = vmatprep.mubr.bf16.mxu0 %v3475_v19  ;;  %v53_v16 = vld [vmem:[%s5698_s0 + $0x138] sm:$0xff]  ;;  %v3412_v19 = vcombine.low %v37_v8, %v45_v9 }
  0xe7   :  { %2688 = vmatpush1.bf16.msra.mxu1 %v4396_v20  ;;  %v61_v17 = vld [vmem:[%s5698_s0 + $0x178] sm:$0xff]  ;;  %v3421_v20 = vcombine.high %v49_v14, %v57_v15 }
  0xe8   :  { %3140 = vmatpush1.bf16.msra.mxu0 %v4399_v21  ;;  %2689 = vmatprep.subr.bf16.mxu1 %v4404_v22  ;;  %v3429_v21 = vcombine.high %v53_v16, %v61_v17  ;;  %v65_v22 = vld [vmem:[%s5698_s0 + $0x198] sm:$0xff]  ;;  %v3428_v27 = vcombine.low %v53_v16, %v61_v17 }
  0xe9   :  { %3141 = vmatprep.subr.bf16.mxu0 %v4407_v23  ;;  %v73_v23 = vld [vmem:[%s5698_s0 + $0x1d8] sm:$0xff] }
  0xea   :  { %2639 = vmatmul.mubr.bf16.gmra.mrb[20].mxu1 %v3466_v25  ;;  %v77_v25 = vld [vmem:[%s5698_s0 + $0x1f8] sm:$0xff]  ;;  %v3437_v28 = vcombine.high %v65_v22, %v73_v23 }
  0xeb   :  { %3091 = vmatmul.mubr.bf16.gmra.mrb[20].mxu0 %v3474_v26  ;;  %2690 = vmatpush1.bf16.msra.mxu1 %v4402_v30  ;;  %v3420_v26 = vcombine.low %v49_v14, %v57_v15  ;;  %v3445_v29 = vcombine.high %v69_v24, %v77_v25  ;;  %v81_v30 = vld [vmem:[%s5698_s0 + $0x218] sm:$0xff] }
  0xec   :  { %3142 = vmatpush1.bf16.msra.mxu0 %v4405_v31  ;;  %2691 = vmatprep.subr.bf16.mxu1 %v4410_v32  ;;  %v89_v31 = vld [vmem:[%s5698_s0 + $0x258] sm:$0xff] }
  0xed   :  { %3143 = vmatprep.subr.bf16.mxu0 %v4413_v33  ;;  %2648 = vmatprep.mubr.bf16.mxu1 %v3483_v34  ;;  %v85_v32 = vld [vmem:[%s5698_s0 + $0x238] sm:$0xff]  ;;  %v3436_v34 = vcombine.low %v65_v22, %v73_v23 }
  0xee   :  { %3100 = vmatprep.mubr.bf16.mxu0 %v3491_v35  ;;  %v93_v33 = vld [vmem:[%s5698_s0 + $0x278] sm:$0xff]  ;;  %v3444_v35 = vcombine.low %v69_v24, %v77_v25 }
  0xef   :  { %2692 = vmatpush1.bf16.msra.mxu1 %v4408_v36  ;;  %v3453_v36 = vcombine.high %v81_v30, %v89_v31  ;;  %v3460_v43 = vcombine.low %v85_v32, %v93_v33  ;;  %v133_v56 = vld [vmem:[%s5698_s0 + $0x3b8] sm:$0xff] }
  0xf0   :  { %3144 = vmatpush1.bf16.msra.mxu0 %v4411_v37  ;;  %2693 = vmatprep.subr.bf16.mxu1 %v4416_v38  ;;  %v3461_v37 = vcombine.high %v85_v32, %v93_v33  ;;  %v97_v38 = vld [vmem:[%s5698_s0 + $0x298] sm:$0xff] }
  0xf1   :  { %3145 = vmatprep.subr.bf16.mxu0 %v4419_v39  ;;  %v105_v39 = vld [vmem:[%s5698_s0 + $0x2d8] sm:$0xff] }
  0xf2   :  { %2649 = vmatmul.mubr.bf16.gmra.mrb[24].mxu1 %v3482_v41  ;;  %v109_v41 = vld [vmem:[%s5698_s0 + $0x2f8] sm:$0xff]  ;;  %v3469_v44 = vcombine.high %v97_v38, %v105_v39 }
  0xf3   :  { %3101 = vmatmul.mubr.bf16.gmra.mrb[24].mxu0 %v3490_v42  ;;  %2694 = vmatpush1.bf16.msra.mxu1 %v4414_v46  ;;  %v3452_v42 = vcombine.low %v81_v30, %v89_v31  ;;  %v3477_v45 = vcombine.high %v101_v40, %v109_v41  ;;  %v113_v46 = vld [vmem:[%s5698_s0 + $0x318] sm:$0xff] }
  0xf4   :  { %3146 = vmatpush1.bf16.msra.mxu0 %v4417_v47  ;;  %2695 = vmatprep.subr.bf16.mxu1 %v4422_v48  ;;  %v121_v47 = vld [vmem:[%s5698_s0 + $0x358] sm:$0xff] }
  0xf5   :  { %3147 = vmatprep.subr.bf16.mxu0 %v4425_v49  ;;  %2658 = vmatprep.mubr.bf16.mxu1 %v3499_v50  ;;  %v117_v48 = vld [vmem:[%s5698_s0 + $0x338] sm:$0xff]  ;;  %v3468_v50 = vcombine.low %v97_v38, %v105_v39 }
  0xf6   :  { %3110 = vmatprep.mubr.bf16.mxu0 %v3507_v51  ;;  %v125_v49 = vld [vmem:[%s5698_s0 + $0x378] sm:$0xff]  ;;  %v3476_v51 = vcombine.low %v101_v40, %v109_v41 }
  0xf7   :  { %2696 = vmatpush1.bf16.msra.mxu1 %v4420_v52  ;;  %v3485_v52 = vcombine.high %v113_v46, %v121_v47  ;;  %v3492_v59 = vcombine.low %v117_v48, %v125_v49 }
  0xf8   :  { %3148 = vmatpush1.bf16.msra.mxu0 %v4423_v53  ;;  %2697 = vmatprep.subr.bf16.mxu1 %v4428_v54  ;;  %v3493_v53 = vcombine.high %v117_v48, %v125_v49  ;;  %v129_v54 = vld [vmem:[%s5698_s0 + $0x398] sm:$0xff] }
  0xf9   :  { %3149 = vmatprep.subr.bf16.mxu0 %v4431_v55  ;;  %v137_v55 = vld [vmem:[%s5698_s0 + $0x3d8] sm:$0xff] }
  0xfa   :  { %2659 = vmatmul.mubr.bf16.gmra.mrb[28].mxu1 %v3498_v57  ;;  %v141_v57 = vld [vmem:[%s5698_s0 + $0x3f8] sm:$0xff]  ;;  %v3501_v60 = vcombine.high %v129_v54, %v137_v55 }
  0xfb   :  { %3111 = vmatmul.mubr.bf16.gmra.mrb[28].mxu0 %v3506_v58  ;;  %2698 = vmatpush1.bf16.msra.mxu1 %v4426_v62  ;;  %v3484_v58 = vcombine.low %v113_v46, %v121_v47  ;;  %v3509_v61 = vcombine.high %v133_v56, %v141_v57  ;;  %v3500_v62 = vcombine.low %v129_v54, %v137_v55 }
  0xfc   :  { %3150 = vmatpush1.bf16.msra.mxu0 %v4429_v63  ;;  %2699 = vmatprep.subr.bf16.mxu1 %v4434_v0  ;;  %v3508_v63 = vcombine.low %v133_v56, %v141_v57  ;;  %v400_v0 = vlaneseq }
  0xfd   :  { %3151 = vmatprep.subr.bf16.mxu0 %v4437_v1  ;;  %2701 = vmatprep.mubr.bf16.mxu1 %v3389_v2 }
  0xfe   :  { %3153 = vmatprep.mubr.bf16.mxu0 %v3397_v3  ;;  %v401_v1 = vshrl.u32 %v400_v0, 7  ;;  %v398_v3 = vld [vmem:[%s5699_s2] sm:$0x3] }
  0xff   :  { %2700 = vmatpush1.bf16.msra.mxu1 %v4432_v4 }
 0x100   :  { %3152 = vmatpush1.bf16.msra.mxu0 %v4435_v5  ;;  %v402_v2 = vsub.s32 0, %v401_v1  ;;  %v406_v4 = vsub.s32 1, %v401_v1 }
 0x102   :  { %2702 = vmatmul.mubr.bf16.vlgmr.msra.gmra.mrb[0].mxu1 %v3388_v10  ;;  %v5613_v5 = vrot.slane %v398_v3, %v402_v2  ;;  %v5615_v6 = vrot.slane %v398_v3, %v406_v4 }
 0x103   :  { %3154 = vmatmul.mubr.bf16.vlgmr.msra.gmra.mrb[0].mxu0 %v3396_v11  ;;  %2711 = vmatprep.mubr.bf16.mxu1 %v3405_v12 }
 0x104   :  { %3163 = vmatprep.mubr.bf16.mxu0 %v3413_v13 }
 0x10a   :  { %2712 = vmatmul.mubr.bf16.gmra.mrb[4].mxu1 %v3404_v18 }
 0x10b   :  { %3164 = vmatmul.mubr.bf16.gmra.mrb[4].mxu0 %v3412_v19  ;;  %2721 = vmatprep.mubr.bf16.mxu1 %v3421_v20 }
 0x10c   :  { %3173 = vmatprep.mubr.bf16.mxu0 %v3429_v21 }
 0x112   :  { %2722 = vmatmul.mubr.bf16.gmra.mrb[8].mxu1 %v3420_v26 }
 0x113   :  { %3174 = vmatmul.mubr.bf16.gmra.mrb[8].mxu0 %v3428_v27  ;;  %2731 = vmatprep.mubr.bf16.mxu1 %v3437_v28 }
 0x114   :  { %3183 = vmatprep.mubr.bf16.mxu0 %v3445_v29 }
 0x11a   :  { %2732 = vmatmul.mubr.bf16.gmra.mrb[12].mxu1 %v3436_v34 }
 0x11b   :  { %3184 = vmatmul.mubr.bf16.gmra.mrb[12].mxu0 %v3444_v35  ;;  %2741 = vmatprep.mubr.bf16.mxu1 %v3453_v36 }
 0x11c   :  { %3193 = vmatprep.mubr.bf16.mxu0 %v3461_v37 }
 0x122   :  { %2742 = vmatmul.mubr.bf16.gmra.mrb[16].mxu1 %v3452_v42 }
 0x123   :  { %3194 = vmatmul.mubr.bf16.gmra.mrb[16].mxu0 %v3460_v43  ;;  %2751 = vmatprep.mubr.bf16.mxu1 %v3469_v44 }
 0x124   :  { %3203 = vmatprep.mubr.bf16.mxu0 %v3477_v45 }
 0x12a   :  { %2752 = vmatmul.mubr.bf16.gmra.mrb[20].mxu1 %v3468_v50 }
 0x12b   :  { %3204 = vmatmul.mubr.bf16.gmra.mrb[20].mxu0 %v3476_v51  ;;  %2761 = vmatprep.mubr.bf16.mxu1 %v3485_v52 }
 0x12c   :  { %3213 = vmatprep.mubr.bf16.mxu0 %v3493_v53 }
 0x132   :  { %2762 = vmatmul.mubr.bf16.gmra.mrb[24].mxu1 %v3484_v58 }
 0x133   :  { %3214 = vmatmul.mubr.bf16.gmra.mrb[24].mxu0 %v3492_v59  ;;  %2771 = vmatprep.mubr.bf16.mxu1 %v3501_v60 }
 0x134   :  { %3223 = vmatprep.mubr.bf16.mxu0 %v3509_v61 }
 0x13a   :  { %2772 = vmatmul.mubr.bf16.gmra.mrb[28].mxu1 %v3500_v62 }
 0x13b   :  { %3224 = vmatmul.mubr.bf16.gmra.mrb[28].mxu0 %v3508_v63 }
 0x1d5   :  { %v2703_v7 = vpop.f32.mrb[0].mxu1 }
 0x1d6   :  { %v3155_v8 = vpop.f32.mrb[0].mxu0  ;;  %v3798_v9 = vadd.f32 %v2703_v7, %v5613_v5  ;;  %v2705_v10 = vpop.f32.mrb[1].mxu1 }
 0x1d7   :  { %v3157_v11 = vpop.f32.mrb[1].mxu0  ;;  %v3800_v12 = vadd.f32 %v2705_v10, %v5615_v6  ;;  %v2707_v13 = vpop.f32.mrb[2].mxu1 }
 0x1d8   :  { %v3159_v14 = vpop.f32.mrb[2].mxu0  ;;  %v3799_v15 = vadd.f32 %v3798_v9, %v3155_v8  ;;  %v3802_v16 = vadd.f32 %v2707_v13, %v5613_v5  ;;  %v2709_v17 = vpop.f32.mrb[3].mxu1 }
 0x1d9   :  { %v3161_v18 = vpop.f32.mrb[3].mxu0  ;;  %v3801_v19 = vadd.f32 %v3800_v12, %v3157_v11  ;;  %v3804_v20 = vadd.f32 %v2709_v17, %v5615_v6 }
 0x1da   :  { %v3234_v21 = vmax.f32 %v3799_v15, 0.0  ;;  %v3803_v22 = vadd.f32 %v3802_v16, %v3159_v14 }
 0x1db   :  { %v3235_v23 = vmax.f32 %v3801_v19, 0.0  ;;  %v3805_v24 = vadd.f32 %v3804_v20, %v3161_v18 }
 0x1dc   :  { %v3236_v25 = vmax.f32 %v3803_v22, 0.0 }
 0x1dd   :  { %v3782_v26 = vpack.c.bf16 %v3235_v23, %v3234_v21  ;;  %v3237_v27 = vmax.f32 %v3805_v24, 0.0  ;;  %v2713_v28 = vpop.f32.mrb[4].mxu1 }
 0x1de   :  { %v3165_v29 = vpop.f32.mrb[4].mxu0  ;;  %v3806_v30 = vadd.f32 %v2713_v28, %v5613_v5  ;;  %v2715_v31 = vpop.f32.mrb[5].mxu1 }
 0x1df   :  { %v3167_v32 = vpop.f32.mrb[5].mxu0  ;;  %3362 = vst [vmem:[%s5700_s3] sm:$0xff] %v3782_v26  ;;  %v3783_v33 = vpack.c.bf16 %v3237_v27, %v3236_v25  ;;  %v3808_v34 = vadd.f32 %v2715_v31, %v5615_v6  ;;  %v2717_v35 = vpop.f32.mrb[6].mxu1 }
 0x1e0   :  { %v3169_v36 = vpop.f32.mrb[6].mxu0  ;;  %v3807_v37 = vadd.f32 %v3806_v30, %v3165_v29  ;;  %v3810_v38 = vadd.f32 %v2717_v35, %v5613_v5  ;;  %v2719_v39 = vpop.f32.mrb[7].mxu1 }
 0x1e1   :  { %v3171_v40 = vpop.f32.mrb[7].mxu0  ;;  %3363 = vst [vmem:[%s5700_s3 + $0x8] sm:$0xff] %v3783_v33  ;;  %v3809_v41 = vadd.f32 %v3808_v34, %v3167_v32  ;;  %v3812_v42 = vadd.f32 %v2719_v39, %v5615_v6 }
 0x1e2   :  { %v3238_v43 = vmax.f32 %v3807_v37, 0.0  ;;  %v3811_v44 = vadd.f32 %v3810_v38, %v3169_v36 }
 0x1e3   :  { %v3239_v45 = vmax.f32 %v3809_v41, 0.0  ;;  %v3813_v46 = vadd.f32 %v3812_v42, %v3171_v40 }
 0x1e4   :  { %v3240_v47 = vmax.f32 %v3811_v44, 0.0 }
 0x1e5   :  { %v3784_v48 = vpack.c.bf16 %v3239_v45, %v3238_v43  ;;  %v3241_v49 = vmax.f32 %v3813_v46, 0.0  ;;  %v2723_v50 = vpop.f32.mrb[8].mxu1 }
 0x1e6   :  { %v3175_v51 = vpop.f32.mrb[8].mxu0  ;;  %v3814_v52 = vadd.f32 %v2723_v50, %v5613_v5  ;;  %v2725_v53 = vpop.f32.mrb[9].mxu1 }
 0x1e7   :  { %v3177_v54 = vpop.f32.mrb[9].mxu0  ;;  %3364 = vst [vmem:[%s5700_s3 + $0x10] sm:$0xff] %v3784_v48  ;;  %v3785_v55 = vpack.c.bf16 %v3241_v49, %v3240_v47  ;;  %v3816_v56 = vadd.f32 %v2725_v53, %v5615_v6  ;;  %v2727_v57 = vpop.f32.mrb[10].mxu1 }
 0x1e8   :  { %v3179_v58 = vpop.f32.mrb[10].mxu0  ;;  %v3815_v59 = vadd.f32 %v3814_v52, %v3175_v51  ;;  %v3818_v60 = vadd.f32 %v2727_v57, %v5613_v5  ;;  %v2729_v61 = vpop.f32.mrb[11].mxu1 }
 0x1e9   :  { %v3181_v62 = vpop.f32.mrb[11].mxu0  ;;  %3365 = vst [vmem:[%s5700_s3 + $0x18] sm:$0xff] %v3785_v55  ;;  %v3817_v63 = vadd.f32 %v3816_v56, %v3177_v54  ;;  %v3820_v0 = vadd.f32 %v2729_v61, %v5615_v6 }
 0x1ea   :  { %v3242_v1 = vmax.f32 %v3815_v59, 0.0  ;;  %v3819_v2 = vadd.f32 %v3818_v60, %v3179_v58 }
 0x1eb   :  { %v3243_v3 = vmax.f32 %v3817_v63, 0.0  ;;  %v3821_v4 = vadd.f32 %v3820_v0, %v3181_v62 }
 0x1ec   :  { %v3244_v7 = vmax.f32 %v3819_v2, 0.0 }
 0x1ed   :  { %v3786_v8 = vpack.c.bf16 %v3243_v3, %v3242_v1  ;;  %v3245_v9 = vmax.f32 %v3821_v4, 0.0  ;;  %v2733_v10 = vpop.f32.mrb[12].mxu1 }
 0x1ee   :  { %v3185_v11 = vpop.f32.mrb[12].mxu0  ;;  %v3822_v12 = vadd.f32 %v2733_v10, %v5613_v5  ;;  %v2735_v13 = vpop.f32.mrb[13].mxu1 }
 0x1ef   :  { %v3187_v14 = vpop.f32.mrb[13].mxu0  ;;  %3366 = vst [vmem:[%s5700_s3 + $0x20] sm:$0xff] %v3786_v8  ;;  %v3787_v15 = vpack.c.bf16 %v3245_v9, %v3244_v7  ;;  %v3824_v16 = vadd.f32 %v2735_v13, %v5615_v6  ;;  %v2737_v17 = vpop.f32.mrb[14].mxu1 }
 0x1f0   :  { %v3189_v18 = vpop.f32.mrb[14].mxu0  ;;  %v3823_v19 = vadd.f32 %v3822_v12, %v3185_v11  ;;  %v3826_v20 = vadd.f32 %v2737_v17, %v5613_v5  ;;  %v2739_v21 = vpop.f32.mrb[15].mxu1 }
 0x1f1   :  { %v3191_v22 = vpop.f32.mrb[15].mxu0  ;;  %3367 = vst [vmem:[%s5700_s3 + $0x28] sm:$0xff] %v3787_v15  ;;  %v3825_v23 = vadd.f32 %v3824_v16, %v3187_v14  ;;  %v3828_v24 = vadd.f32 %v2739_v21, %v5615_v6 }
 0x1f2   :  { %v3246_v25 = vmax.f32 %v3823_v19, 0.0  ;;  %v3827_v26 = vadd.f32 %v3826_v20, %v3189_v18 }
 0x1f3   :  { %v3247_v27 = vmax.f32 %v3825_v23, 0.0  ;;  %v3829_v28 = vadd.f32 %v3828_v24, %v3191_v22 }
 0x1f4   :  { %v3248_v29 = vmax.f32 %v3827_v26, 0.0 }
 0x1f5   :  { %v3788_v30 = vpack.c.bf16 %v3247_v27, %v3246_v25  ;;  %v3249_v31 = vmax.f32 %v3829_v28, 0.0  ;;  %v2743_v32 = vpop.f32.mrb[16].mxu1 }
 0x1f6   :  { %v3195_v33 = vpop.f32.mrb[16].mxu0  ;;  %v3830_v34 = vadd.f32 %v2743_v32, %v5613_v5  ;;  %v2745_v35 = vpop.f32.mrb[17].mxu1 }
 0x1f7   :  { %v3197_v36 = vpop.f32.mrb[17].mxu0  ;;  %3368 = vst [vmem:[%s5700_s3 + $0x30] sm:$0xff] %v3788_v30  ;;  %v3789_v37 = vpack.c.bf16 %v3249_v31, %v3248_v29  ;;  %v3832_v38 = vadd.f32 %v2745_v35, %v5615_v6  ;;  %v2747_v39 = vpop.f32.mrb[18].mxu1 }
 0x1f8   :  { %v3199_v40 = vpop.f32.mrb[18].mxu0  ;;  %v3831_v41 = vadd.f32 %v3830_v34, %v3195_v33  ;;  %v3834_v42 = vadd.f32 %v2747_v39, %v5613_v5  ;;  %v2749_v43 = vpop.f32.mrb[19].mxu1 }
 0x1f9   :  { %v3201_v44 = vpop.f32.mrb[19].mxu0  ;;  %3369 = vst [vmem:[%s5700_s3 + $0x38] sm:$0xff] %v3789_v37  ;;  %v3833_v45 = vadd.f32 %v3832_v38, %v3197_v36  ;;  %v3836_v46 = vadd.f32 %v2749_v43, %v5615_v6 }
 0x1fa   :  { %v3250_v47 = vmax.f32 %v3831_v41, 0.0  ;;  %v3835_v48 = vadd.f32 %v3834_v42, %v3199_v40 }
 0x1fb   :  { %v3251_v49 = vmax.f32 %v3833_v45, 0.0  ;;  %v3837_v50 = vadd.f32 %v3836_v46, %v3201_v44 }
 0x1fc   :  { %v3252_v51 = vmax.f32 %v3835_v48, 0.0 }
 0x1fd   :  { %v3790_v52 = vpack.c.bf16 %v3251_v49, %v3250_v47  ;;  %v3253_v53 = vmax.f32 %v3837_v50, 0.0  ;;  %v2753_v54 = vpop.f32.mrb[20].mxu1 }
 0x1fe   :  { %v3205_v55 = vpop.f32.mrb[20].mxu0  ;;  %v3838_v56 = vadd.f32 %v2753_v54, %v5613_v5  ;;  %v2755_v57 = vpop.f32.mrb[21].mxu1 }
 0x1ff   :  { %v3207_v58 = vpop.f32.mrb[21].mxu0  ;;  %3370 = vst [vmem:[%s5700_s3 + $0x40] sm:$0xff] %v3790_v52  ;;  %v3791_v59 = vpack.c.bf16 %v3253_v53, %v3252_v51  ;;  %v3840_v60 = vadd.f32 %v2755_v57, %v5615_v6  ;;  %v2757_v61 = vpop.f32.mrb[22].mxu1 }
 0x200   :  { %v3209_v62 = vpop.f32.mrb[22].mxu0  ;;  %v3839_v63 = vadd.f32 %v3838_v56, %v3205_v55  ;;  %v3842_v0 = vadd.f32 %v2757_v61, %v5613_v5  ;;  %v2759_v1 = vpop.f32.mrb[23].mxu1 }
 0x201   :  { %v3211_v2 = vpop.f32.mrb[23].mxu0  ;;  %3371 = vst [vmem:[%s5700_s3 + $0x48] sm:$0xff] %v3791_v59  ;;  %v3841_v3 = vadd.f32 %v3840_v60, %v3207_v58  ;;  %v3844_v4 = vadd.f32 %v2759_v1, %v5615_v6 }
 0x202   :  { %v3254_v7 = vmax.f32 %v3839_v63, 0.0  ;;  %v3843_v8 = vadd.f32 %v3842_v0, %v3209_v62 }
 0x203   :  { %v3255_v9 = vmax.f32 %v3841_v3, 0.0  ;;  %v3845_v10 = vadd.f32 %v3844_v4, %v3211_v2 }
 0x204   :  { %v3256_v11 = vmax.f32 %v3843_v8, 0.0 }
 0x205   :  { %v3792_v12 = vpack.c.bf16 %v3255_v9, %v3254_v7  ;;  %v3257_v13 = vmax.f32 %v3845_v10, 0.0  ;;  %v2763_v14 = vpop.f32.mrb[24].mxu1 }
 0x206   :  { %v3215_v15 = vpop.f32.mrb[24].mxu0  ;;  %v3846_v16 = vadd.f32 %v2763_v14, %v5613_v5  ;;  %v2765_v17 = vpop.f32.mrb[25].mxu1 }
 0x207   :  { %v3217_v18 = vpop.f32.mrb[25].mxu0  ;;  %3372 = vst [vmem:[%s5700_s3 + $0x50] sm:$0xff] %v3792_v12  ;;  %v3793_v19 = vpack.c.bf16 %v3257_v13, %v3256_v11  ;;  %v3848_v20 = vadd.f32 %v2765_v17, %v5615_v6  ;;  %v2767_v21 = vpop.f32.mrb[26].mxu1 }
 0x208   :  { %v3219_v22 = vpop.f32.mrb[26].mxu0  ;;  %v3847_v23 = vadd.f32 %v3846_v16, %v3215_v15  ;;  %v3850_v24 = vadd.f32 %v2767_v21, %v5613_v5  ;;  %v2769_v25 = vpop.f32.mrb[27].mxu1 }
 0x209   :  { %v3221_v26 = vpop.f32.mrb[27].mxu0  ;;  %3373 = vst [vmem:[%s5700_s3 + $0x58] sm:$0xff] %v3793_v19  ;;  %v3849_v27 = vadd.f32 %v3848_v20, %v3217_v18  ;;  %v3852_v28 = vadd.f32 %v2769_v25, %v5615_v6 }
 0x20a   :  { %v3258_v29 = vmax.f32 %v3847_v23, 0.0  ;;  %v3851_v30 = vadd.f32 %v3850_v24, %v3219_v22 }
 0x20b   :  { %v3259_v31 = vmax.f32 %v3849_v27, 0.0  ;;  %v3853_v32 = vadd.f32 %v3852_v28, %v3221_v26 }
 0x20c   :  { %v3260_v33 = vmax.f32 %v3851_v30, 0.0 }
 0x20d   :  { %v3794_v34 = vpack.c.bf16 %v3259_v31, %v3258_v29  ;;  %v3261_v35 = vmax.f32 %v3853_v32, 0.0  ;;  %v2773_v36 = vpop.f32.mrb[28].mxu1 }
 0x20e   :  { %v3225_v37 = vpop.f32.mrb[28].mxu0  ;;  %v3854_v38 = vadd.f32 %v2773_v36, %v5613_v5  ;;  %v2775_v39 = vpop.f32.mrb[29].mxu1 }
 0x20f   :  { %v3227_v40 = vpop.f32.mrb[29].mxu0  ;;  %3374 = vst [vmem:[%s5700_s3 + $0x60] sm:$0xff] %v3794_v34  ;;  %v3795_v41 = vpack.c.bf16 %v3261_v35, %v3260_v33  ;;  %v3856_v42 = vadd.f32 %v2775_v39, %v5615_v6  ;;  %v2777_v43 = vpop.f32.mrb[30].mxu1 }
 0x210   :  { %v3229_v44 = vpop.f32.mrb[30].mxu0  ;;  %v3855_v45 = vadd.f32 %v3854_v38, %v3225_v37  ;;  %v3858_v46 = vadd.f32 %v2777_v43, %v5613_v5  ;;  %v2779_v47 = vpop.f32.mrb[31].mxu1 }
 0x211   :  { %v3231_v48 = vpop.f32.mrb[31].mxu0  ;;  %3375 = vst [vmem:[%s5700_s3 + $0x68] sm:$0xff] %v3795_v41  ;;  %v3857_v49 = vadd.f32 %v3856_v42, %v3227_v40  ;;  %v3860_v50 = vadd.f32 %v2779_v47, %v5615_v6 }
 0x212   :  { %v3262_v51 = vmax.f32 %v3855_v45, 0.0  ;;  %v3859_v52 = vadd.f32 %v3858_v46, %v3229_v44 }
 0x213   :  { %v3263_v53 = vmax.f32 %v3857_v49, 0.0  ;;  %v3861_v54 = vadd.f32 %v3860_v50, %v3231_v48 }
 0x214   :  { %v3264_v55 = vmax.f32 %v3859_v52, 0.0 }
 0x215   :  { %v3796_v56 = vpack.c.bf16 %v3263_v53, %v3262_v51  ;;  %v3265_v57 = vmax.f32 %v3861_v54, 0.0 }
 0x217   :  { %3376 = vst [vmem:[%s5700_s3 + $0x70] sm:$0xff] %v3796_v56  ;;  %v3797_v5 = vpack.c.bf16 %v3265_v57, %v3264_v55 }
 0x219   :  { %3377 = vst [vmem:[%s5700_s3 + $0x78] sm:$0xff] %v3797_v5 }

// kernel: normal_discriminator_forward.9
= control target key start
LH: loop header
LB: loop body
LE: loop exit
PB: predicated region body
PF: predicated region fallthrough
CT: control target
= control target key end

     0   :  { %v147_v0 = vlaneseq  ;;  %vm852_vm0 = vcmask 7168   ;;  %s1552_s1 = inlined_call_operand.vmem [shape: bf16[1,8192], index: 1, kind: input, shape index: {}]   ;;  %s1553_s0 = inlined_call_operand.vmem [shape: bf16[8,8192], index: 0, kind: input, shape index: {}]   ;;  %s1554_s2 = inlined_call_operand.vmem [shape: f32[8,1], index: 2, kind: output, shape index: {}]  }
   0x1   :  { %v112_v1 = vld [vmem:[%s1552_s1 + $0x28] sm:$0xff]  ;;  %v113_v2 = vld [vmem:[%s1552_s1 + $0x30] sm:$0xff]  ;;  %v114_v4 = vld [vmem:[%s1552_s1 + $0x38] sm:$0xff] }
   0x2   :  { %v148_v3 = vshrl.u32 %v147_v0, 7  ;;  %v882_v5 = vunpack.c.l.bf16 %v112_v1  ;;  %v884_v6 = vunpack.c.h.bf16 %v112_v1  ;;  %v886_v7 = vunpack.c.l.bf16 %v113_v2  ;;  %v937_v31 = vld [vmem:[%s1553_s0] sm:$0xff]  ;;  %v942_v32 = vld [vmem:[%s1553_s0 + $0x8] sm:$0xff]  ;;  %v955_v37 = vld [vmem:[%s1553_s0 + $0x10] sm:$0xff] }
   0x3   :  { %v896_v12 = vunpack.c.h.bf16 %v113_v2  ;;  %v898_v13 = vunpack.c.l.bf16 %v114_v4  ;;  %v900_v14 = vunpack.c.h.bf16 %v114_v4  ;;  %1572 = vst [vmem:[#allocation6_spill] sm:$0xff] %v955_v37  ;;  %v960_v38 = vld [vmem:[%s1553_s0 + $0x88] sm:$0xff]  ;;  %v111_v39 = vld [vmem:[%s1552_s1 + $0x20] sm:$0xff]  ;;  %v976_v44 = vld [vmem:[%s1553_s0 + $0x90] sm:$0xff] }
   0x4   :  { %v888_v8 = vsub.s32 0, %v148_v3  ;;  %v890_v9 = vsub.s32 2, %v148_v3  ;;  %v892_v10 = vsub.s32 4, %v148_v3  ;;  %v894_v11 = vsub.s32 6, %v148_v3  ;;  %v981_v45 = vld [vmem:[%s1553_s0 + $0x98] sm:$0xff]  ;;  %v107_v53 = vld [vmem:[%s1552_s1] sm:$0xff] }
   0x5   :  { %v993_v54 = vunpack.c.l.bf16 %v111_v39  ;;  %v998_v55 = vld [vmem:[%s1553_s0 + $0xa0] sm:$0xff]  ;;  %v1003_v56 = vld [vmem:[%s1553_s0 + $0xa8] sm:$0xff]  ;;  %v1008_v60 = vunpack.c.h.bf16 %v111_v39  ;;  %v1013_v61 = vld [vmem:[%s1553_s0 + $0xb0] sm:$0xff]  ;;  %v1027_v3 = vunpack.c.l.bf16 %v107_v53  ;;  %v1043_v47 = vunpack.c.h.bf16 %v107_v53 }
   0x6   :  { %1568 = vst [vmem:[#allocation2_spill] sm:$0xff] %v888_v8  ;;  %1569 = vst [vmem:[#allocation3_spill] sm:$0xff] %v890_v9  ;;  %v310_v15 = vrot.slane %v882_v5, %v888_v8  ;;  %v314_v16 = vrot.slane %v882_v5, %v890_v9  ;;  %v318_v17 = vrot.slane %v882_v5, %v892_v10  ;;  %v1018_v62 = vld [vmem:[%s1553_s0 + $0xb8] sm:$0xff]  ;;  %v41_v49 = vld [vmem:[%s1553_s0 + $0xf0] sm:$0xff] }
   0x7   :  { %1570 = vst [vmem:[#allocation4_spill] sm:$0xff] %v892_v10  ;;  %1571 = vst [vmem:[#allocation5_spill] sm:$0xff] %v894_v11  ;;  %v322_v18 = vrot.slane %v882_v5, %v894_v11  ;;  %v326_v19 = vrot.slane %v884_v6, %v888_v8  ;;  %v330_v20 = vrot.slane %v884_v6, %v890_v9 }
   0x8   :  { %v334_v21 = vrot.slane %v884_v6, %v892_v10  ;;  %v338_v22 = vrot.slane %v884_v6, %v894_v11  ;;  %v342_v23 = vrot.slane %v886_v7, %v888_v8  ;;  %v346_v24 = vrot.slane %v886_v7, %v890_v9  ;;  %1573 = vst [vmem:[#allocation7_spill] sm:$0xff] %v993_v54 }
   0x9   :  { %v350_v25 = vrot.slane %v886_v7, %v892_v10  ;;  %v354_v26 = vrot.slane %v886_v7, %v894_v11  ;;  %v358_v27 = vrot.slane %v896_v12, %v888_v8  ;;  %v362_v28 = vrot.slane %v896_v12, %v890_v9 }
   0xa   :  { %v366_v29 = vrot.slane %v896_v12, %v892_v10  ;;  %v370_v30 = vrot.slane %v896_v12, %v894_v11  ;;  %v374_v33 = vrot.slane %v898_v13, %v888_v8  ;;  %v378_v34 = vrot.slane %v898_v13, %v890_v9 }
   0xb   :  { %v382_v35 = vrot.slane %v898_v13, %v892_v10  ;;  %v386_v36 = vrot.slane %v898_v13, %v894_v11  ;;  %v390_v40 = vrot.slane %v900_v14, %v888_v8  ;;  %v394_v41 = vrot.slane %v900_v14, %v890_v9 }
   0xc   :  { %v398_v42 = vrot.slane %v900_v14, %v892_v10  ;;  %v402_v43 = vrot.slane %v900_v14, %v894_v11  ;;  %v282_v0 = vrot.slane %v993_v54, %v890_v9  ;;  %v286_v1 = vrot.slane %v993_v54, %v892_v10  ;;  %v40_v14 = vld [vmem:[%s1553_s0 + $0xe8] sm:$0xff] }
   0xd   :  { %v290_v2 = vrot.slane %v993_v54, %v894_v11  ;;  %v298_v4 = vrot.slane %v1008_v60, %v890_v9  ;;  %v302_v39 = vrot.slane %v1008_v60, %v892_v10  ;;  %v306_v51 = vrot.slane %v1008_v60, %v894_v11 }
   0xe   :  { %v1046_v46 = vrot.slane %v282_v0, %v888_v8  ;;  %v1049_v50 = vrot.slane %v286_v1, %v888_v8  ;;  %v150_v58 = vrot.slane %v1027_v3, %v888_v8  ;;  %v1069_v0 = vrot.slane %v310_v15, %v888_v8 }
   0xf   :  { %v1052_v63 = vrot.slane %v290_v2, %v888_v8  ;;  %v1057_v57 = vrot.slane %v298_v4, %v888_v8  ;;  %v1060_v52 = vrot.slane %v302_v39, %v888_v8  ;;  %v1063_v53 = vrot.slane %v306_v51, %v888_v8 }
  0x10   :  { %1574 = vst [vmem:[#allocation8_spill] sm:$0xff] %v1046_v46  ;;  %v1075_v1 = vrot.slane %v314_v16, %v888_v8  ;;  %v1081_v2 = vrot.slane %v318_v17, %v888_v8  ;;  %v1087_v51 = vrot.slane %v322_v18, %v888_v8  ;;  %v1093_v15 = vrot.slane %v326_v19, %v888_v8 }
  0x11   :  { %v1099_v16 = vrot.slane %v330_v20, %v888_v8  ;;  %v1105_v17 = vrot.slane %v334_v21, %v888_v8  ;;  %v1111_v5 = vrot.slane %v338_v22, %v888_v8  ;;  %v1117_v18 = vrot.slane %v342_v23, %v888_v8  ;;  %v1140_v21 = vld [vmem:[%s1553_s0 + $0xc0] sm:$0xff] }
  0x12   :  { %v1123_v19 = vrot.slane %v346_v24, %v888_v8  ;;  %v1129_v20 = vrot.slane %v350_v25, %v888_v8  ;;  %v1135_v6 = vrot.slane %v354_v26, %v888_v8  ;;  %v1146_v22 = vrot.slane %v358_v27, %v888_v8  ;;  %v1169_v25 = vld [vmem:[%s1553_s0 + $0xc8] sm:$0xff] }
  0x13   :  { %v1152_v23 = vrot.slane %v362_v28, %v888_v8  ;;  %v1158_v7 = vrot.slane %v366_v29, %v888_v8  ;;  %v1164_v24 = vrot.slane %v370_v30, %v888_v8  ;;  %v1175_v26 = vrot.slane %v374_v33, %v888_v8  ;;  %v1198_v29 = vld [vmem:[%s1553_s0 + $0xd0] sm:$0xff]  ;;  %v1203_v30 = vld [vmem:[%s1553_s0 + $0xd8] sm:$0xff] }
  0x14   :  { %1575 = vst [vmem:[#allocation9_spill] sm:$0xff] %v1146_v22  ;;  %v1181_v27 = vrot.slane %v378_v34, %v888_v8  ;;  %v1187_v12 = vrot.slane %v382_v35, %v888_v8  ;;  %v1193_v28 = vrot.slane %v386_v36, %v888_v8  ;;  %v1209_v33 = vrot.slane %v390_v40, %v888_v8  ;;  %v1232_v36 = vld [vmem:[%s1553_s0 + $0xe0] sm:$0xff] }
  0x15   :  { %1576 = vst [vmem:[#allocation10_spill] sm:$0xff] %v1152_v23  ;;  %1577 = vst [vmem:[#allocation11_spill] sm:$0xff] %v1158_v7  ;;  %v1215_v13 = vrot.slane %v394_v41, %v888_v8  ;;  %v1221_v34 = vrot.slane %v398_v42, %v888_v8  ;;  %v1227_v35 = vrot.slane %v402_v43, %v888_v8  ;;  %v90_v40 = vunpack.c.h.bf16 %v1018_v62 }
  0x16   :  { %1578 = vst [vmem:[#allocation12_spill] sm:$0xff] %v1164_v24  ;;  %1579 = vst [vmem:[#allocation13_spill] sm:$0xff] %v1175_v26  ;;  %v91_v41 = vunpack.c.l.bf16 %v1140_v21  ;;  %v154_v4 = vrot.slane %v1027_v3, %v890_v9  ;;  %v158_v42 = vrot.slane %v1027_v3, %v892_v10  ;;  %v92_v43 = vunpack.c.h.bf16 %v1140_v21  ;;  %v42_v21 = vld [vmem:[%s1553_s0 + $0xf8] sm:$0xff] }
  0x17   :  { %1580 = vst [vmem:[#allocation14_spill] sm:$0xff] %v1181_v27  ;;  %1581 = vst [vmem:[#allocation15_spill] sm:$0xff] %v1187_v12  ;;  %v93_v39 = vunpack.c.l.bf16 %v1169_v25  ;;  %v94_v48 = vunpack.c.h.bf16 %v1169_v25  ;;  %v294_v59 = vrot.slane %v1008_v60, %v888_v8  ;;  %v95_v46 = vunpack.c.l.bf16 %v1198_v29  ;;  %v1262_v60 = vld [vmem:[%s1552_s1 + $0x8] sm:$0xff] }
  0x18   :  { %1582 = vst [vmem:[#allocation16_spill] sm:$0xff] %v1193_v28  ;;  %1583 = vst [vmem:[#allocation17_spill] sm:$0xff] %v1209_v33  ;;  %v96_v54 = vunpack.c.h.bf16 %v1198_v29  ;;  %v97_v37 = vunpack.c.l.bf16 %v1203_v30  ;;  %v99_v25 = vunpack.c.l.bf16 %v1232_v36  ;;  %v166_v29 = vrot.slane %v1043_v47, %v888_v8 }
  0x19   :  { %1584 = vst [vmem:[#allocation18_spill] sm:$0xff] %v1215_v13  ;;  %1585 = vst [vmem:[#allocation19_spill] sm:$0xff] %v1221_v34  ;;  %v162_v34 = vrot.slane %v1027_v3, %v894_v11  ;;  %v470_v13 = vrot.slane %v150_v58, %v888_v8  ;;  %v101_v33 = vunpack.c.l.bf16 %v40_v14  ;;  %v474_v28 = vrot.slane %v154_v4, %v888_v8 }
  0x1a   :  { %1586 = vst [vmem:[#allocation20_spill] sm:$0xff] %v1227_v35  ;;  %v98_v35 = vunpack.c.h.bf16 %v1203_v30  ;;  %1587 = vst [vmem:[#allocation21_spill] sm:$0xff] %v1262_v60  ;;  %v100_v30 = vunpack.c.h.bf16 %v1232_v36  ;;  %v478_v12 = vrot.slane %v158_v42, %v888_v8  ;;  %v102_v27 = vunpack.c.h.bf16 %v40_v14 }
  0x1b   :  { %v103_v26 = vunpack.c.l.bf16 %v41_v49  ;;  %v104_v24 = vunpack.c.h.bf16 %v41_v49  ;;  %v614_v7 = vrot.slane %v294_v59, %v888_v8  ;;  %v105_v23 = vunpack.c.l.bf16 %v42_v21 }
  0x1c   :  { %v106_v22 = vunpack.c.h.bf16 %v42_v21  ;;  %v1274_v3 = vunpack.c.l.bf16 %v1262_v60  ;;  %v170_v58 = vrot.slane %v1043_v47, %v890_v9  ;;  %v174_v36 = vrot.slane %v1043_v47, %v892_v10 }
  0x1d   :  { %v482_v4 = vrot.slane %v162_v34, %v888_v8  ;;  %v486_v42 = vrot.slane %v166_v29, %v888_v8  ;;  %v1589_v14 = vunpack.c.l.bf16 %v937_v31  ;;  %v1590_v59 = vunpack.c.h.bf16 %v937_v31 }
  0x1e   :  { %1588 = vst [vmem:[#allocation22_spill] sm:$0xff] %v1274_v3  ;;  %v1591_v21 = vunpack.c.l.bf16 %v942_v32  ;;  %v1592_v3 = vunpack.c.l.bf16 %v960_v38  ;;  %v1593_v10 = vunpack.c.h.bf16 %v960_v38  ;;  %v1594_v29 = vunpack.c.l.bf16 %v976_v44 }
  0x1f   :  { %v723_v49 = vmul.f32 %v470_v13, %v1589_v14  ;;  %v724_v11 = vmul.f32 %v474_v28, %v1590_v59  ;;  %v1595_v31 = vunpack.c.h.bf16 %v976_v44  ;;  %v1599_v44 = vunpack.c.h.bf16 %v998_v55 }
  0x20   :  { %v725_v60 = vmul.f32 %v478_v12, %v1591_v21  ;;  %v1291_v9 = vmul.f32 %v1049_v50, %v1592_v3  ;;  %v1296_v34 = vmul.f32 %v1052_v63, %v1593_v10  ;;  %v1300_v8 = vmul.f32 %v614_v7, %v1594_v29 }
  0x21   :  { %v1305_v28 = vmul.f32 %v1057_v57, %v1595_v31  ;;  %v1596_v12 = vunpack.c.l.bf16 %v981_v45  ;;  %v1597_v50 = vunpack.c.h.bf16 %v981_v45  ;;  %v1598_v10 = vunpack.c.l.bf16 %v998_v55 }
  0x22   :  { %v1325_v57 = vmul.f32 %v1075_v1, %v1599_v44  ;;  %v1600_v7 = vunpack.c.l.bf16 %v1003_v56  ;;  %v1601_v45 = vunpack.c.h.bf16 %v1003_v56  ;;  %v1602_v3 = vunpack.c.l.bf16 %v1013_v61 }
  0x23   :  { %v1310_v13 = vmul.f32 %v1060_v52, %v1596_v12  ;;  %v1315_v38 = vmul.f32 %v1063_v53, %v1597_v50  ;;  %v1320_v63 = vmul.f32 %v1069_v0, %v1598_v10  ;;  %v1603_v55 = vunpack.c.h.bf16 %v1013_v61  ;;  %v1615_v50 = vld [vmem:[#allocation19_spill] sm:$0xff] }
  0x24   :  { %v1330_v52 = vmul.f32 %v1081_v2, %v1600_v7  ;;  %v1335_v53 = vmul.f32 %v1087_v51, %v1601_v45  ;;  %v1340_v0 = vmul.f32 %v1093_v15, %v1602_v3  ;;  %v1604_v14 = vunpack.c.l.bf16 %v1018_v62 }
  0x25   :  { %v1345_v1 = vmul.f32 %v1099_v16, %v1603_v55  ;;  %v1353_v56 = vmul.f32 %v1111_v5, %v90_v40  ;;  %v1356_v51 = vmul.f32 %v1117_v18, %v91_v41  ;;  %v1359_v59 = vmul.f32 %v1123_v19, %v92_v43  ;;  %v1605_v16 = vld [vmem:[#allocation9_spill] sm:$0xff]  ;;  %v1607_v5 = vld [vmem:[#allocation11_spill] sm:$0xff]  ;;  %v1608_v18 = vld [vmem:[#allocation12_spill] sm:$0xff] }
  0x26   :  { %v1350_v2 = vmul.f32 %v1105_v17, %v1604_v14  ;;  %v1362_v15 = vmul.f32 %v1129_v20, %v93_v39  ;;  %v1365_v61 = vmul.f32 %v1135_v6, %v94_v48  ;;  %v1368_v62 = vmul.f32 %v1605_v16, %v95_v46  ;;  %v1606_v17 = vld [vmem:[#allocation10_spill] sm:$0xff]  ;;  %v14_v19 = vld [vmem:[%s1553_s0 + $0x18] sm:$0xff]  ;;  %v1611_v46 = vld [vmem:[#allocation15_spill] sm:$0xff] }
  0x27   :  { %v1371_v21 = vmul.f32 %v1606_v17, %v96_v54  ;;  %v1374_v40 = vmul.f32 %v1607_v5, %v97_v37  ;;  %v1377_v41 = vmul.f32 %v1608_v18, %v98_v35  ;;  %v1609_v20 = vld [vmem:[#allocation13_spill] sm:$0xff]  ;;  %v1610_v48 = vld [vmem:[#allocation14_spill] sm:$0xff]  ;;  %v1389_v39 = vmul.f32 %v1611_v46, %v101_v33  ;;  %v1612_v54 = vld [vmem:[#allocation16_spill] sm:$0xff] }
  0x28   :  { %v1383_v43 = vmul.f32 %v1609_v20, %v99_v25  ;;  %v1386_v6 = vmul.f32 %v1610_v48, %v100_v30  ;;  %v1392_v29 = vmul.f32 %v1612_v54, %v102_v27  ;;  %v1613_v37 = vld [vmem:[#allocation17_spill] sm:$0xff]  ;;  %v1614_v35 = vld [vmem:[#allocation18_spill] sm:$0xff]  ;;  %v1401_v10 = vmul.f32 %v1615_v50, %v105_v23  ;;  %v1616_v25 = vld [vmem:[#allocation20_spill] sm:$0xff] }
  0x29   :  { %v1395_v31 = vmul.f32 %v1613_v37, %v103_v26  ;;  %v1398_v12 = vmul.f32 %v1614_v35, %v104_v24  ;;  %v1404_v44 = vmul.f32 %v1616_v25, %v106_v22  ;;  %v1617_v30 = vld [vmem:[#allocation5_spill] sm:$0xff]  ;;  %v1618_v33 = vld [vmem:[#allocation2_spill] sm:$0xff]  ;;  %v1619_v27 = vunpack.c.h.bf16 %v942_v32  ;;  %v1626_v37 = vld [vmem:[#allocation4_spill] sm:$0xff] }
  0x2a   :  { %v178_v7 = vrot.slane %v1043_v47, %v1617_v30  ;;  %v490_v45 = vrot.slane %v170_v58, %v1618_v33  ;;  %v787_v55 = vadd.f32 %v724_v11, %v723_v49  ;;  %v49_v26 = vunpack.c.l.bf16 %v14_v19  ;;  %v15_v24 = vld [vmem:[%s1553_s0 + $0x20] sm:$0xff]  ;;  %v1623_v58 = vld [vmem:[#allocation3_spill] sm:$0xff]  ;;  %v1625_v46 = vld [vmem:[#allocation21_spill] sm:$0xff] }
  0x2b   :  { %v726_v3 = vmul.f32 %v482_v4, %v1619_v27  ;;  %v1620_v23 = vld [vmem:[#allocation22_spill] sm:$0xff]  ;;  %v494_v22 = vrot.slane %v174_v36, %v1618_v33  ;;  %v50_v18 = vunpack.c.h.bf16 %v14_v19  ;;  %v51_v48 = vunpack.c.l.bf16 %v15_v24  ;;  %v16_v36 = vld [vmem:[%s1553_s0 + $0x28] sm:$0xff] }
  0x2c   :  { %v182_v14 = vrot.slane %v1620_v23, %v1618_v33  ;;  %v1621_v16 = vld [vmem:[#allocation6_spill] sm:$0xff]  ;;  %v788_v47 = vadd.f32 %v787_v55, %v725_v60  ;;  %v186_v32 = vrot.slane %v1620_v23, %v1623_v58  ;;  %v498_v11 = vrot.slane %v178_v7, %v1618_v33  ;;  %v17_v55 = vld [vmem:[%s1553_s0 + $0x30] sm:$0xff] }
  0x2d   :  { %v1622_v17 = vunpack.c.l.bf16 %v1621_v16  ;;  %v1624_v4 = vunpack.c.h.bf16 %v1621_v16  ;;  %v118_v54 = vunpack.c.h.bf16 %v1625_v46  ;;  %v190_v60 = vrot.slane %v1620_v23, %v1626_v37  ;;  %v109_v16 = vld [vmem:[%s1552_s1 + $0x10] sm:$0xff] }
  0x2e   :  { %v789_v20 = vadd.f32 %v788_v47, %v726_v3  ;;  %v729_v19 = vmul.f32 %v494_v22, %v49_v26  ;;  %v52_v50 = vunpack.c.h.bf16 %v15_v24  ;;  %v194_v25 = vrot.slane %v1620_v23, %v1617_v30 }
  0x2f   :  { %v727_v5 = vmul.f32 %v486_v42, %v1622_v17  ;;  %v728_v49 = vmul.f32 %v490_v45, %v1624_v4  ;;  %v502_v42 = vrot.slane %v182_v14, %v1618_v33  ;;  %v506_v7 = vrot.slane %v186_v32, %v1618_v33  ;;  %v18_v4 = vld [vmem:[%s1553_s0 + $0x38] sm:$0xff] }
  0x30   :  { %v730_v45 = vmul.f32 %v498_v11, %v50_v18  ;;  %v53_v3 = vunpack.c.l.bf16 %v16_v36  ;;  %v198_v26 = vrot.slane %v118_v54, %v1618_v33  ;;  %v510_v24 = vrot.slane %v190_v60, %v1618_v33 }
  0x31   :  { %v790_v35 = vadd.f32 %v789_v20, %v727_v5  ;;  %v731_v14 = vmul.f32 %v502_v42, %v51_v48  ;;  %v54_v23 = vunpack.c.h.bf16 %v16_v36  ;;  %v202_v17 = vrot.slane %v118_v54, %v1623_v58 }
  0x32   :  { %v514_v5 = vrot.slane %v194_v25, %v1618_v33  ;;  %v732_v47 = vmul.f32 %v506_v7, %v52_v50  ;;  %v55_v32 = vunpack.c.l.bf16 %v17_v55  ;;  %v119_v11 = vunpack.c.l.bf16 %v109_v16  ;;  %v19_v25 = vld [vmem:[%s1553_s0 + $0x40] sm:$0xff] }
  0x33   :  { %v791_v27 = vadd.f32 %v790_v35, %v728_v49  ;;  %v206_v49 = vrot.slane %v118_v54, %v1626_v37  ;;  %v518_v20 = vrot.slane %v198_v26, %v1618_v33  ;;  %v733_v46 = vmul.f32 %v510_v24, %v53_v3 }
  0x34   :  { %v56_v60 = vunpack.c.h.bf16 %v17_v55  ;;  %v210_v36 = vrot.slane %v118_v54, %v1617_v30  ;;  %v522_v42 = vrot.slane %v202_v17, %v1618_v33  ;;  %v57_v50 = vunpack.c.l.bf16 %v18_v4  ;;  %v20_v17 = vld [vmem:[%s1553_s0 + $0x48] sm:$0xff] }
  0x35   :  { %v792_v22 = vadd.f32 %v791_v27, %v729_v19  ;;  %v734_v19 = vmul.f32 %v514_v5, %v54_v23  ;;  %v214_v7 = vrot.slane %v119_v11, %v1618_v33  ;;  %v735_v27 = vmul.f32 %v518_v20, %v55_v32 }
  0x36   :  { %v58_v3 = vunpack.c.h.bf16 %v18_v4  ;;  %v218_v55 = vrot.slane %v119_v11, %v1623_v58  ;;  %v530_v54 = vrot.slane %v210_v36, %v1618_v33  ;;  %v736_v24 = vmul.f32 %v522_v42, %v56_v60  ;;  %v110_v36 = vld [vmem:[%s1552_s1 + $0x18] sm:$0xff] }
  0x37   :  { %v793_v18 = vadd.f32 %v792_v22, %v730_v45  ;;  %v526_v45 = vrot.slane %v206_v49, %v1618_v33  ;;  %v59_v22 = vunpack.c.l.bf16 %v19_v25  ;;  %v120_v23 = vunpack.c.h.bf16 %v109_v16  ;;  %v21_v16 = vld [vmem:[%s1553_s0 + $0x50] sm:$0xff] }
  0x38   :  { %v222_v5 = vrot.slane %v119_v11, %v1626_v37  ;;  %v60_v49 = vunpack.c.h.bf16 %v19_v25  ;;  %v226_v4 = vrot.slane %v119_v11, %v1617_v30  ;;  %v538_v20 = vrot.slane %v218_v55, %v1618_v33  ;;  %v22_v55 = vld [vmem:[%s1553_s0 + $0x58] sm:$0xff] }
  0x39   :  { %v794_v48 = vadd.f32 %v793_v18, %v731_v14  ;;  %v737_v18 = vmul.f32 %v526_v45, %v57_v50  ;;  %v61_v60 = vunpack.c.l.bf16 %v20_v17  ;;  %v230_v42 = vrot.slane %v120_v23, %v1618_v33 }
  0x3a   :  { %v62_v11 = vunpack.c.h.bf16 %v20_v17  ;;  %v234_v25 = vrot.slane %v120_v23, %v1623_v58  ;;  %v740_v45 = vmul.f32 %v538_v20, %v60_v49  ;;  %v242_v17 = vrot.slane %v120_v23, %v1617_v30 }
  0x3b   :  { %v795_v35 = vadd.f32 %v794_v48, %v732_v47  ;;  %v534_v47 = vrot.slane %v214_v7, %v1618_v33  ;;  %v546_v7 = vrot.slane %v226_v4, %v1618_v33  ;;  %v65_v49 = vunpack.c.l.bf16 %v22_v55  ;;  %v23_v4 = vld [vmem:[%s1553_s0 + $0x60] sm:$0xff] }
  0x3d   :  { %v796_v26 = vadd.f32 %v795_v35, %v733_v46  ;;  %v738_v46 = vmul.f32 %v530_v54, %v58_v3  ;;  %v739_v35 = vmul.f32 %v534_v47, %v59_v22  ;;  %v121_v3 = vunpack.c.l.bf16 %v110_v36 }
  0x3e   :  { %v238_v54 = vrot.slane %v120_v23, %v1626_v37  ;;  %v554_v47 = vrot.slane %v234_v25, %v1618_v33  ;;  %v562_v23 = vrot.slane %v242_v17, %v1618_v33  ;;  %v24_v25 = vld [vmem:[%s1553_s0 + $0x68] sm:$0xff] }
  0x3f   :  { %v797_v14 = vadd.f32 %v796_v26, %v734_v19  ;;  %v542_v19 = vrot.slane %v222_v5, %v1618_v33  ;;  %v63_v26 = vunpack.c.l.bf16 %v21_v16  ;;  %v64_v5 = vunpack.c.h.bf16 %v21_v16 }
  0x40   :  { %v246_v20 = vrot.slane %v121_v3, %v1618_v33  ;;  %v250_v16 = vrot.slane %v121_v3, %v1623_v58 }
  0x41   :  { %v798_v32 = vadd.f32 %v797_v14, %v735_v27  ;;  %v741_v14 = vmul.f32 %v542_v19, %v61_v60  ;;  %v66_v60 = vunpack.c.h.bf16 %v22_v55  ;;  %v744_v19 = vmul.f32 %v554_v47, %v64_v5 }
  0x42   :  { %v258_v55 = vrot.slane %v121_v3, %v1617_v30  ;;  %v69_v5 = vunpack.c.l.bf16 %v24_v25 }
  0x43   :  { %v799_v48 = vadd.f32 %v798_v32, %v736_v24  ;;  %v550_v24 = vrot.slane %v230_v42, %v1618_v33 }
  0x45   :  { %v800_v50 = vadd.f32 %v799_v48, %v737_v18  ;;  %v742_v18 = vmul.f32 %v546_v7, %v62_v11  ;;  %v743_v48 = vmul.f32 %v550_v24, %v63_v26  ;;  %v122_v11 = vunpack.c.h.bf16 %v110_v36  ;;  %v25_v36 = vld [vmem:[%s1553_s0 + $0x70] sm:$0xff] }
  0x46   :  { %v254_v7 = vrot.slane %v121_v3, %v1626_v37  ;;  %v570_v24 = vrot.slane %v250_v16, %v1618_v33  ;;  %v578_v3 = vrot.slane %v258_v55, %v1618_v33 }
  0x47   :  { %v801_v27 = vadd.f32 %v800_v50, %v738_v46  ;;  %v558_v46 = vrot.slane %v238_v54, %v1618_v33  ;;  %v67_v50 = vunpack.c.l.bf16 %v23_v4  ;;  %v68_v54 = vunpack.c.h.bf16 %v23_v4 }
  0x48   :  { %v262_v17 = vrot.slane %v122_v11, %v1618_v33  ;;  %v574_v47 = vrot.slane %v254_v7, %v1618_v33  ;;  %v266_v4 = vrot.slane %v122_v11, %v1623_v58 }
  0x49   :  { %v802_v22 = vadd.f32 %v801_v27, %v739_v35  ;;  %v745_v27 = vmul.f32 %v558_v46, %v65_v49  ;;  %v70_v49 = vunpack.c.h.bf16 %v24_v25 }
  0x4a   :  { %v582_v16 = vrot.slane %v262_v17, %v1618_v33  ;;  %v586_v58 = vrot.slane %v266_v4, %v1618_v33 }
  0x4b   :  { %v803_v32 = vadd.f32 %v802_v22, %v740_v45  ;;  %v566_v45 = vrot.slane %v246_v20, %v1618_v33  ;;  %v748_v20 = vmul.f32 %v570_v24, %v68_v54  ;;  %v750_v25 = vmul.f32 %v578_v3, %v70_v49 }
  0x4d   :  { %v804_v42 = vadd.f32 %v803_v32, %v741_v14  ;;  %v746_v14 = vmul.f32 %v562_v23, %v66_v60  ;;  %v270_v60 = vrot.slane %v122_v11, %v1626_v37  ;;  %v749_v23 = vmul.f32 %v574_v47, %v69_v5  ;;  %v27_v37 = vld [vmem:[%s1553_s0 + $0x80] sm:$0xff] }
  0x4e   :  { %v75_v5 = vunpack.c.l.bf16 %v27_v37 }
  0x4f   :  { %v805_v35 = vadd.f32 %v804_v42, %v742_v18  ;;  %v747_v18 = vmul.f32 %v566_v45, %v67_v50  ;;  %v26_v42 = vld [vmem:[%s1553_s0 + $0x78] sm:$0xff]  ;;  %v274_v50 = vrot.slane %v122_v11, %v1617_v30  ;;  %v590_v54 = vrot.slane %v270_v60, %v1618_v33 }
  0x50   :  { %v73_v45 = vunpack.c.l.bf16 %v26_v42 }
  0x51   :  { %v806_v26 = vadd.f32 %v805_v35, %v743_v48  ;;  %v71_v48 = vunpack.c.l.bf16 %v25_v36  ;;  %v72_v35 = vunpack.c.h.bf16 %v25_v36 }
  0x52   :  { %v753_v17 = vmul.f32 %v590_v54, %v73_v45 }
  0x53   :  { %v807_v22 = vadd.f32 %v806_v26, %v744_v19  ;;  %v751_v55 = vmul.f32 %v582_v16, %v71_v48  ;;  %v752_v30 = vmul.f32 %v586_v58, %v72_v35 }
  0x55   :  { %v808_v32 = vadd.f32 %v807_v22, %v745_v27  ;;  %v1627_v27 = vld [vmem:[#allocation7_spill] sm:$0xff]  ;;  %v594_v22 = vrot.slane %v274_v50, %v1618_v33 }
  0x56   :  { %v278_v26 = vrot.slane %v1627_v27, %v1618_v33 }
  0x57   :  { %v809_v46 = vadd.f32 %v808_v32, %v746_v14  ;;  %v74_v14 = vunpack.c.h.bf16 %v26_v42 }
  0x58   :  { %v598_v36 = vrot.slane %v278_v26, %v1618_v33 }
  0x59   :  { %v810_v19 = vadd.f32 %v809_v46, %v747_v18  ;;  %v76_v18 = vunpack.c.h.bf16 %v27_v37  ;;  %v754_v32 = vmul.f32 %v594_v22, %v74_v14 }
  0x5a   :  { %v755_v4 = vmul.f32 %v598_v36, %v75_v5 }
  0x5b   :  { %v811_v7 = vadd.f32 %v810_v19, %v748_v20  ;;  %v1628_v20 = vld [vmem:[#allocation8_spill] sm:$0xff] }
  0x5c   :  { %v756_v46 = vmul.f32 %v1628_v20, %v76_v18 }
  0x5d   :  { %v812_v24 = vadd.f32 %v811_v7, %v749_v23 }
  0x5f   :  { %v813_v11 = vadd.f32 %v812_v24, %v750_v25 }
  0x61   :  { %v814_v47 = vadd.f32 %v813_v11, %v751_v55 }
  0x63   :  { %v815_v49 = vadd.f32 %v814_v47, %v752_v30 }
  0x65   :  { %v816_v3 = vadd.f32 %v815_v49, %v753_v17 }
  0x67   :  { %v817_v48 = vadd.f32 %v816_v3, %v754_v32 }
  0x69   :  { %v818_v60 = vadd.f32 %v817_v48, %v755_v4 }
  0x6b   :  { %v819_v16 = vadd.f32 %v818_v60, %v756_v46 }
  0x6d   :  { %v820_v42 = vadd.f32 %v819_v16, %v1291_v9 }
  0x6f   :  { %v821_v23 = vadd.f32 %v820_v42, %v1296_v34 }
  0x71   :  { %v822_v19 = vadd.f32 %v821_v23, %v1300_v8 }
  0x73   :  { %v823_v33 = vadd.f32 %v822_v19, %v1305_v28 }
  0x75   :  { %v824_v35 = vadd.f32 %v823_v33, %v1310_v13 }
  0x77   :  { %v825_v50 = vadd.f32 %v824_v35, %v1315_v38 }
  0x79   :  { %v826_v58 = vadd.f32 %v825_v50, %v1320_v63 }
  0x7b   :  { %v827_v25 = vadd.f32 %v826_v58, %v1325_v57 }
  0x7d   :  { %v828_v7 = vadd.f32 %v827_v25, %v1330_v52 }
  0x7f   :  { %v829_v45 = vadd.f32 %v828_v7, %v1335_v53 }
  0x81   :  { %v830_v9 = vadd.f32 %v829_v45, %v1340_v0 }
  0x83   :  { %v831_v34 = vadd.f32 %v830_v9, %v1345_v1 }
  0x85   :  { %v832_v8 = vadd.f32 %v831_v34, %v1350_v2 }
  0x87   :  { %v833_v28 = vadd.f32 %v832_v8, %v1353_v56 }
  0x89   :  { %v834_v13 = vadd.f32 %v833_v28, %v1356_v51 }
  0x8b   :  { %v835_v38 = vadd.f32 %v834_v13, %v1359_v59 }
  0x8d   :  { %v836_v63 = vadd.f32 %v835_v38, %v1362_v15 }
  0x8f   :  { %v837_v57 = vadd.f32 %v836_v63, %v1365_v61 }
  0x91   :  { %v838_v52 = vadd.f32 %v837_v57, %v1368_v62 }
  0x93   :  { %v839_v53 = vadd.f32 %v838_v52, %v1371_v21 }
  0x95   :  { %v840_v0 = vadd.f32 %v839_v53, %v1374_v40 }
  0x97   :  { %v841_v1 = vadd.f32 %v840_v0, %v1377_v41 }
  0x99   :  { %v842_v2 = vadd.f32 %v841_v1, %v1383_v43 }
  0x9b   :  { %v843_v56 = vadd.f32 %v842_v2, %v1386_v6 }
  0x9d   :  { %v844_v51 = vadd.f32 %v843_v56, %v1389_v39 }
  0x9f   :  { %v845_v59 = vadd.f32 %v844_v51, %v1392_v29 }
  0xa1   :  { %v846_v15 = vadd.f32 %v845_v59, %v1395_v31 }
  0xa3   :  { %v847_v61 = vadd.f32 %v846_v15, %v1398_v12 }
  0xa5   :  { %v848_v62 = vadd.f32 %v847_v61, %v1401_v10 }
  0xa7   :  { %v849_v21 = vadd.f32 %v848_v62, %v1404_v44 }
  0xa9   :  { %850 = vadd.xlane.f32.xlu0 %v849_v21 }
 0x136   :  { %v851_v40 = vpop.xlane.xlu0 %850 }
 0x137   :  { %853 = vst.msk [vmem:[%s1554_s2] sm:$0xff] %vm852_vm0, %v851_v40 }

// kernel: normal_discriminator_forward.8
= control target key start
LH: loop header
LB: loop body
LE: loop exit
PB: predicated region body
PF: predicated region fallthrough
CT: control target
= control target key end

     0   :  { %s10501_s12 = smov 0   ;;  %s10503_s13 = smov 0   ;;  %s12459_s0 = inlined_call_operand.vmem [shape: bf16[32,4096], index: 0, kind: input, shape index: {}]   ;;  %s12460_s1 = inlined_call_operand.vmem [shape: bf16[4096,512], index: 1, kind: input, shape index: {}]   ;;  %s12461_s2 = inlined_call_operand.vmem [shape: f32[1,512], index: 2, kind: input, shape index: {}]   ;;  %s12462_s3 = inlined_call_operand.vmem [shape: bf16[32,512], index: 3, kind: output, shape index: {}]  }
   0x1   :  { %s10505_s14 = smov 0   ;;  %s10507_s15 = smov 0  }
   0x2   :  { %s10509_s16 = smov 0  }
   0x3 LB: > { %s25_s17 = sadd.s32 1, %s10475_s15  ;;  %s8902_s18 = sadd.s32 4294967295, %s10479_s16   ;;  %s10479_s16 = sphi %s10509_s16, %s13_s16   ;;  %s10475_s15 = sphi %s10507_s15, %s12467_s15   ;;  %s10471_s14 = sphi %s10505_s14, %s12466_s14   ;;  %s10467_s13 = sphi %s10503_s13, %s12465_s13   ;;  %s10463_s12 = sphi %s10501_s12, %s12464_s12  }
   0x4   : > { %p27_p0 = scmp.ge.s32.totalorder %s25_s17, 2  ;;  %p65_p1 = scmp.ne.s32.totalorder %s10467_s13, %s10463_s12 }
   0x5   : > { %p66_p2 = scmp.eq.s32.totalorder %s10479_s16, 0  ;;  %p123_p4 = scmp.eq.s32.totalorder %s8902_s18, 1 }
   0x6   : > { %s12469_s17 = smov (%p27_p0, %s25_s17), 0  ;;  %s58_s20 = sadd.s32 1, %s10467_s13 }
   0x7   : > { %p67_p3 = por %p66_p2, %p65_p1  ;;  %s55_s19 = ssub.s32 %s10475_s15, %s12469_s17 }
   0x8   : > { %p56_p5 = scmp.eq.s32.totalorder %s55_s19, 0  ;;  %p10536_p6 = por %p123_p4, %p65_p1 }
   0x9   : > { %p8906_p7 = scmp.ge.s32.totalorder %s10479_s16, 2 }
   0xa   : > { %s10541_s22 = scalar_select %p56_p5, %s10467_s13, %s58_s20  }
   0xb   : > { %155 = sbr.rel (%p8906_p7) target bundleno = 278 (0x116), region = 20 }
  0x12   : > { %158 = sbr.rel (!%p67_p3) target bundleno = 278 (0x116), region = 24  ;;  %s160_s23 = sand.u32 (%p67_p3), 1, %s10467_s13  }
  0x13   : > { %s9499_s24 = sshll.u32 (%p67_p3), %s10475_s15, 3  ;;  %s8907_s25 = sshll.u32 (%p67_p3), %s160_s23, 12 }
  0x14   : > { %s10549_s28 = scalar_lea.vmem (%p67_p3), %s12460_s1, %s9499_s24  ;;  %s10554_s29 = scalar_lea.vmem (%p67_p3), [#allocation2], %s8907_s25 }
  0x15   : > { %v1218_v0 = vld [vmem:[%s10549_s28] sm:$0xff] (%p67_p3)  ;;  %v1220_v1 = vld [vmem:[%s10549_s28 + $0x10] sm:$0xff] (%p67_p3) }
  0x16   : > { %v1222_v2 = vld [vmem:[%s10549_s28 + $0x20] sm:$0xff] (%p67_p3)  ;;  %1219 = vst [vmem:[%s10554_s29] sm:$0xff] (%p67_p3), %v1218_v0  ;;  %1221 = vst [vmem:[%s10554_s29 + $0x8] sm:$0xff] (%p67_p3), %v1220_v1  ;;  %v1224_v3 = vld [vmem:[%s10549_s28 + $0x30] sm:$0xff] (%p67_p3) }
  0x17   : > { %1223 = vst [vmem:[%s10554_s29 + $0x10] sm:$0xff] (%p67_p3), %v1222_v2  ;;  %v1226_v4 = vld [vmem:[%s10549_s28 + $0x40] sm:$0xff] (%p67_p3)  ;;  %v1228_v5 = vld [vmem:[%s10549_s28 + $0x50] sm:$0xff] (%p67_p3)  ;;  %1225 = vst [vmem:[%s10554_s29 + $0x18] sm:$0xff] (%p67_p3), %v1224_v3 }
  0x18   : > { %1227 = vst [vmem:[%s10554_s29 + $0x20] sm:$0xff] (%p67_p3), %v1226_v4  ;;  %1229 = vst [vmem:[%s10554_s29 + $0x28] sm:$0xff] (%p67_p3), %v1228_v5  ;;  %v1230_v6 = vld [vmem:[%s10549_s28 + $0x60] sm:$0xff] (%p67_p3)  ;;  %v1232_v7 = vld [vmem:[%s10549_s28 + $0x70] sm:$0xff] (%p67_p3) }
  0x19   : > { %v1234_v8 = vld [vmem:[%s10549_s28 + $0x80] sm:$0xff]  ;;  %1231 = vst [vmem:[%s10554_s29 + $0x30] sm:$0xff] %v1230_v6  ;;  %1233 = vst [vmem:[%s10554_s29 + $0x38] sm:$0xff] %v1232_v7  ;;  %v1236_v9 = vld [vmem:[%s10549_s28 + $0x90] sm:$0xff] }
  0x1a   : > { %1235 = vst [vmem:[%s10554_s29 + $0x40] sm:$0xff] %v1234_v8  ;;  %v1238_v10 = vld [vmem:[%s10549_s28 + $0xa0] sm:$0xff]  ;;  %v1240_v11 = vld [vmem:[%s10549_s28 + $0xb0] sm:$0xff]  ;;  %1237 = vst [vmem:[%s10554_s29 + $0x48] sm:$0xff] %v1236_v9 }
  0x1b   : > { %1239 = vst [vmem:[%s10554_s29 + $0x50] sm:$0xff] %v1238_v10  ;;  %1241 = vst [vmem:[%s10554_s29 + $0x58] sm:$0xff] %v1240_v11  ;;  %v1242_v12 = vld [vmem:[%s10549_s28 + $0xc0] sm:$0xff]  ;;  %v1244_v13 = vld [vmem:[%s10549_s28 + $0xd0] sm:$0xff] }
  0x1c   : > { %v1246_v14 = vld [vmem:[%s10549_s28 + $0xe0] sm:$0xff]  ;;  %1243 = vst [vmem:[%s10554_s29 + $0x60] sm:$0xff] %v1242_v12  ;;  %1245 = vst [vmem:[%s10554_s29 + $0x68] sm:$0xff] %v1244_v13  ;;  %v1248_v15 = vld [vmem:[%s10549_s28 + $0xf0] sm:$0xff] }
  0x1d   : > { %1247 = vst [vmem:[%s10554_s29 + $0x70] sm:$0xff] %v1246_v14  ;;  %v1250_v16 = vld [vmem:[%s10549_s28 + $0x100] sm:$0xff]  ;;  %v1252_v17 = vld [vmem:[%s10549_s28 + $0x110] sm:$0xff]  ;;  %1249 = vst [vmem:[%s10554_s29 + $0x78] sm:$0xff] %v1248_v15 }
  0x1e   : > { %1251 = vst [vmem:[%s10554_s29 + $0x80] sm:$0xff] %v1250_v16  ;;  %1253 = vst [vmem:[%s10554_s29 + $0x88] sm:$0xff] %v1252_v17  ;;  %v1254_v18 = vld [vmem:[%s10549_s28 + $0x120] sm:$0xff]  ;;  %v1256_v19 = vld [vmem:[%s10549_s28 + $0x130] sm:$0xff] }
  0x1f   : > { %v1258_v20 = vld [vmem:[%s10549_s28 + $0x140] sm:$0xff]  ;;  %1255 = vst [vmem:[%s10554_s29 + $0x90] sm:$0xff] %v1254_v18  ;;  %1257 = vst [vmem:[%s10554_s29 + $0x98] sm:$0xff] %v1256_v19  ;;  %v1260_v21 = vld [vmem:[%s10549_s28 + $0x150] sm:$0xff] }
  0x20   : > { %1259 = vst [vmem:[%s10554_s29 + $0xa0] sm:$0xff] %v1258_v20  ;;  %v1262_v22 = vld [vmem:[%s10549_s28 + $0x160] sm:$0xff]  ;;  %v1264_v23 = vld [vmem:[%s10549_s28 + $0x170] sm:$0xff]  ;;  %1261 = vst [vmem:[%s10554_s29 + $0xa8] sm:$0xff] %v1260_v21 }
  0x21   : > { %1263 = vst [vmem:[%s10554_s29 + $0xb0] sm:$0xff] %v1262_v22  ;;  %1265 = vst [vmem:[%s10554_s29 + $0xb8] sm:$0xff] %v1264_v23  ;;  %v1266_v24 = vld [vmem:[%s10549_s28 + $0x180] sm:$0xff]  ;;  %v1268_v25 = vld [vmem:[%s10549_s28 + $0x190] sm:$0xff] }
  0x22   : > { %v1270_v26 = vld [vmem:[%s10549_s28 + $0x1a0] sm:$0xff]  ;;  %1267 = vst [vmem:[%s10554_s29 + $0xc0] sm:$0xff] %v1266_v24  ;;  %1269 = vst [vmem:[%s10554_s29 + $0xc8] sm:$0xff] %v1268_v25  ;;  %v1272_v27 = vld [vmem:[%s10549_s28 + $0x1b0] sm:$0xff] }
  0x23   : > { %1271 = vst [vmem:[%s10554_s29 + $0xd0] sm:$0xff] %v1270_v26  ;;  %v1274_v28 = vld [vmem:[%s10549_s28 + $0x1c0] sm:$0xff]  ;;  %v1276_v29 = vld [vmem:[%s10549_s28 + $0x1d0] sm:$0xff]  ;;  %1273 = vst [vmem:[%s10554_s29 + $0xd8] sm:$0xff] %v1272_v27 }
  0x24   : > { %1275 = vst [vmem:[%s10554_s29 + $0xe0] sm:$0xff] %v1274_v28  ;;  %1277 = vst [vmem:[%s10554_s29 + $0xe8] sm:$0xff] %v1276_v29  ;;  %v1278_v30 = vld [vmem:[%s10549_s28 + $0x1e0] sm:$0xff]  ;;  %v1280_v31 = vld [vmem:[%s10549_s28 + $0x1f0] sm:$0xff] }
  0x25   : > { %v1282_v32 = vld [vmem:[%s10549_s28 + $0x200] sm:$0xff]  ;;  %1279 = vst [vmem:[%s10554_s29 + $0xf0] sm:$0xff] %v1278_v30  ;;  %1281 = vst [vmem:[%s10554_s29 + $0xf8] sm:$0xff] %v1280_v31  ;;  %v1284_v33 = vld [vmem:[%s10549_s28 + $0x210] sm:$0xff] }
  0x26   : > { %1283 = vst [vmem:[%s10554_s29 + $0x100] sm:$0xff] %v1282_v32  ;;  %v1286_v34 = vld [vmem:[%s10549_s28 + $0x220] sm:$0xff]  ;;  %v1288_v35 = vld [vmem:[%s10549_s28 + $0x230] sm:$0xff]  ;;  %1285 = vst [vmem:[%s10554_s29 + $0x108] sm:$0xff] %v1284_v33 }
  0x27   : > { %1287 = vst [vmem:[%s10554_s29 + $0x110] sm:$0xff] %v1286_v34  ;;  %1289 = vst [vmem:[%s10554_s29 + $0x118] sm:$0xff] %v1288_v35  ;;  %v1290_v36 = vld [vmem:[%s10549_s28 + $0x240] sm:$0xff]  ;;  %v1292_v37 = vld [vmem:[%s10549_s28 + $0x250] sm:$0xff] }
  0x28   : > { %v1294_v38 = vld [vmem:[%s10549_s28 + $0x260] sm:$0xff]  ;;  %1291 = vst [vmem:[%s10554_s29 + $0x120] sm:$0xff] %v1290_v36  ;;  %1293 = vst [vmem:[%s10554_s29 + $0x128] sm:$0xff] %v1292_v37  ;;  %v1296_v39 = vld [vmem:[%s10549_s28 + $0x270] sm:$0xff] }
  0x29   : > { %1295 = vst [vmem:[%s10554_s29 + $0x130] sm:$0xff] %v1294_v38  ;;  %v1298_v40 = vld [vmem:[%s10549_s28 + $0x280] sm:$0xff]  ;;  %v1300_v41 = vld [vmem:[%s10549_s28 + $0x290] sm:$0xff]  ;;  %1297 = vst [vmem:[%s10554_s29 + $0x138] sm:$0xff] %v1296_v39 }
  0x2a   : > { %1299 = vst [vmem:[%s10554_s29 + $0x140] sm:$0xff] %v1298_v40  ;;  %1301 = vst [vmem:[%s10554_s29 + $0x148] sm:$0xff] %v1300_v41  ;;  %v1302_v42 = vld [vmem:[%s10549_s28 + $0x2a0] sm:$0xff]  ;;  %v1304_v43 = vld [vmem:[%s10549_s28 + $0x2b0] sm:$0xff] }
  0x2b   : > { %v1306_v44 = vld [vmem:[%s10549_s28 + $0x2c0] sm:$0xff]  ;;  %1303 = vst [vmem:[%s10554_s29 + $0x150] sm:$0xff] %v1302_v42  ;;  %1305 = vst [vmem:[%s10554_s29 + $0x158] sm:$0xff] %v1304_v43  ;;  %v1308_v45 = vld [vmem:[%s10549_s28 + $0x2d0] sm:$0xff] }
  0x2c   : > { %1307 = vst [vmem:[%s10554_s29 + $0x160] sm:$0xff] %v1306_v44  ;;  %v1310_v46 = vld [vmem:[%s10549_s28 + $0x2e0] sm:$0xff]  ;;  %v1312_v47 = vld [vmem:[%s10549_s28 + $0x2f0] sm:$0xff]  ;;  %1309 = vst [vmem:[%s10554_s29 + $0x168] sm:$0xff] %v1308_v45 }
  0x2d   : > { %1311 = vst [vmem:[%s10554_s29 + $0x170] sm:$0xff] %v1310_v46  ;;  %1313 = vst [vmem:[%s10554_s29 + $0x178] sm:$0xff] %v1312_v47  ;;  %v1314_v48 = vld [vmem:[%s10549_s28 + $0x300] sm:$0xff]  ;;  %v1316_v49 = vld [vmem:[%s10549_s28 + $0x310] sm:$0xff] }
  0x2e   : > { %v1318_v50 = vld [vmem:[%s10549_s28 + $0x320] sm:$0xff]  ;;  %1315 = vst [vmem:[%s10554_s29 + $0x180] sm:$0xff] %v1314_v48  ;;  %1317 = vst [vmem:[%s10554_s29 + $0x188] sm:$0xff] %v1316_v49  ;;  %v1320_v51 = vld [vmem:[%s10549_s28 + $0x330] sm:$0xff] }
  0x2f   : > { %1319 = vst [vmem:[%s10554_s29 + $0x190] sm:$0xff] %v1318_v50  ;;  %v1322_v52 = vld [vmem:[%s10549_s28 + $0x340] sm:$0xff]  ;;  %v1324_v53 = vld [vmem:[%s10549_s28 + $0x350] sm:$0xff]  ;;  %1321 = vst [vmem:[%s10554_s29 + $0x198] sm:$0xff] %v1320_v51 }
  0x30   : > { %1323 = vst [vmem:[%s10554_s29 + $0x1a0] sm:$0xff] %v1322_v52  ;;  %1325 = vst [vmem:[%s10554_s29 + $0x1a8] sm:$0xff] %v1324_v53  ;;  %v1326_v54 = vld [vmem:[%s10549_s28 + $0x360] sm:$0xff]  ;;  %v1328_v55 = vld [vmem:[%s10549_s28 + $0x370] sm:$0xff] }
  0x31   : > { %v1330_v56 = vld [vmem:[%s10549_s28 + $0x380] sm:$0xff]  ;;  %1327 = vst [vmem:[%s10554_s29 + $0x1b0] sm:$0xff] %v1326_v54  ;;  %1329 = vst [vmem:[%s10554_s29 + $0x1b8] sm:$0xff] %v1328_v55  ;;  %v1332_v57 = vld [vmem:[%s10549_s28 + $0x390] sm:$0xff] }
  0x32   : > { %1331 = vst [vmem:[%s10554_s29 + $0x1c0] sm:$0xff] %v1330_v56  ;;  %v1334_v58 = vld [vmem:[%s10549_s28 + $0x3a0] sm:$0xff]  ;;  %v1336_v59 = vld [vmem:[%s10549_s28 + $0x3b0] sm:$0xff]  ;;  %1333 = vst [vmem:[%s10554_s29 + $0x1c8] sm:$0xff] %v1332_v57 }
  0x33   : > { %1335 = vst [vmem:[%s10554_s29 + $0x1d0] sm:$0xff] %v1334_v58  ;;  %1337 = vst [vmem:[%s10554_s29 + $0x1d8] sm:$0xff] %v1336_v59  ;;  %v1338_v60 = vld [vmem:[%s10549_s28 + $0x3c0] sm:$0xff]  ;;  %v1340_v61 = vld [vmem:[%s10549_s28 + $0x3d0] sm:$0xff] }
  0x34   : > { %v1342_v62 = vld [vmem:[%s10549_s28 + $0x3e0] sm:$0xff]  ;;  %1339 = vst [vmem:[%s10554_s29 + $0x1e0] sm:$0xff] %v1338_v60  ;;  %1341 = vst [vmem:[%s10554_s29 + $0x1e8] sm:$0xff] %v1340_v61  ;;  %v1344_v63 = vld [vmem:[%s10549_s28 + $0x3f0] sm:$0xff] }
  0x35   : > { %1343 = vst [vmem:[%s10554_s29 + $0x1f0] sm:$0xff] %v1342_v62  ;;  %v1346_v0 = vld [vmem:[%s10549_s28 + $0x400] sm:$0xff]  ;;  %v1348_v1 = vld [vmem:[%s10549_s28 + $0x410] sm:$0xff]  ;;  %1345 = vst [vmem:[%s10554_s29 + $0x1f8] sm:$0xff] %v1344_v63 }
  0x36   : > { %1347 = vst [vmem:[%s10554_s29 + $0x200] sm:$0xff] %v1346_v0  ;;  %1349 = vst [vmem:[%s10554_s29 + $0x208] sm:$0xff] %v1348_v1  ;;  %v1350_v2 = vld [vmem:[%s10549_s28 + $0x420] sm:$0xff]  ;;  %v1352_v3 = vld [vmem:[%s10549_s28 + $0x430] sm:$0xff] }
  0x37   : > { %v1354_v4 = vld [vmem:[%s10549_s28 + $0x440] sm:$0xff]  ;;  %1351 = vst [vmem:[%s10554_s29 + $0x210] sm:$0xff] %v1350_v2  ;;  %1353 = vst [vmem:[%s10554_s29 + $0x218] sm:$0xff] %v1352_v3  ;;  %v1356_v5 = vld [vmem:[%s10549_s28 + $0x450] sm:$0xff] }
  0x38   : > { %1355 = vst [vmem:[%s10554_s29 + $0x220] sm:$0xff] %v1354_v4  ;;  %v1358_v6 = vld [vmem:[%s10549_s28 + $0x460] sm:$0xff]  ;;  %v1360_v7 = vld [vmem:[%s10549_s28 + $0x470] sm:$0xff]  ;;  %1357 = vst [vmem:[%s10554_s29 + $0x228] sm:$0xff] %v1356_v5 }
  0x39   : > { %1359 = vst [vmem:[%s10554_s29 + $0x230] sm:$0xff] %v1358_v6  ;;  %1361 = vst [vmem:[%s10554_s29 + $0x238] sm:$0xff] %v1360_v7  ;;  %v1362_v8 = vld [vmem:[%s10549_s28 + $0x480] sm:$0xff]  ;;  %v1364_v9 = vld [vmem:[%s10549_s28 + $0x490] sm:$0xff] }
  0x3a   : > { %v1366_v10 = vld [vmem:[%s10549_s28 + $0x4a0] sm:$0xff]  ;;  %1363 = vst [vmem:[%s10554_s29 + $0x240] sm:$0xff] %v1362_v8  ;;  %1365 = vst [vmem:[%s10554_s29 + $0x248] sm:$0xff] %v1364_v9  ;;  %v1368_v11 = vld [vmem:[%s10549_s28 + $0x4b0] sm:$0xff] }
  0x3b   : > { %1367 = vst [vmem:[%s10554_s29 + $0x250] sm:$0xff] %v1366_v10  ;;  %v1370_v12 = vld [vmem:[%s10549_s28 + $0x4c0] sm:$0xff]  ;;  %v1372_v13 = vld [vmem:[%s10549_s28 + $0x4d0] sm:$0xff]  ;;  %1369 = vst [vmem:[%s10554_s29 + $0x258] sm:$0xff] %v1368_v11 }
  0x3c   : > { %1371 = vst [vmem:[%s10554_s29 + $0x260] sm:$0xff] %v1370_v12  ;;  %1373 = vst [vmem:[%s10554_s29 + $0x268] sm:$0xff] %v1372_v13  ;;  %v1374_v14 = vld [vmem:[%s10549_s28 + $0x4e0] sm:$0xff]  ;;  %v1376_v15 = vld [vmem:[%s10549_s28 + $0x4f0] sm:$0xff] }
  0x3d   : > { %v1378_v16 = vld [vmem:[%s10549_s28 + $0x500] sm:$0xff]  ;;  %1375 = vst [vmem:[%s10554_s29 + $0x270] sm:$0xff] %v1374_v14  ;;  %1377 = vst [vmem:[%s10554_s29 + $0x278] sm:$0xff] %v1376_v15  ;;  %v1380_v17 = vld [vmem:[%s10549_s28 + $0x510] sm:$0xff] }
  0x3e   : > { %1379 = vst [vmem:[%s10554_s29 + $0x280] sm:$0xff] %v1378_v16  ;;  %v1382_v18 = vld [vmem:[%s10549_s28 + $0x520] sm:$0xff]  ;;  %v1384_v19 = vld [vmem:[%s10549_s28 + $0x530] sm:$0xff]  ;;  %1381 = vst [vmem:[%s10554_s29 + $0x288] sm:$0xff] %v1380_v17 }
  0x3f   : > { %1383 = vst [vmem:[%s10554_s29 + $0x290] sm:$0xff] %v1382_v18  ;;  %1385 = vst [vmem:[%s10554_s29 + $0x298] sm:$0xff] %v1384_v19  ;;  %v1386_v20 = vld [vmem:[%s10549_s28 + $0x540] sm:$0xff]  ;;  %v1388_v21 = vld [vmem:[%s10549_s28 + $0x550] sm:$0xff] }
  0x40   : > { %v1390_v22 = vld [vmem:[%s10549_s28 + $0x560] sm:$0xff]  ;;  %1387 = vst [vmem:[%s10554_s29 + $0x2a0] sm:$0xff] %v1386_v20  ;;  %1389 = vst [vmem:[%s10554_s29 + $0x2a8] sm:$0xff] %v1388_v21  ;;  %v1392_v23 = vld [vmem:[%s10549_s28 + $0x570] sm:$0xff] }
  0x41   : > { %1391 = vst [vmem:[%s10554_s29 + $0x2b0] sm:$0xff] %v1390_v22  ;;  %v1394_v24 = vld [vmem:[%s10549_s28 + $0x580] sm:$0xff]  ;;  %v1396_v25 = vld [vmem:[%s10549_s28 + $0x590] sm:$0xff]  ;;  %1393 = vst [vmem:[%s10554_s29 + $0x2b8] sm:$0xff] %v1392_v23 }
  0x42   : > { %1395 = vst [vmem:[%s10554_s29 + $0x2c0] sm:$0xff] %v1394_v24  ;;  %1397 = vst [vmem:[%s10554_s29 + $0x2c8] sm:$0xff] %v1396_v25  ;;  %v1398_v26 = vld [vmem:[%s10549_s28 + $0x5a0] sm:$0xff]  ;;  %v1400_v27 = vld [vmem:[%s10549_s28 + $0x5b0] sm:$0xff] }
  0x43   : > { %v1402_v28 = vld [vmem:[%s10549_s28 + $0x5c0] sm:$0xff]  ;;  %1399 = vst [vmem:[%s10554_s29 + $0x2d0] sm:$0xff] %v1398_v26  ;;  %1401 = vst [vmem:[%s10554_s29 + $0x2d8] sm:$0xff] %v1400_v27  ;;  %v1404_v29 = vld [vmem:[%s10549_s28 + $0x5d0] sm:$0xff] }
  0x44   : > { %1403 = vst [vmem:[%s10554_s29 + $0x2e0] sm:$0xff] %v1402_v28  ;;  %v1406_v30 = vld [vmem:[%s10549_s28 + $0x5e0] sm:$0xff]  ;;  %v1408_v31 = vld [vmem:[%s10549_s28 + $0x5f0] sm:$0xff]  ;;  %1405 = vst [vmem:[%s10554_s29 + $0x2e8] sm:$0xff] %v1404_v29 }
  0x45   : > { %1407 = vst [vmem:[%s10554_s29 + $0x2f0] sm:$0xff] %v1406_v30  ;;  %1409 = vst [vmem:[%s10554_s29 + $0x2f8] sm:$0xff] %v1408_v31  ;;  %v1410_v32 = vld [vmem:[%s10549_s28 + $0x600] sm:$0xff]  ;;  %v1412_v33 = vld [vmem:[%s10549_s28 + $0x610] sm:$0xff] }
  0x46   : > { %v1414_v34 = vld [vmem:[%s10549_s28 + $0x620] sm:$0xff]  ;;  %1411 = vst [vmem:[%s10554_s29 + $0x300] sm:$0xff] %v1410_v32  ;;  %1413 = vst [vmem:[%s10554_s29 + $0x308] sm:$0xff] %v1412_v33  ;;  %v1416_v35 = vld [vmem:[%s10549_s28 + $0x630] sm:$0xff] }
  0x47   : > { %1415 = vst [vmem:[%s10554_s29 + $0x310] sm:$0xff] %v1414_v34  ;;  %v1418_v36 = vld [vmem:[%s10549_s28 + $0x640] sm:$0xff]  ;;  %v1420_v37 = vld [vmem:[%s10549_s28 + $0x650] sm:$0xff]  ;;  %1417 = vst [vmem:[%s10554_s29 + $0x318] sm:$0xff] %v1416_v35 }
  0x48   : > { %1419 = vst [vmem:[%s10554_s29 + $0x320] sm:$0xff] %v1418_v36  ;;  %1421 = vst [vmem:[%s10554_s29 + $0x328] sm:$0xff] %v1420_v37  ;;  %v1422_v38 = vld [vmem:[%s10549_s28 + $0x660] sm:$0xff]  ;;  %v1424_v39 = vld [vmem:[%s10549_s28 + $0x670] sm:$0xff] }
  0x49   : > { %v1426_v40 = vld [vmem:[%s10549_s28 + $0x680] sm:$0xff]  ;;  %1423 = vst [vmem:[%s10554_s29 + $0x330] sm:$0xff] %v1422_v38  ;;  %1425 = vst [vmem:[%s10554_s29 + $0x338] sm:$0xff] %v1424_v39  ;;  %v1428_v41 = vld [vmem:[%s10549_s28 + $0x690] sm:$0xff] }
  0x4a   : > { %1427 = vst [vmem:[%s10554_s29 + $0x340] sm:$0xff] %v1426_v40  ;;  %v1430_v42 = vld [vmem:[%s10549_s28 + $0x6a0] sm:$0xff]  ;;  %v1432_v43 = vld [vmem:[%s10549_s28 + $0x6b0] sm:$0xff]  ;;  %1429 = vst [vmem:[%s10554_s29 + $0x348] sm:$0xff] %v1428_v41 }
  0x4b   : > { %1431 = vst [vmem:[%s10554_s29 + $0x350] sm:$0xff] %v1430_v42  ;;  %1433 = vst [vmem:[%s10554_s29 + $0x358] sm:$0xff] %v1432_v43  ;;  %v1434_v44 = vld [vmem:[%s10549_s28 + $0x6c0] sm:$0xff]  ;;  %v1436_v45 = vld [vmem:[%s10549_s28 + $0x6d0] sm:$0xff] }
  0x4c   : > { %v1438_v46 = vld [vmem:[%s10549_s28 + $0x6e0] sm:$0xff]  ;;  %1435 = vst [vmem:[%s10554_s29 + $0x360] sm:$0xff] %v1434_v44  ;;  %1437 = vst [vmem:[%s10554_s29 + $0x368] sm:$0xff] %v1436_v45  ;;  %v1440_v47 = vld [vmem:[%s10549_s28 + $0x6f0] sm:$0xff] }
  0x4d   : > { %1439 = vst [vmem:[%s10554_s29 + $0x370] sm:$0xff] %v1438_v46  ;;  %v1442_v48 = vld [vmem:[%s10549_s28 + $0x700] sm:$0xff]  ;;  %v1444_v49 = vld [vmem:[%s10549_s28 + $0x710] sm:$0xff]  ;;  %1441 = vst [vmem:[%s10554_s29 + $0x378] sm:$0xff] %v1440_v47 }
  0x4e   : > { %1443 = vst [vmem:[%s10554_s29 + $0x380] sm:$0xff] %v1442_v48  ;;  %1445 = vst [vmem:[%s10554_s29 + $0x388] sm:$0xff] %v1444_v49  ;;  %v1446_v50 = vld [vmem:[%s10549_s28 + $0x720] sm:$0xff]  ;;  %v1448_v51 = vld [vmem:[%s10549_s28 + $0x730] sm:$0xff] }
  0x4f   : > { %v1450_v52 = vld [vmem:[%s10549_s28 + $0x740] sm:$0xff]  ;;  %1447 = vst [vmem:[%s10554_s29 + $0x390] sm:$0xff] %v1446_v50  ;;  %1449 = vst [vmem:[%s10554_s29 + $0x398] sm:$0xff] %v1448_v51  ;;  %v1452_v53 = vld [vmem:[%s10549_s28 + $0x750] sm:$0xff] }
  0x50   : > { %1451 = vst [vmem:[%s10554_s29 + $0x3a0] sm:$0xff] %v1450_v52  ;;  %v1454_v54 = vld [vmem:[%s10549_s28 + $0x760] sm:$0xff]  ;;  %v1456_v55 = vld [vmem:[%s10549_s28 + $0x770] sm:$0xff]  ;;  %1453 = vst [vmem:[%s10554_s29 + $0x3a8] sm:$0xff] %v1452_v53 }
  0x51   : > { %1455 = vst [vmem:[%s10554_s29 + $0x3b0] sm:$0xff] %v1454_v54  ;;  %1457 = vst [vmem:[%s10554_s29 + $0x3b8] sm:$0xff] %v1456_v55  ;;  %v1458_v56 = vld [vmem:[%s10549_s28 + $0x780] sm:$0xff]  ;;  %v1460_v57 = vld [vmem:[%s10549_s28 + $0x790] sm:$0xff] }
  0x52   : > { %v1462_v58 = vld [vmem:[%s10549_s28 + $0x7a0] sm:$0xff]  ;;  %1459 = vst [vmem:[%s10554_s29 + $0x3c0] sm:$0xff] %v1458_v56  ;;  %1461 = vst [vmem:[%s10554_s29 + $0x3c8] sm:$0xff] %v1460_v57  ;;  %v1464_v59 = vld [vmem:[%s10549_s28 + $0x7b0] sm:$0xff] }
  0x53   : > { %1463 = vst [vmem:[%s10554_s29 + $0x3d0] sm:$0xff] %v1462_v58  ;;  %v1466_v60 = vld [vmem:[%s10549_s28 + $0x7c0] sm:$0xff]  ;;  %v1468_v61 = vld [vmem:[%s10549_s28 + $0x7d0] sm:$0xff]  ;;  %1465 = vst [vmem:[%s10554_s29 + $0x3d8] sm:$0xff] %v1464_v59 }
  0x54   : > { %1467 = vst [vmem:[%s10554_s29 + $0x3e0] sm:$0xff] %v1466_v60  ;;  %1469 = vst [vmem:[%s10554_s29 + $0x3e8] sm:$0xff] %v1468_v61  ;;  %v1470_v62 = vld [vmem:[%s10549_s28 + $0x7e0] sm:$0xff]  ;;  %v1472_v63 = vld [vmem:[%s10549_s28 + $0x7f0] sm:$0xff] }
  0x55   : > { %v1474_v0 = vld [vmem:[%s10549_s28 + $0x800] sm:$0xff]  ;;  %1471 = vst [vmem:[%s10554_s29 + $0x3f0] sm:$0xff] %v1470_v62  ;;  %1473 = vst [vmem:[%s10554_s29 + $0x3f8] sm:$0xff] %v1472_v63  ;;  %v1476_v1 = vld [vmem:[%s10549_s28 + $0x810] sm:$0xff] }
  0x56   : > { %1475 = vst [vmem:[%s10554_s29 + $0x400] sm:$0xff] %v1474_v0  ;;  %v1478_v2 = vld [vmem:[%s10549_s28 + $0x820] sm:$0xff]  ;;  %v1480_v3 = vld [vmem:[%s10549_s28 + $0x830] sm:$0xff]  ;;  %1477 = vst [vmem:[%s10554_s29 + $0x408] sm:$0xff] %v1476_v1 }
  0x57   : > { %1479 = vst [vmem:[%s10554_s29 + $0x410] sm:$0xff] %v1478_v2  ;;  %1481 = vst [vmem:[%s10554_s29 + $0x418] sm:$0xff] %v1480_v3  ;;  %v1482_v4 = vld [vmem:[%s10549_s28 + $0x840] sm:$0xff]  ;;  %v1484_v5 = vld [vmem:[%s10549_s28 + $0x850] sm:$0xff] }
  0x58   : > { %v1486_v6 = vld [vmem:[%s10549_s28 + $0x860] sm:$0xff]  ;;  %1483 = vst [vmem:[%s10554_s29 + $0x420] sm:$0xff] %v1482_v4  ;;  %1485 = vst [vmem:[%s10554_s29 + $0x428] sm:$0xff] %v1484_v5  ;;  %v1488_v7 = vld [vmem:[%s10549_s28 + $0x870] sm:$0xff] }
  0x59   : > { %1487 = vst [vmem:[%s10554_s29 + $0x430] sm:$0xff] %v1486_v6  ;;  %v1490_v8 = vld [vmem:[%s10549_s28 + $0x880] sm:$0xff]  ;;  %v1492_v9 = vld [vmem:[%s10549_s28 + $0x890] sm:$0xff]  ;;  %1489 = vst [vmem:[%s10554_s29 + $0x438] sm:$0xff] %v1488_v7 }
  0x5a   : > { %1491 = vst [vmem:[%s10554_s29 + $0x440] sm:$0xff] %v1490_v8  ;;  %1493 = vst [vmem:[%s10554_s29 + $0x448] sm:$0xff] %v1492_v9  ;;  %v1494_v10 = vld [vmem:[%s10549_s28 + $0x8a0] sm:$0xff]  ;;  %v1496_v11 = vld [vmem:[%s10549_s28 + $0x8b0] sm:$0xff] }
  0x5b   : > { %v1498_v12 = vld [vmem:[%s10549_s28 + $0x8c0] sm:$0xff]  ;;  %1495 = vst [vmem:[%s10554_s29 + $0x450] sm:$0xff] %v1494_v10  ;;  %1497 = vst [vmem:[%s10554_s29 + $0x458] sm:$0xff] %v1496_v11  ;;  %v1500_v13 = vld [vmem:[%s10549_s28 + $0x8d0] sm:$0xff] }
  0x5c   : > { %1499 = vst [vmem:[%s10554_s29 + $0x460] sm:$0xff] %v1498_v12  ;;  %v1502_v14 = vld [vmem:[%s10549_s28 + $0x8e0] sm:$0xff]  ;;  %v1504_v15 = vld [vmem:[%s10549_s28 + $0x8f0] sm:$0xff]  ;;  %1501 = vst [vmem:[%s10554_s29 + $0x468] sm:$0xff] %v1500_v13 }
  0x5d   : > { %1503 = vst [vmem:[%s10554_s29 + $0x470] sm:$0xff] %v1502_v14  ;;  %1505 = vst [vmem:[%s10554_s29 + $0x478] sm:$0xff] %v1504_v15  ;;  %v1506_v16 = vld [vmem:[%s10549_s28 + $0x900] sm:$0xff]  ;;  %v1508_v17 = vld [vmem:[%s10549_s28 + $0x910] sm:$0xff] }
  0x5e   : > { %v1510_v18 = vld [vmem:[%s10549_s28 + $0x920] sm:$0xff]  ;;  %1507 = vst [vmem:[%s10554_s29 + $0x480] sm:$0xff] %v1506_v16  ;;  %1509 = vst [vmem:[%s10554_s29 + $0x488] sm:$0xff] %v1508_v17  ;;  %v1512_v19 = vld [vmem:[%s10549_s28 + $0x930] sm:$0xff] }
  0x5f   : > { %1511 = vst [vmem:[%s10554_s29 + $0x490] sm:$0xff] %v1510_v18  ;;  %v1514_v20 = vld [vmem:[%s10549_s28 + $0x940] sm:$0xff]  ;;  %v1516_v21 = vld [vmem:[%s10549_s28 + $0x950] sm:$0xff]  ;;  %1513 = vst [vmem:[%s10554_s29 + $0x498] sm:$0xff] %v1512_v19 }
  0x60   : > { %1515 = vst [vmem:[%s10554_s29 + $0x4a0] sm:$0xff] %v1514_v20  ;;  %1517 = vst [vmem:[%s10554_s29 + $0x4a8] sm:$0xff] %v1516_v21  ;;  %v1518_v22 = vld [vmem:[%s10549_s28 + $0x960] sm:$0xff]  ;;  %v1520_v23 = vld [vmem:[%s10549_s28 + $0x970] sm:$0xff] }
  0x61   : > { %v1522_v24 = vld [vmem:[%s10549_s28 + $0x980] sm:$0xff]  ;;  %1519 = vst [vmem:[%s10554_s29 + $0x4b0] sm:$0xff] %v1518_v22  ;;  %1521 = vst [vmem:[%s10554_s29 + $0x4b8] sm:$0xff] %v1520_v23  ;;  %v1524_v25 = vld [vmem:[%s10549_s28 + $0x990] sm:$0xff] }
  0x62   : > { %1523 = vst [vmem:[%s10554_s29 + $0x4c0] sm:$0xff] %v1522_v24  ;;  %v1526_v26 = vld [vmem:[%s10549_s28 + $0x9a0] sm:$0xff]  ;;  %v1528_v27 = vld [vmem:[%s10549_s28 + $0x9b0] sm:$0xff]  ;;  %1525 = vst [vmem:[%s10554_s29 + $0x4c8] sm:$0xff] %v1524_v25 }
  0x63   : > { %1527 = vst [vmem:[%s10554_s29 + $0x4d0] sm:$0xff] %v1526_v26  ;;  %1529 = vst [vmem:[%s10554_s29 + $0x4d8] sm:$0xff] %v1528_v27  ;;  %v1530_v28 = vld [vmem:[%s10549_s28 + $0x9c0] sm:$0xff]  ;;  %v1532_v29 = vld [vmem:[%s10549_s28 + $0x9d0] sm:$0xff] }
  0x64   : > { %v1534_v30 = vld [vmem:[%s10549_s28 + $0x9e0] sm:$0xff]  ;;  %1531 = vst [vmem:[%s10554_s29 + $0x4e0] sm:$0xff] %v1530_v28  ;;  %1533 = vst [vmem:[%s10554_s29 + $0x4e8] sm:$0xff] %v1532_v29  ;;  %v1536_v31 = vld [vmem:[%s10549_s28 + $0x9f0] sm:$0xff] }
  0x65   : > { %1535 = vst [vmem:[%s10554_s29 + $0x4f0] sm:$0xff] %v1534_v30  ;;  %v1538_v32 = vld [vmem:[%s10549_s28 + $0xa00] sm:$0xff]  ;;  %v1540_v33 = vld [vmem:[%s10549_s28 + $0xa10] sm:$0xff]  ;;  %1537 = vst [vmem:[%s10554_s29 + $0x4f8] sm:$0xff] %v1536_v31 }
  0x66   : > { %1539 = vst [vmem:[%s10554_s29 + $0x500] sm:$0xff] %v1538_v32  ;;  %1541 = vst [vmem:[%s10554_s29 + $0x508] sm:$0xff] %v1540_v33  ;;  %v1542_v34 = vld [vmem:[%s10549_s28 + $0xa20] sm:$0xff]  ;;  %v1544_v35 = vld [vmem:[%s10549_s28 + $0xa30] sm:$0xff] }
  0x67   : > { %v1546_v36 = vld [vmem:[%s10549_s28 + $0xa40] sm:$0xff]  ;;  %1543 = vst [vmem:[%s10554_s29 + $0x510] sm:$0xff] %v1542_v34  ;;  %1545 = vst [vmem:[%s10554_s29 + $0x518] sm:$0xff] %v1544_v35  ;;  %v1548_v37 = vld [vmem:[%s10549_s28 + $0xa50] sm:$0xff] }
  0x68   : > { %1547 = vst [vmem:[%s10554_s29 + $0x520] sm:$0xff] %v1546_v36  ;;  %v1550_v38 = vld [vmem:[%s10549_s28 + $0xa60] sm:$0xff]  ;;  %v1552_v39 = vld [vmem:[%s10549_s28 + $0xa70] sm:$0xff]  ;;  %1549 = vst [vmem:[%s10554_s29 + $0x528] sm:$0xff] %v1548_v37 }
  0x69   : > { %1551 = vst [vmem:[%s10554_s29 + $0x530] sm:$0xff] %v1550_v38  ;;  %1553 = vst [vmem:[%s10554_s29 + $0x538] sm:$0xff] %v1552_v39  ;;  %v1554_v40 = vld [vmem:[%s10549_s28 + $0xa80] sm:$0xff]  ;;  %v1556_v41 = vld [vmem:[%s10549_s28 + $0xa90] sm:$0xff] }
  0x6a   : > { %v1558_v42 = vld [vmem:[%s10549_s28 + $0xaa0] sm:$0xff]  ;;  %1555 = vst [vmem:[%s10554_s29 + $0x540] sm:$0xff] %v1554_v40  ;;  %1557 = vst [vmem:[%s10554_s29 + $0x548] sm:$0xff] %v1556_v41  ;;  %v1560_v43 = vld [vmem:[%s10549_s28 + $0xab0] sm:$0xff] }
  0x6b   : > { %1559 = vst [vmem:[%s10554_s29 + $0x550] sm:$0xff] %v1558_v42  ;;  %v1562_v44 = vld [vmem:[%s10549_s28 + $0xac0] sm:$0xff]  ;;  %v1564_v45 = vld [vmem:[%s10549_s28 + $0xad0] sm:$0xff]  ;;  %1561 = vst [vmem:[%s10554_s29 + $0x558] sm:$0xff] %v1560_v43 }
  0x6c   : > { %1563 = vst [vmem:[%s10554_s29 + $0x560] sm:$0xff] %v1562_v44  ;;  %1565 = vst [vmem:[%s10554_s29 + $0x568] sm:$0xff] %v1564_v45  ;;  %v1566_v46 = vld [vmem:[%s10549_s28 + $0xae0] sm:$0xff]  ;;  %v1568_v47 = vld [vmem:[%s10549_s28 + $0xaf0] sm:$0xff] }
  0x6d   : > { %v1570_v48 = vld [vmem:[%s10549_s28 + $0xb00] sm:$0xff]  ;;  %1567 = vst [vmem:[%s10554_s29 + $0x570] sm:$0xff] %v1566_v46  ;;  %1569 = vst [vmem:[%s10554_s29 + $0x578] sm:$0xff] %v1568_v47  ;;  %v1572_v49 = vld [vmem:[%s10549_s28 + $0xb10] sm:$0xff] }
  0x6e   : > { %1571 = vst [vmem:[%s10554_s29 + $0x580] sm:$0xff] %v1570_v48  ;;  %v1574_v50 = vld [vmem:[%s10549_s28 + $0xb20] sm:$0xff]  ;;  %v1576_v51 = vld [vmem:[%s10549_s28 + $0xb30] sm:$0xff]  ;;  %1573 = vst [vmem:[%s10554_s29 + $0x588] sm:$0xff] %v1572_v49 }
  0x6f   : > { %1575 = vst [vmem:[%s10554_s29 + $0x590] sm:$0xff] %v1574_v50  ;;  %1577 = vst [vmem:[%s10554_s29 + $0x598] sm:$0xff] %v1576_v51  ;;  %v1578_v52 = vld [vmem:[%s10549_s28 + $0xb40] sm:$0xff]  ;;  %v1580_v53 = vld [vmem:[%s10549_s28 + $0xb50] sm:$0xff] }
  0x70   : > { %v1582_v54 = vld [vmem:[%s10549_s28 + $0xb60] sm:$0xff]  ;;  %1579 = vst [vmem:[%s10554_s29 + $0x5a0] sm:$0xff] %v1578_v52  ;;  %1581 = vst [vmem:[%s10554_s29 + $0x5a8] sm:$0xff] %v1580_v53  ;;  %v1584_v55 = vld [vmem:[%s10549_s28 + $0xb70] sm:$0xff] }
  0x71   : > { %1583 = vst [vmem:[%s10554_s29 + $0x5b0] sm:$0xff] %v1582_v54  ;;  %v1586_v56 = vld [vmem:[%s10549_s28 + $0xb80] sm:$0xff]  ;;  %v1588_v57 = vld [vmem:[%s10549_s28 + $0xb90] sm:$0xff]  ;;  %1585 = vst [vmem:[%s10554_s29 + $0x5b8] sm:$0xff] %v1584_v55 }
  0x72   : > { %1587 = vst [vmem:[%s10554_s29 + $0x5c0] sm:$0xff] %v1586_v56  ;;  %1589 = vst [vmem:[%s10554_s29 + $0x5c8] sm:$0xff] %v1588_v57  ;;  %v1590_v58 = vld [vmem:[%s10549_s28 + $0xba0] sm:$0xff]  ;;  %v1592_v59 = vld [vmem:[%s10549_s28 + $0xbb0] sm:$0xff] }
  0x73   : > { %v1594_v60 = vld [vmem:[%s10549_s28 + $0xbc0] sm:$0xff]  ;;  %1591 = vst [vmem:[%s10554_s29 + $0x5d0] sm:$0xff] %v1590_v58  ;;  %1593 = vst [vmem:[%s10554_s29 + $0x5d8] sm:$0xff] %v1592_v59  ;;  %v1596_v61 = vld [vmem:[%s10549_s28 + $0xbd0] sm:$0xff] }
  0x74   : > { %1595 = vst [vmem:[%s10554_s29 + $0x5e0] sm:$0xff] %v1594_v60  ;;  %v1598_v62 = vld [vmem:[%s10549_s28 + $0xbe0] sm:$0xff]  ;;  %v1600_v63 = vld [vmem:[%s10549_s28 + $0xbf0] sm:$0xff]  ;;  %1597 = vst [vmem:[%s10554_s29 + $0x5e8] sm:$0xff] %v1596_v61 }
  0x75   : > { %1599 = vst [vmem:[%s10554_s29 + $0x5f0] sm:$0xff] %v1598_v62  ;;  %1601 = vst [vmem:[%s10554_s29 + $0x5f8] sm:$0xff] %v1600_v63  ;;  %v1602_v0 = vld [vmem:[%s10549_s28 + $0xc00] sm:$0xff]  ;;  %v1604_v1 = vld [vmem:[%s10549_s28 + $0xc10] sm:$0xff] }
  0x76   : > { %v1606_v2 = vld [vmem:[%s10549_s28 + $0xc20] sm:$0xff]  ;;  %1603 = vst [vmem:[%s10554_s29 + $0x600] sm:$0xff] %v1602_v0  ;;  %1605 = vst [vmem:[%s10554_s29 + $0x608] sm:$0xff] %v1604_v1  ;;  %v1608_v3 = vld [vmem:[%s10549_s28 + $0xc30] sm:$0xff] }
  0x77   : > { %1607 = vst [vmem:[%s10554_s29 + $0x610] sm:$0xff] %v1606_v2  ;;  %v1610_v4 = vld [vmem:[%s10549_s28 + $0xc40] sm:$0xff]  ;;  %v1612_v5 = vld [vmem:[%s10549_s28 + $0xc50] sm:$0xff]  ;;  %1609 = vst [vmem:[%s10554_s29 + $0x618] sm:$0xff] %v1608_v3 }
  0x78   : > { %1611 = vst [vmem:[%s10554_s29 + $0x620] sm:$0xff] %v1610_v4  ;;  %1613 = vst [vmem:[%s10554_s29 + $0x628] sm:$0xff] %v1612_v5  ;;  %v1614_v6 = vld [vmem:[%s10549_s28 + $0xc60] sm:$0xff]  ;;  %v1616_v7 = vld [vmem:[%s10549_s28 + $0xc70] sm:$0xff] }
  0x79   : > { %v1618_v8 = vld [vmem:[%s10549_s28 + $0xc80] sm:$0xff]  ;;  %1615 = vst [vmem:[%s10554_s29 + $0x630] sm:$0xff] %v1614_v6  ;;  %1617 = vst [vmem:[%s10554_s29 + $0x638] sm:$0xff] %v1616_v7  ;;  %v1620_v9 = vld [vmem:[%s10549_s28 + $0xc90] sm:$0xff] }
  0x7a   : > { %1619 = vst [vmem:[%s10554_s29 + $0x640] sm:$0xff] %v1618_v8  ;;  %v1622_v10 = vld [vmem:[%s10549_s28 + $0xca0] sm:$0xff]  ;;  %v1624_v11 = vld [vmem:[%s10549_s28 + $0xcb0] sm:$0xff]  ;;  %1621 = vst [vmem:[%s10554_s29 + $0x648] sm:$0xff] %v1620_v9 }
  0x7b   : > { %1623 = vst [vmem:[%s10554_s29 + $0x650] sm:$0xff] %v1622_v10  ;;  %1625 = vst [vmem:[%s10554_s29 + $0x658] sm:$0xff] %v1624_v11  ;;  %v1626_v12 = vld [vmem:[%s10549_s28 + $0xcc0] sm:$0xff]  ;;  %v1628_v13 = vld [vmem:[%s10549_s28 + $0xcd0] sm:$0xff] }
  0x7c   : > { %v1630_v14 = vld [vmem:[%s10549_s28 + $0xce0] sm:$0xff]  ;;  %1627 = vst [vmem:[%s10554_s29 + $0x660] sm:$0xff] %v1626_v12  ;;  %1629 = vst [vmem:[%s10554_s29 + $0x668] sm:$0xff] %v1628_v13  ;;  %v1632_v15 = vld [vmem:[%s10549_s28 + $0xcf0] sm:$0xff] }
  0x7d   : > { %1631 = vst [vmem:[%s10554_s29 + $0x670] sm:$0xff] %v1630_v14  ;;  %v1634_v16 = vld [vmem:[%s10549_s28 + $0xd00] sm:$0xff]  ;;  %v1636_v17 = vld [vmem:[%s10549_s28 + $0xd10] sm:$0xff]  ;;  %1633 = vst [vmem:[%s10554_s29 + $0x678] sm:$0xff] %v1632_v15 }
  0x7e   : > { %1635 = vst [vmem:[%s10554_s29 + $0x680] sm:$0xff] %v1634_v16  ;;  %1637 = vst [vmem:[%s10554_s29 + $0x688] sm:$0xff] %v1636_v17  ;;  %v1638_v18 = vld [vmem:[%s10549_s28 + $0xd20] sm:$0xff]  ;;  %v1640_v19 = vld [vmem:[%s10549_s28 + $0xd30] sm:$0xff] }
  0x7f   : > { %v1642_v20 = vld [vmem:[%s10549_s28 + $0xd40] sm:$0xff]  ;;  %1639 = vst [vmem:[%s10554_s29 + $0x690] sm:$0xff] %v1638_v18  ;;  %1641 = vst [vmem:[%s10554_s29 + $0x698] sm:$0xff] %v1640_v19  ;;  %v1644_v21 = vld [vmem:[%s10549_s28 + $0xd50] sm:$0xff] }
  0x80   : > { %1643 = vst [vmem:[%s10554_s29 + $0x6a0] sm:$0xff] %v1642_v20  ;;  %v1646_v22 = vld [vmem:[%s10549_s28 + $0xd60] sm:$0xff]  ;;  %v1648_v23 = vld [vmem:[%s10549_s28 + $0xd70] sm:$0xff]  ;;  %1645 = vst [vmem:[%s10554_s29 + $0x6a8] sm:$0xff] %v1644_v21 }
  0x81   : > { %1647 = vst [vmem:[%s10554_s29 + $0x6b0] sm:$0xff] %v1646_v22  ;;  %1649 = vst [vmem:[%s10554_s29 + $0x6b8] sm:$0xff] %v1648_v23  ;;  %v1650_v24 = vld [vmem:[%s10549_s28 + $0xd80] sm:$0xff]  ;;  %v1652_v25 = vld [vmem:[%s10549_s28 + $0xd90] sm:$0xff] }
  0x82   : > { %v1654_v26 = vld [vmem:[%s10549_s28 + $0xda0] sm:$0xff]  ;;  %1651 = vst [vmem:[%s10554_s29 + $0x6c0] sm:$0xff] %v1650_v24  ;;  %1653 = vst [vmem:[%s10554_s29 + $0x6c8] sm:$0xff] %v1652_v25  ;;  %v1656_v27 = vld [vmem:[%s10549_s28 + $0xdb0] sm:$0xff] }
  0x83   : > { %1655 = vst [vmem:[%s10554_s29 + $0x6d0] sm:$0xff] %v1654_v26  ;;  %v1658_v28 = vld [vmem:[%s10549_s28 + $0xdc0] sm:$0xff]  ;;  %v1660_v29 = vld [vmem:[%s10549_s28 + $0xdd0] sm:$0xff]  ;;  %1657 = vst [vmem:[%s10554_s29 + $0x6d8] sm:$0xff] %v1656_v27 }
  0x84   : > { %1659 = vst [vmem:[%s10554_s29 + $0x6e0] sm:$0xff] %v1658_v28  ;;  %1661 = vst [vmem:[%s10554_s29 + $0x6e8] sm:$0xff] %v1660_v29  ;;  %v1662_v30 = vld [vmem:[%s10549_s28 + $0xde0] sm:$0xff]  ;;  %v1664_v31 = vld [vmem:[%s10549_s28 + $0xdf0] sm:$0xff] }
  0x85   : > { %v1666_v32 = vld [vmem:[%s10549_s28 + $0xe00] sm:$0xff]  ;;  %1663 = vst [vmem:[%s10554_s29 + $0x6f0] sm:$0xff] %v1662_v30  ;;  %1665 = vst [vmem:[%s10554_s29 + $0x6f8] sm:$0xff] %v1664_v31  ;;  %v1668_v33 = vld [vmem:[%s10549_s28 + $0xe10] sm:$0xff] }
  0x86   : > { %1667 = vst [vmem:[%s10554_s29 + $0x700] sm:$0xff] %v1666_v32  ;;  %v1670_v34 = vld [vmem:[%s10549_s28 + $0xe20] sm:$0xff]  ;;  %v1672_v35 = vld [vmem:[%s10549_s28 + $0xe30] sm:$0xff]  ;;  %1669 = vst [vmem:[%s10554_s29 + $0x708] sm:$0xff] %v1668_v33 }
  0x87   : > { %1671 = vst [vmem:[%s10554_s29 + $0x710] sm:$0xff] %v1670_v34  ;;  %1673 = vst [vmem:[%s10554_s29 + $0x718] sm:$0xff] %v1672_v35  ;;  %v1674_v36 = vld [vmem:[%s10549_s28 + $0xe40] sm:$0xff]  ;;  %v1676_v37 = vld [vmem:[%s10549_s28 + $0xe50] sm:$0xff] }
  0x88   : > { %v1678_v38 = vld [vmem:[%s10549_s28 + $0xe60] sm:$0xff]  ;;  %1675 = vst [vmem:[%s10554_s29 + $0x720] sm:$0xff] %v1674_v36  ;;  %1677 = vst [vmem:[%s10554_s29 + $0x728] sm:$0xff] %v1676_v37  ;;  %v1680_v39 = vld [vmem:[%s10549_s28 + $0xe70] sm:$0xff] }
  0x89   : > { %1679 = vst [vmem:[%s10554_s29 + $0x730] sm:$0xff] %v1678_v38  ;;  %v1682_v40 = vld [vmem:[%s10549_s28 + $0xe80] sm:$0xff]  ;;  %v1684_v41 = vld [vmem:[%s10549_s28 + $0xe90] sm:$0xff]  ;;  %1681 = vst [vmem:[%s10554_s29 + $0x738] sm:$0xff] %v1680_v39 }
  0x8a   : > { %1683 = vst [vmem:[%s10554_s29 + $0x740] sm:$0xff] %v1682_v40  ;;  %1685 = vst [vmem:[%s10554_s29 + $0x748] sm:$0xff] %v1684_v41  ;;  %v1686_v42 = vld [vmem:[%s10549_s28 + $0xea0] sm:$0xff]  ;;  %v1688_v43 = vld [vmem:[%s10549_s28 + $0xeb0] sm:$0xff] }
  0x8b   : > { %v1690_v44 = vld [vmem:[%s10549_s28 + $0xec0] sm:$0xff]  ;;  %1687 = vst [vmem:[%s10554_s29 + $0x750] sm:$0xff] %v1686_v42  ;;  %1689 = vst [vmem:[%s10554_s29 + $0x758] sm:$0xff] %v1688_v43  ;;  %v1692_v45 = vld [vmem:[%s10549_s28 + $0xed0] sm:$0xff] }
  0x8c   : > { %1691 = vst [vmem:[%s10554_s29 + $0x760] sm:$0xff] %v1690_v44  ;;  %v1694_v46 = vld [vmem:[%s10549_s28 + $0xee0] sm:$0xff]  ;;  %v1696_v47 = vld [vmem:[%s10549_s28 + $0xef0] sm:$0xff]  ;;  %1693 = vst [vmem:[%s10554_s29 + $0x768] sm:$0xff] %v1692_v45 }
  0x8d   : > { %1695 = vst [vmem:[%s10554_s29 + $0x770] sm:$0xff] %v1694_v46  ;;  %1697 = vst [vmem:[%s10554_s29 + $0x778] sm:$0xff] %v1696_v47  ;;  %v1698_v48 = vld [vmem:[%s10549_s28 + $0xf00] sm:$0xff]  ;;  %v1700_v49 = vld [vmem:[%s10549_s28 + $0xf10] sm:$0xff] }
  0x8e   : > { %v1702_v50 = vld [vmem:[%s10549_s28 + $0xf20] sm:$0xff]  ;;  %1699 = vst [vmem:[%s10554_s29 + $0x780] sm:$0xff] %v1698_v48  ;;  %1701 = vst [vmem:[%s10554_s29 + $0x788] sm:$0xff] %v1700_v49  ;;  %v1704_v51 = vld [vmem:[%s10549_s28 + $0xf30] sm:$0xff] }
  0x8f   : > { %1703 = vst [vmem:[%s10554_s29 + $0x790] sm:$0xff] %v1702_v50  ;;  %v1706_v52 = vld [vmem:[%s10549_s28 + $0xf40] sm:$0xff]  ;;  %v1708_v53 = vld [vmem:[%s10549_s28 + $0xf50] sm:$0xff]  ;;  %1705 = vst [vmem:[%s10554_s29 + $0x798] sm:$0xff] %v1704_v51 }
  0x90   : > { %1707 = vst [vmem:[%s10554_s29 + $0x7a0] sm:$0xff] %v1706_v52  ;;  %1709 = vst [vmem:[%s10554_s29 + $0x7a8] sm:$0xff] %v1708_v53  ;;  %v1710_v54 = vld [vmem:[%s10549_s28 + $0xf60] sm:$0xff]  ;;  %v1712_v55 = vld [vmem:[%s10549_s28 + $0xf70] sm:$0xff] }
  0x91   : > { %v1714_v56 = vld [vmem:[%s10549_s28 + $0xf80] sm:$0xff]  ;;  %1711 = vst [vmem:[%s10554_s29 + $0x7b0] sm:$0xff] %v1710_v54  ;;  %1713 = vst [vmem:[%s10554_s29 + $0x7b8] sm:$0xff] %v1712_v55  ;;  %v1716_v57 = vld [vmem:[%s10549_s28 + $0xf90] sm:$0xff] }
  0x92   : > { %1715 = vst [vmem:[%s10554_s29 + $0x7c0] sm:$0xff] %v1714_v56  ;;  %v1718_v58 = vld [vmem:[%s10549_s28 + $0xfa0] sm:$0xff]  ;;  %v1720_v59 = vld [vmem:[%s10549_s28 + $0xfb0] sm:$0xff]  ;;  %1717 = vst [vmem:[%s10554_s29 + $0x7c8] sm:$0xff] %v1716_v57 }
  0x93   : > { %1719 = vst [vmem:[%s10554_s29 + $0x7d0] sm:$0xff] %v1718_v58  ;;  %1721 = vst [vmem:[%s10554_s29 + $0x7d8] sm:$0xff] %v1720_v59  ;;  %v1722_v60 = vld [vmem:[%s10549_s28 + $0xfc0] sm:$0xff]  ;;  %v1724_v61 = vld [vmem:[%s10549_s28 + $0xfd0] sm:$0xff] }
  0x94   : > { %v1726_v62 = vld [vmem:[%s10549_s28 + $0xfe0] sm:$0xff]  ;;  %1723 = vst [vmem:[%s10554_s29 + $0x7e0] sm:$0xff] %v1722_v60  ;;  %1725 = vst [vmem:[%s10554_s29 + $0x7e8] sm:$0xff] %v1724_v61  ;;  %v1728_v63 = vld [vmem:[%s10549_s28 + $0xff0] sm:$0xff] }
  0x95   : > { %1727 = vst [vmem:[%s10554_s29 + $0x7f0] sm:$0xff] %v1726_v62  ;;  %v1730_v0 = vld [vmem:[%s10549_s28 + $0x1000] sm:$0xff]  ;;  %v1732_v1 = vld [vmem:[%s10549_s28 + $0x1010] sm:$0xff]  ;;  %1729 = vst [vmem:[%s10554_s29 + $0x7f8] sm:$0xff] %v1728_v63 }
  0x96   : > { %1731 = vst [vmem:[%s10554_s29 + $0x800] sm:$0xff] %v1730_v0  ;;  %1733 = vst [vmem:[%s10554_s29 + $0x808] sm:$0xff] %v1732_v1  ;;  %v1734_v2 = vld [vmem:[%s10549_s28 + $0x1020] sm:$0xff]  ;;  %v1736_v3 = vld [vmem:[%s10549_s28 + $0x1030] sm:$0xff] }
  0x97   : > { %v1738_v4 = vld [vmem:[%s10549_s28 + $0x1040] sm:$0xff]  ;;  %1735 = vst [vmem:[%s10554_s29 + $0x810] sm:$0xff] %v1734_v2  ;;  %1737 = vst [vmem:[%s10554_s29 + $0x818] sm:$0xff] %v1736_v3  ;;  %v1740_v5 = vld [vmem:[%s10549_s28 + $0x1050] sm:$0xff] }
  0x98   : > { %1739 = vst [vmem:[%s10554_s29 + $0x820] sm:$0xff] %v1738_v4  ;;  %v1742_v6 = vld [vmem:[%s10549_s28 + $0x1060] sm:$0xff]  ;;  %v1744_v7 = vld [vmem:[%s10549_s28 + $0x1070] sm:$0xff]  ;;  %1741 = vst [vmem:[%s10554_s29 + $0x828] sm:$0xff] %v1740_v5 }
  0x99   : > { %1743 = vst [vmem:[%s10554_s29 + $0x830] sm:$0xff] %v1742_v6  ;;  %1745 = vst [vmem:[%s10554_s29 + $0x838] sm:$0xff] %v1744_v7  ;;  %v1746_v8 = vld [vmem:[%s10549_s28 + $0x1080] sm:$0xff]  ;;  %v1748_v9 = vld [vmem:[%s10549_s28 + $0x1090] sm:$0xff] }
  0x9a   : > { %v1750_v10 = vld [vmem:[%s10549_s28 + $0x10a0] sm:$0xff]  ;;  %1747 = vst [vmem:[%s10554_s29 + $0x840] sm:$0xff] %v1746_v8  ;;  %1749 = vst [vmem:[%s10554_s29 + $0x848] sm:$0xff] %v1748_v9  ;;  %v1752_v11 = vld [vmem:[%s10549_s28 + $0x10b0] sm:$0xff] }
  0x9b   : > { %1751 = vst [vmem:[%s10554_s29 + $0x850] sm:$0xff] %v1750_v10  ;;  %v1754_v12 = vld [vmem:[%s10549_s28 + $0x10c0] sm:$0xff]  ;;  %v1756_v13 = vld [vmem:[%s10549_s28 + $0x10d0] sm:$0xff]  ;;  %1753 = vst [vmem:[%s10554_s29 + $0x858] sm:$0xff] %v1752_v11 }
  0x9c   : > { %1755 = vst [vmem:[%s10554_s29 + $0x860] sm:$0xff] %v1754_v12  ;;  %1757 = vst [vmem:[%s10554_s29 + $0x868] sm:$0xff] %v1756_v13  ;;  %v1758_v14 = vld [vmem:[%s10549_s28 + $0x10e0] sm:$0xff]  ;;  %v1760_v15 = vld [vmem:[%s10549_s28 + $0x10f0] sm:$0xff] }
  0x9d   : > { %v1762_v16 = vld [vmem:[%s10549_s28 + $0x1100] sm:$0xff]  ;;  %1759 = vst [vmem:[%s10554_s29 + $0x870] sm:$0xff] %v1758_v14  ;;  %1761 = vst [vmem:[%s10554_s29 + $0x878] sm:$0xff] %v1760_v15  ;;  %v1764_v17 = vld [vmem:[%s10549_s28 + $0x1110] sm:$0xff] }
  0x9e   : > { %1763 = vst [vmem:[%s10554_s29 + $0x880] sm:$0xff] %v1762_v16  ;;  %v1766_v18 = vld [vmem:[%s10549_s28 + $0x1120] sm:$0xff]  ;;  %v1768_v19 = vld [vmem:[%s10549_s28 + $0x1130] sm:$0xff]  ;;  %1765 = vst [vmem:[%s10554_s29 + $0x888] sm:$0xff] %v1764_v17 }
  0x9f   : > { %1767 = vst [vmem:[%s10554_s29 + $0x890] sm:$0xff] %v1766_v18  ;;  %1769 = vst [vmem:[%s10554_s29 + $0x898] sm:$0xff] %v1768_v19  ;;  %v1770_v20 = vld [vmem:[%s10549_s28 + $0x1140] sm:$0xff]  ;;  %v1772_v21 = vld [vmem:[%s10549_s28 + $0x1150] sm:$0xff] }
  0xa0   : > { %v1774_v22 = vld [vmem:[%s10549_s28 + $0x1160] sm:$0xff]  ;;  %1771 = vst [vmem:[%s10554_s29 + $0x8a0] sm:$0xff] %v1770_v20  ;;  %1773 = vst [vmem:[%s10554_s29 + $0x8a8] sm:$0xff] %v1772_v21  ;;  %v1776_v23 = vld [vmem:[%s10549_s28 + $0x1170] sm:$0xff] }
  0xa1   : > { %1775 = vst [vmem:[%s10554_s29 + $0x8b0] sm:$0xff] %v1774_v22  ;;  %v1778_v24 = vld [vmem:[%s10549_s28 + $0x1180] sm:$0xff]  ;;  %v1780_v25 = vld [vmem:[%s10549_s28 + $0x1190] sm:$0xff]  ;;  %1777 = vst [vmem:[%s10554_s29 + $0x8b8] sm:$0xff] %v1776_v23 }
  0xa2   : > { %1779 = vst [vmem:[%s10554_s29 + $0x8c0] sm:$0xff] %v1778_v24  ;;  %1781 = vst [vmem:[%s10554_s29 + $0x8c8] sm:$0xff] %v1780_v25  ;;  %v1782_v26 = vld [vmem:[%s10549_s28 + $0x11a0] sm:$0xff]  ;;  %v1784_v27 = vld [vmem:[%s10549_s28 + $0x11b0] sm:$0xff] }
  0xa3   : > { %v1786_v28 = vld [vmem:[%s10549_s28 + $0x11c0] sm:$0xff]  ;;  %1783 = vst [vmem:[%s10554_s29 + $0x8d0] sm:$0xff] %v1782_v26  ;;  %1785 = vst [vmem:[%s10554_s29 + $0x8d8] sm:$0xff] %v1784_v27  ;;  %v1788_v29 = vld [vmem:[%s10549_s28 + $0x11d0] sm:$0xff] }
  0xa4   : > { %1787 = vst [vmem:[%s10554_s29 + $0x8e0] sm:$0xff] %v1786_v28  ;;  %v1790_v30 = vld [vmem:[%s10549_s28 + $0x11e0] sm:$0xff]  ;;  %v1792_v31 = vld [vmem:[%s10549_s28 + $0x11f0] sm:$0xff]  ;;  %1789 = vst [vmem:[%s10554_s29 + $0x8e8] sm:$0xff] %v1788_v29 }
  0xa5   : > { %1791 = vst [vmem:[%s10554_s29 + $0x8f0] sm:$0xff] %v1790_v30  ;;  %1793 = vst [vmem:[%s10554_s29 + $0x8f8] sm:$0xff] %v1792_v31  ;;  %v1794_v32 = vld [vmem:[%s10549_s28 + $0x1200] sm:$0xff]  ;;  %v1796_v33 = vld [vmem:[%s10549_s28 + $0x1210] sm:$0xff] }
  0xa6   : > { %v1798_v34 = vld [vmem:[%s10549_s28 + $0x1220] sm:$0xff]  ;;  %1795 = vst [vmem:[%s10554_s29 + $0x900] sm:$0xff] %v1794_v32  ;;  %1797 = vst [vmem:[%s10554_s29 + $0x908] sm:$0xff] %v1796_v33  ;;  %v1800_v35 = vld [vmem:[%s10549_s28 + $0x1230] sm:$0xff] }
  0xa7   : > { %1799 = vst [vmem:[%s10554_s29 + $0x910] sm:$0xff] %v1798_v34  ;;  %v1802_v36 = vld [vmem:[%s10549_s28 + $0x1240] sm:$0xff]  ;;  %v1804_v37 = vld [vmem:[%s10549_s28 + $0x1250] sm:$0xff]  ;;  %1801 = vst [vmem:[%s10554_s29 + $0x918] sm:$0xff] %v1800_v35 }
  0xa8   : > { %1803 = vst [vmem:[%s10554_s29 + $0x920] sm:$0xff] %v1802_v36  ;;  %1805 = vst [vmem:[%s10554_s29 + $0x928] sm:$0xff] %v1804_v37  ;;  %v1806_v38 = vld [vmem:[%s10549_s28 + $0x1260] sm:$0xff]  ;;  %v1808_v39 = vld [vmem:[%s10549_s28 + $0x1270] sm:$0xff] }
  0xa9   : > { %v1810_v40 = vld [vmem:[%s10549_s28 + $0x1280] sm:$0xff]  ;;  %1807 = vst [vmem:[%s10554_s29 + $0x930] sm:$0xff] %v1806_v38  ;;  %1809 = vst [vmem:[%s10554_s29 + $0x938] sm:$0xff] %v1808_v39  ;;  %v1812_v41 = vld [vmem:[%s10549_s28 + $0x1290] sm:$0xff] }
  0xaa   : > { %1811 = vst [vmem:[%s10554_s29 + $0x940] sm:$0xff] %v1810_v40  ;;  %v1814_v42 = vld [vmem:[%s10549_s28 + $0x12a0] sm:$0xff]  ;;  %v1816_v43 = vld [vmem:[%s10549_s28 + $0x12b0] sm:$0xff]  ;;  %1813 = vst [vmem:[%s10554_s29 + $0x948] sm:$0xff] %v1812_v41 }
  0xab   : > { %1815 = vst [vmem:[%s10554_s29 + $0x950] sm:$0xff] %v1814_v42  ;;  %1817 = vst [vmem:[%s10554_s29 + $0x958] sm:$0xff] %v1816_v43  ;;  %v1818_v44 = vld [vmem:[%s10549_s28 + $0x12c0] sm:$0xff]  ;;  %v1820_v45 = vld [vmem:[%s10549_s28 + $0x12d0] sm:$0xff] }
  0xac   : > { %v1822_v46 = vld [vmem:[%s10549_s28 + $0x12e0] sm:$0xff]  ;;  %1819 = vst [vmem:[%s10554_s29 + $0x960] sm:$0xff] %v1818_v44  ;;  %1821 = vst [vmem:[%s10554_s29 + $0x968] sm:$0xff] %v1820_v45  ;;  %v1824_v47 = vld [vmem:[%s10549_s28 + $0x12f0] sm:$0xff] }
  0xad   : > { %1823 = vst [vmem:[%s10554_s29 + $0x970] sm:$0xff] %v1822_v46  ;;  %v1826_v48 = vld [vmem:[%s10549_s28 + $0x1300] sm:$0xff]  ;;  %v1828_v49 = vld [vmem:[%s10549_s28 + $0x1310] sm:$0xff]  ;;  %1825 = vst [vmem:[%s10554_s29 + $0x978] sm:$0xff] %v1824_v47 }
  0xae   : > { %1827 = vst [vmem:[%s10554_s29 + $0x980] sm:$0xff] %v1826_v48  ;;  %1829 = vst [vmem:[%s10554_s29 + $0x988] sm:$0xff] %v1828_v49  ;;  %v1830_v50 = vld [vmem:[%s10549_s28 + $0x1320] sm:$0xff]  ;;  %v1832_v51 = vld [vmem:[%s10549_s28 + $0x1330] sm:$0xff] }
  0xaf   : > { %v1834_v52 = vld [vmem:[%s10549_s28 + $0x1340] sm:$0xff]  ;;  %1831 = vst [vmem:[%s10554_s29 + $0x990] sm:$0xff] %v1830_v50  ;;  %1833 = vst [vmem:[%s10554_s29 + $0x998] sm:$0xff] %v1832_v51  ;;  %v1836_v53 = vld [vmem:[%s10549_s28 + $0x1350] sm:$0xff] }
  0xb0   : > { %1835 = vst [vmem:[%s10554_s29 + $0x9a0] sm:$0xff] %v1834_v52  ;;  %v1838_v54 = vld [vmem:[%s10549_s28 + $0x1360] sm:$0xff]  ;;  %v1840_v55 = vld [vmem:[%s10549_s28 + $0x1370] sm:$0xff]  ;;  %1837 = vst [vmem:[%s10554_s29 + $0x9a8] sm:$0xff] %v1836_v53 }
  0xb1   : > { %1839 = vst [vmem:[%s10554_s29 + $0x9b0] sm:$0xff] %v1838_v54  ;;  %1841 = vst [vmem:[%s10554_s29 + $0x9b8] sm:$0xff] %v1840_v55  ;;  %v1842_v56 = vld [vmem:[%s10549_s28 + $0x1380] sm:$0xff]  ;;  %v1844_v57 = vld [vmem:[%s10549_s28 + $0x1390] sm:$0xff] }
  0xb2   : > { %v1846_v58 = vld [vmem:[%s10549_s28 + $0x13a0] sm:$0xff]  ;;  %1843 = vst [vmem:[%s10554_s29 + $0x9c0] sm:$0xff] %v1842_v56  ;;  %1845 = vst [vmem:[%s10554_s29 + $0x9c8] sm:$0xff] %v1844_v57  ;;  %v1848_v59 = vld [vmem:[%s10549_s28 + $0x13b0] sm:$0xff] }
  0xb3   : > { %1847 = vst [vmem:[%s10554_s29 + $0x9d0] sm:$0xff] %v1846_v58  ;;  %v1850_v60 = vld [vmem:[%s10549_s28 + $0x13c0] sm:$0xff]  ;;  %v1852_v61 = vld [vmem:[%s10549_s28 + $0x13d0] sm:$0xff]  ;;  %1849 = vst [vmem:[%s10554_s29 + $0x9d8] sm:$0xff] %v1848_v59 }
  0xb4   : > { %1851 = vst [vmem:[%s10554_s29 + $0x9e0] sm:$0xff] %v1850_v60  ;;  %1853 = vst [vmem:[%s10554_s29 + $0x9e8] sm:$0xff] %v1852_v61  ;;  %v1854_v62 = vld [vmem:[%s10549_s28 + $0x13e0] sm:$0xff]  ;;  %v1856_v63 = vld [vmem:[%s10549_s28 + $0x13f0] sm:$0xff] }
  0xb5   : > { %v1858_v0 = vld [vmem:[%s10549_s28 + $0x1400] sm:$0xff]  ;;  %1855 = vst [vmem:[%s10554_s29 + $0x9f0] sm:$0xff] %v1854_v62  ;;  %1857 = vst [vmem:[%s10554_s29 + $0x9f8] sm:$0xff] %v1856_v63  ;;  %v1860_v1 = vld [vmem:[%s10549_s28 + $0x1410] sm:$0xff] }
  0xb6   : > { %1859 = vst [vmem:[%s10554_s29 + $0xa00] sm:$0xff] %v1858_v0  ;;  %v1862_v2 = vld [vmem:[%s10549_s28 + $0x1420] sm:$0xff]  ;;  %v1864_v3 = vld [vmem:[%s10549_s28 + $0x1430] sm:$0xff]  ;;  %1861 = vst [vmem:[%s10554_s29 + $0xa08] sm:$0xff] %v1860_v1 }
  0xb7   : > { %1863 = vst [vmem:[%s10554_s29 + $0xa10] sm:$0xff] %v1862_v2  ;;  %1865 = vst [vmem:[%s10554_s29 + $0xa18] sm:$0xff] %v1864_v3  ;;  %v1866_v4 = vld [vmem:[%s10549_s28 + $0x1440] sm:$0xff]  ;;  %v1868_v5 = vld [vmem:[%s10549_s28 + $0x1450] sm:$0xff] }
  0xb8   : > { %v1870_v6 = vld [vmem:[%s10549_s28 + $0x1460] sm:$0xff]  ;;  %1867 = vst [vmem:[%s10554_s29 + $0xa20] sm:$0xff] %v1866_v4  ;;  %1869 = vst [vmem:[%s10554_s29 + $0xa28] sm:$0xff] %v1868_v5  ;;  %v1872_v7 = vld [vmem:[%s10549_s28 + $0x1470] sm:$0xff] }
  0xb9   : > { %1871 = vst [vmem:[%s10554_s29 + $0xa30] sm:$0xff] %v1870_v6  ;;  %v1874_v8 = vld [vmem:[%s10549_s28 + $0x1480] sm:$0xff]  ;;  %v1876_v9 = vld [vmem:[%s10549_s28 + $0x1490] sm:$0xff]  ;;  %1873 = vst [vmem:[%s10554_s29 + $0xa38] sm:$0xff] %v1872_v7 }
  0xba   : > { %1875 = vst [vmem:[%s10554_s29 + $0xa40] sm:$0xff] %v1874_v8  ;;  %1877 = vst [vmem:[%s10554_s29 + $0xa48] sm:$0xff] %v1876_v9  ;;  %v1878_v10 = vld [vmem:[%s10549_s28 + $0x14a0] sm:$0xff]  ;;  %v1880_v11 = vld [vmem:[%s10549_s28 + $0x14b0] sm:$0xff] }
  0xbb   : > { %v1882_v12 = vld [vmem:[%s10549_s28 + $0x14c0] sm:$0xff]  ;;  %1879 = vst [vmem:[%s10554_s29 + $0xa50] sm:$0xff] %v1878_v10  ;;  %1881 = vst [vmem:[%s10554_s29 + $0xa58] sm:$0xff] %v1880_v11  ;;  %v1884_v13 = vld [vmem:[%s10549_s28 + $0x14d0] sm:$0xff] }
  0xbc   : > { %1883 = vst [vmem:[%s10554_s29 + $0xa60] sm:$0xff] %v1882_v12  ;;  %v1886_v14 = vld [vmem:[%s10549_s28 + $0x14e0] sm:$0xff]  ;;  %v1888_v15 = vld [vmem:[%s10549_s28 + $0x14f0] sm:$0xff]  ;;  %1885 = vst [vmem:[%s10554_s29 + $0xa68] sm:$0xff] %v1884_v13 }
  0xbd   : > { %1887 = vst [vmem:[%s10554_s29 + $0xa70] sm:$0xff] %v1886_v14  ;;  %1889 = vst [vmem:[%s10554_s29 + $0xa78] sm:$0xff] %v1888_v15  ;;  %v1890_v16 = vld [vmem:[%s10549_s28 + $0x1500] sm:$0xff]  ;;  %v1892_v17 = vld [vmem:[%s10549_s28 + $0x1510] sm:$0xff] }
  0xbe   : > { %v1894_v18 = vld [vmem:[%s10549_s28 + $0x1520] sm:$0xff]  ;;  %1891 = vst [vmem:[%s10554_s29 + $0xa80] sm:$0xff] %v1890_v16  ;;  %1893 = vst [vmem:[%s10554_s29 + $0xa88] sm:$0xff] %v1892_v17  ;;  %v1896_v19 = vld [vmem:[%s10549_s28 + $0x1530] sm:$0xff] }
  0xbf   : > { %1895 = vst [vmem:[%s10554_s29 + $0xa90] sm:$0xff] %v1894_v18  ;;  %v1898_v20 = vld [vmem:[%s10549_s28 + $0x1540] sm:$0xff]  ;;  %v1900_v21 = vld [vmem:[%s10549_s28 + $0x1550] sm:$0xff]  ;;  %1897 = vst [vmem:[%s10554_s29 + $0xa98] sm:$0xff] %v1896_v19 }
  0xc0   : > { %1899 = vst [vmem:[%s10554_s29 + $0xaa0] sm:$0xff] %v1898_v20  ;;  %1901 = vst [vmem:[%s10554_s29 + $0xaa8] sm:$0xff] %v1900_v21  ;;  %v1902_v22 = vld [vmem:[%s10549_s28 + $0x1560] sm:$0xff]  ;;  %v1904_v23 = vld [vmem:[%s10549_s28 + $0x1570] sm:$0xff] }
  0xc1   : > { %v1906_v24 = vld [vmem:[%s10549_s28 + $0x1580] sm:$0xff]  ;;  %1903 = vst [vmem:[%s10554_s29 + $0xab0] sm:$0xff] %v1902_v22  ;;  %1905 = vst [vmem:[%s10554_s29 + $0xab8] sm:$0xff] %v1904_v23  ;;  %v1908_v25 = vld [vmem:[%s10549_s28 + $0x1590] sm:$0xff] }
  0xc2   : > { %1907 = vst [vmem:[%s10554_s29 + $0xac0] sm:$0xff] %v1906_v24  ;;  %v1910_v26 = vld [vmem:[%s10549_s28 + $0x15a0] sm:$0xff]  ;;  %v1912_v27 = vld [vmem:[%s10549_s28 + $0x15b0] sm:$0xff]  ;;  %1909 = vst [vmem:[%s10554_s29 + $0xac8] sm:$0xff] %v1908_v25 }
  0xc3   : > { %1911 = vst [vmem:[%s10554_s29 + $0xad0] sm:$0xff] %v1910_v26  ;;  %1913 = vst [vmem:[%s10554_s29 + $0xad8] sm:$0xff] %v1912_v27  ;;  %v1914_v28 = vld [vmem:[%s10549_s28 + $0x15c0] sm:$0xff]  ;;  %v1916_v29 = vld [vmem:[%s10549_s28 + $0x15d0] sm:$0xff] }
  0xc4   : > { %v1918_v30 = vld [vmem:[%s10549_s28 + $0x15e0] sm:$0xff]  ;;  %1915 = vst [vmem:[%s10554_s29 + $0xae0] sm:$0xff] %v1914_v28  ;;  %1917 = vst [vmem:[%s10554_s29 + $0xae8] sm:$0xff] %v1916_v29  ;;  %v1920_v31 = vld [vmem:[%s10549_s28 + $0x15f0] sm:$0xff] }
  0xc5   : > { %1919 = vst [vmem:[%s10554_s29 + $0xaf0] sm:$0xff] %v1918_v30  ;;  %v1922_v32 = vld [vmem:[%s10549_s28 + $0x1600] sm:$0xff]  ;;  %v1924_v33 = vld [vmem:[%s10549_s28 + $0x1610] sm:$0xff]  ;;  %1921 = vst [vmem:[%s10554_s29 + $0xaf8] sm:$0xff] %v1920_v31 }
  0xc6   : > { %1923 = vst [vmem:[%s10554_s29 + $0xb00] sm:$0xff] %v1922_v32  ;;  %1925 = vst [vmem:[%s10554_s29 + $0xb08] sm:$0xff] %v1924_v33  ;;  %v1926_v34 = vld [vmem:[%s10549_s28 + $0x1620] sm:$0xff]  ;;  %v1928_v35 = vld [vmem:[%s10549_s28 + $0x1630] sm:$0xff] }
  0xc7   : > { %v1930_v36 = vld [vmem:[%s10549_s28 + $0x1640] sm:$0xff]  ;;  %1927 = vst [vmem:[%s10554_s29 + $0xb10] sm:$0xff] %v1926_v34  ;;  %1929 = vst [vmem:[%s10554_s29 + $0xb18] sm:$0xff] %v1928_v35  ;;  %v1932_v37 = vld [vmem:[%s10549_s28 + $0x1650] sm:$0xff] }
  0xc8   : > { %1931 = vst [vmem:[%s10554_s29 + $0xb20] sm:$0xff] %v1930_v36  ;;  %v1934_v38 = vld [vmem:[%s10549_s28 + $0x1660] sm:$0xff]  ;;  %v1936_v39 = vld [vmem:[%s10549_s28 + $0x1670] sm:$0xff]  ;;  %1933 = vst [vmem:[%s10554_s29 + $0xb28] sm:$0xff] %v1932_v37 }
  0xc9   : > { %1935 = vst [vmem:[%s10554_s29 + $0xb30] sm:$0xff] %v1934_v38  ;;  %1937 = vst [vmem:[%s10554_s29 + $0xb38] sm:$0xff] %v1936_v39  ;;  %v1938_v40 = vld [vmem:[%s10549_s28 + $0x1680] sm:$0xff]  ;;  %v1940_v41 = vld [vmem:[%s10549_s28 + $0x1690] sm:$0xff] }
  0xca   : > { %v1942_v42 = vld [vmem:[%s10549_s28 + $0x16a0] sm:$0xff]  ;;  %1939 = vst [vmem:[%s10554_s29 + $0xb40] sm:$0xff] %v1938_v40  ;;  %1941 = vst [vmem:[%s10554_s29 + $0xb48] sm:$0xff] %v1940_v41  ;;  %v1944_v43 = vld [vmem:[%s10549_s28 + $0x16b0] sm:$0xff] }
  0xcb   : > { %1943 = vst [vmem:[%s10554_s29 + $0xb50] sm:$0xff] %v1942_v42  ;;  %v1946_v44 = vld [vmem:[%s10549_s28 + $0x16c0] sm:$0xff]  ;;  %v1948_v45 = vld [vmem:[%s10549_s28 + $0x16d0] sm:$0xff]  ;;  %1945 = vst [vmem:[%s10554_s29 + $0xb58] sm:$0xff] %v1944_v43 }
  0xcc   : > { %1947 = vst [vmem:[%s10554_s29 + $0xb60] sm:$0xff] %v1946_v44  ;;  %1949 = vst [vmem:[%s10554_s29 + $0xb68] sm:$0xff] %v1948_v45  ;;  %v1950_v46 = vld [vmem:[%s10549_s28 + $0x16e0] sm:$0xff]  ;;  %v1952_v47 = vld [vmem:[%s10549_s28 + $0x16f0] sm:$0xff] }
  0xcd   : > { %v1954_v48 = vld [vmem:[%s10549_s28 + $0x1700] sm:$0xff]  ;;  %1951 = vst [vmem:[%s10554_s29 + $0xb70] sm:$0xff] %v1950_v46  ;;  %1953 = vst [vmem:[%s10554_s29 + $0xb78] sm:$0xff] %v1952_v47  ;;  %v1956_v49 = vld [vmem:[%s10549_s28 + $0x1710] sm:$0xff] }
  0xce   : > { %1955 = vst [vmem:[%s10554_s29 + $0xb80] sm:$0xff] %v1954_v48  ;;  %v1958_v50 = vld [vmem:[%s10549_s28 + $0x1720] sm:$0xff]  ;;  %v1960_v51 = vld [vmem:[%s10549_s28 + $0x1730] sm:$0xff]  ;;  %1957 = vst [vmem:[%s10554_s29 + $0xb88] sm:$0xff] %v1956_v49 }
  0xcf   : > { %1959 = vst [vmem:[%s10554_s29 + $0xb90] sm:$0xff] %v1958_v50  ;;  %1961 = vst [vmem:[%s10554_s29 + $0xb98] sm:$0xff] %v1960_v51  ;;  %v1962_v52 = vld [vmem:[%s10549_s28 + $0x1740] sm:$0xff]  ;;  %v1964_v53 = vld [vmem:[%s10549_s28 + $0x1750] sm:$0xff] }
  0xd0   : > { %v1966_v54 = vld [vmem:[%s10549_s28 + $0x1760] sm:$0xff]  ;;  %1963 = vst [vmem:[%s10554_s29 + $0xba0] sm:$0xff] %v1962_v52  ;;  %1965 = vst [vmem:[%s10554_s29 + $0xba8] sm:$0xff] %v1964_v53  ;;  %v1968_v55 = vld [vmem:[%s10549_s28 + $0x1770] sm:$0xff] }
  0xd1   : > { %1967 = vst [vmem:[%s10554_s29 + $0xbb0] sm:$0xff] %v1966_v54  ;;  %v1970_v56 = vld [vmem:[%s10549_s28 + $0x1780] sm:$0xff]  ;;  %v1972_v57 = vld [vmem:[%s10549_s28 + $0x1790] sm:$0xff]  ;;  %1969 = vst [vmem:[%s10554_s29 + $0xbb8] sm:$0xff] %v1968_v55 }
  0xd2   : > { %1971 = vst [vmem:[%s10554_s29 + $0xbc0] sm:$0xff] %v1970_v56  ;;  %1973 = vst [vmem:[%s10554_s29 + $0xbc8] sm:$0xff] %v1972_v57  ;;  %v1974_v58 = vld [vmem:[%s10549_s28 + $0x17a0] sm:$0xff]  ;;  %v1976_v59 = vld [vmem:[%s10549_s28 + $0x17b0] sm:$0xff] }
  0xd3   : > { %v1978_v60 = vld [vmem:[%s10549_s28 + $0x17c0] sm:$0xff]  ;;  %1975 = vst [vmem:[%s10554_s29 + $0xbd0] sm:$0xff] %v1974_v58  ;;  %1977 = vst [vmem:[%s10554_s29 + $0xbd8] sm:$0xff] %v1976_v59  ;;  %v1980_v61 = vld [vmem:[%s10549_s28 + $0x17d0] sm:$0xff] }
  0xd4   : > { %1979 = vst [vmem:[%s10554_s29 + $0xbe0] sm:$0xff] %v1978_v60  ;;  %v1982_v62 = vld [vmem:[%s10549_s28 + $0x17e0] sm:$0xff]  ;;  %v1984_v63 = vld [vmem:[%s10549_s28 + $0x17f0] sm:$0xff]  ;;  %1981 = vst [vmem:[%s10554_s29 + $0xbe8] sm:$0xff] %v1980_v61 }
  0xd5   : > { %1983 = vst [vmem:[%s10554_s29 + $0xbf0] sm:$0xff] %v1982_v62  ;;  %1985 = vst [vmem:[%s10554_s29 + $0xbf8] sm:$0xff] %v1984_v63  ;;  %v1986_v0 = vld [vmem:[%s10549_s28 + $0x1800] sm:$0xff]  ;;  %v1988_v1 = vld [vmem:[%s10549_s28 + $0x1810] sm:$0xff] }
  0xd6   : > { %v1990_v2 = vld [vmem:[%s10549_s28 + $0x1820] sm:$0xff]  ;;  %1987 = vst [vmem:[%s10554_s29 + $0xc00] sm:$0xff] %v1986_v0  ;;  %1989 = vst [vmem:[%s10554_s29 + $0xc08] sm:$0xff] %v1988_v1  ;;  %v1992_v3 = vld [vmem:[%s10549_s28 + $0x1830] sm:$0xff] }
  0xd7   : > { %1991 = vst [vmem:[%s10554_s29 + $0xc10] sm:$0xff] %v1990_v2  ;;  %v1994_v4 = vld [vmem:[%s10549_s28 + $0x1840] sm:$0xff]  ;;  %v1996_v5 = vld [vmem:[%s10549_s28 + $0x1850] sm:$0xff]  ;;  %1993 = vst [vmem:[%s10554_s29 + $0xc18] sm:$0xff] %v1992_v3 }
  0xd8   : > { %1995 = vst [vmem:[%s10554_s29 + $0xc20] sm:$0xff] %v1994_v4  ;;  %1997 = vst [vmem:[%s10554_s29 + $0xc28] sm:$0xff] %v1996_v5  ;;  %v1998_v6 = vld [vmem:[%s10549_s28 + $0x1860] sm:$0xff]  ;;  %v2000_v7 = vld [vmem:[%s10549_s28 + $0x1870] sm:$0xff] }
  0xd9   : > { %v2002_v8 = vld [vmem:[%s10549_s28 + $0x1880] sm:$0xff]  ;;  %1999 = vst [vmem:[%s10554_s29 + $0xc30] sm:$0xff] %v1998_v6  ;;  %2001 = vst [vmem:[%s10554_s29 + $0xc38] sm:$0xff] %v2000_v7  ;;  %v2004_v9 = vld [vmem:[%s10549_s28 + $0x1890] sm:$0xff] }
  0xda   : > { %2003 = vst [vmem:[%s10554_s29 + $0xc40] sm:$0xff] %v2002_v8  ;;  %v2006_v10 = vld [vmem:[%s10549_s28 + $0x18a0] sm:$0xff]  ;;  %v2008_v11 = vld [vmem:[%s10549_s28 + $0x18b0] sm:$0xff]  ;;  %2005 = vst [vmem:[%s10554_s29 + $0xc48] sm:$0xff] %v2004_v9 }
  0xdb   : > { %2007 = vst [vmem:[%s10554_s29 + $0xc50] sm:$0xff] %v2006_v10  ;;  %2009 = vst [vmem:[%s10554_s29 + $0xc58] sm:$0xff] %v2008_v11  ;;  %v2010_v12 = vld [vmem:[%s10549_s28 + $0x18c0] sm:$0xff]  ;;  %v2012_v13 = vld [vmem:[%s10549_s28 + $0x18d0] sm:$0xff] }
  0xdc   : > { %v2014_v14 = vld [vmem:[%s10549_s28 + $0x18e0] sm:$0xff]  ;;  %2011 = vst [vmem:[%s10554_s29 + $0xc60] sm:$0xff] %v2010_v12  ;;  %2013 = vst [vmem:[%s10554_s29 + $0xc68] sm:$0xff] %v2012_v13  ;;  %v2016_v15 = vld [vmem:[%s10549_s28 + $0x18f0] sm:$0xff] }
  0xdd   : > { %2015 = vst [vmem:[%s10554_s29 + $0xc70] sm:$0xff] %v2014_v14  ;;  %v2018_v16 = vld [vmem:[%s10549_s28 + $0x1900] sm:$0xff]  ;;  %v2020_v17 = vld [vmem:[%s10549_s28 + $0x1910] sm:$0xff]  ;;  %2017 = vst [vmem:[%s10554_s29 + $0xc78] sm:$0xff] %v2016_v15 }
  0xde   : > { %2019 = vst [vmem:[%s10554_s29 + $0xc80] sm:$0xff] %v2018_v16  ;;  %2021 = vst [vmem:[%s10554_s29 + $0xc88] sm:$0xff] %v2020_v17  ;;  %v2022_v18 = vld [vmem:[%s10549_s28 + $0x1920] sm:$0xff]  ;;  %v2024_v19 = vld [vmem:[%s10549_s28 + $0x1930] sm:$0xff] }
  0xdf   : > { %v2026_v20 = vld [vmem:[%s10549_s28 + $0x1940] sm:$0xff]  ;;  %2023 = vst [vmem:[%s10554_s29 + $0xc90] sm:$0xff] %v2022_v18  ;;  %2025 = vst [vmem:[%s10554_s29 + $0xc98] sm:$0xff] %v2024_v19  ;;  %v2028_v21 = vld [vmem:[%s10549_s28 + $0x1950] sm:$0xff] }
  0xe0   : > { %2027 = vst [vmem:[%s10554_s29 + $0xca0] sm:$0xff] %v2026_v20  ;;  %v2030_v22 = vld [vmem:[%s10549_s28 + $0x1960] sm:$0xff]  ;;  %v2032_v23 = vld [vmem:[%s10549_s28 + $0x1970] sm:$0xff]  ;;  %2029 = vst [vmem:[%s10554_s29 + $0xca8] sm:$0xff] %v2028_v21 }
  0xe1   : > { %2031 = vst [vmem:[%s10554_s29 + $0xcb0] sm:$0xff] %v2030_v22  ;;  %2033 = vst [vmem:[%s10554_s29 + $0xcb8] sm:$0xff] %v2032_v23  ;;  %v2034_v24 = vld [vmem:[%s10549_s28 + $0x1980] sm:$0xff]  ;;  %v2036_v25 = vld [vmem:[%s10549_s28 + $0x1990] sm:$0xff] }
  0xe2   : > { %v2038_v26 = vld [vmem:[%s10549_s28 + $0x19a0] sm:$0xff]  ;;  %2035 = vst [vmem:[%s10554_s29 + $0xcc0] sm:$0xff] %v2034_v24  ;;  %2037 = vst [vmem:[%s10554_s29 + $0xcc8] sm:$0xff] %v2036_v25  ;;  %v2040_v27 = vld [vmem:[%s10549_s28 + $0x19b0] sm:$0xff] }
  0xe3   : > { %2039 = vst [vmem:[%s10554_s29 + $0xcd0] sm:$0xff] %v2038_v26  ;;  %v2042_v28 = vld [vmem:[%s10549_s28 + $0x19c0] sm:$0xff]  ;;  %v2044_v29 = vld [vmem:[%s10549_s28 + $0x19d0] sm:$0xff]  ;;  %2041 = vst [vmem:[%s10554_s29 + $0xcd8] sm:$0xff] %v2040_v27 }
  0xe4   : > { %2043 = vst [vmem:[%s10554_s29 + $0xce0] sm:$0xff] %v2042_v28  ;;  %2045 = vst [vmem:[%s10554_s29 + $0xce8] sm:$0xff] %v2044_v29  ;;  %v2046_v30 = vld [vmem:[%s10549_s28 + $0x19e0] sm:$0xff]  ;;  %v2048_v31 = vld [vmem:[%s10549_s28 + $0x19f0] sm:$0xff] }
  0xe5   : > { %v2050_v32 = vld [vmem:[%s10549_s28 + $0x1a00] sm:$0xff]  ;;  %2047 = vst [vmem:[%s10554_s29 + $0xcf0] sm:$0xff] %v2046_v30  ;;  %2049 = vst [vmem:[%s10554_s29 + $0xcf8] sm:$0xff] %v2048_v31  ;;  %v2052_v33 = vld [vmem:[%s10549_s28 + $0x1a10] sm:$0xff] }
  0xe6   : > { %2051 = vst [vmem:[%s10554_s29 + $0xd00] sm:$0xff] %v2050_v32  ;;  %v2054_v34 = vld [vmem:[%s10549_s28 + $0x1a20] sm:$0xff]  ;;  %v2056_v35 = vld [vmem:[%s10549_s28 + $0x1a30] sm:$0xff]  ;;  %2053 = vst [vmem:[%s10554_s29 + $0xd08] sm:$0xff] %v2052_v33 }
  0xe7   : > { %2055 = vst [vmem:[%s10554_s29 + $0xd10] sm:$0xff] %v2054_v34  ;;  %2057 = vst [vmem:[%s10554_s29 + $0xd18] sm:$0xff] %v2056_v35  ;;  %v2058_v36 = vld [vmem:[%s10549_s28 + $0x1a40] sm:$0xff]  ;;  %v2060_v37 = vld [vmem:[%s10549_s28 + $0x1a50] sm:$0xff] }
  0xe8   : > { %v2062_v38 = vld [vmem:[%s10549_s28 + $0x1a60] sm:$0xff]  ;;  %2059 = vst [vmem:[%s10554_s29 + $0xd20] sm:$0xff] %v2058_v36  ;;  %2061 = vst [vmem:[%s10554_s29 + $0xd28] sm:$0xff] %v2060_v37  ;;  %v2064_v39 = vld [vmem:[%s10549_s28 + $0x1a70] sm:$0xff] }
  0xe9   : > { %2063 = vst [vmem:[%s10554_s29 + $0xd30] sm:$0xff] %v2062_v38  ;;  %v2066_v40 = vld [vmem:[%s10549_s28 + $0x1a80] sm:$0xff]  ;;  %v2068_v41 = vld [vmem:[%s10549_s28 + $0x1a90] sm:$0xff]  ;;  %2065 = vst [vmem:[%s10554_s29 + $0xd38] sm:$0xff] %v2064_v39 }
  0xea   : > { %2067 = vst [vmem:[%s10554_s29 + $0xd40] sm:$0xff] %v2066_v40  ;;  %2069 = vst [vmem:[%s10554_s29 + $0xd48] sm:$0xff] %v2068_v41  ;;  %v2070_v42 = vld [vmem:[%s10549_s28 + $0x1aa0] sm:$0xff]  ;;  %v2072_v43 = vld [vmem:[%s10549_s28 + $0x1ab0] sm:$0xff] }
  0xeb   : > { %v2074_v44 = vld [vmem:[%s10549_s28 + $0x1ac0] sm:$0xff]  ;;  %2071 = vst [vmem:[%s10554_s29 + $0xd50] sm:$0xff] %v2070_v42  ;;  %2073 = vst [vmem:[%s10554_s29 + $0xd58] sm:$0xff] %v2072_v43  ;;  %v2076_v45 = vld [vmem:[%s10549_s28 + $0x1ad0] sm:$0xff] }
  0xec   : > { %2075 = vst [vmem:[%s10554_s29 + $0xd60] sm:$0xff] %v2074_v44  ;;  %v2078_v46 = vld [vmem:[%s10549_s28 + $0x1ae0] sm:$0xff]  ;;  %v2080_v47 = vld [vmem:[%s10549_s28 + $0x1af0] sm:$0xff]  ;;  %2077 = vst [vmem:[%s10554_s29 + $0xd68] sm:$0xff] %v2076_v45 }
  0xed   : > { %2079 = vst [vmem:[%s10554_s29 + $0xd70] sm:$0xff] %v2078_v46  ;;  %2081 = vst [vmem:[%s10554_s29 + $0xd78] sm:$0xff] %v2080_v47  ;;  %v2082_v48 = vld [vmem:[%s10549_s28 + $0x1b00] sm:$0xff]  ;;  %v2084_v49 = vld [vmem:[%s10549_s28 + $0x1b10] sm:$0xff] }
  0xee   : > { %v2086_v50 = vld [vmem:[%s10549_s28 + $0x1b20] sm:$0xff]  ;;  %2083 = vst [vmem:[%s10554_s29 + $0xd80] sm:$0xff] %v2082_v48  ;;  %2085 = vst [vmem:[%s10554_s29 + $0xd88] sm:$0xff] %v2084_v49  ;;  %v2088_v51 = vld [vmem:[%s10549_s28 + $0x1b30] sm:$0xff] }
  0xef   : > { %2087 = vst [vmem:[%s10554_s29 + $0xd90] sm:$0xff] %v2086_v50  ;;  %v2090_v52 = vld [vmem:[%s10549_s28 + $0x1b40] sm:$0xff]  ;;  %v2092_v53 = vld [vmem:[%s10549_s28 + $0x1b50] sm:$0xff]  ;;  %2089 = vst [vmem:[%s10554_s29 + $0xd98] sm:$0xff] %v2088_v51 }
  0xf0   : > { %2091 = vst [vmem:[%s10554_s29 + $0xda0] sm:$0xff] %v2090_v52  ;;  %2093 = vst [vmem:[%s10554_s29 + $0xda8] sm:$0xff] %v2092_v53  ;;  %v2094_v54 = vld [vmem:[%s10549_s28 + $0x1b60] sm:$0xff]  ;;  %v2096_v55 = vld [vmem:[%s10549_s28 + $0x1b70] sm:$0xff] }
  0xf1   : > { %v2098_v56 = vld [vmem:[%s10549_s28 + $0x1b80] sm:$0xff]  ;;  %2095 = vst [vmem:[%s10554_s29 + $0xdb0] sm:$0xff] %v2094_v54  ;;  %2097 = vst [vmem:[%s10554_s29 + $0xdb8] sm:$0xff] %v2096_v55  ;;  %v2100_v57 = vld [vmem:[%s10549_s28 + $0x1b90] sm:$0xff] }
  0xf2   : > { %2099 = vst [vmem:[%s10554_s29 + $0xdc0] sm:$0xff] %v2098_v56  ;;  %v2102_v58 = vld [vmem:[%s10549_s28 + $0x1ba0] sm:$0xff]  ;;  %v2104_v59 = vld [vmem:[%s10549_s28 + $0x1bb0] sm:$0xff]  ;;  %2101 = vst [vmem:[%s10554_s29 + $0xdc8] sm:$0xff] %v2100_v57 }
  0xf3   : > { %2103 = vst [vmem:[%s10554_s29 + $0xdd0] sm:$0xff] %v2102_v58  ;;  %2105 = vst [vmem:[%s10554_s29 + $0xdd8] sm:$0xff] %v2104_v59  ;;  %v2106_v60 = vld [vmem:[%s10549_s28 + $0x1bc0] sm:$0xff]  ;;  %v2108_v61 = vld [vmem:[%s10549_s28 + $0x1bd0] sm:$0xff] }
  0xf4   : > { %v2110_v62 = vld [vmem:[%s10549_s28 + $0x1be0] sm:$0xff]  ;;  %2107 = vst [vmem:[%s10554_s29 + $0xde0] sm:$0xff] %v2106_v60  ;;  %2109 = vst [vmem:[%s10554_s29 + $0xde8] sm:$0xff] %v2108_v61  ;;  %v2112_v63 = vld [vmem:[%s10549_s28 + $0x1bf0] sm:$0xff] }
  0xf5   : > { %2111 = vst [vmem:[%s10554_s29 + $0xdf0] sm:$0xff] %v2110_v62  ;;  %v2114_v0 = vld [vmem:[%s10549_s28 + $0x1c00] sm:$0xff]  ;;  %v2116_v1 = vld [vmem:[%s10549_s28 + $0x1c10] sm:$0xff]  ;;  %2113 = vst [vmem:[%s10554_s29 + $0xdf8] sm:$0xff] %v2112_v63 }
  0xf6   : > { %2115 = vst [vmem:[%s10554_s29 + $0xe00] sm:$0xff] %v2114_v0  ;;  %2117 = vst [vmem:[%s10554_s29 + $0xe08] sm:$0xff] %v2116_v1  ;;  %v2118_v2 = vld [vmem:[%s10549_s28 + $0x1c20] sm:$0xff]  ;;  %v2120_v3 = vld [vmem:[%s10549_s28 + $0x1c30] sm:$0xff] }
  0xf7   : > { %v2122_v4 = vld [vmem:[%s10549_s28 + $0x1c40] sm:$0xff]  ;;  %2119 = vst [vmem:[%s10554_s29 + $0xe10] sm:$0xff] %v2118_v2  ;;  %2121 = vst [vmem:[%s10554_s29 + $0xe18] sm:$0xff] %v2120_v3  ;;  %v2124_v5 = vld [vmem:[%s10549_s28 + $0x1c50] sm:$0xff] }
  0xf8   : > { %2123 = vst [vmem:[%s10554_s29 + $0xe20] sm:$0xff] %v2122_v4  ;;  %v2126_v6 = vld [vmem:[%s10549_s28 + $0x1c60] sm:$0xff]  ;;  %v2128_v7 = vld [vmem:[%s10549_s28 + $0x1c70] sm:$0xff]  ;;  %2125 = vst [vmem:[%s10554_s29 + $0xe28] sm:$0xff] %v2124_v5 }
  0xf9   : > { %2127 = vst [vmem:[%s10554_s29 + $0xe30] sm:$0xff] %v2126_v6  ;;  %2129 = vst [vmem:[%s10554_s29 + $0xe38] sm:$0xff] %v2128_v7  ;;  %v2130_v8 = vld [vmem:[%s10549_s28 + $0x1c80] sm:$0xff]  ;;  %v2132_v9 = vld [vmem:[%s10549_s28 + $0x1c90] sm:$0xff] }
  0xfa   : > { %v2134_v10 = vld [vmem:[%s10549_s28 + $0x1ca0] sm:$0xff]  ;;  %2131 = vst [vmem:[%s10554_s29 + $0xe40] sm:$0xff] %v2130_v8  ;;  %2133 = vst [vmem:[%s10554_s29 + $0xe48] sm:$0xff] %v2132_v9  ;;  %v2136_v11 = vld [vmem:[%s10549_s28 + $0x1cb0] sm:$0xff] }
  0xfb   : > { %2135 = vst [vmem:[%s10554_s29 + $0xe50] sm:$0xff] %v2134_v10  ;;  %v2138_v12 = vld [vmem:[%s10549_s28 + $0x1cc0] sm:$0xff]  ;;  %v2140_v13 = vld [vmem:[%s10549_s28 + $0x1cd0] sm:$0xff]  ;;  %2137 = vst [vmem:[%s10554_s29 + $0xe58] sm:$0xff] %v2136_v11 }
  0xfc   : > { %2139 = vst [vmem:[%s10554_s29 + $0xe60] sm:$0xff] %v2138_v12  ;;  %2141 = vst [vmem:[%s10554_s29 + $0xe68] sm:$0xff] %v2140_v13  ;;  %v2142_v14 = vld [vmem:[%s10549_s28 + $0x1ce0] sm:$0xff]  ;;  %v2144_v15 = vld [vmem:[%s10549_s28 + $0x1cf0] sm:$0xff] }
  0xfd   : > { %v2146_v16 = vld [vmem:[%s10549_s28 + $0x1d00] sm:$0xff]  ;;  %2143 = vst [vmem:[%s10554_s29 + $0xe70] sm:$0xff] %v2142_v14  ;;  %2145 = vst [vmem:[%s10554_s29 + $0xe78] sm:$0xff] %v2144_v15  ;;  %v2148_v17 = vld [vmem:[%s10549_s28 + $0x1d10] sm:$0xff] }
  0xfe   : > { %2147 = vst [vmem:[%s10554_s29 + $0xe80] sm:$0xff] %v2146_v16  ;;  %v2150_v18 = vld [vmem:[%s10549_s28 + $0x1d20] sm:$0xff]  ;;  %v2152_v19 = vld [vmem:[%s10549_s28 + $0x1d30] sm:$0xff]  ;;  %2149 = vst [vmem:[%s10554_s29 + $0xe88] sm:$0xff] %v2148_v17 }
  0xff   : > { %2151 = vst [vmem:[%s10554_s29 + $0xe90] sm:$0xff] %v2150_v18  ;;  %2153 = vst [vmem:[%s10554_s29 + $0xe98] sm:$0xff] %v2152_v19  ;;  %v2154_v20 = vld [vmem:[%s10549_s28 + $0x1d40] sm:$0xff]  ;;  %v2156_v21 = vld [vmem:[%s10549_s28 + $0x1d50] sm:$0xff] }
 0x100   : > { %v2158_v22 = vld [vmem:[%s10549_s28 + $0x1d60] sm:$0xff]  ;;  %2155 = vst [vmem:[%s10554_s29 + $0xea0] sm:$0xff] %v2154_v20  ;;  %2157 = vst [vmem:[%s10554_s29 + $0xea8] sm:$0xff] %v2156_v21  ;;  %v2160_v23 = vld [vmem:[%s10549_s28 + $0x1d70] sm:$0xff] }
 0x101   : > { %2159 = vst [vmem:[%s10554_s29 + $0xeb0] sm:$0xff] %v2158_v22  ;;  %v2162_v24 = vld [vmem:[%s10549_s28 + $0x1d80] sm:$0xff]  ;;  %v2164_v25 = vld [vmem:[%s10549_s28 + $0x1d90] sm:$0xff]  ;;  %2161 = vst [vmem:[%s10554_s29 + $0xeb8] sm:$0xff] %v2160_v23 }
 0x102   : > { %2163 = vst [vmem:[%s10554_s29 + $0xec0] sm:$0xff] %v2162_v24  ;;  %2165 = vst [vmem:[%s10554_s29 + $0xec8] sm:$0xff] %v2164_v25  ;;  %v2166_v26 = vld [vmem:[%s10549_s28 + $0x1da0] sm:$0xff]  ;;  %v2168_v27 = vld [vmem:[%s10549_s28 + $0x1db0] sm:$0xff] }
 0x103   : > { %v2170_v28 = vld [vmem:[%s10549_s28 + $0x1dc0] sm:$0xff]  ;;  %2167 = vst [vmem:[%s10554_s29 + $0xed0] sm:$0xff] %v2166_v26  ;;  %2169 = vst [vmem:[%s10554_s29 + $0xed8] sm:$0xff] %v2168_v27  ;;  %v2172_v29 = vld [vmem:[%s10549_s28 + $0x1dd0] sm:$0xff] }
 0x104   : > { %2171 = vst [vmem:[%s10554_s29 + $0xee0] sm:$0xff] %v2170_v28  ;;  %v2174_v30 = vld [vmem:[%s10549_s28 + $0x1de0] sm:$0xff]  ;;  %v2176_v31 = vld [vmem:[%s10549_s28 + $0x1df0] sm:$0xff]  ;;  %2173 = vst [vmem:[%s10554_s29 + $0xee8] sm:$0xff] %v2172_v29 }
 0x105   : > { %2175 = vst [vmem:[%s10554_s29 + $0xef0] sm:$0xff] %v2174_v30  ;;  %2177 = vst [vmem:[%s10554_s29 + $0xef8] sm:$0xff] %v2176_v31  ;;  %v2178_v32 = vld [vmem:[%s10549_s28 + $0x1e00] sm:$0xff]  ;;  %v2180_v33 = vld [vmem:[%s10549_s28 + $0x1e10] sm:$0xff] }
 0x106   : > { %v2182_v34 = vld [vmem:[%s10549_s28 + $0x1e20] sm:$0xff]  ;;  %2179 = vst [vmem:[%s10554_s29 + $0xf00] sm:$0xff] %v2178_v32  ;;  %2181 = vst [vmem:[%s10554_s29 + $0xf08] sm:$0xff] %v2180_v33  ;;  %v2184_v35 = vld [vmem:[%s10549_s28 + $0x1e30] sm:$0xff] }
 0x107   : > { %2183 = vst [vmem:[%s10554_s29 + $0xf10] sm:$0xff] %v2182_v34  ;;  %v2186_v36 = vld [vmem:[%s10549_s28 + $0x1e40] sm:$0xff]  ;;  %v2188_v37 = vld [vmem:[%s10549_s28 + $0x1e50] sm:$0xff]  ;;  %2185 = vst [vmem:[%s10554_s29 + $0xf18] sm:$0xff] %v2184_v35 }
 0x108   : > { %2187 = vst [vmem:[%s10554_s29 + $0xf20] sm:$0xff] %v2186_v36  ;;  %2189 = vst [vmem:[%s10554_s29 + $0xf28] sm:$0xff] %v2188_v37  ;;  %v2190_v38 = vld [vmem:[%s10549_s28 + $0x1e60] sm:$0xff]  ;;  %v2192_v39 = vld [vmem:[%s10549_s28 + $0x1e70] sm:$0xff] }
 0x109   : > { %v2194_v40 = vld [vmem:[%s10549_s28 + $0x1e80] sm:$0xff]  ;;  %2191 = vst [vmem:[%s10554_s29 + $0xf30] sm:$0xff] %v2190_v38  ;;  %2193 = vst [vmem:[%s10554_s29 + $0xf38] sm:$0xff] %v2192_v39  ;;  %v2196_v41 = vld [vmem:[%s10549_s28 + $0x1e90] sm:$0xff] }
 0x10a   : > { %2195 = vst [vmem:[%s10554_s29 + $0xf40] sm:$0xff] %v2194_v40  ;;  %v2198_v42 = vld [vmem:[%s10549_s28 + $0x1ea0] sm:$0xff]  ;;  %v2200_v43 = vld [vmem:[%s10549_s28 + $0x1eb0] sm:$0xff]  ;;  %2197 = vst [vmem:[%s10554_s29 + $0xf48] sm:$0xff] %v2196_v41 }
 0x10b   : > { %2199 = vst [vmem:[%s10554_s29 + $0xf50] sm:$0xff] %v2198_v42  ;;  %2201 = vst [vmem:[%s10554_s29 + $0xf58] sm:$0xff] %v2200_v43  ;;  %v2202_v44 = vld [vmem:[%s10549_s28 + $0x1ec0] sm:$0xff]  ;;  %v2204_v45 = vld [vmem:[%s10549_s28 + $0x1ed0] sm:$0xff] }
 0x10c   : > { %v2206_v46 = vld [vmem:[%s10549_s28 + $0x1ee0] sm:$0xff]  ;;  %2203 = vst [vmem:[%s10554_s29 + $0xf60] sm:$0xff] %v2202_v44  ;;  %2205 = vst [vmem:[%s10554_s29 + $0xf68] sm:$0xff] %v2204_v45  ;;  %v2208_v47 = vld [vmem:[%s10549_s28 + $0x1ef0] sm:$0xff] }
 0x10d   : > { %2207 = vst [vmem:[%s10554_s29 + $0xf70] sm:$0xff] %v2206_v46  ;;  %v2210_v48 = vld [vmem:[%s10549_s28 + $0x1f00] sm:$0xff]  ;;  %v2212_v49 = vld [vmem:[%s10549_s28 + $0x1f10] sm:$0xff]  ;;  %2209 = vst [vmem:[%s10554_s29 + $0xf78] sm:$0xff] %v2208_v47 }
 0x10e   : > { %2211 = vst [vmem:[%s10554_s29 + $0xf80] sm:$0xff] %v2210_v48  ;;  %2213 = vst [vmem:[%s10554_s29 + $0xf88] sm:$0xff] %v2212_v49  ;;  %v2214_v50 = vld [vmem:[%s10549_s28 + $0x1f20] sm:$0xff]  ;;  %v2216_v51 = vld [vmem:[%s10549_s28 + $0x1f30] sm:$0xff] }
 0x10f   : > { %v2218_v52 = vld [vmem:[%s10549_s28 + $0x1f40] sm:$0xff]  ;;  %2215 = vst [vmem:[%s10554_s29 + $0xf90] sm:$0xff] %v2214_v50  ;;  %2217 = vst [vmem:[%s10554_s29 + $0xf98] sm:$0xff] %v2216_v51  ;;  %v2220_v53 = vld [vmem:[%s10549_s28 + $0x1f50] sm:$0xff] }
 0x110   : > { %2219 = vst [vmem:[%s10554_s29 + $0xfa0] sm:$0xff] %v2218_v52  ;;  %v2222_v54 = vld [vmem:[%s10549_s28 + $0x1f60] sm:$0xff]  ;;  %v2224_v55 = vld [vmem:[%s10549_s28 + $0x1f70] sm:$0xff]  ;;  %2221 = vst [vmem:[%s10554_s29 + $0xfa8] sm:$0xff] %v2220_v53 }
 0x111   : > { %2223 = vst [vmem:[%s10554_s29 + $0xfb0] sm:$0xff] %v2222_v54  ;;  %2225 = vst [vmem:[%s10554_s29 + $0xfb8] sm:$0xff] %v2224_v55  ;;  %v2226_v56 = vld [vmem:[%s10549_s28 + $0x1f80] sm:$0xff]  ;;  %v2228_v57 = vld [vmem:[%s10549_s28 + $0x1f90] sm:$0xff] }
 0x112   : > { %v2230_v58 = vld [vmem:[%s10549_s28 + $0x1fa0] sm:$0xff]  ;;  %2227 = vst [vmem:[%s10554_s29 + $0xfc0] sm:$0xff] %v2226_v56  ;;  %2229 = vst [vmem:[%s10554_s29 + $0xfc8] sm:$0xff] %v2228_v57  ;;  %v2232_v59 = vld [vmem:[%s10549_s28 + $0x1fb0] sm:$0xff] }
 0x113   : > { %2231 = vst [vmem:[%s10554_s29 + $0xfd0] sm:$0xff] %v2230_v58  ;;  %v2234_v60 = vld [vmem:[%s10549_s28 + $0x1fc0] sm:$0xff]  ;;  %v2236_v61 = vld [vmem:[%s10549_s28 + $0x1fd0] sm:$0xff]  ;;  %2233 = vst [vmem:[%s10554_s29 + $0xfd8] sm:$0xff] %v2232_v59 }
 0x114   : > { %2235 = vst [vmem:[%s10554_s29 + $0xfe0] sm:$0xff] %v2234_v60  ;;  %2237 = vst [vmem:[%s10554_s29 + $0xfe8] sm:$0xff] %v2236_v61  ;;  %v2238_v62 = vld [vmem:[%s10549_s28 + $0x1fe0] sm:$0xff]  ;;  %v2240_v63 = vld [vmem:[%s10549_s28 + $0x1ff0] sm:$0xff] }
 0x115   : > { %2239 = vst [vmem:[%s10554_s29 + $0xff0] sm:$0xff] %v2238_v62  ;;  %2241 = vst [vmem:[%s10554_s29 + $0xff8] sm:$0xff] %v2240_v63 }
 0x116 PF: > { %p8910_p8 = scmp.ge.s32.totalorder %s10479_s16, 1  ;;  %p4338_p9 = scmp.lt.s32.totalorder %s10479_s16, 3 }
 0x118   : > { %p4339_p10 = pnand %p8910_p8, %p4338_p9 }
 0x119   : > { %s4345_s30 = sand.u32 (!%p4339_p10), 1, %s10463_s12   ;;  %v11583_v0 = vld [vmem:[%s12459_s0] sm:$0xff] (!%p4339_p10) }
 0x11a   : > { %4342 = sbr.rel (%p4339_p10) target bundleno = 1039 (0x40f), region = 80  ;;  %v11588_v1 = vld [vmem:[%s12459_s0 + $0x80] sm:$0xff] (!%p4339_p10)  ;;  %s8911_s10 = sshll.u32 (!%p4339_p10), %s4345_s30, 12 }
 0x11b   : > { %v11593_v2 = vld [vmem:[%s12459_s0 + $0x40] sm:$0xff] (!%p4339_p10)  ;;  %v8914_v3 = vcombine.low (!%p4339_p10), %v11583_v0, %v11588_v1  ;;  %v8915_v4 = vcombine.high (!%p4339_p10), %v11583_v0, %v11588_v1  ;;  %s11610_s19 = scalar_lea.vmem (!%p4339_p10), [#allocation2], %s8911_s10  ;;  %s8912_s26 = sshll.u32 (!%p4339_p10), %s4345_s30, 5 }
 0x11c   : > { %v11604_v5 = vld [vmem:[%s12459_s0 + $0xc0] sm:$0xff] (!%p4339_p10)  ;;  %v9679_v12 = vld [vmem:[%s11610_s19 + $0x14] ss:$8 sps:$4 sm:$0xff] (!%p4339_p10)   ;;  %v9683_v14 = vld [vmem:[%s11610_s19 + $0x10] ss:$8 sps:$4 sm:$0xff] (!%p4339_p10)   ;;  %s12428_s27 = scalar_lea.vmem (!%p4339_p10), [#allocation3], %s8912_s26 }
 0x11d   : > { %v8930_v6 = vcombine.low (!%p4339_p10), %v11593_v2, %v11604_v5  ;;  %v8931_v7 = vcombine.high (!%p4339_p10), %v11593_v2, %v11604_v5  ;;  %v9673_v8 = vld [vmem:[%s11610_s19 + $0x4] ss:$8 sps:$4 sm:$0xff] (!%p4339_p10)   ;;  %7892 = vmatprep.mubr.bf16.mxu1 (!%p4339_p10), %v8915_v4  ;;  %v9677_v10 = vld [vmem:[%s11610_s19] ss:$8 sps:$4 sm:$0xff] (!%p4339_p10)   ;;  %v9681_v13 = vld [vmem:[%s11610_s19 + $0x814] ss:$8 sps:$4 sm:$0xff] (!%p4339_p10)  }
 0x11e   : > { %v9675_v9 = vld [vmem:[%s11610_s19 + $0x804] ss:$8 sps:$4 sm:$0xff] (!%p4339_p10)   ;;  %7860 = vmatprep.subr.bf16.mxu1 (!%p4339_p10), %v9673_v8  ;;  %v9678_v11 = vld [vmem:[%s11610_s19 + $0x800] ss:$8 sps:$4 sm:$0xff] (!%p4339_p10)   ;;  %v9684_v15 = vld [vmem:[%s11610_s19 + $0x810] ss:$8 sps:$4 sm:$0xff] (!%p4339_p10)  }
 0x11f   : > { %8316 = vmatprep.mubr.bf16.mxu0 (!%p4339_p10), %v8931_v7  ;;  %8284 = vmatprep.subr.bf16.mxu0 (!%p4339_p10), %v9675_v9  ;;  %v9685_v16 = vld [vmem:[%s11610_s19 + $0x24] ss:$8 sps:$4 sm:$0xff] (!%p4339_p10)   ;;  %v9689_v18 = vld [vmem:[%s11610_s19 + $0x20] ss:$8 sps:$4 sm:$0xff] (!%p4339_p10)   ;;  %v9691_v20 = vld [vmem:[%s11610_s19 + $0x34] ss:$8 sps:$4 sm:$0xff] (!%p4339_p10)  }
 0x120   : > { %7861 = vmatpush1.bf16.msra.mxu1 (!%p4339_p10), %v9677_v10  ;;  %8285 = vmatpush1.bf16.msra.mxu0 (!%p4339_p10), %v9678_v11  ;;  %v9687_v17 = vld [vmem:[%s11610_s19 + $0x824] ss:$8 sps:$4 sm:$0xff] (!%p4339_p10)   ;;  %v9690_v19 = vld [vmem:[%s11610_s19 + $0x820] ss:$8 sps:$4 sm:$0xff] (!%p4339_p10)   ;;  %v9693_v21 = vld [vmem:[%s11610_s19 + $0x834] ss:$8 sps:$4 sm:$0xff] (!%p4339_p10)  }
 0x121   : > { %7862 = vmatprep.subr.bf16.mxu1 %v9679_v12  ;;  %8286 = vmatprep.subr.bf16.mxu0 %v9681_v13  ;;  %v9695_v22 = vld [vmem:[%s11610_s19 + $0x30] ss:$8 sps:$4 sm:$0xff]   ;;  %v9697_v24 = vld [vmem:[%s11610_s19 + $0x44] ss:$8 sps:$4 sm:$0xff]   ;;  %v9701_v26 = vld [vmem:[%s11610_s19 + $0x40] ss:$8 sps:$4 sm:$0xff]  }
 0x122   : > { %v9696_v23 = vld [vmem:[%s11610_s19 + $0x830] ss:$8 sps:$4 sm:$0xff]   ;;  %v9699_v25 = vld [vmem:[%s11610_s19 + $0x844] ss:$8 sps:$4 sm:$0xff]   ;;  %v9702_v27 = vld [vmem:[%s11610_s19 + $0x840] ss:$8 sps:$4 sm:$0xff]  }
 0x123   : > { %v9703_v28 = vld [vmem:[%s11610_s19 + $0x54] ss:$8 sps:$4 sm:$0xff]   ;;  %v9707_v30 = vld [vmem:[%s11610_s19 + $0x50] ss:$8 sps:$4 sm:$0xff]   ;;  %v9709_v32 = vld [vmem:[%s11610_s19 + $0x64] ss:$8 sps:$4 sm:$0xff]  }
 0x124   : > { %7863 = vmatpush1.bf16.msra.mxu1 %v9683_v14  ;;  %8287 = vmatpush1.bf16.msra.mxu0 %v9684_v15  ;;  %v9705_v29 = vld [vmem:[%s11610_s19 + $0x854] ss:$8 sps:$4 sm:$0xff]   ;;  %v9708_v31 = vld [vmem:[%s11610_s19 + $0x850] ss:$8 sps:$4 sm:$0xff]   ;;  %v9711_v33 = vld [vmem:[%s11610_s19 + $0x864] ss:$8 sps:$4 sm:$0xff]  }
 0x125   : > { %7864 = vmatprep.subr.bf16.mxu1 %v9685_v16  ;;  %8288 = vmatprep.subr.bf16.mxu0 %v9687_v17  ;;  %v9713_v34 = vld [vmem:[%s11610_s19 + $0x60] ss:$8 sps:$4 sm:$0xff]   ;;  %v9715_v36 = vld [vmem:[%s11610_s19 + $0x74] ss:$8 sps:$4 sm:$0xff]   ;;  %v9719_v38 = vld [vmem:[%s11610_s19 + $0x70] ss:$8 sps:$4 sm:$0xff]  }
 0x126   : > { %v9714_v35 = vld [vmem:[%s11610_s19 + $0x860] ss:$8 sps:$4 sm:$0xff]   ;;  %v9717_v37 = vld [vmem:[%s11610_s19 + $0x874] ss:$8 sps:$4 sm:$0xff]   ;;  %v9720_v39 = vld [vmem:[%s11610_s19 + $0x870] ss:$8 sps:$4 sm:$0xff]  }
 0x127   : > { %v9721_v40 = vld [vmem:[%s11610_s19 + $0x84] ss:$8 sps:$4 sm:$0xff]   ;;  %v9725_v42 = vld [vmem:[%s11610_s19 + $0x80] ss:$8 sps:$4 sm:$0xff]   ;;  %v9727_v44 = vld [vmem:[%s11610_s19 + $0x94] ss:$8 sps:$4 sm:$0xff]  }
 0x128   : > { %7865 = vmatpush1.bf16.msra.mxu1 %v9689_v18  ;;  %8289 = vmatpush1.bf16.msra.mxu0 %v9690_v19  ;;  %v9723_v41 = vld [vmem:[%s11610_s19 + $0x884] ss:$8 sps:$4 sm:$0xff]   ;;  %v9726_v43 = vld [vmem:[%s11610_s19 + $0x880] ss:$8 sps:$4 sm:$0xff]   ;;  %v9729_v45 = vld [vmem:[%s11610_s19 + $0x894] ss:$8 sps:$4 sm:$0xff]  }
 0x129   : > { %7866 = vmatprep.subr.bf16.mxu1 %v9691_v20  ;;  %8290 = vmatprep.subr.bf16.mxu0 %v9693_v21  ;;  %v9731_v46 = vld [vmem:[%s11610_s19 + $0x90] ss:$8 sps:$4 sm:$0xff]   ;;  %v9733_v48 = vld [vmem:[%s11610_s19 + $0xa4] ss:$8 sps:$4 sm:$0xff]   ;;  %v9737_v50 = vld [vmem:[%s11610_s19 + $0xa0] ss:$8 sps:$4 sm:$0xff]  }
 0x12a   : > { %v9732_v47 = vld [vmem:[%s11610_s19 + $0x890] ss:$8 sps:$4 sm:$0xff]   ;;  %v9735_v49 = vld [vmem:[%s11610_s19 + $0x8a4] ss:$8 sps:$4 sm:$0xff]   ;;  %v9738_v51 = vld [vmem:[%s11610_s19 + $0x8a0] ss:$8 sps:$4 sm:$0xff]  }
 0x12b   : > { %v9739_v52 = vld [vmem:[%s11610_s19 + $0xb4] ss:$8 sps:$4 sm:$0xff]   ;;  %v9743_v54 = vld [vmem:[%s11610_s19 + $0xb0] ss:$8 sps:$4 sm:$0xff]   ;;  %v9745_v56 = vld [vmem:[%s11610_s19 + $0xc4] ss:$8 sps:$4 sm:$0xff]  }
 0x12c   : > { %7867 = vmatpush1.bf16.msra.mxu1 %v9695_v22  ;;  %8291 = vmatpush1.bf16.msra.mxu0 %v9696_v23  ;;  %v9741_v53 = vld [vmem:[%s11610_s19 + $0x8b4] ss:$8 sps:$4 sm:$0xff]   ;;  %v9744_v55 = vld [vmem:[%s11610_s19 + $0x8b0] ss:$8 sps:$4 sm:$0xff]   ;;  %v9747_v57 = vld [vmem:[%s11610_s19 + $0x8c4] ss:$8 sps:$4 sm:$0xff]  }
 0x12d   : > { %7868 = vmatprep.subr.bf16.mxu1 %v9697_v24  ;;  %8292 = vmatprep.subr.bf16.mxu0 %v9699_v25  ;;  %v9749_v58 = vld [vmem:[%s11610_s19 + $0xc0] ss:$8 sps:$4 sm:$0xff]   ;;  %v9751_v60 = vld [vmem:[%s11610_s19 + $0xd4] ss:$8 sps:$4 sm:$0xff]   ;;  %v9755_v62 = vld [vmem:[%s11610_s19 + $0xd0] ss:$8 sps:$4 sm:$0xff]  }
 0x12e   : > { %v9750_v59 = vld [vmem:[%s11610_s19 + $0x8c0] ss:$8 sps:$4 sm:$0xff]   ;;  %v9753_v61 = vld [vmem:[%s11610_s19 + $0x8d4] ss:$8 sps:$4 sm:$0xff]   ;;  %v9756_v63 = vld [vmem:[%s11610_s19 + $0x8d0] ss:$8 sps:$4 sm:$0xff]  }
 0x12f   : > { %v9757_v4 = vld [vmem:[%s11610_s19 + $0xe4] ss:$8 sps:$4 sm:$0xff]   ;;  %v9761_v8 = vld [vmem:[%s11610_s19 + $0xe0] ss:$8 sps:$4 sm:$0xff]   ;;  %v9763_v10 = vld [vmem:[%s11610_s19 + $0xf4] ss:$8 sps:$4 sm:$0xff]  }
 0x130   : > { %7869 = vmatpush1.bf16.msra.mxu1 %v9701_v26  ;;  %8293 = vmatpush1.bf16.msra.mxu0 %v9702_v27  ;;  %v9759_v7 = vld [vmem:[%s11610_s19 + $0x8e4] ss:$8 sps:$4 sm:$0xff]   ;;  %v9762_v9 = vld [vmem:[%s11610_s19 + $0x8e0] ss:$8 sps:$4 sm:$0xff]   ;;  %v9765_v11 = vld [vmem:[%s11610_s19 + $0x8f4] ss:$8 sps:$4 sm:$0xff]  }
 0x131   : > { %7870 = vmatprep.subr.bf16.mxu1 %v9703_v28  ;;  %8294 = vmatprep.subr.bf16.mxu0 %v9705_v29  ;;  %v9767_v12 = vld [vmem:[%s11610_s19 + $0xf0] ss:$8 sps:$4 sm:$0xff]   ;;  %v9771_v14 = vld [vmem:[%s11610_s19 + $0x104] ss:$8 sps:$4 sm:$0xff]   ;;  %v9769_v20 = vld [vmem:[%s11610_s19 + $0x100] ss:$8 sps:$4 sm:$0xff]  }
 0x132   : > { %v9768_v13 = vld [vmem:[%s11610_s19 + $0x8f0] ss:$8 sps:$4 sm:$0xff]   ;;  %v9774_v15 = vld [vmem:[%s11610_s19 + $0x904] ss:$8 sps:$4 sm:$0xff]   ;;  %v9772_v21 = vld [vmem:[%s11610_s19 + $0x900] ss:$8 sps:$4 sm:$0xff]  }
 0x133   : > { %v4424_v16 = vld [vmem:[%s12459_s0 + $0x100] sm:$0xff]  ;;  %v9777_v22 = vld [vmem:[%s11610_s19 + $0x114] ss:$8 sps:$4 sm:$0xff]   ;;  %v9775_v26 = vld [vmem:[%s11610_s19 + $0x110] ss:$8 sps:$4 sm:$0xff]   ;;  %s9504_s12 = sshll.u32 (%p10536_p6), %s10471_s14, 3 }
 0x134   : > { %7871 = vmatpush1.bf16.msra.mxu1 %v9707_v30  ;;  %8295 = vmatpush1.bf16.msra.mxu0 %v9708_v31  ;;  %v4440_v17 = vld [vmem:[%s12459_s0 + $0x180] sm:$0xff]  ;;  %v9780_v23 = vld [vmem:[%s11610_s19 + $0x914] ss:$8 sps:$4 sm:$0xff]   ;;  %v9778_v27 = vld [vmem:[%s11610_s19 + $0x910] ss:$8 sps:$4 sm:$0xff]   ;;  %s8756_s29 = scalar_lea.vmem (%p10536_p6), %s12462_s3, %s9504_s12 }
 0x135   : > { %7872 = vmatprep.subr.bf16.mxu1 %v9709_v32  ;;  %8296 = vmatprep.subr.bf16.mxu0 %v9711_v33  ;;  %v4432_v18 = vld [vmem:[%s12459_s0 + $0x140] sm:$0xff]  ;;  %v8947_v24 = vcombine.high %v4424_v16, %v4440_v17  ;;  %v9789_v5 = vld [vmem:[%s11610_s19 + $0x134] ss:$8 sps:$4 sm:$0xff]   ;;  %v9787_v30 = vld [vmem:[%s11610_s19 + $0x130] ss:$8 sps:$4 sm:$0xff]  }
 0x136   : > { %v4448_v19 = vld [vmem:[%s12459_s0 + $0x1c0] sm:$0xff]  ;;  %v9790_v31 = vld [vmem:[%s11610_s19 + $0x930] ss:$8 sps:$4 sm:$0xff]  }
 0x137   : > { %v8963_v25 = vcombine.high %v4432_v18, %v4448_v19  ;;  %v9783_v28 = vld [vmem:[%s11610_s19 + $0x124] ss:$8 sps:$4 sm:$0xff]   ;;  %v9781_v0 = vld [vmem:[%s11610_s19 + $0x120] ss:$8 sps:$4 sm:$0xff]   ;;  %v8962_v2 = vcombine.low %v4432_v18, %v4448_v19  ;;  %v9847_v18 = vld [vmem:[%s11610_s19 + $0x1d0] ss:$8 sps:$4 sm:$0xff]  }
 0x138   : > { %7873 = vmatpush1.bf16.msra.mxu1 %v9713_v34  ;;  %8297 = vmatpush1.bf16.msra.mxu0 %v9714_v35  ;;  %v9786_v29 = vld [vmem:[%s11610_s19 + $0x924] ss:$8 sps:$4 sm:$0xff]   ;;  %v9784_v1 = vld [vmem:[%s11610_s19 + $0x920] ss:$8 sps:$4 sm:$0xff]   ;;  %v9850_v19 = vld [vmem:[%s11610_s19 + $0x9d0] ss:$8 sps:$4 sm:$0xff]  }
 0x139   : > { %7874 = vmatprep.subr.bf16.mxu1 %v9715_v36  ;;  %8298 = vmatprep.subr.bf16.mxu0 %v9717_v37  ;;  %v9795_v32 = vld [vmem:[%s11610_s19 + $0x144] ss:$8 sps:$4 sm:$0xff]   ;;  %v9793_v34 = vld [vmem:[%s11610_s19 + $0x140] ss:$8 sps:$4 sm:$0xff]   ;;  %v9801_v36 = vld [vmem:[%s11610_s19 + $0x154] ss:$8 sps:$4 sm:$0xff]  }
 0x13a   : > { %v9798_v33 = vld [vmem:[%s11610_s19 + $0x944] ss:$8 sps:$4 sm:$0xff]   ;;  %v9796_v35 = vld [vmem:[%s11610_s19 + $0x940] ss:$8 sps:$4 sm:$0xff]   ;;  %v9804_v37 = vld [vmem:[%s11610_s19 + $0x954] ss:$8 sps:$4 sm:$0xff]  }
 0x13c   : > { %7875 = vmatpush1.bf16.msra.mxu1 %v9719_v38  ;;  %8299 = vmatpush1.bf16.msra.mxu0 %v9720_v39  ;;  %v9799_v38 = vld [vmem:[%s11610_s19 + $0x150] ss:$8 sps:$4 sm:$0xff]  }
 0x13d   : > { %7876 = vmatprep.subr.bf16.mxu1 %v9721_v40  ;;  %8300 = vmatprep.subr.bf16.mxu0 %v9723_v41  ;;  %v9802_v39 = vld [vmem:[%s11610_s19 + $0x950] ss:$8 sps:$4 sm:$0xff]   ;;  %v9807_v40 = vld [vmem:[%s11610_s19 + $0x164] ss:$8 sps:$4 sm:$0xff]  }
 0x13e   : > { %v9810_v41 = vld [vmem:[%s11610_s19 + $0x964] ss:$8 sps:$4 sm:$0xff]  }
 0x140   : > { %7877 = vmatpush1.bf16.msra.mxu1 %v9725_v42  ;;  %8301 = vmatpush1.bf16.msra.mxu0 %v9726_v43  ;;  %v11723_v42 = vld [vmem:[%s12459_s0 + $0x8] sm:$0xff] }
 0x141   : > { %7878 = vmatprep.subr.bf16.mxu1 %v9727_v44  ;;  %8302 = vmatprep.subr.bf16.mxu0 %v9729_v45  ;;  %v11728_v43 = vld [vmem:[%s12459_s0 + $0x88] sm:$0xff] }
 0x142   : > { %v9805_v44 = vld [vmem:[%s11610_s19 + $0x160] ss:$8 sps:$4 sm:$0xff]   ;;  %v8917_v45 = vcombine.high %v11723_v42, %v11728_v43 }
 0x144   : > { %7879 = vmatpush1.bf16.msra.mxu1 %v9731_v46  ;;  %8303 = vmatpush1.bf16.msra.mxu0 %v9732_v47  ;;  %v9808_v46 = vld [vmem:[%s11610_s19 + $0x960] ss:$8 sps:$4 sm:$0xff]  }
 0x145   : > { %7880 = vmatprep.subr.bf16.mxu1 %v9733_v48  ;;  %8304 = vmatprep.subr.bf16.mxu0 %v9735_v49  ;;  %v11737_v47 = vld [vmem:[%s12459_s0 + $0x48] sm:$0xff]  ;;  %v9813_v49 = vld [vmem:[%s11610_s19 + $0x174] ss:$8 sps:$4 sm:$0xff]  }
 0x146   : > { %v11742_v48 = vld [vmem:[%s12459_s0 + $0xc8] sm:$0xff] }
 0x148   : > { %7881 = vmatpush1.bf16.msra.mxu1 %v9737_v50  ;;  %8305 = vmatpush1.bf16.msra.mxu0 %v9738_v51  ;;  %v8933_v50 = vcombine.high %v11737_v47, %v11742_v48  ;;  %v9816_v51 = vld [vmem:[%s11610_s19 + $0x974] ss:$8 sps:$4 sm:$0xff]  }
 0x149   : > { %7882 = vmatprep.subr.bf16.mxu1 %v9739_v52  ;;  %8306 = vmatprep.subr.bf16.mxu0 %v9741_v53  ;;  %v9811_v52 = vld [vmem:[%s11610_s19 + $0x170] ss:$8 sps:$4 sm:$0xff]  }
 0x14a   : > { %v9814_v53 = vld [vmem:[%s11610_s19 + $0x970] ss:$8 sps:$4 sm:$0xff]  }
 0x14c   : > { %7883 = vmatpush1.bf16.msra.mxu1 %v9743_v54  ;;  %8307 = vmatpush1.bf16.msra.mxu0 %v9744_v55  ;;  %v9819_v54 = vld [vmem:[%s11610_s19 + $0x184] ss:$8 sps:$4 sm:$0xff]  }
 0x14d   : > { %7884 = vmatprep.subr.bf16.mxu1 %v9745_v56  ;;  %8308 = vmatprep.subr.bf16.mxu0 %v9747_v57  ;;  %v9822_v55 = vld [vmem:[%s11610_s19 + $0x984] ss:$8 sps:$4 sm:$0xff]   ;;  %v9817_v56 = vld [vmem:[%s11610_s19 + $0x180] ss:$8 sps:$4 sm:$0xff]  }
 0x14e   : > { %v9820_v57 = vld [vmem:[%s11610_s19 + $0x980] ss:$8 sps:$4 sm:$0xff]  }
 0x150   : > { %7885 = vmatpush1.bf16.msra.mxu1 %v9749_v58  ;;  %8309 = vmatpush1.bf16.msra.mxu0 %v9750_v59  ;;  %v9825_v58 = vld [vmem:[%s11610_s19 + $0x194] ss:$8 sps:$4 sm:$0xff]  }
 0x151   : > { %7886 = vmatprep.subr.bf16.mxu1 %v9751_v60  ;;  %8310 = vmatprep.subr.bf16.mxu0 %v9753_v61  ;;  %v9828_v59 = vld [vmem:[%s11610_s19 + $0x994] ss:$8 sps:$4 sm:$0xff]   ;;  %v9823_v60 = vld [vmem:[%s11610_s19 + $0x190] ss:$8 sps:$4 sm:$0xff]  }
 0x152   : > { %v9826_v61 = vld [vmem:[%s11610_s19 + $0x990] ss:$8 sps:$4 sm:$0xff]  }
 0x154   : > { %7887 = vmatpush1.bf16.msra.mxu1 %v9755_v62  ;;  %8311 = vmatpush1.bf16.msra.mxu0 %v9756_v63  ;;  %v9831_v62 = vld [vmem:[%s11610_s19 + $0x1a4] ss:$8 sps:$4 sm:$0xff]  }
 0x155   : > { %7888 = vmatprep.subr.bf16.mxu1 %v9757_v4  ;;  %8312 = vmatprep.subr.bf16.mxu0 %v9759_v7  ;;  %v9834_v63 = vld [vmem:[%s11610_s19 + $0x9a4] ss:$8 sps:$4 sm:$0xff]   ;;  %v9829_v4 = vld [vmem:[%s11610_s19 + $0x1a0] ss:$8 sps:$4 sm:$0xff]  }
 0x156   : > { %v9832_v7 = vld [vmem:[%s11610_s19 + $0x9a0] ss:$8 sps:$4 sm:$0xff]  }
 0x158   : > { %7889 = vmatpush1.bf16.msra.mxu1 %v9761_v8  ;;  %8313 = vmatpush1.bf16.msra.mxu0 %v9762_v9  ;;  %v9837_v8 = vld [vmem:[%s11610_s19 + $0x1b4] ss:$8 sps:$4 sm:$0xff]  }
 0x159   : > { %7890 = vmatprep.subr.bf16.mxu1 %v9763_v10  ;;  %8314 = vmatprep.subr.bf16.mxu0 %v9765_v11  ;;  %v9840_v9 = vld [vmem:[%s11610_s19 + $0x9b4] ss:$8 sps:$4 sm:$0xff]   ;;  %v9835_v10 = vld [vmem:[%s11610_s19 + $0x1b0] ss:$8 sps:$4 sm:$0xff]  }
 0x15a   : > { %v9838_v11 = vld [vmem:[%s11610_s19 + $0x9b0] ss:$8 sps:$4 sm:$0xff]  }
 0x15c   : > { %7891 = vmatpush1.bf16.msra.mxu1 %v9767_v12  ;;  %8315 = vmatpush1.bf16.msra.mxu0 %v9768_v13  ;;  %v9843_v12 = vld [vmem:[%s11610_s19 + $0x1c4] ss:$8 sps:$4 sm:$0xff]  }
 0x15d   : > { %7913 = vmatprep.subr.bf16.mxu1 %v9771_v14  ;;  %8337 = vmatprep.subr.bf16.mxu0 %v9774_v15  ;;  %v9846_v13 = vld [vmem:[%s11610_s19 + $0x9c4] ss:$8 sps:$4 sm:$0xff]   ;;  %v9841_v14 = vld [vmem:[%s11610_s19 + $0x1c0] ss:$8 sps:$4 sm:$0xff]  }
 0x15e   : > { %v9844_v15 = vld [vmem:[%s11610_s19 + $0x9c0] ss:$8 sps:$4 sm:$0xff]  }
 0x15f   : > { %7893 = vmatmul.mubr.bf16.vlgmr.msra.gmra.mrb[0].mxu1 %v8914_v3  ;;  %8317 = vmatmul.mubr.bf16.vlgmr.msra.gmra.mrb[0].mxu0 %v8930_v6  ;;  %v8946_v3 = vcombine.low %v4424_v16, %v4440_v17  ;;  %v9792_v6 = vld [vmem:[%s11610_s19 + $0x934] ss:$8 sps:$4 sm:$0xff]  }
 0x160   : > { %7914 = vmatpush1.bf16.msra.mxu1 %v9769_v20  ;;  %8338 = vmatpush1.bf16.msra.mxu0 %v9772_v21  ;;  %v9849_v16 = vld [vmem:[%s11610_s19 + $0x1d4] ss:$8 sps:$4 sm:$0xff]   ;;  %v9855_v20 = vld [vmem:[%s11610_s19 + $0x1e4] ss:$8 sps:$4 sm:$0xff]  }
 0x161   : > { %7915 = vmatprep.subr.bf16.mxu1 %v9777_v22  ;;  %8339 = vmatprep.subr.bf16.mxu0 %v9780_v23  ;;  %v9852_v17 = vld [vmem:[%s11610_s19 + $0x9d4] ss:$8 sps:$4 sm:$0xff]   ;;  %v9858_v21 = vld [vmem:[%s11610_s19 + $0x9e4] ss:$8 sps:$4 sm:$0xff]   ;;  %v9853_v22 = vld [vmem:[%s11610_s19 + $0x1e0] ss:$8 sps:$4 sm:$0xff]  }
 0x162   : > { %7902 = vmatprep.mubr.bf16.mxu1 %v8947_v24  ;;  %8326 = vmatprep.mubr.bf16.mxu0 %v8963_v25  ;;  %v9856_v23 = vld [vmem:[%s11610_s19 + $0x9e0] ss:$8 sps:$4 sm:$0xff]   ;;  %v9861_v24 = vld [vmem:[%s11610_s19 + $0x1f4] ss:$8 sps:$4 sm:$0xff]  }
 0x163   : > { %v9864_v25 = vld [vmem:[%s11610_s19 + $0x9f4] ss:$8 sps:$4 sm:$0xff]  }
 0x164   : > { %7916 = vmatpush1.bf16.msra.mxu1 %v9775_v26  ;;  %8340 = vmatpush1.bf16.msra.mxu0 %v9778_v27  ;;  %v9859_v26 = vld [vmem:[%s11610_s19 + $0x1f0] ss:$8 sps:$4 sm:$0xff]  }
 0x165   : > { %7917 = vmatprep.subr.bf16.mxu1 %v9783_v28  ;;  %8341 = vmatprep.subr.bf16.mxu0 %v9786_v29  ;;  %v9862_v27 = vld [vmem:[%s11610_s19 + $0x9f0] ss:$8 sps:$4 sm:$0xff]   ;;  %v9867_v28 = vld [vmem:[%s11610_s19 + $0x204] ss:$8 sps:$4 sm:$0xff]  }
 0x166   : > { %v9870_v29 = vld [vmem:[%s11610_s19 + $0xa04] ss:$8 sps:$4 sm:$0xff]  }
 0x167   : > { %7903 = vmatmul.mubr.bf16.gmra.mrb[4].mxu1 %v8946_v3  ;;  %8327 = vmatmul.mubr.bf16.gmra.mrb[4].mxu0 %v8962_v2  ;;  %v4425_v3 = vld [vmem:[%s12459_s0 + $0x108] sm:$0xff] }
 0x168   : > { %7918 = vmatpush1.bf16.msra.mxu1 %v9781_v0  ;;  %8342 = vmatpush1.bf16.msra.mxu0 %v9784_v1  ;;  %v9865_v0 = vld [vmem:[%s11610_s19 + $0x200] ss:$8 sps:$4 sm:$0xff]  }
 0x169   : > { %7919 = vmatprep.subr.bf16.mxu1 %v9789_v5  ;;  %8343 = vmatprep.subr.bf16.mxu0 %v9792_v6  ;;  %v9868_v1 = vld [vmem:[%s11610_s19 + $0xa00] ss:$8 sps:$4 sm:$0xff]   ;;  %v8916_v5 = vcombine.low %v11723_v42, %v11728_v43  ;;  %v8932_v6 = vcombine.low %v11737_v47, %v11742_v48  ;;  %v11813_v42 = vld [vmem:[%s12459_s0 + $0x10] sm:$0xff] }
 0x16a   : > { %7945 = vmatprep.mubr.bf16.mxu1 %v8917_v45  ;;  %8369 = vmatprep.mubr.bf16.mxu0 %v8933_v50  ;;  %v4441_v2 = vld [vmem:[%s12459_s0 + $0x188] sm:$0xff]  ;;  %v11818_v43 = vld [vmem:[%s12459_s0 + $0x90] sm:$0xff] }
 0x16b   : > { %v11828_v47 = vld [vmem:[%s12459_s0 + $0xd0] sm:$0xff]  ;;  %v8919_v50 = vcombine.high %v11813_v42, %v11818_v43 }
 0x16c   : > { %7920 = vmatpush1.bf16.msra.mxu1 %v9787_v30  ;;  %8344 = vmatpush1.bf16.msra.mxu0 %v9790_v31  ;;  %v4433_v30 = vld [vmem:[%s12459_s0 + $0x148] sm:$0xff]  ;;  %v9885_v48 = vld [vmem:[%s11610_s19 + $0x234] ss:$8 sps:$4 sm:$0xff]  }
 0x16d   : > { %7921 = vmatprep.subr.bf16.mxu1 %v9795_v32  ;;  %8345 = vmatprep.subr.bf16.mxu0 %v9798_v33  ;;  %v4449_v31 = vld [vmem:[%s12459_s0 + $0x1c8] sm:$0xff]  ;;  %v9873_v32 = vld [vmem:[%s11610_s19 + $0x214] ss:$8 sps:$4 sm:$0xff]  }
 0x16e   : > { %v9876_v33 = vld [vmem:[%s11610_s19 + $0xa14] ss:$8 sps:$4 sm:$0xff]   ;;  %v8964_v45 = vcombine.low %v4433_v30, %v4449_v31 }
 0x170   : > { %7922 = vmatpush1.bf16.msra.mxu1 %v9793_v34  ;;  %8346 = vmatpush1.bf16.msra.mxu0 %v9796_v35  ;;  %v8949_v34 = vcombine.high %v4425_v3, %v4441_v2  ;;  %v8965_v35 = vcombine.high %v4433_v30, %v4449_v31  ;;  %v9951_v30 = vld [vmem:[%s11610_s19 + $0x2e4] ss:$8 sps:$4 sm:$0xff]  }
 0x171   : > { %7923 = vmatprep.subr.bf16.mxu1 %v9801_v36  ;;  %8347 = vmatprep.subr.bf16.mxu0 %v9804_v37  ;;  %v9871_v36 = vld [vmem:[%s11610_s19 + $0x210] ss:$8 sps:$4 sm:$0xff]   ;;  %v9954_v31 = vld [vmem:[%s11610_s19 + $0xae4] ss:$8 sps:$4 sm:$0xff]  }
 0x172   : > { %v9874_v37 = vld [vmem:[%s11610_s19 + $0xa10] ss:$8 sps:$4 sm:$0xff]  }
 0x174   : > { %7924 = vmatpush1.bf16.msra.mxu1 %v9799_v38  ;;  %8348 = vmatpush1.bf16.msra.mxu0 %v9802_v39  ;;  %v9879_v38 = vld [vmem:[%s11610_s19 + $0x224] ss:$8 sps:$4 sm:$0xff]  }
 0x175   : > { %7925 = vmatprep.subr.bf16.mxu1 %v9807_v40  ;;  %8349 = vmatprep.subr.bf16.mxu0 %v9810_v41  ;;  %v9882_v39 = vld [vmem:[%s11610_s19 + $0xa24] ss:$8 sps:$4 sm:$0xff]   ;;  %v9877_v40 = vld [vmem:[%s11610_s19 + $0x220] ss:$8 sps:$4 sm:$0xff]  }
 0x176   : > { %v9880_v41 = vld [vmem:[%s11610_s19 + $0xa20] ss:$8 sps:$4 sm:$0xff]  }
 0x178   : > { %7926 = vmatpush1.bf16.msra.mxu1 %v9805_v44  ;;  %8350 = vmatpush1.bf16.msra.mxu0 %v9808_v46  ;;  %v8948_v44 = vcombine.low %v4425_v3, %v4441_v2  ;;  %v11823_v46 = vld [vmem:[%s12459_s0 + $0x50] sm:$0xff] }
 0x179   : > { %7927 = vmatprep.subr.bf16.mxu1 %v9813_v49  ;;  %8351 = vmatprep.subr.bf16.mxu0 %v9816_v51  ;;  %v9888_v49 = vld [vmem:[%s11610_s19 + $0xa34] ss:$8 sps:$4 sm:$0xff]   ;;  %v8935_v51 = vcombine.high %v11823_v46, %v11828_v47 }
 0x17a   : > { %v9945_v3 = vld [vmem:[%s11610_s19 + $0x2d4] ss:$8 sps:$4 sm:$0xff]  }
 0x17b   : > { %v9948_v2 = vld [vmem:[%s11610_s19 + $0xad4] ss:$8 sps:$4 sm:$0xff]  }
 0x17c   : > { %7928 = vmatpush1.bf16.msra.mxu1 %v9811_v52  ;;  %8352 = vmatpush1.bf16.msra.mxu0 %v9814_v53  ;;  %v9883_v52 = vld [vmem:[%s11610_s19 + $0x230] ss:$8 sps:$4 sm:$0xff]  }
 0x17d   : > { %7929 = vmatprep.subr.bf16.mxu1 %v9819_v54  ;;  %8353 = vmatprep.subr.bf16.mxu0 %v9822_v55  ;;  %v9886_v53 = vld [vmem:[%s11610_s19 + $0xa30] ss:$8 sps:$4 sm:$0xff]   ;;  %v9891_v54 = vld [vmem:[%s11610_s19 + $0x244] ss:$8 sps:$4 sm:$0xff]  }
 0x17e   : > { %v9894_v55 = vld [vmem:[%s11610_s19 + $0xa44] ss:$8 sps:$4 sm:$0xff]  }
 0x180   : > { %7930 = vmatpush1.bf16.msra.mxu1 %v9817_v56  ;;  %8354 = vmatpush1.bf16.msra.mxu0 %v9820_v57  ;;  %v9889_v56 = vld [vmem:[%s11610_s19 + $0x240] ss:$8 sps:$4 sm:$0xff]  }
 0x181   : > { %7931 = vmatprep.subr.bf16.mxu1 %v9825_v58  ;;  %8355 = vmatprep.subr.bf16.mxu0 %v9828_v59  ;;  %v9892_v57 = vld [vmem:[%s11610_s19 + $0xa40] ss:$8 sps:$4 sm:$0xff]   ;;  %v9897_v58 = vld [vmem:[%s11610_s19 + $0x254] ss:$8 sps:$4 sm:$0xff]  }
 0x182   : > { %v9900_v59 = vld [vmem:[%s11610_s19 + $0xa54] ss:$8 sps:$4 sm:$0xff]  }
 0x184   : > { %7932 = vmatpush1.bf16.msra.mxu1 %v9823_v60  ;;  %8356 = vmatpush1.bf16.msra.mxu0 %v9826_v61  ;;  %v9895_v60 = vld [vmem:[%s11610_s19 + $0x250] ss:$8 sps:$4 sm:$0xff]  }
 0x185   : > { %7933 = vmatprep.subr.bf16.mxu1 %v9831_v62  ;;  %8357 = vmatprep.subr.bf16.mxu0 %v9834_v63  ;;  %v9898_v61 = vld [vmem:[%s11610_s19 + $0xa50] ss:$8 sps:$4 sm:$0xff]   ;;  %v9903_v62 = vld [vmem:[%s11610_s19 + $0x264] ss:$8 sps:$4 sm:$0xff]  }
 0x186   : > { %v9906_v63 = vld [vmem:[%s11610_s19 + $0xa64] ss:$8 sps:$4 sm:$0xff]  }
 0x188   : > { %7934 = vmatpush1.bf16.msra.mxu1 %v9829_v4  ;;  %8358 = vmatpush1.bf16.msra.mxu0 %v9832_v7  ;;  %v9901_v4 = vld [vmem:[%s11610_s19 + $0x260] ss:$8 sps:$4 sm:$0xff]  }
 0x189   : > { %7935 = vmatprep.subr.bf16.mxu1 %v9837_v8  ;;  %8359 = vmatprep.subr.bf16.mxu0 %v9840_v9  ;;  %v9904_v7 = vld [vmem:[%s11610_s19 + $0xa60] ss:$8 sps:$4 sm:$0xff]   ;;  %v9909_v8 = vld [vmem:[%s11610_s19 + $0x274] ss:$8 sps:$4 sm:$0xff]  }
 0x18a   : > { %v9912_v9 = vld [vmem:[%s11610_s19 + $0xa74] ss:$8 sps:$4 sm:$0xff]  }
 0x18c   : > { %7936 = vmatpush1.bf16.msra.mxu1 %v9835_v10  ;;  %8360 = vmatpush1.bf16.msra.mxu0 %v9838_v11  ;;  %v9907_v10 = vld [vmem:[%s11610_s19 + $0x270] ss:$8 sps:$4 sm:$0xff]  }
 0x18d   : > { %7937 = vmatprep.subr.bf16.mxu1 %v9843_v12  ;;  %8361 = vmatprep.subr.bf16.mxu0 %v9846_v13  ;;  %v9910_v11 = vld [vmem:[%s11610_s19 + $0xa70] ss:$8 sps:$4 sm:$0xff]   ;;  %v9915_v12 = vld [vmem:[%s11610_s19 + $0x284] ss:$8 sps:$4 sm:$0xff]  }
 0x18e   : > { %v9918_v13 = vld [vmem:[%s11610_s19 + $0xa84] ss:$8 sps:$4 sm:$0xff]  }
 0x190   : > { %7938 = vmatpush1.bf16.msra.mxu1 %v9841_v14  ;;  %8362 = vmatpush1.bf16.msra.mxu0 %v9844_v15  ;;  %v9913_v14 = vld [vmem:[%s11610_s19 + $0x280] ss:$8 sps:$4 sm:$0xff]  }
 0x191   : > { %7939 = vmatprep.subr.bf16.mxu1 %v9849_v16  ;;  %8363 = vmatprep.subr.bf16.mxu0 %v9852_v17  ;;  %v9916_v15 = vld [vmem:[%s11610_s19 + $0xa80] ss:$8 sps:$4 sm:$0xff]   ;;  %v9921_v16 = vld [vmem:[%s11610_s19 + $0x294] ss:$8 sps:$4 sm:$0xff]  }
 0x192   : > { %v9924_v17 = vld [vmem:[%s11610_s19 + $0xa94] ss:$8 sps:$4 sm:$0xff]  }
 0x194   : > { %7940 = vmatpush1.bf16.msra.mxu1 %v9847_v18  ;;  %8364 = vmatpush1.bf16.msra.mxu0 %v9850_v19  ;;  %v9919_v18 = vld [vmem:[%s11610_s19 + $0x290] ss:$8 sps:$4 sm:$0xff]  }
 0x195   : > { %7941 = vmatprep.subr.bf16.mxu1 %v9855_v20  ;;  %8365 = vmatprep.subr.bf16.mxu0 %v9858_v21  ;;  %v9922_v19 = vld [vmem:[%s11610_s19 + $0xa90] ss:$8 sps:$4 sm:$0xff]   ;;  %v9927_v20 = vld [vmem:[%s11610_s19 + $0x2a4] ss:$8 sps:$4 sm:$0xff]  }
 0x196   : > { %v9930_v21 = vld [vmem:[%s11610_s19 + $0xaa4] ss:$8 sps:$4 sm:$0xff]  }
 0x198   : > { %7942 = vmatpush1.bf16.msra.mxu1 %v9853_v22  ;;  %8366 = vmatpush1.bf16.msra.mxu0 %v9856_v23  ;;  %v9925_v22 = vld [vmem:[%s11610_s19 + $0x2a0] ss:$8 sps:$4 sm:$0xff]  }
 0x199   : > { %7943 = vmatprep.subr.bf16.mxu1 %v9861_v24  ;;  %8367 = vmatprep.subr.bf16.mxu0 %v9864_v25  ;;  %v9928_v23 = vld [vmem:[%s11610_s19 + $0xaa0] ss:$8 sps:$4 sm:$0xff]   ;;  %v9933_v24 = vld [vmem:[%s11610_s19 + $0x2b4] ss:$8 sps:$4 sm:$0xff]  }
 0x19a   : > { %v9936_v25 = vld [vmem:[%s11610_s19 + $0xab4] ss:$8 sps:$4 sm:$0xff]  }
 0x19c   : > { %7944 = vmatpush1.bf16.msra.mxu1 %v9859_v26  ;;  %8368 = vmatpush1.bf16.msra.mxu0 %v9862_v27  ;;  %v9931_v26 = vld [vmem:[%s11610_s19 + $0x2b0] ss:$8 sps:$4 sm:$0xff]  }
 0x19d   : > { %7966 = vmatprep.subr.bf16.mxu1 %v9867_v28  ;;  %8390 = vmatprep.subr.bf16.mxu0 %v9870_v29  ;;  %v9934_v27 = vld [vmem:[%s11610_s19 + $0xab0] ss:$8 sps:$4 sm:$0xff]   ;;  %v9939_v28 = vld [vmem:[%s11610_s19 + $0x2c4] ss:$8 sps:$4 sm:$0xff]  }
 0x19e   : > { %v9942_v29 = vld [vmem:[%s11610_s19 + $0xac4] ss:$8 sps:$4 sm:$0xff]  }
 0x19f   : > { %7946 = vmatmul.mubr.bf16.vlgmr.msra.gmra.mrb[0].mxu1 %v8916_v5  ;;  %8370 = vmatmul.mubr.bf16.vlgmr.msra.gmra.mrb[0].mxu0 %v8932_v6  ;;  %v9943_v5 = vld [vmem:[%s11610_s19 + $0x2d0] ss:$8 sps:$4 sm:$0xff]  }
 0x1a0   : > { %7967 = vmatpush1.bf16.msra.mxu1 %v9865_v0  ;;  %8391 = vmatpush1.bf16.msra.mxu0 %v9868_v1  ;;  %v9937_v0 = vld [vmem:[%s11610_s19 + $0x2c0] ss:$8 sps:$4 sm:$0xff]   ;;  %v9946_v6 = vld [vmem:[%s11610_s19 + $0xad0] ss:$8 sps:$4 sm:$0xff]  }
 0x1a1   : > { %7968 = vmatprep.subr.bf16.mxu1 %v9873_v32  ;;  %8392 = vmatprep.subr.bf16.mxu0 %v9876_v33  ;;  %v9940_v1 = vld [vmem:[%s11610_s19 + $0xac0] ss:$8 sps:$4 sm:$0xff]  }
 0x1a2   : > { %7955 = vmatprep.mubr.bf16.mxu1 %v8949_v34  ;;  %8379 = vmatprep.mubr.bf16.mxu0 %v8965_v35  ;;  %v9949_v32 = vld [vmem:[%s11610_s19 + $0x2e0] ss:$8 sps:$4 sm:$0xff]   ;;  %v9957_v34 = vld [vmem:[%s11610_s19 + $0x2f4] ss:$8 sps:$4 sm:$0xff]  }
 0x1a3   : > { %v9952_v33 = vld [vmem:[%s11610_s19 + $0xae0] ss:$8 sps:$4 sm:$0xff]   ;;  %v9960_v35 = vld [vmem:[%s11610_s19 + $0xaf4] ss:$8 sps:$4 sm:$0xff]  }
 0x1a4   : > { %7969 = vmatpush1.bf16.msra.mxu1 %v9871_v36  ;;  %8393 = vmatpush1.bf16.msra.mxu0 %v9874_v37  ;;  %v9955_v36 = vld [vmem:[%s11610_s19 + $0x2f0] ss:$8 sps:$4 sm:$0xff]  }
 0x1a5   : > { %7970 = vmatprep.subr.bf16.mxu1 %v9879_v38  ;;  %8394 = vmatprep.subr.bf16.mxu0 %v9882_v39  ;;  %v9958_v37 = vld [vmem:[%s11610_s19 + $0xaf0] ss:$8 sps:$4 sm:$0xff]   ;;  %v9963_v38 = vld [vmem:[%s11610_s19 + $0x304] ss:$8 sps:$4 sm:$0xff]  }
 0x1a6   : > { %v9966_v39 = vld [vmem:[%s11610_s19 + $0xb04] ss:$8 sps:$4 sm:$0xff]  }
 0x1a7   : > { %7956 = vmatmul.mubr.bf16.gmra.mrb[4].mxu1 %v8948_v44  ;;  %8380 = vmatmul.mubr.bf16.gmra.mrb[4].mxu0 %v8964_v45  ;;  %v4426_v44 = vld [vmem:[%s12459_s0 + $0x110] sm:$0xff] }
 0x1a8   : > { %7971 = vmatpush1.bf16.msra.mxu1 %v9877_v40  ;;  %8395 = vmatpush1.bf16.msra.mxu0 %v9880_v41  ;;  %v9961_v40 = vld [vmem:[%s11610_s19 + $0x300] ss:$8 sps:$4 sm:$0xff]   ;;  %v4442_v45 = vld [vmem:[%s12459_s0 + $0x190] sm:$0xff] }
 0x1a9   : > { %7972 = vmatprep.subr.bf16.mxu1 %v9885_v48  ;;  %8396 = vmatprep.subr.bf16.mxu0 %v9888_v49  ;;  %v9964_v41 = vld [vmem:[%s11610_s19 + $0xb00] ss:$8 sps:$4 sm:$0xff]   ;;  %v8918_v48 = vcombine.low %v11813_v42, %v11818_v43  ;;  %v8934_v49 = vcombine.low %v11823_v46, %v11828_v47  ;;  %v9972_v42 = vld [vmem:[%s11610_s19 + $0xb14] ss:$8 sps:$4 sm:$0xff]   ;;  %v8951_v43 = vcombine.high %v4426_v44, %v4442_v45  ;;  %v9967_v47 = vld [vmem:[%s11610_s19 + $0x310] ss:$8 sps:$4 sm:$0xff]  }
 0x1aa   : > { %7998 = vmatprep.mubr.bf16.mxu1 %v8919_v50  ;;  %8422 = vmatprep.mubr.bf16.mxu0 %v8935_v51  ;;  %v4434_v50 = vld [vmem:[%s12459_s0 + $0x150] sm:$0xff] }
 0x1ab   : > { %v4450_v51 = vld [vmem:[%s12459_s0 + $0x1d0] sm:$0xff] }
 0x1ac   : > { %7973 = vmatpush1.bf16.msra.mxu1 %v9883_v52  ;;  %8397 = vmatpush1.bf16.msra.mxu0 %v9886_v53  ;;  %v9969_v52 = vld [vmem:[%s11610_s19 + $0x314] ss:$8 sps:$4 sm:$0xff]   ;;  %v8967_v46 = vcombine.high %v4434_v50, %v4450_v51  ;;  %v9970_v53 = vld [vmem:[%s11610_s19 + $0xb10] ss:$8 sps:$4 sm:$0xff]  }
 0x1ad   : > { %7974 = vmatprep.subr.bf16.mxu1 %v9891_v54  ;;  %8398 = vmatprep.subr.bf16.mxu0 %v9894_v55  ;;  %v9975_v54 = vld [vmem:[%s11610_s19 + $0x324] ss:$8 sps:$4 sm:$0xff]  }
 0x1ae   : > { %v9978_v55 = vld [vmem:[%s11610_s19 + $0xb24] ss:$8 sps:$4 sm:$0xff]  }
 0x1b0   : > { %7975 = vmatpush1.bf16.msra.mxu1 %v9889_v56  ;;  %8399 = vmatpush1.bf16.msra.mxu0 %v9892_v57  ;;  %v9973_v56 = vld [vmem:[%s11610_s19 + $0x320] ss:$8 sps:$4 sm:$0xff]  }
 0x1b1   : > { %7976 = vmatprep.subr.bf16.mxu1 %v9897_v58  ;;  %8400 = vmatprep.subr.bf16.mxu0 %v9900_v59  ;;  %v9976_v57 = vld [vmem:[%s11610_s19 + $0xb20] ss:$8 sps:$4 sm:$0xff]   ;;  %v11917_v58 = vld [vmem:[%s12459_s0 + $0x18] sm:$0xff] }
 0x1b2   : > { %v11922_v59 = vld [vmem:[%s12459_s0 + $0x98] sm:$0xff] }
 0x1b4   : > { %7977 = vmatpush1.bf16.msra.mxu1 %v9895_v60  ;;  %8401 = vmatpush1.bf16.msra.mxu0 %v9898_v61  ;;  %v8950_v60 = vcombine.low %v4426_v44, %v4442_v45  ;;  %v8966_v61 = vcombine.low %v4434_v50, %v4450_v51  ;;  %v10041_v44 = vld [vmem:[%s11610_s19 + $0x3d4] ss:$8 sps:$4 sm:$0xff]   ;;  %v10047_v50 = vld [vmem:[%s11610_s19 + $0x3e4] ss:$8 sps:$4 sm:$0xff]  }
 0x1b5   : > { %7978 = vmatprep.subr.bf16.mxu1 %v9903_v62  ;;  %8402 = vmatprep.subr.bf16.mxu0 %v9906_v63  ;;  %v11927_v62 = vld [vmem:[%s12459_s0 + $0x58] sm:$0xff]  ;;  %v10050_v51 = vld [vmem:[%s11610_s19 + $0xbe4] ss:$8 sps:$4 sm:$0xff]  }
 0x1b6   : > { %v11932_v63 = vld [vmem:[%s12459_s0 + $0xd8] sm:$0xff] }
 0x1b7   : > { %v10044_v45 = vld [vmem:[%s11610_s19 + $0xbd4] ss:$8 sps:$4 sm:$0xff]  }
 0x1b8   : > { %7979 = vmatpush1.bf16.msra.mxu1 %v9901_v4  ;;  %8403 = vmatpush1.bf16.msra.mxu0 %v9904_v7  ;;  %v9981_v4 = vld [vmem:[%s11610_s19 + $0x334] ss:$8 sps:$4 sm:$0xff]  }
 0x1b9   : > { %7980 = vmatprep.subr.bf16.mxu1 %v9909_v8  ;;  %8404 = vmatprep.subr.bf16.mxu0 %v9912_v9  ;;  %v9984_v7 = vld [vmem:[%s11610_s19 + $0xb34] ss:$8 sps:$4 sm:$0xff]   ;;  %v8921_v8 = vcombine.high %v11917_v58, %v11922_v59  ;;  %v8937_v9 = vcombine.high %v11927_v62, %v11932_v63 }
 0x1bc   : > { %7981 = vmatpush1.bf16.msra.mxu1 %v9907_v10  ;;  %8405 = vmatpush1.bf16.msra.mxu0 %v9910_v11  ;;  %v9979_v10 = vld [vmem:[%s11610_s19 + $0x330] ss:$8 sps:$4 sm:$0xff]  }
 0x1bd   : > { %7982 = vmatprep.subr.bf16.mxu1 %v9915_v12  ;;  %8406 = vmatprep.subr.bf16.mxu0 %v9918_v13  ;;  %v9982_v11 = vld [vmem:[%s11610_s19 + $0xb30] ss:$8 sps:$4 sm:$0xff]   ;;  %v9987_v12 = vld [vmem:[%s11610_s19 + $0x344] ss:$8 sps:$4 sm:$0xff]  }
 0x1be   : > { %v9990_v13 = vld [vmem:[%s11610_s19 + $0xb44] ss:$8 sps:$4 sm:$0xff]  }
 0x1c0   : > { %7983 = vmatpush1.bf16.msra.mxu1 %v9913_v14  ;;  %8407 = vmatpush1.bf16.msra.mxu0 %v9916_v15  ;;  %v9985_v14 = vld [vmem:[%s11610_s19 + $0x340] ss:$8 sps:$4 sm:$0xff]  }
 0x1c1   : > { %7984 = vmatprep.subr.bf16.mxu1 %v9921_v16  ;;  %8408 = vmatprep.subr.bf16.mxu0 %v9924_v17  ;;  %v9988_v15 = vld [vmem:[%s11610_s19 + $0xb40] ss:$8 sps:$4 sm:$0xff]   ;;  %v9993_v16 = vld [vmem:[%s11610_s19 + $0x354] ss:$8 sps:$4 sm:$0xff]  }
 0x1c2   : > { %v9996_v17 = vld [vmem:[%s11610_s19 + $0xb54] ss:$8 sps:$4 sm:$0xff]  }
 0x1c4   : > { %7985 = vmatpush1.bf16.msra.mxu1 %v9919_v18  ;;  %8409 = vmatpush1.bf16.msra.mxu0 %v9922_v19  ;;  %v9991_v18 = vld [vmem:[%s11610_s19 + $0x350] ss:$8 sps:$4 sm:$0xff]  }
 0x1c5   : > { %7986 = vmatprep.subr.bf16.mxu1 %v9927_v20  ;;  %8410 = vmatprep.subr.bf16.mxu0 %v9930_v21  ;;  %v9994_v19 = vld [vmem:[%s11610_s19 + $0xb50] ss:$8 sps:$4 sm:$0xff]   ;;  %v9999_v20 = vld [vmem:[%s11610_s19 + $0x364] ss:$8 sps:$4 sm:$0xff]  }
 0x1c6   : > { %v10002_v21 = vld [vmem:[%s11610_s19 + $0xb64] ss:$8 sps:$4 sm:$0xff]  }
 0x1c8   : > { %7987 = vmatpush1.bf16.msra.mxu1 %v9925_v22  ;;  %8411 = vmatpush1.bf16.msra.mxu0 %v9928_v23  ;;  %v9997_v22 = vld [vmem:[%s11610_s19 + $0x360] ss:$8 sps:$4 sm:$0xff]  }
 0x1c9   : > { %7988 = vmatprep.subr.bf16.mxu1 %v9933_v24  ;;  %8412 = vmatprep.subr.bf16.mxu0 %v9936_v25  ;;  %v10000_v23 = vld [vmem:[%s11610_s19 + $0xb60] ss:$8 sps:$4 sm:$0xff]   ;;  %v10005_v24 = vld [vmem:[%s11610_s19 + $0x374] ss:$8 sps:$4 sm:$0xff]  }
 0x1ca   : > { %v10008_v25 = vld [vmem:[%s11610_s19 + $0xb74] ss:$8 sps:$4 sm:$0xff]  }
 0x1cc   : > { %7989 = vmatpush1.bf16.msra.mxu1 %v9931_v26  ;;  %8413 = vmatpush1.bf16.msra.mxu0 %v9934_v27  ;;  %v10003_v26 = vld [vmem:[%s11610_s19 + $0x370] ss:$8 sps:$4 sm:$0xff]  }
 0x1cd   : > { %7990 = vmatprep.subr.bf16.mxu1 %v9939_v28  ;;  %8414 = vmatprep.subr.bf16.mxu0 %v9942_v29  ;;  %v10006_v27 = vld [vmem:[%s11610_s19 + $0xb70] ss:$8 sps:$4 sm:$0xff]   ;;  %v10011_v28 = vld [vmem:[%s11610_s19 + $0x384] ss:$8 sps:$4 sm:$0xff]  }
 0x1ce   : > { %v10014_v29 = vld [vmem:[%s11610_s19 + $0xb84] ss:$8 sps:$4 sm:$0xff]  }
 0x1d0   : > { %7991 = vmatpush1.bf16.msra.mxu1 %v9937_v0  ;;  %8415 = vmatpush1.bf16.msra.mxu0 %v9940_v1  ;;  %v10009_v0 = vld [vmem:[%s11610_s19 + $0x380] ss:$8 sps:$4 sm:$0xff]  }
 0x1d1   : > { %7992 = vmatprep.subr.bf16.mxu1 %v9945_v3  ;;  %8416 = vmatprep.subr.bf16.mxu0 %v9948_v2  ;;  %v10012_v1 = vld [vmem:[%s11610_s19 + $0xb80] ss:$8 sps:$4 sm:$0xff]   ;;  %v10017_v3 = vld [vmem:[%s11610_s19 + $0x394] ss:$8 sps:$4 sm:$0xff]  }
 0x1d2   : > { %v10020_v2 = vld [vmem:[%s11610_s19 + $0xb94] ss:$8 sps:$4 sm:$0xff]  }
 0x1d4   : > { %7993 = vmatpush1.bf16.msra.mxu1 %v9943_v5  ;;  %8417 = vmatpush1.bf16.msra.mxu0 %v9946_v6  ;;  %v10015_v5 = vld [vmem:[%s11610_s19 + $0x390] ss:$8 sps:$4 sm:$0xff]  }
 0x1d5   : > { %7994 = vmatprep.subr.bf16.mxu1 %v9951_v30  ;;  %8418 = vmatprep.subr.bf16.mxu0 %v9954_v31  ;;  %v10018_v6 = vld [vmem:[%s11610_s19 + $0xb90] ss:$8 sps:$4 sm:$0xff]   ;;  %v10023_v30 = vld [vmem:[%s11610_s19 + $0x3a4] ss:$8 sps:$4 sm:$0xff]  }
 0x1d6   : > { %v10026_v31 = vld [vmem:[%s11610_s19 + $0xba4] ss:$8 sps:$4 sm:$0xff]  }
 0x1d8   : > { %7995 = vmatpush1.bf16.msra.mxu1 %v9949_v32  ;;  %8419 = vmatpush1.bf16.msra.mxu0 %v9952_v33  ;;  %v10021_v32 = vld [vmem:[%s11610_s19 + $0x3a0] ss:$8 sps:$4 sm:$0xff]  }
 0x1d9   : > { %7996 = vmatprep.subr.bf16.mxu1 %v9957_v34  ;;  %8420 = vmatprep.subr.bf16.mxu0 %v9960_v35  ;;  %v10024_v33 = vld [vmem:[%s11610_s19 + $0xba0] ss:$8 sps:$4 sm:$0xff]   ;;  %v10029_v34 = vld [vmem:[%s11610_s19 + $0x3b4] ss:$8 sps:$4 sm:$0xff]  }
 0x1da   : > { %v10032_v35 = vld [vmem:[%s11610_s19 + $0xbb4] ss:$8 sps:$4 sm:$0xff]  }
 0x1dc   : > { %7997 = vmatpush1.bf16.msra.mxu1 %v9955_v36  ;;  %8421 = vmatpush1.bf16.msra.mxu0 %v9958_v37  ;;  %v10027_v36 = vld [vmem:[%s11610_s19 + $0x3b0] ss:$8 sps:$4 sm:$0xff]  }
 0x1dd   : > { %8019 = vmatprep.subr.bf16.mxu1 %v9963_v38  ;;  %8443 = vmatprep.subr.bf16.mxu0 %v9966_v39  ;;  %v10030_v37 = vld [vmem:[%s11610_s19 + $0xbb0] ss:$8 sps:$4 sm:$0xff]   ;;  %v10035_v38 = vld [vmem:[%s11610_s19 + $0x3c4] ss:$8 sps:$4 sm:$0xff]  }
 0x1de   : > { %v10038_v39 = vld [vmem:[%s11610_s19 + $0xbc4] ss:$8 sps:$4 sm:$0xff]  }
 0x1df   : > { %7999 = vmatmul.mubr.bf16.vlgmr.msra.gmra.mrb[0].mxu1 %v8918_v48  ;;  %8423 = vmatmul.mubr.bf16.vlgmr.msra.gmra.mrb[0].mxu0 %v8934_v49  ;;  %v10039_v48 = vld [vmem:[%s11610_s19 + $0x3d0] ss:$8 sps:$4 sm:$0xff]  }
 0x1e0   : > { %8020 = vmatpush1.bf16.msra.mxu1 %v9961_v40  ;;  %8444 = vmatpush1.bf16.msra.mxu0 %v9964_v41  ;;  %v10033_v40 = vld [vmem:[%s11610_s19 + $0x3c0] ss:$8 sps:$4 sm:$0xff]   ;;  %v10042_v49 = vld [vmem:[%s11610_s19 + $0xbd0] ss:$8 sps:$4 sm:$0xff]  }
 0x1e1   : > { %8021 = vmatprep.subr.bf16.mxu1 %v9969_v52  ;;  %8445 = vmatprep.subr.bf16.mxu0 %v9972_v42  ;;  %v10036_v41 = vld [vmem:[%s11610_s19 + $0xbc0] ss:$8 sps:$4 sm:$0xff]  }
 0x1e2   : > { %8008 = vmatprep.mubr.bf16.mxu1 %v8951_v43  ;;  %8432 = vmatprep.mubr.bf16.mxu0 %v8967_v46  ;;  %v10045_v52 = vld [vmem:[%s11610_s19 + $0x3e0] ss:$8 sps:$4 sm:$0xff]   ;;  %v10053_v43 = vld [vmem:[%s11610_s19 + $0x3f4] ss:$8 sps:$4 sm:$0xff]  }
 0x1e3   : > { %v10048_v42 = vld [vmem:[%s11610_s19 + $0xbe0] ss:$8 sps:$4 sm:$0xff]   ;;  %v10056_v46 = vld [vmem:[%s11610_s19 + $0xbf4] ss:$8 sps:$4 sm:$0xff]  }
 0x1e4   : > { %8022 = vmatpush1.bf16.msra.mxu1 %v9967_v47  ;;  %8446 = vmatpush1.bf16.msra.mxu0 %v9970_v53  ;;  %v10051_v47 = vld [vmem:[%s11610_s19 + $0x3f0] ss:$8 sps:$4 sm:$0xff]  }
 0x1e5   : > { %8023 = vmatprep.subr.bf16.mxu1 %v9975_v54  ;;  %8447 = vmatprep.subr.bf16.mxu0 %v9978_v55  ;;  %v10054_v53 = vld [vmem:[%s11610_s19 + $0xbf0] ss:$8 sps:$4 sm:$0xff]   ;;  %v10059_v54 = vld [vmem:[%s11610_s19 + $0x404] ss:$8 sps:$4 sm:$0xff]  }
 0x1e6   : > { %v10062_v55 = vld [vmem:[%s11610_s19 + $0xc04] ss:$8 sps:$4 sm:$0xff]  }
 0x1e7   : > { %8009 = vmatmul.mubr.bf16.gmra.mrb[4].mxu1 %v8950_v60  ;;  %8433 = vmatmul.mubr.bf16.gmra.mrb[4].mxu0 %v8966_v61  ;;  %v4427_v60 = vld [vmem:[%s12459_s0 + $0x118] sm:$0xff] }
 0x1e8   : > { %8024 = vmatpush1.bf16.msra.mxu1 %v9973_v56  ;;  %8448 = vmatpush1.bf16.msra.mxu0 %v9976_v57  ;;  %v10057_v56 = vld [vmem:[%s11610_s19 + $0x400] ss:$8 sps:$4 sm:$0xff]   ;;  %v4443_v61 = vld [vmem:[%s12459_s0 + $0x198] sm:$0xff] }
 0x1e9   : > { %8025 = vmatprep.subr.bf16.mxu1 %v9981_v4  ;;  %8449 = vmatprep.subr.bf16.mxu0 %v9984_v7  ;;  %v10060_v57 = vld [vmem:[%s11610_s19 + $0xc00] ss:$8 sps:$4 sm:$0xff]   ;;  %v8920_v4 = vcombine.low %v11917_v58, %v11922_v59  ;;  %v8936_v7 = vcombine.low %v11927_v62, %v11932_v63  ;;  %v10068_v58 = vld [vmem:[%s11610_s19 + $0xc14] ss:$8 sps:$4 sm:$0xff]   ;;  %v8953_v59 = vcombine.high %v4427_v60, %v4443_v61  ;;  %v10063_v63 = vld [vmem:[%s11610_s19 + $0x410] ss:$8 sps:$4 sm:$0xff]  }
 0x1ea   : > { %8051 = vmatprep.mubr.bf16.mxu1 %v8921_v8  ;;  %8475 = vmatprep.mubr.bf16.mxu0 %v8937_v9  ;;  %v4435_v8 = vld [vmem:[%s12459_s0 + $0x158] sm:$0xff] }
 0x1eb   : > { %v4451_v9 = vld [vmem:[%s12459_s0 + $0x1d8] sm:$0xff] }
 0x1ec   : > { %8026 = vmatpush1.bf16.msra.mxu1 %v9979_v10  ;;  %8450 = vmatpush1.bf16.msra.mxu0 %v9982_v11  ;;  %v10065_v10 = vld [vmem:[%s11610_s19 + $0x414] ss:$8 sps:$4 sm:$0xff]   ;;  %v8969_v62 = vcombine.high %v4435_v8, %v4451_v9  ;;  %v10066_v11 = vld [vmem:[%s11610_s19 + $0xc10] ss:$8 sps:$4 sm:$0xff]  }
 0x1ed   : > { %8027 = vmatprep.subr.bf16.mxu1 %v9987_v12  ;;  %8451 = vmatprep.subr.bf16.mxu0 %v9990_v13  ;;  %v10071_v12 = vld [vmem:[%s11610_s19 + $0x424] ss:$8 sps:$4 sm:$0xff]  }
 0x1ee   : > { %v10074_v13 = vld [vmem:[%s11610_s19 + $0xc24] ss:$8 sps:$4 sm:$0xff]  }
 0x1f0   : > { %8028 = vmatpush1.bf16.msra.mxu1 %v9985_v14  ;;  %8452 = vmatpush1.bf16.msra.mxu0 %v9988_v15  ;;  %v10069_v14 = vld [vmem:[%s11610_s19 + $0x420] ss:$8 sps:$4 sm:$0xff]  }
 0x1f1   : > { %8029 = vmatprep.subr.bf16.mxu1 %v9993_v16  ;;  %8453 = vmatprep.subr.bf16.mxu0 %v9996_v17  ;;  %v10072_v15 = vld [vmem:[%s11610_s19 + $0xc20] ss:$8 sps:$4 sm:$0xff]  }
 0x1f2   : > { %v12021_v16 = vld [vmem:[%s12459_s0 + $0x20] sm:$0xff] }
 0x1f3   : > { %v12026_v17 = vld [vmem:[%s12459_s0 + $0xa0] sm:$0xff] }
 0x1f4   : > { %8030 = vmatpush1.bf16.msra.mxu1 %v9991_v18  ;;  %8454 = vmatpush1.bf16.msra.mxu0 %v9994_v19  ;;  %v8952_v18 = vcombine.low %v4427_v60, %v4443_v61  ;;  %v8968_v19 = vcombine.low %v4435_v8, %v4451_v9  ;;  %v10137_v60 = vld [vmem:[%s11610_s19 + $0x4d4] ss:$8 sps:$4 sm:$0xff]   ;;  %v10143_v8 = vld [vmem:[%s11610_s19 + $0x4e4] ss:$8 sps:$4 sm:$0xff]  }
 0x1f5   : > { %8031 = vmatprep.subr.bf16.mxu1 %v9999_v20  ;;  %8455 = vmatprep.subr.bf16.mxu0 %v10002_v21  ;;  %v12031_v20 = vld [vmem:[%s12459_s0 + $0x60] sm:$0xff]  ;;  %v10140_v61 = vld [vmem:[%s11610_s19 + $0xcd4] ss:$8 sps:$4 sm:$0xff]  }
 0x1f6   : > { %v12036_v21 = vld [vmem:[%s12459_s0 + $0xe0] sm:$0xff] }
 0x1f7   : > { %v10146_v9 = vld [vmem:[%s11610_s19 + $0xce4] ss:$8 sps:$4 sm:$0xff]  }
 0x1f8   : > { %8032 = vmatpush1.bf16.msra.mxu1 %v9997_v22  ;;  %8456 = vmatpush1.bf16.msra.mxu0 %v10000_v23  ;;  %v10077_v22 = vld [vmem:[%s11610_s19 + $0x434] ss:$8 sps:$4 sm:$0xff]  }
 0x1f9   : > { %8033 = vmatprep.subr.bf16.mxu1 %v10005_v24  ;;  %8457 = vmatprep.subr.bf16.mxu0 %v10008_v25  ;;  %v10080_v23 = vld [vmem:[%s11610_s19 + $0xc34] ss:$8 sps:$4 sm:$0xff]   ;;  %v8923_v24 = vcombine.high %v12021_v16, %v12026_v17  ;;  %v8939_v25 = vcombine.high %v12031_v20, %v12036_v21 }
 0x1fc   : > { %8034 = vmatpush1.bf16.msra.mxu1 %v10003_v26  ;;  %8458 = vmatpush1.bf16.msra.mxu0 %v10006_v27  ;;  %v10075_v26 = vld [vmem:[%s11610_s19 + $0x430] ss:$8 sps:$4 sm:$0xff]  }
 0x1fd   : > { %8035 = vmatprep.subr.bf16.mxu1 %v10011_v28  ;;  %8459 = vmatprep.subr.bf16.mxu0 %v10014_v29  ;;  %v10078_v27 = vld [vmem:[%s11610_s19 + $0xc30] ss:$8 sps:$4 sm:$0xff]   ;;  %v10083_v28 = vld [vmem:[%s11610_s19 + $0x444] ss:$8 sps:$4 sm:$0xff]  }
 0x1fe   : > { %v10086_v29 = vld [vmem:[%s11610_s19 + $0xc44] ss:$8 sps:$4 sm:$0xff]  }
 0x200   : > { %8036 = vmatpush1.bf16.msra.mxu1 %v10009_v0  ;;  %8460 = vmatpush1.bf16.msra.mxu0 %v10012_v1  ;;  %v10081_v0 = vld [vmem:[%s11610_s19 + $0x440] ss:$8 sps:$4 sm:$0xff]  }
 0x201   : > { %8037 = vmatprep.subr.bf16.mxu1 %v10017_v3  ;;  %8461 = vmatprep.subr.bf16.mxu0 %v10020_v2  ;;  %v10084_v1 = vld [vmem:[%s11610_s19 + $0xc40] ss:$8 sps:$4 sm:$0xff]   ;;  %v10089_v3 = vld [vmem:[%s11610_s19 + $0x454] ss:$8 sps:$4 sm:$0xff]  }
 0x202   : > { %v10092_v2 = vld [vmem:[%s11610_s19 + $0xc54] ss:$8 sps:$4 sm:$0xff]  }
 0x204   : > { %8038 = vmatpush1.bf16.msra.mxu1 %v10015_v5  ;;  %8462 = vmatpush1.bf16.msra.mxu0 %v10018_v6  ;;  %v10087_v5 = vld [vmem:[%s11610_s19 + $0x450] ss:$8 sps:$4 sm:$0xff]  }
 0x205   : > { %8039 = vmatprep.subr.bf16.mxu1 %v10023_v30  ;;  %8463 = vmatprep.subr.bf16.mxu0 %v10026_v31  ;;  %v10090_v6 = vld [vmem:[%s11610_s19 + $0xc50] ss:$8 sps:$4 sm:$0xff]   ;;  %v10095_v30 = vld [vmem:[%s11610_s19 + $0x464] ss:$8 sps:$4 sm:$0xff]  }
 0x206   : > { %v10098_v31 = vld [vmem:[%s11610_s19 + $0xc64] ss:$8 sps:$4 sm:$0xff]  }
 0x208   : > { %8040 = vmatpush1.bf16.msra.mxu1 %v10021_v32  ;;  %8464 = vmatpush1.bf16.msra.mxu0 %v10024_v33  ;;  %v10093_v32 = vld [vmem:[%s11610_s19 + $0x460] ss:$8 sps:$4 sm:$0xff]  }
 0x209   : > { %8041 = vmatprep.subr.bf16.mxu1 %v10029_v34  ;;  %8465 = vmatprep.subr.bf16.mxu0 %v10032_v35  ;;  %v10096_v33 = vld [vmem:[%s11610_s19 + $0xc60] ss:$8 sps:$4 sm:$0xff]   ;;  %v10101_v34 = vld [vmem:[%s11610_s19 + $0x474] ss:$8 sps:$4 sm:$0xff]  }
 0x20a   : > { %v10104_v35 = vld [vmem:[%s11610_s19 + $0xc74] ss:$8 sps:$4 sm:$0xff]  }
 0x20c   : > { %8042 = vmatpush1.bf16.msra.mxu1 %v10027_v36  ;;  %8466 = vmatpush1.bf16.msra.mxu0 %v10030_v37  ;;  %v10099_v36 = vld [vmem:[%s11610_s19 + $0x470] ss:$8 sps:$4 sm:$0xff]  }
 0x20d   : > { %8043 = vmatprep.subr.bf16.mxu1 %v10035_v38  ;;  %8467 = vmatprep.subr.bf16.mxu0 %v10038_v39  ;;  %v10102_v37 = vld [vmem:[%s11610_s19 + $0xc70] ss:$8 sps:$4 sm:$0xff]   ;;  %v10107_v38 = vld [vmem:[%s11610_s19 + $0x484] ss:$8 sps:$4 sm:$0xff]  }
 0x20e   : > { %v10110_v39 = vld [vmem:[%s11610_s19 + $0xc84] ss:$8 sps:$4 sm:$0xff]  }
 0x210   : > { %8044 = vmatpush1.bf16.msra.mxu1 %v10033_v40  ;;  %8468 = vmatpush1.bf16.msra.mxu0 %v10036_v41  ;;  %v10105_v40 = vld [vmem:[%s11610_s19 + $0x480] ss:$8 sps:$4 sm:$0xff]  }
 0x211   : > { %8045 = vmatprep.subr.bf16.mxu1 %v10041_v44  ;;  %8469 = vmatprep.subr.bf16.mxu0 %v10044_v45  ;;  %v10108_v41 = vld [vmem:[%s11610_s19 + $0xc80] ss:$8 sps:$4 sm:$0xff]   ;;  %v10113_v44 = vld [vmem:[%s11610_s19 + $0x494] ss:$8 sps:$4 sm:$0xff]  }
 0x212   : > { %v10116_v45 = vld [vmem:[%s11610_s19 + $0xc94] ss:$8 sps:$4 sm:$0xff]  }
 0x214   : > { %8046 = vmatpush1.bf16.msra.mxu1 %v10039_v48  ;;  %8470 = vmatpush1.bf16.msra.mxu0 %v10042_v49  ;;  %v10111_v48 = vld [vmem:[%s11610_s19 + $0x490] ss:$8 sps:$4 sm:$0xff]  }
 0x215   : > { %8047 = vmatprep.subr.bf16.mxu1 %v10047_v50  ;;  %8471 = vmatprep.subr.bf16.mxu0 %v10050_v51  ;;  %v10114_v49 = vld [vmem:[%s11610_s19 + $0xc90] ss:$8 sps:$4 sm:$0xff]   ;;  %v10119_v50 = vld [vmem:[%s11610_s19 + $0x4a4] ss:$8 sps:$4 sm:$0xff]  }
 0x216   : > { %v10122_v51 = vld [vmem:[%s11610_s19 + $0xca4] ss:$8 sps:$4 sm:$0xff]  }
 0x218   : > { %8048 = vmatpush1.bf16.msra.mxu1 %v10045_v52  ;;  %8472 = vmatpush1.bf16.msra.mxu0 %v10048_v42  ;;  %v10117_v52 = vld [vmem:[%s11610_s19 + $0x4a0] ss:$8 sps:$4 sm:$0xff]  }
 0x219   : > { %8049 = vmatprep.subr.bf16.mxu1 %v10053_v43  ;;  %8473 = vmatprep.subr.bf16.mxu0 %v10056_v46  ;;  %v10120_v42 = vld [vmem:[%s11610_s19 + $0xca0] ss:$8 sps:$4 sm:$0xff]   ;;  %v10125_v43 = vld [vmem:[%s11610_s19 + $0x4b4] ss:$8 sps:$4 sm:$0xff]  }
 0x21a   : > { %v10128_v46 = vld [vmem:[%s11610_s19 + $0xcb4] ss:$8 sps:$4 sm:$0xff]  }
 0x21c   : > { %8050 = vmatpush1.bf16.msra.mxu1 %v10051_v47  ;;  %8474 = vmatpush1.bf16.msra.mxu0 %v10054_v53  ;;  %v10123_v47 = vld [vmem:[%s11610_s19 + $0x4b0] ss:$8 sps:$4 sm:$0xff]  }
 0x21d   : > { %8072 = vmatprep.subr.bf16.mxu1 %v10059_v54  ;;  %8496 = vmatprep.subr.bf16.mxu0 %v10062_v55  ;;  %v10126_v53 = vld [vmem:[%s11610_s19 + $0xcb0] ss:$8 sps:$4 sm:$0xff]   ;;  %v10131_v54 = vld [vmem:[%s11610_s19 + $0x4c4] ss:$8 sps:$4 sm:$0xff]  }
 0x21e   : > { %v10134_v55 = vld [vmem:[%s11610_s19 + $0xcc4] ss:$8 sps:$4 sm:$0xff]  }
 0x21f   : > { %8052 = vmatmul.mubr.bf16.vlgmr.msra.gmra.mrb[0].mxu1 %v8920_v4  ;;  %8476 = vmatmul.mubr.bf16.vlgmr.msra.gmra.mrb[0].mxu0 %v8936_v7  ;;  %v10135_v4 = vld [vmem:[%s11610_s19 + $0x4d0] ss:$8 sps:$4 sm:$0xff]  }
 0x220   : > { %8073 = vmatpush1.bf16.msra.mxu1 %v10057_v56  ;;  %8497 = vmatpush1.bf16.msra.mxu0 %v10060_v57  ;;  %v10129_v56 = vld [vmem:[%s11610_s19 + $0x4c0] ss:$8 sps:$4 sm:$0xff]   ;;  %v10138_v7 = vld [vmem:[%s11610_s19 + $0xcd0] ss:$8 sps:$4 sm:$0xff]  }
 0x221   : > { %8074 = vmatprep.subr.bf16.mxu1 %v10065_v10  ;;  %8498 = vmatprep.subr.bf16.mxu0 %v10068_v58  ;;  %v10132_v57 = vld [vmem:[%s11610_s19 + $0xcc0] ss:$8 sps:$4 sm:$0xff]  }
 0x222   : > { %8061 = vmatprep.mubr.bf16.mxu1 %v8953_v59  ;;  %8485 = vmatprep.mubr.bf16.mxu0 %v8969_v62  ;;  %v10141_v10 = vld [vmem:[%s11610_s19 + $0x4e0] ss:$8 sps:$4 sm:$0xff]   ;;  %v10149_v59 = vld [vmem:[%s11610_s19 + $0x4f4] ss:$8 sps:$4 sm:$0xff]  }
 0x223   : > { %v10144_v58 = vld [vmem:[%s11610_s19 + $0xce0] ss:$8 sps:$4 sm:$0xff]   ;;  %v10152_v62 = vld [vmem:[%s11610_s19 + $0xcf4] ss:$8 sps:$4 sm:$0xff]  }
 0x224   : > { %8075 = vmatpush1.bf16.msra.mxu1 %v10063_v63  ;;  %8499 = vmatpush1.bf16.msra.mxu0 %v10066_v11  ;;  %v10147_v63 = vld [vmem:[%s11610_s19 + $0x4f0] ss:$8 sps:$4 sm:$0xff]  }
 0x225   : > { %8076 = vmatprep.subr.bf16.mxu1 %v10071_v12  ;;  %8500 = vmatprep.subr.bf16.mxu0 %v10074_v13  ;;  %v10150_v11 = vld [vmem:[%s11610_s19 + $0xcf0] ss:$8 sps:$4 sm:$0xff]   ;;  %v10155_v12 = vld [vmem:[%s11610_s19 + $0x504] ss:$8 sps:$4 sm:$0xff]  }
 0x226   : > { %v10158_v13 = vld [vmem:[%s11610_s19 + $0xd04] ss:$8 sps:$4 sm:$0xff]  }
 0x227   : > { %8062 = vmatmul.mubr.bf16.gmra.mrb[4].mxu1 %v8952_v18  ;;  %8486 = vmatmul.mubr.bf16.gmra.mrb[4].mxu0 %v8968_v19  ;;  %v4436_v18 = vld [vmem:[%s12459_s0 + $0x160] sm:$0xff] }
 0x228   : > { %8077 = vmatpush1.bf16.msra.mxu1 %v10069_v14  ;;  %8501 = vmatpush1.bf16.msra.mxu0 %v10072_v15  ;;  %v4428_v14 = vld [vmem:[%s12459_s0 + $0x120] sm:$0xff] }
 0x229   : > { %8078 = vmatprep.subr.bf16.mxu1 %v10077_v22  ;;  %8502 = vmatprep.subr.bf16.mxu0 %v10080_v23  ;;  %v4444_v15 = vld [vmem:[%s12459_s0 + $0x1a0] sm:$0xff]  ;;  %v8922_v22 = vcombine.low %v12021_v16, %v12026_v17  ;;  %v8938_v23 = vcombine.low %v12031_v20, %v12036_v21  ;;  %v12123_v20 = vld [vmem:[%s12459_s0 + $0x28] sm:$0xff] }
 0x22a   : > { %8104 = vmatprep.mubr.bf16.mxu1 %v8923_v24  ;;  %8528 = vmatprep.mubr.bf16.mxu0 %v8939_v25  ;;  %v4452_v19 = vld [vmem:[%s12459_s0 + $0x1e0] sm:$0xff]  ;;  %v12128_v21 = vld [vmem:[%s12459_s0 + $0xa8] sm:$0xff] }
 0x22b   : > { %v10153_v24 = vld [vmem:[%s11610_s19 + $0x500] ss:$8 sps:$4 sm:$0xff]   ;;  %v10167_v16 = vld [vmem:[%s11610_s19 + $0x524] ss:$8 sps:$4 sm:$0xff]  }
 0x22c   : > { %8079 = vmatpush1.bf16.msra.mxu1 %v10075_v26  ;;  %8503 = vmatpush1.bf16.msra.mxu0 %v10078_v27  ;;  %v10156_v25 = vld [vmem:[%s11610_s19 + $0xd00] ss:$8 sps:$4 sm:$0xff]   ;;  %v10161_v26 = vld [vmem:[%s11610_s19 + $0x514] ss:$8 sps:$4 sm:$0xff]   ;;  %v10170_v17 = vld [vmem:[%s11610_s19 + $0xd24] ss:$8 sps:$4 sm:$0xff]  }
 0x22d   : > { %8080 = vmatprep.subr.bf16.mxu1 %v10083_v28  ;;  %8504 = vmatprep.subr.bf16.mxu0 %v10086_v29  ;;  %v10164_v27 = vld [vmem:[%s11610_s19 + $0xd14] ss:$8 sps:$4 sm:$0xff]   ;;  %v10159_v28 = vld [vmem:[%s11610_s19 + $0x510] ss:$8 sps:$4 sm:$0xff]  }
 0x22e   : > { %v10162_v29 = vld [vmem:[%s11610_s19 + $0xd10] ss:$8 sps:$4 sm:$0xff]  }
 0x230   : > { %8081 = vmatpush1.bf16.msra.mxu1 %v10081_v0  ;;  %8505 = vmatpush1.bf16.msra.mxu0 %v10084_v1  ;;  %v8955_v0 = vcombine.high %v4428_v14, %v4444_v15  ;;  %v8971_v1 = vcombine.high %v4436_v18, %v4452_v19 }
 0x231   : > { %8082 = vmatprep.subr.bf16.mxu1 %v10089_v3  ;;  %8506 = vmatprep.subr.bf16.mxu0 %v10092_v2  ;;  %v12133_v3 = vld [vmem:[%s12459_s0 + $0x68] sm:$0xff] }
 0x232   : > { %v12138_v2 = vld [vmem:[%s12459_s0 + $0xe8] sm:$0xff] }
 0x234   : > { %8083 = vmatpush1.bf16.msra.mxu1 %v10087_v5  ;;  %8507 = vmatpush1.bf16.msra.mxu0 %v10090_v6  ;;  %v8954_v5 = vcombine.low %v4428_v14, %v4444_v15  ;;  %v8970_v6 = vcombine.low %v4436_v18, %v4452_v19  ;;  %v10225_v14 = vld [vmem:[%s11610_s19 + $0x5c0] ss:$8 sps:$4 sm:$0xff]   ;;  %v10233_v18 = vld [vmem:[%s11610_s19 + $0x5d4] ss:$8 sps:$4 sm:$0xff]  }
 0x235   : > { %8084 = vmatprep.subr.bf16.mxu1 %v10095_v30  ;;  %8508 = vmatprep.subr.bf16.mxu0 %v10098_v31  ;;  %v10165_v30 = vld [vmem:[%s11610_s19 + $0x520] ss:$8 sps:$4 sm:$0xff]   ;;  %v10236_v19 = vld [vmem:[%s11610_s19 + $0xdd4] ss:$8 sps:$4 sm:$0xff]  }
 0x236   : > { %v10168_v31 = vld [vmem:[%s11610_s19 + $0xd20] ss:$8 sps:$4 sm:$0xff]  }
 0x237   : > { %v10228_v15 = vld [vmem:[%s11610_s19 + $0xdc0] ss:$8 sps:$4 sm:$0xff]  }
 0x238   : > { %8085 = vmatpush1.bf16.msra.mxu1 %v10093_v32  ;;  %8509 = vmatpush1.bf16.msra.mxu0 %v10096_v33  ;;  %v10173_v32 = vld [vmem:[%s11610_s19 + $0x534] ss:$8 sps:$4 sm:$0xff]  }
 0x239   : > { %8086 = vmatprep.subr.bf16.mxu1 %v10101_v34  ;;  %8510 = vmatprep.subr.bf16.mxu0 %v10104_v35  ;;  %v10176_v33 = vld [vmem:[%s11610_s19 + $0xd34] ss:$8 sps:$4 sm:$0xff]   ;;  %v8925_v34 = vcombine.high %v12123_v20, %v12128_v21  ;;  %v8941_v35 = vcombine.high %v12133_v3, %v12138_v2 }
 0x23c   : > { %8087 = vmatpush1.bf16.msra.mxu1 %v10099_v36  ;;  %8511 = vmatpush1.bf16.msra.mxu0 %v10102_v37  ;;  %v10171_v36 = vld [vmem:[%s11610_s19 + $0x530] ss:$8 sps:$4 sm:$0xff]  }
 0x23d   : > { %8088 = vmatprep.subr.bf16.mxu1 %v10107_v38  ;;  %8512 = vmatprep.subr.bf16.mxu0 %v10110_v39  ;;  %v10174_v37 = vld [vmem:[%s11610_s19 + $0xd30] ss:$8 sps:$4 sm:$0xff]   ;;  %v10179_v38 = vld [vmem:[%s11610_s19 + $0x544] ss:$8 sps:$4 sm:$0xff]  }
 0x23e   : > { %v10182_v39 = vld [vmem:[%s11610_s19 + $0xd44] ss:$8 sps:$4 sm:$0xff]  }
 0x240   : > { %8089 = vmatpush1.bf16.msra.mxu1 %v10105_v40  ;;  %8513 = vmatpush1.bf16.msra.mxu0 %v10108_v41  ;;  %v10177_v40 = vld [vmem:[%s11610_s19 + $0x540] ss:$8 sps:$4 sm:$0xff]  }
 0x241   : > { %8090 = vmatprep.subr.bf16.mxu1 %v10113_v44  ;;  %8514 = vmatprep.subr.bf16.mxu0 %v10116_v45  ;;  %v10180_v41 = vld [vmem:[%s11610_s19 + $0xd40] ss:$8 sps:$4 sm:$0xff]   ;;  %v10185_v44 = vld [vmem:[%s11610_s19 + $0x554] ss:$8 sps:$4 sm:$0xff]  }
 0x242   : > { %v10188_v45 = vld [vmem:[%s11610_s19 + $0xd54] ss:$8 sps:$4 sm:$0xff]  }
 0x244   : > { %8091 = vmatpush1.bf16.msra.mxu1 %v10111_v48  ;;  %8515 = vmatpush1.bf16.msra.mxu0 %v10114_v49  ;;  %v10183_v48 = vld [vmem:[%s11610_s19 + $0x550] ss:$8 sps:$4 sm:$0xff]  }
 0x245   : > { %8092 = vmatprep.subr.bf16.mxu1 %v10119_v50  ;;  %8516 = vmatprep.subr.bf16.mxu0 %v10122_v51  ;;  %v10186_v49 = vld [vmem:[%s11610_s19 + $0xd50] ss:$8 sps:$4 sm:$0xff]   ;;  %v10191_v50 = vld [vmem:[%s11610_s19 + $0x564] ss:$8 sps:$4 sm:$0xff]  }
 0x246   : > { %v10194_v51 = vld [vmem:[%s11610_s19 + $0xd64] ss:$8 sps:$4 sm:$0xff]  }
 0x248   : > { %8093 = vmatpush1.bf16.msra.mxu1 %v10117_v52  ;;  %8517 = vmatpush1.bf16.msra.mxu0 %v10120_v42  ;;  %v10189_v52 = vld [vmem:[%s11610_s19 + $0x560] ss:$8 sps:$4 sm:$0xff]  }
 0x249   : > { %8094 = vmatprep.subr.bf16.mxu1 %v10125_v43  ;;  %8518 = vmatprep.subr.bf16.mxu0 %v10128_v46  ;;  %v10192_v42 = vld [vmem:[%s11610_s19 + $0xd60] ss:$8 sps:$4 sm:$0xff]   ;;  %v10197_v43 = vld [vmem:[%s11610_s19 + $0x574] ss:$8 sps:$4 sm:$0xff]  }
 0x24a   : > { %v10200_v46 = vld [vmem:[%s11610_s19 + $0xd74] ss:$8 sps:$4 sm:$0xff]  }
 0x24c   : > { %8095 = vmatpush1.bf16.msra.mxu1 %v10123_v47  ;;  %8519 = vmatpush1.bf16.msra.mxu0 %v10126_v53  ;;  %v10195_v47 = vld [vmem:[%s11610_s19 + $0x570] ss:$8 sps:$4 sm:$0xff]  }
 0x24d   : > { %8096 = vmatprep.subr.bf16.mxu1 %v10131_v54  ;;  %8520 = vmatprep.subr.bf16.mxu0 %v10134_v55  ;;  %v10198_v53 = vld [vmem:[%s11610_s19 + $0xd70] ss:$8 sps:$4 sm:$0xff]   ;;  %v10203_v54 = vld [vmem:[%s11610_s19 + $0x584] ss:$8 sps:$4 sm:$0xff]  }
 0x24e   : > { %v10206_v55 = vld [vmem:[%s11610_s19 + $0xd84] ss:$8 sps:$4 sm:$0xff]  }
 0x250   : > { %8097 = vmatpush1.bf16.msra.mxu1 %v10129_v56  ;;  %8521 = vmatpush1.bf16.msra.mxu0 %v10132_v57  ;;  %v10201_v56 = vld [vmem:[%s11610_s19 + $0x580] ss:$8 sps:$4 sm:$0xff]  }
 0x251   : > { %8098 = vmatprep.subr.bf16.mxu1 %v10137_v60  ;;  %8522 = vmatprep.subr.bf16.mxu0 %v10140_v61  ;;  %v10204_v57 = vld [vmem:[%s11610_s19 + $0xd80] ss:$8 sps:$4 sm:$0xff]   ;;  %v10209_v60 = vld [vmem:[%s11610_s19 + $0x594] ss:$8 sps:$4 sm:$0xff]  }
 0x252   : > { %v10212_v61 = vld [vmem:[%s11610_s19 + $0xd94] ss:$8 sps:$4 sm:$0xff]  }
 0x254   : > { %8099 = vmatpush1.bf16.msra.mxu1 %v10135_v4  ;;  %8523 = vmatpush1.bf16.msra.mxu0 %v10138_v7  ;;  %v10207_v4 = vld [vmem:[%s11610_s19 + $0x590] ss:$8 sps:$4 sm:$0xff]  }
 0x255   : > { %8100 = vmatprep.subr.bf16.mxu1 %v10143_v8  ;;  %8524 = vmatprep.subr.bf16.mxu0 %v10146_v9  ;;  %v10210_v7 = vld [vmem:[%s11610_s19 + $0xd90] ss:$8 sps:$4 sm:$0xff]   ;;  %v10215_v8 = vld [vmem:[%s11610_s19 + $0x5a4] ss:$8 sps:$4 sm:$0xff]  }
 0x256   : > { %v10218_v9 = vld [vmem:[%s11610_s19 + $0xda4] ss:$8 sps:$4 sm:$0xff]  }
 0x258   : > { %8101 = vmatpush1.bf16.msra.mxu1 %v10141_v10  ;;  %8525 = vmatpush1.bf16.msra.mxu0 %v10144_v58  ;;  %v10213_v10 = vld [vmem:[%s11610_s19 + $0x5a0] ss:$8 sps:$4 sm:$0xff]  }
 0x259   : > { %8102 = vmatprep.subr.bf16.mxu1 %v10149_v59  ;;  %8526 = vmatprep.subr.bf16.mxu0 %v10152_v62  ;;  %v10216_v58 = vld [vmem:[%s11610_s19 + $0xda0] ss:$8 sps:$4 sm:$0xff]   ;;  %v10221_v59 = vld [vmem:[%s11610_s19 + $0x5b4] ss:$8 sps:$4 sm:$0xff]  }
 0x25a   : > { %v10224_v62 = vld [vmem:[%s11610_s19 + $0xdb4] ss:$8 sps:$4 sm:$0xff]  }
 0x25c   : > { %8103 = vmatpush1.bf16.msra.mxu1 %v10147_v63  ;;  %8527 = vmatpush1.bf16.msra.mxu0 %v10150_v11  ;;  %v10219_v63 = vld [vmem:[%s11610_s19 + $0x5b0] ss:$8 sps:$4 sm:$0xff]  }
 0x25d   : > { %8125 = vmatprep.subr.bf16.mxu1 %v10155_v12  ;;  %8549 = vmatprep.subr.bf16.mxu0 %v10158_v13  ;;  %v10222_v11 = vld [vmem:[%s11610_s19 + $0xdb0] ss:$8 sps:$4 sm:$0xff]   ;;  %v10227_v12 = vld [vmem:[%s11610_s19 + $0x5c4] ss:$8 sps:$4 sm:$0xff]  }
 0x25e   : > { %v10230_v13 = vld [vmem:[%s11610_s19 + $0xdc4] ss:$8 sps:$4 sm:$0xff]  }
 0x25f   : > { %8105 = vmatmul.mubr.bf16.vlgmr.msra.gmra.mrb[0].mxu1 %v8922_v22  ;;  %8529 = vmatmul.mubr.bf16.vlgmr.msra.gmra.mrb[0].mxu0 %v8938_v23  ;;  %v10231_v22 = vld [vmem:[%s11610_s19 + $0x5d0] ss:$8 sps:$4 sm:$0xff]  }
 0x260   : > { %8126 = vmatpush1.bf16.msra.mxu1 %v10153_v24  ;;  %8550 = vmatpush1.bf16.msra.mxu0 %v10156_v25  ;;  %v10234_v23 = vld [vmem:[%s11610_s19 + $0xdd0] ss:$8 sps:$4 sm:$0xff]   ;;  %v10239_v24 = vld [vmem:[%s11610_s19 + $0x5e4] ss:$8 sps:$4 sm:$0xff]  }
 0x261   : > { %8127 = vmatprep.subr.bf16.mxu1 %v10161_v26  ;;  %8551 = vmatprep.subr.bf16.mxu0 %v10164_v27  ;;  %v10242_v25 = vld [vmem:[%s11610_s19 + $0xde4] ss:$8 sps:$4 sm:$0xff]   ;;  %v10237_v26 = vld [vmem:[%s11610_s19 + $0x5e0] ss:$8 sps:$4 sm:$0xff]  }
 0x262   : > { %8114 = vmatprep.mubr.bf16.mxu1 %v8955_v0  ;;  %8538 = vmatprep.mubr.bf16.mxu0 %v8971_v1  ;;  %v10240_v27 = vld [vmem:[%s11610_s19 + $0xde0] ss:$8 sps:$4 sm:$0xff]   ;;  %v10243_v0 = vld [vmem:[%s11610_s19 + $0x5f0] ss:$8 sps:$4 sm:$0xff]  }
 0x263   : > { %v10246_v1 = vld [vmem:[%s11610_s19 + $0xdf0] ss:$8 sps:$4 sm:$0xff]  }
 0x264   : > { %8128 = vmatpush1.bf16.msra.mxu1 %v10159_v28  ;;  %8552 = vmatpush1.bf16.msra.mxu0 %v10162_v29  ;;  %v10245_v28 = vld [vmem:[%s11610_s19 + $0x5f4] ss:$8 sps:$4 sm:$0xff]  }
 0x265   : > { %8129 = vmatprep.subr.bf16.mxu1 %v10167_v16  ;;  %8553 = vmatprep.subr.bf16.mxu0 %v10170_v17  ;;  %v10248_v29 = vld [vmem:[%s11610_s19 + $0xdf4] ss:$8 sps:$4 sm:$0xff]   ;;  %v10251_v16 = vld [vmem:[%s11610_s19 + $0x604] ss:$8 sps:$4 sm:$0xff]  }
 0x266   : > { %v10254_v17 = vld [vmem:[%s11610_s19 + $0xe04] ss:$8 sps:$4 sm:$0xff]  }
 0x267   : > { %8115 = vmatmul.mubr.bf16.gmra.mrb[4].mxu1 %v8954_v5  ;;  %8539 = vmatmul.mubr.bf16.gmra.mrb[4].mxu0 %v8970_v6  ;;  %v4429_v5 = vld [vmem:[%s12459_s0 + $0x128] sm:$0xff]  ;;  %v8924_v6 = vcombine.low %v12123_v20, %v12128_v21 }
 0x268   : > { %8130 = vmatpush1.bf16.msra.mxu1 %v10165_v30  ;;  %8554 = vmatpush1.bf16.msra.mxu0 %v10168_v31  ;;  %v8940_v30 = vcombine.low %v12133_v3, %v12138_v2  ;;  %v4445_v31 = vld [vmem:[%s12459_s0 + $0x1a8] sm:$0xff]  ;;  %v10257_v3 = vld [vmem:[%s11610_s19 + $0x614] ss:$8 sps:$4 sm:$0xff]  }
 0x269   : > { %8131 = vmatprep.subr.bf16.mxu1 %v10173_v32  ;;  %8555 = vmatprep.subr.bf16.mxu0 %v10176_v33  ;;  %v4437_v32 = vld [vmem:[%s12459_s0 + $0x168] sm:$0xff]  ;;  %v10260_v2 = vld [vmem:[%s11610_s19 + $0xe14] ss:$8 sps:$4 sm:$0xff]  }
 0x26a   : > { %8157 = vmatprep.mubr.bf16.mxu1 %v8925_v34  ;;  %8581 = vmatprep.mubr.bf16.mxu0 %v8941_v35  ;;  %v4453_v33 = vld [vmem:[%s12459_s0 + $0x1e8] sm:$0xff]  ;;  %v8957_v34 = vcombine.high %v4429_v5, %v4445_v31 }
 0x26b   : > { %v10249_v20 = vld [vmem:[%s11610_s19 + $0x600] ss:$8 sps:$4 sm:$0xff]   ;;  %v8973_v35 = vcombine.high %v4437_v32, %v4453_v33 }
 0x26c   : > { %8132 = vmatpush1.bf16.msra.mxu1 %v10171_v36  ;;  %8556 = vmatpush1.bf16.msra.mxu0 %v10174_v37  ;;  %v10252_v21 = vld [vmem:[%s11610_s19 + $0xe00] ss:$8 sps:$4 sm:$0xff]   ;;  %v10255_v36 = vld [vmem:[%s11610_s19 + $0x610] ss:$8 sps:$4 sm:$0xff]  }
 0x26d   : > { %8133 = vmatprep.subr.bf16.mxu1 %v10179_v38  ;;  %8557 = vmatprep.subr.bf16.mxu0 %v10182_v39  ;;  %v10258_v37 = vld [vmem:[%s11610_s19 + $0xe10] ss:$8 sps:$4 sm:$0xff]   ;;  %v10263_v38 = vld [vmem:[%s11610_s19 + $0x624] ss:$8 sps:$4 sm:$0xff]  }
 0x26e   : > { %v10266_v39 = vld [vmem:[%s11610_s19 + $0xe24] ss:$8 sps:$4 sm:$0xff]  }
 0x270   : > { %8134 = vmatpush1.bf16.msra.mxu1 %v10177_v40  ;;  %8558 = vmatpush1.bf16.msra.mxu0 %v10180_v41  ;;  %v12227_v40 = vld [vmem:[%s12459_s0 + $0x30] sm:$0xff]  ;;  %v8956_v41 = vcombine.low %v4429_v5, %v4445_v31  ;;  %v10321_v5 = vld [vmem:[%s11610_s19 + $0x6c0] ss:$8 sps:$4 sm:$0xff]  }
 0x271   : > { %8135 = vmatprep.subr.bf16.mxu1 %v10185_v44  ;;  %8559 = vmatprep.subr.bf16.mxu0 %v10188_v45  ;;  %v8972_v44 = vcombine.low %v4437_v32, %v4453_v33  ;;  %v12232_v45 = vld [vmem:[%s12459_s0 + $0xb0] sm:$0xff] }
 0x272   : > { %v10332_v31 = vld [vmem:[%s11610_s19 + $0xed4] ss:$8 sps:$4 sm:$0xff]   ;;  %v10327_v32 = vld [vmem:[%s11610_s19 + $0x6d0] ss:$8 sps:$4 sm:$0xff]  }
 0x273   : > { %v10330_v33 = vld [vmem:[%s11610_s19 + $0xed0] ss:$8 sps:$4 sm:$0xff]  }
 0x274   : > { %8136 = vmatpush1.bf16.msra.mxu1 %v10183_v48  ;;  %8560 = vmatpush1.bf16.msra.mxu0 %v10186_v49  ;;  %v12237_v48 = vld [vmem:[%s12459_s0 + $0x70] sm:$0xff] }
 0x275   : > { %8137 = vmatprep.subr.bf16.mxu1 %v10191_v50  ;;  %8561 = vmatprep.subr.bf16.mxu0 %v10194_v51  ;;  %v12242_v49 = vld [vmem:[%s12459_s0 + $0xf0] sm:$0xff]  ;;  %v10261_v50 = vld [vmem:[%s11610_s19 + $0x620] ss:$8 sps:$4 sm:$0xff]  }
 0x276   : > { %v10264_v51 = vld [vmem:[%s11610_s19 + $0xe20] ss:$8 sps:$4 sm:$0xff]  }
 0x278   : > { %8138 = vmatpush1.bf16.msra.mxu1 %v10189_v52  ;;  %8562 = vmatpush1.bf16.msra.mxu0 %v10192_v42  ;;  %v10269_v52 = vld [vmem:[%s11610_s19 + $0x634] ss:$8 sps:$4 sm:$0xff]  }
 0x279   : > { %8139 = vmatprep.subr.bf16.mxu1 %v10197_v43  ;;  %8563 = vmatprep.subr.bf16.mxu0 %v10200_v46  ;;  %v10272_v42 = vld [vmem:[%s11610_s19 + $0xe34] ss:$8 sps:$4 sm:$0xff]   ;;  %v8927_v43 = vcombine.high %v12227_v40, %v12232_v45  ;;  %v8943_v46 = vcombine.high %v12237_v48, %v12242_v49 }
 0x27c   : > { %8140 = vmatpush1.bf16.msra.mxu1 %v10195_v47  ;;  %8564 = vmatpush1.bf16.msra.mxu0 %v10198_v53  ;;  %v10267_v47 = vld [vmem:[%s11610_s19 + $0x630] ss:$8 sps:$4 sm:$0xff]  }
 0x27d   : > { %8141 = vmatprep.subr.bf16.mxu1 %v10203_v54  ;;  %8565 = vmatprep.subr.bf16.mxu0 %v10206_v55  ;;  %v10270_v53 = vld [vmem:[%s11610_s19 + $0xe30] ss:$8 sps:$4 sm:$0xff]   ;;  %v10275_v54 = vld [vmem:[%s11610_s19 + $0x644] ss:$8 sps:$4 sm:$0xff]  }
 0x27e   : > { %v10278_v55 = vld [vmem:[%s11610_s19 + $0xe44] ss:$8 sps:$4 sm:$0xff]  }
 0x280   : > { %8142 = vmatpush1.bf16.msra.mxu1 %v10201_v56  ;;  %8566 = vmatpush1.bf16.msra.mxu0 %v10204_v57  ;;  %v10273_v56 = vld [vmem:[%s11610_s19 + $0x640] ss:$8 sps:$4 sm:$0xff]  }
 0x281   : > { %8143 = vmatprep.subr.bf16.mxu1 %v10209_v60  ;;  %8567 = vmatprep.subr.bf16.mxu0 %v10212_v61  ;;  %v10276_v57 = vld [vmem:[%s11610_s19 + $0xe40] ss:$8 sps:$4 sm:$0xff]   ;;  %v10281_v60 = vld [vmem:[%s11610_s19 + $0x654] ss:$8 sps:$4 sm:$0xff]  }
 0x282   : > { %v10284_v61 = vld [vmem:[%s11610_s19 + $0xe54] ss:$8 sps:$4 sm:$0xff]  }
 0x284   : > { %8144 = vmatpush1.bf16.msra.mxu1 %v10207_v4  ;;  %8568 = vmatpush1.bf16.msra.mxu0 %v10210_v7  ;;  %v10279_v4 = vld [vmem:[%s11610_s19 + $0x650] ss:$8 sps:$4 sm:$0xff]  }
 0x285   : > { %8145 = vmatprep.subr.bf16.mxu1 %v10215_v8  ;;  %8569 = vmatprep.subr.bf16.mxu0 %v10218_v9  ;;  %v10282_v7 = vld [vmem:[%s11610_s19 + $0xe50] ss:$8 sps:$4 sm:$0xff]   ;;  %v10287_v8 = vld [vmem:[%s11610_s19 + $0x664] ss:$8 sps:$4 sm:$0xff]  }
 0x286   : > { %v10290_v9 = vld [vmem:[%s11610_s19 + $0xe64] ss:$8 sps:$4 sm:$0xff]  }
 0x288   : > { %8146 = vmatpush1.bf16.msra.mxu1 %v10213_v10  ;;  %8570 = vmatpush1.bf16.msra.mxu0 %v10216_v58  ;;  %v10285_v10 = vld [vmem:[%s11610_s19 + $0x660] ss:$8 sps:$4 sm:$0xff]  }
 0x289   : > { %8147 = vmatprep.subr.bf16.mxu1 %v10221_v59  ;;  %8571 = vmatprep.subr.bf16.mxu0 %v10224_v62  ;;  %v10288_v58 = vld [vmem:[%s11610_s19 + $0xe60] ss:$8 sps:$4 sm:$0xff]   ;;  %v10293_v59 = vld [vmem:[%s11610_s19 + $0x674] ss:$8 sps:$4 sm:$0xff]  }
 0x28a   : > { %v10296_v62 = vld [vmem:[%s11610_s19 + $0xe74] ss:$8 sps:$4 sm:$0xff]  }
 0x28c   : > { %8148 = vmatpush1.bf16.msra.mxu1 %v10219_v63  ;;  %8572 = vmatpush1.bf16.msra.mxu0 %v10222_v11  ;;  %v10291_v63 = vld [vmem:[%s11610_s19 + $0x670] ss:$8 sps:$4 sm:$0xff]  }
 0x28d   : > { %8149 = vmatprep.subr.bf16.mxu1 %v10227_v12  ;;  %8573 = vmatprep.subr.bf16.mxu0 %v10230_v13  ;;  %v10294_v11 = vld [vmem:[%s11610_s19 + $0xe70] ss:$8 sps:$4 sm:$0xff]   ;;  %v10299_v12 = vld [vmem:[%s11610_s19 + $0x684] ss:$8 sps:$4 sm:$0xff]  }
 0x28e   : > { %v10302_v13 = vld [vmem:[%s11610_s19 + $0xe84] ss:$8 sps:$4 sm:$0xff]  }
 0x290   : > { %8150 = vmatpush1.bf16.msra.mxu1 %v10225_v14  ;;  %8574 = vmatpush1.bf16.msra.mxu0 %v10228_v15  ;;  %v10297_v14 = vld [vmem:[%s11610_s19 + $0x680] ss:$8 sps:$4 sm:$0xff]  }
 0x291   : > { %8151 = vmatprep.subr.bf16.mxu1 %v10233_v18  ;;  %8575 = vmatprep.subr.bf16.mxu0 %v10236_v19  ;;  %v10300_v15 = vld [vmem:[%s11610_s19 + $0xe80] ss:$8 sps:$4 sm:$0xff]   ;;  %v10305_v18 = vld [vmem:[%s11610_s19 + $0x694] ss:$8 sps:$4 sm:$0xff]  }
 0x292   : > { %v10308_v19 = vld [vmem:[%s11610_s19 + $0xe94] ss:$8 sps:$4 sm:$0xff]  }
 0x294   : > { %8152 = vmatpush1.bf16.msra.mxu1 %v10231_v22  ;;  %8576 = vmatpush1.bf16.msra.mxu0 %v10234_v23  ;;  %v10303_v22 = vld [vmem:[%s11610_s19 + $0x690] ss:$8 sps:$4 sm:$0xff]  }
 0x295   : > { %8153 = vmatprep.subr.bf16.mxu1 %v10239_v24  ;;  %8577 = vmatprep.subr.bf16.mxu0 %v10242_v25  ;;  %v10306_v23 = vld [vmem:[%s11610_s19 + $0xe90] ss:$8 sps:$4 sm:$0xff]   ;;  %v10311_v24 = vld [vmem:[%s11610_s19 + $0x6a4] ss:$8 sps:$4 sm:$0xff]  }
 0x296   : > { %v10314_v25 = vld [vmem:[%s11610_s19 + $0xea4] ss:$8 sps:$4 sm:$0xff]  }
 0x298   : > { %8154 = vmatpush1.bf16.msra.mxu1 %v10237_v26  ;;  %8578 = vmatpush1.bf16.msra.mxu0 %v10240_v27  ;;  %v10309_v26 = vld [vmem:[%s11610_s19 + $0x6a0] ss:$8 sps:$4 sm:$0xff]  }
 0x299   : > { %8155 = vmatprep.subr.bf16.mxu1 %v10245_v28  ;;  %8579 = vmatprep.subr.bf16.mxu0 %v10248_v29  ;;  %v10312_v27 = vld [vmem:[%s11610_s19 + $0xea0] ss:$8 sps:$4 sm:$0xff]   ;;  %v10317_v28 = vld [vmem:[%s11610_s19 + $0x6b4] ss:$8 sps:$4 sm:$0xff]  }
 0x29a   : > { %v10320_v29 = vld [vmem:[%s11610_s19 + $0xeb4] ss:$8 sps:$4 sm:$0xff]  }
 0x29c   : > { %8156 = vmatpush1.bf16.msra.mxu1 %v10243_v0  ;;  %8580 = vmatpush1.bf16.msra.mxu0 %v10246_v1  ;;  %v10315_v0 = vld [vmem:[%s11610_s19 + $0x6b0] ss:$8 sps:$4 sm:$0xff]  }
 0x29d   : > { %8178 = vmatprep.subr.bf16.mxu1 %v10251_v16  ;;  %8602 = vmatprep.subr.bf16.mxu0 %v10254_v17  ;;  %v10318_v1 = vld [vmem:[%s11610_s19 + $0xeb0] ss:$8 sps:$4 sm:$0xff]   ;;  %v10323_v16 = vld [vmem:[%s11610_s19 + $0x6c4] ss:$8 sps:$4 sm:$0xff]  }
 0x29e   : > { %v10326_v17 = vld [vmem:[%s11610_s19 + $0xec4] ss:$8 sps:$4 sm:$0xff]  }
 0x29f   : > { %8158 = vmatmul.mubr.bf16.vlgmr.msra.gmra.mrb[0].mxu1 %v8924_v6  ;;  %8582 = vmatmul.mubr.bf16.vlgmr.msra.gmra.mrb[0].mxu0 %v8940_v30  ;;  %v10324_v6 = vld [vmem:[%s11610_s19 + $0xec0] ss:$8 sps:$4 sm:$0xff]   ;;  %v10329_v30 = vld [vmem:[%s11610_s19 + $0x6d4] ss:$8 sps:$4 sm:$0xff]  }
 0x2a0   : > { %8179 = vmatpush1.bf16.msra.mxu1 %v10249_v20  ;;  %8603 = vmatpush1.bf16.msra.mxu0 %v10252_v21  ;;  %v10335_v20 = vld [vmem:[%s11610_s19 + $0x6e4] ss:$8 sps:$4 sm:$0xff]  }
 0x2a1   : > { %8180 = vmatprep.subr.bf16.mxu1 %v10257_v3  ;;  %8604 = vmatprep.subr.bf16.mxu0 %v10260_v2  ;;  %v10338_v21 = vld [vmem:[%s11610_s19 + $0xee4] ss:$8 sps:$4 sm:$0xff]   ;;  %v10333_v3 = vld [vmem:[%s11610_s19 + $0x6e0] ss:$8 sps:$4 sm:$0xff]  }
 0x2a2   : > { %8167 = vmatprep.mubr.bf16.mxu1 %v8957_v34  ;;  %8591 = vmatprep.mubr.bf16.mxu0 %v8973_v35  ;;  %v10336_v2 = vld [vmem:[%s11610_s19 + $0xee0] ss:$8 sps:$4 sm:$0xff]   ;;  %v10341_v34 = vld [vmem:[%s11610_s19 + $0x6f4] ss:$8 sps:$4 sm:$0xff]  }
 0x2a3   : > { %v10344_v35 = vld [vmem:[%s11610_s19 + $0xef4] ss:$8 sps:$4 sm:$0xff]  }
 0x2a4   : > { %8181 = vmatpush1.bf16.msra.mxu1 %v10255_v36  ;;  %8605 = vmatpush1.bf16.msra.mxu0 %v10258_v37  ;;  %v10339_v36 = vld [vmem:[%s11610_s19 + $0x6f0] ss:$8 sps:$4 sm:$0xff]  }
 0x2a5   : > { %8182 = vmatprep.subr.bf16.mxu1 %v10263_v38  ;;  %8606 = vmatprep.subr.bf16.mxu0 %v10266_v39  ;;  %v10342_v37 = vld [vmem:[%s11610_s19 + $0xef0] ss:$8 sps:$4 sm:$0xff]   ;;  %v10347_v38 = vld [vmem:[%s11610_s19 + $0x704] ss:$8 sps:$4 sm:$0xff]  }
 0x2a6   : > { %v10350_v39 = vld [vmem:[%s11610_s19 + $0xf04] ss:$8 sps:$4 sm:$0xff]  }
 0x2a7   : > { %8168 = vmatmul.mubr.bf16.gmra.mrb[4].mxu1 %v8956_v41  ;;  %8592 = vmatmul.mubr.bf16.gmra.mrb[4].mxu0 %v8972_v44  ;;  %v4430_v41 = vld [vmem:[%s12459_s0 + $0x130] sm:$0xff]  ;;  %v8926_v44 = vcombine.low %v12227_v40, %v12232_v45  ;;  %v10345_v40 = vld [vmem:[%s11610_s19 + $0x700] ss:$8 sps:$4 sm:$0xff]  }
 0x2a8   : > { %8183 = vmatpush1.bf16.msra.mxu1 %v10261_v50  ;;  %8607 = vmatpush1.bf16.msra.mxu0 %v10264_v51  ;;  %v8942_v50 = vcombine.low %v12237_v48, %v12242_v49  ;;  %v4446_v51 = vld [vmem:[%s12459_s0 + $0x1b0] sm:$0xff]  ;;  %v10348_v45 = vld [vmem:[%s11610_s19 + $0xf00] ss:$8 sps:$4 sm:$0xff]  }
 0x2a9   : > { %8184 = vmatprep.subr.bf16.mxu1 %v10269_v52  ;;  %8608 = vmatprep.subr.bf16.mxu0 %v10272_v42  ;;  %v4438_v52 = vld [vmem:[%s12459_s0 + $0x170] sm:$0xff] }
 0x2aa   : > { %8210 = vmatprep.mubr.bf16.mxu1 %v8927_v43  ;;  %8634 = vmatprep.mubr.bf16.mxu0 %v8943_v46  ;;  %v4454_v42 = vld [vmem:[%s12459_s0 + $0x1f0] sm:$0xff]  ;;  %v8959_v43 = vcombine.high %v4430_v41, %v4446_v51 }
 0x2ab   : > { %v10353_v48 = vld [vmem:[%s11610_s19 + $0x714] ss:$8 sps:$4 sm:$0xff]   ;;  %v8975_v46 = vcombine.high %v4438_v52, %v4454_v42 }
 0x2ac   : > { %8185 = vmatpush1.bf16.msra.mxu1 %v10267_v47  ;;  %8609 = vmatpush1.bf16.msra.mxu0 %v10270_v53  ;;  %v10356_v49 = vld [vmem:[%s11610_s19 + $0xf14] ss:$8 sps:$4 sm:$0xff]   ;;  %v10351_v47 = vld [vmem:[%s11610_s19 + $0x710] ss:$8 sps:$4 sm:$0xff]  }
 0x2ad   : > { %8186 = vmatprep.subr.bf16.mxu1 %v10275_v54  ;;  %8610 = vmatprep.subr.bf16.mxu0 %v10278_v55  ;;  %v10354_v53 = vld [vmem:[%s11610_s19 + $0xf10] ss:$8 sps:$4 sm:$0xff]   ;;  %v10359_v54 = vld [vmem:[%s11610_s19 + $0x724] ss:$8 sps:$4 sm:$0xff]  }
 0x2ae   : > { %v10362_v55 = vld [vmem:[%s11610_s19 + $0xf24] ss:$8 sps:$4 sm:$0xff]  }
 0x2b0   : > { %8187 = vmatpush1.bf16.msra.mxu1 %v10273_v56  ;;  %8611 = vmatpush1.bf16.msra.mxu0 %v10276_v57  ;;  %v12331_v56 = vld [vmem:[%s12459_s0 + $0x38] sm:$0xff]  ;;  %v8958_v57 = vcombine.low %v4430_v41, %v4446_v51  ;;  %v10417_v41 = vld [vmem:[%s11610_s19 + $0x7c0] ss:$8 sps:$4 sm:$0xff]  }
 0x2b1   : > { %8188 = vmatprep.subr.bf16.mxu1 %v10281_v60  ;;  %8612 = vmatprep.subr.bf16.mxu0 %v10284_v61  ;;  %v8974_v60 = vcombine.low %v4438_v52, %v4454_v42  ;;  %v12336_v61 = vld [vmem:[%s12459_s0 + $0xb8] sm:$0xff] }
 0x2b2   : > { %v10428_v51 = vld [vmem:[%s11610_s19 + $0xfd4] ss:$8 sps:$4 sm:$0xff]   ;;  %v10423_v52 = vld [vmem:[%s11610_s19 + $0x7d0] ss:$8 sps:$4 sm:$0xff]  }
 0x2b3   : > { %v10426_v42 = vld [vmem:[%s11610_s19 + $0xfd0] ss:$8 sps:$4 sm:$0xff]  }
 0x2b4   : > { %8189 = vmatpush1.bf16.msra.mxu1 %v10279_v4  ;;  %8613 = vmatpush1.bf16.msra.mxu0 %v10282_v7  ;;  %v12341_v4 = vld [vmem:[%s12459_s0 + $0x78] sm:$0xff] }
 0x2b5   : > { %8190 = vmatprep.subr.bf16.mxu1 %v10287_v8  ;;  %8614 = vmatprep.subr.bf16.mxu0 %v10290_v9  ;;  %v12346_v7 = vld [vmem:[%s12459_s0 + $0xf8] sm:$0xff]  ;;  %v10357_v8 = vld [vmem:[%s11610_s19 + $0x720] ss:$8 sps:$4 sm:$0xff]  }
 0x2b6   : > { %v10360_v9 = vld [vmem:[%s11610_s19 + $0xf20] ss:$8 sps:$4 sm:$0xff]  }
 0x2b8   : > { %8191 = vmatpush1.bf16.msra.mxu1 %v10285_v10  ;;  %8615 = vmatpush1.bf16.msra.mxu0 %v10288_v58  ;;  %v10365_v10 = vld [vmem:[%s11610_s19 + $0x734] ss:$8 sps:$4 sm:$0xff]  }
 0x2b9   : > { %8192 = vmatprep.subr.bf16.mxu1 %v10293_v59  ;;  %8616 = vmatprep.subr.bf16.mxu0 %v10296_v62  ;;  %v10368_v58 = vld [vmem:[%s11610_s19 + $0xf34] ss:$8 sps:$4 sm:$0xff]   ;;  %v8929_v59 = vcombine.high %v12331_v56, %v12336_v61  ;;  %v8945_v62 = vcombine.high %v12341_v4, %v12346_v7 }
 0x2bc   : > { %8193 = vmatpush1.bf16.msra.mxu1 %v10291_v63  ;;  %8617 = vmatpush1.bf16.msra.mxu0 %v10294_v11  ;;  %v10363_v63 = vld [vmem:[%s11610_s19 + $0x730] ss:$8 sps:$4 sm:$0xff]  }
 0x2bd   : > { %8194 = vmatprep.subr.bf16.mxu1 %v10299_v12  ;;  %8618 = vmatprep.subr.bf16.mxu0 %v10302_v13  ;;  %v10366_v11 = vld [vmem:[%s11610_s19 + $0xf30] ss:$8 sps:$4 sm:$0xff]   ;;  %v10371_v12 = vld [vmem:[%s11610_s19 + $0x744] ss:$8 sps:$4 sm:$0xff]  }
 0x2be   : > { %v10374_v13 = vld [vmem:[%s11610_s19 + $0xf44] ss:$8 sps:$4 sm:$0xff]  }
 0x2c0   : > { %8195 = vmatpush1.bf16.msra.mxu1 %v10297_v14  ;;  %8619 = vmatpush1.bf16.msra.mxu0 %v10300_v15  ;;  %v10369_v14 = vld [vmem:[%s11610_s19 + $0x740] ss:$8 sps:$4 sm:$0xff]  }
 0x2c1   : > { %8196 = vmatprep.subr.bf16.mxu1 %v10305_v18  ;;  %8620 = vmatprep.subr.bf16.mxu0 %v10308_v19  ;;  %v10372_v15 = vld [vmem:[%s11610_s19 + $0xf40] ss:$8 sps:$4 sm:$0xff]   ;;  %v10377_v18 = vld [vmem:[%s11610_s19 + $0x754] ss:$8 sps:$4 sm:$0xff]  }
 0x2c2   : > { %v10380_v19 = vld [vmem:[%s11610_s19 + $0xf54] ss:$8 sps:$4 sm:$0xff]  }
 0x2c4   : > { %8197 = vmatpush1.bf16.msra.mxu1 %v10303_v22  ;;  %8621 = vmatpush1.bf16.msra.mxu0 %v10306_v23  ;;  %v10375_v22 = vld [vmem:[%s11610_s19 + $0x750] ss:$8 sps:$4 sm:$0xff]  }
 0x2c5   : > { %8198 = vmatprep.subr.bf16.mxu1 %v10311_v24  ;;  %8622 = vmatprep.subr.bf16.mxu0 %v10314_v25  ;;  %v10378_v23 = vld [vmem:[%s11610_s19 + $0xf50] ss:$8 sps:$4 sm:$0xff]   ;;  %v10383_v24 = vld [vmem:[%s11610_s19 + $0x764] ss:$8 sps:$4 sm:$0xff]  }
 0x2c6   : > { %v10386_v25 = vld [vmem:[%s11610_s19 + $0xf64] ss:$8 sps:$4 sm:$0xff]  }
 0x2c8   : > { %8199 = vmatpush1.bf16.msra.mxu1 %v10309_v26  ;;  %8623 = vmatpush1.bf16.msra.mxu0 %v10312_v27  ;;  %v10381_v26 = vld [vmem:[%s11610_s19 + $0x760] ss:$8 sps:$4 sm:$0xff]  }
 0x2c9   : > { %8200 = vmatprep.subr.bf16.mxu1 %v10317_v28  ;;  %8624 = vmatprep.subr.bf16.mxu0 %v10320_v29  ;;  %v10384_v27 = vld [vmem:[%s11610_s19 + $0xf60] ss:$8 sps:$4 sm:$0xff]   ;;  %v10389_v28 = vld [vmem:[%s11610_s19 + $0x774] ss:$8 sps:$4 sm:$0xff]  }
 0x2ca   : > { %v10392_v29 = vld [vmem:[%s11610_s19 + $0xf74] ss:$8 sps:$4 sm:$0xff]  }
 0x2cc   : > { %8201 = vmatpush1.bf16.msra.mxu1 %v10315_v0  ;;  %8625 = vmatpush1.bf16.msra.mxu0 %v10318_v1  ;;  %v10387_v0 = vld [vmem:[%s11610_s19 + $0x770] ss:$8 sps:$4 sm:$0xff]  }
 0x2cd   : > { %8202 = vmatprep.subr.bf16.mxu1 %v10323_v16  ;;  %8626 = vmatprep.subr.bf16.mxu0 %v10326_v17  ;;  %v10390_v1 = vld [vmem:[%s11610_s19 + $0xf70] ss:$8 sps:$4 sm:$0xff]   ;;  %v10395_v16 = vld [vmem:[%s11610_s19 + $0x784] ss:$8 sps:$4 sm:$0xff]  }
 0x2ce   : > { %v10398_v17 = vld [vmem:[%s11610_s19 + $0xf84] ss:$8 sps:$4 sm:$0xff]  }
 0x2d0   : > { %8203 = vmatpush1.bf16.msra.mxu1 %v10321_v5  ;;  %8627 = vmatpush1.bf16.msra.mxu0 %v10324_v6  ;;  %v10393_v5 = vld [vmem:[%s11610_s19 + $0x780] ss:$8 sps:$4 sm:$0xff]  }
 0x2d1   : > { %8204 = vmatprep.subr.bf16.mxu1 %v10329_v30  ;;  %8628 = vmatprep.subr.bf16.mxu0 %v10332_v31  ;;  %v10396_v6 = vld [vmem:[%s11610_s19 + $0xf80] ss:$8 sps:$4 sm:$0xff]   ;;  %v10401_v30 = vld [vmem:[%s11610_s19 + $0x794] ss:$8 sps:$4 sm:$0xff]  }
 0x2d2   : > { %v10404_v31 = vld [vmem:[%s11610_s19 + $0xf94] ss:$8 sps:$4 sm:$0xff]  }
 0x2d4   : > { %8205 = vmatpush1.bf16.msra.mxu1 %v10327_v32  ;;  %8629 = vmatpush1.bf16.msra.mxu0 %v10330_v33  ;;  %v10399_v32 = vld [vmem:[%s11610_s19 + $0x790] ss:$8 sps:$4 sm:$0xff]  }
 0x2d5   : > { %8206 = vmatprep.subr.bf16.mxu1 %v10335_v20  ;;  %8630 = vmatprep.subr.bf16.mxu0 %v10338_v21  ;;  %v10402_v33 = vld [vmem:[%s11610_s19 + $0xf90] ss:$8 sps:$4 sm:$0xff]   ;;  %v10407_v20 = vld [vmem:[%s11610_s19 + $0x7a4] ss:$8 sps:$4 sm:$0xff]  }
 0x2d6   : > { %v10410_v21 = vld [vmem:[%s11610_s19 + $0xfa4] ss:$8 sps:$4 sm:$0xff]  }
 0x2d8   : > { %8207 = vmatpush1.bf16.msra.mxu1 %v10333_v3  ;;  %8631 = vmatpush1.bf16.msra.mxu0 %v10336_v2  ;;  %v10405_v3 = vld [vmem:[%s11610_s19 + $0x7a0] ss:$8 sps:$4 sm:$0xff]  }
 0x2d9   : > { %8208 = vmatprep.subr.bf16.mxu1 %v10341_v34  ;;  %8632 = vmatprep.subr.bf16.mxu0 %v10344_v35  ;;  %v10408_v2 = vld [vmem:[%s11610_s19 + $0xfa0] ss:$8 sps:$4 sm:$0xff]   ;;  %v10413_v34 = vld [vmem:[%s11610_s19 + $0x7b4] ss:$8 sps:$4 sm:$0xff]  }
 0x2da   : > { %v10416_v35 = vld [vmem:[%s11610_s19 + $0xfb4] ss:$8 sps:$4 sm:$0xff]  }
 0x2dc   : > { %8209 = vmatpush1.bf16.msra.mxu1 %v10339_v36  ;;  %8633 = vmatpush1.bf16.msra.mxu0 %v10342_v37  ;;  %v10411_v36 = vld [vmem:[%s11610_s19 + $0x7b0] ss:$8 sps:$4 sm:$0xff]  }
 0x2dd   : > { %8231 = vmatprep.subr.bf16.mxu1 %v10347_v38  ;;  %8655 = vmatprep.subr.bf16.mxu0 %v10350_v39  ;;  %v10414_v37 = vld [vmem:[%s11610_s19 + $0xfb0] ss:$8 sps:$4 sm:$0xff]   ;;  %v10419_v38 = vld [vmem:[%s11610_s19 + $0x7c4] ss:$8 sps:$4 sm:$0xff]  }
 0x2de   : > { %v10422_v39 = vld [vmem:[%s11610_s19 + $0xfc4] ss:$8 sps:$4 sm:$0xff]  }
 0x2df   : > { %8211 = vmatmul.mubr.bf16.vlgmr.msra.gmra.mrb[0].mxu1 %v8926_v44  ;;  %8635 = vmatmul.mubr.bf16.vlgmr.msra.gmra.mrb[0].mxu0 %v8942_v50  ;;  %v10420_v44 = vld [vmem:[%s11610_s19 + $0xfc0] ss:$8 sps:$4 sm:$0xff]   ;;  %v10425_v50 = vld [vmem:[%s11610_s19 + $0x7d4] ss:$8 sps:$4 sm:$0xff]  }
 0x2e0   : > { %8232 = vmatpush1.bf16.msra.mxu1 %v10345_v40  ;;  %8656 = vmatpush1.bf16.msra.mxu0 %v10348_v45  ;;  %v10431_v40 = vld [vmem:[%s11610_s19 + $0x7e4] ss:$8 sps:$4 sm:$0xff]  }
 0x2e1   : > { %8233 = vmatprep.subr.bf16.mxu1 %v10353_v48  ;;  %8657 = vmatprep.subr.bf16.mxu0 %v10356_v49  ;;  %v10434_v45 = vld [vmem:[%s11610_s19 + $0xfe4] ss:$8 sps:$4 sm:$0xff]   ;;  %v10429_v48 = vld [vmem:[%s11610_s19 + $0x7e0] ss:$8 sps:$4 sm:$0xff]  }
 0x2e2   : > { %8220 = vmatprep.mubr.bf16.mxu1 %v8959_v43  ;;  %8644 = vmatprep.mubr.bf16.mxu0 %v8975_v46  ;;  %v10432_v49 = vld [vmem:[%s11610_s19 + $0xfe0] ss:$8 sps:$4 sm:$0xff]   ;;  %v10437_v43 = vld [vmem:[%s11610_s19 + $0x7f4] ss:$8 sps:$4 sm:$0xff]  }
 0x2e3   : > { %v10440_v46 = vld [vmem:[%s11610_s19 + $0xff4] ss:$8 sps:$4 sm:$0xff]  }
 0x2e4   : > { %8234 = vmatpush1.bf16.msra.mxu1 %v10351_v47  ;;  %8658 = vmatpush1.bf16.msra.mxu0 %v10354_v53  ;;  %v10435_v47 = vld [vmem:[%s11610_s19 + $0x7f0] ss:$8 sps:$4 sm:$0xff]  }
 0x2e5   : > { %8235 = vmatprep.subr.bf16.mxu1 %v10359_v54  ;;  %8659 = vmatprep.subr.bf16.mxu0 %v10362_v55  ;;  %v10438_v53 = vld [vmem:[%s11610_s19 + $0xff0] ss:$8 sps:$4 sm:$0xff]   ;;  %s8913_s19 = sshll.u32 %s10471_s14, 1 }
 0x2e6   : > { %v4431_v54 = vld [vmem:[%s12459_s0 + $0x138] sm:$0xff]  ;;  %p4386_p11 = scmp.lt.s32.totalorder %s8913_s19, 3 }
 0x2e7   : > { %8221 = vmatmul.mubr.bf16.gmra.mrb[4].mxu1 %v8958_v57  ;;  %8645 = vmatmul.mubr.bf16.gmra.mrb[4].mxu0 %v8974_v60  ;;  %v4447_v55 = vld [vmem:[%s12459_s0 + $0x1b8] sm:$0xff] }
 0x2e8   : > { %8236 = vmatpush1.bf16.msra.mxu1 %v10357_v8  ;;  %8660 = vmatpush1.bf16.msra.mxu0 %v10360_v9  ;;  %v4439_v57 = vld [vmem:[%s12459_s0 + $0x178] sm:$0xff]  ;;  %v8928_v8 = vcombine.low %v12331_v56, %v12336_v61  ;;  %v8944_v9 = vcombine.low %v12341_v4, %v12346_v7  ;;  %s12471_s19 = smov (!%p4386_p11, %s8913_s19), 3 }
 0x2e9   : > { %8237 = vmatprep.subr.bf16.mxu1 %v10365_v10  ;;  %8661 = vmatprep.subr.bf16.mxu0 %v10368_v58  ;;  %v4455_v60 = vld [vmem:[%s12459_s0 + $0x1f8] sm:$0xff]  ;;  %v8961_v10 = vcombine.high %v4431_v54, %v4447_v55  ;;  %s4388_s25 = scalar_lea.vmem %s12461_s2, %s12471_s19 }
 0x2ea   : > { %8263 = vmatprep.mubr.bf16.mxu1 %v8929_v59  ;;  %8687 = vmatprep.mubr.bf16.mxu0 %v8945_v62  ;;  %v8977_v58 = vcombine.high %v4439_v57, %v4455_v60  ;;  %v8960_v59 = vcombine.low %v4431_v54, %v4447_v55  ;;  %v8976_v62 = vcombine.low %v4439_v57, %v4455_v60  ;;  %v4968_v4 = vld [vmem:[%s4388_s25] sm:$0x3] }
 0x2ec   : > { %8238 = vmatpush1.bf16.msra.mxu1 %v10363_v63  ;;  %8662 = vmatpush1.bf16.msra.mxu0 %v10366_v11  ;;  %v4970_v63 = vlaneseq }
 0x2ed   : > { %8239 = vmatprep.subr.bf16.mxu1 %v10371_v12  ;;  %8663 = vmatprep.subr.bf16.mxu0 %v10374_v13 }
 0x2ee   : > { %v4971_v56 = vshrl.u32 %v4970_v63, 7 }
 0x2f0   : > { %8240 = vmatpush1.bf16.msra.mxu1 %v10369_v14  ;;  %8664 = vmatpush1.bf16.msra.mxu0 %v10372_v15  ;;  %v4972_v61 = vsub.s32 0, %v4971_v56  ;;  %v4976_v7 = vsub.s32 1, %v4971_v56 }
 0x2f1   : > { %8241 = vmatprep.subr.bf16.mxu1 %v10377_v18  ;;  %8665 = vmatprep.subr.bf16.mxu0 %v10380_v19 }
 0x2f2   : > { %v4973_v11 = vrot.slane %v4968_v4, %v4972_v61  ;;  %v4977_v12 = vrot.slane %v4968_v4, %v4976_v7 }
 0x2f4   : > { %8242 = vmatpush1.bf16.msra.mxu1 %v10375_v22  ;;  %8666 = vmatpush1.bf16.msra.mxu0 %v10378_v23 }
 0x2f5   : > { %8243 = vmatprep.subr.bf16.mxu1 %v10383_v24  ;;  %8667 = vmatprep.subr.bf16.mxu0 %v10386_v25 }
 0x2f8   : > { %8244 = vmatpush1.bf16.msra.mxu1 %v10381_v26  ;;  %8668 = vmatpush1.bf16.msra.mxu0 %v10384_v27 }
 0x2f9   : > { %8245 = vmatprep.subr.bf16.mxu1 %v10389_v28  ;;  %8669 = vmatprep.subr.bf16.mxu0 %v10392_v29 }
 0x2fc   : > { %8246 = vmatpush1.bf16.msra.mxu1 %v10387_v0  ;;  %8670 = vmatpush1.bf16.msra.mxu0 %v10390_v1 }
 0x2fd   : > { %8247 = vmatprep.subr.bf16.mxu1 %v10395_v16  ;;  %8671 = vmatprep.subr.bf16.mxu0 %v10398_v17 }
 0x300   : > { %8248 = vmatpush1.bf16.msra.mxu1 %v10393_v5  ;;  %8672 = vmatpush1.bf16.msra.mxu0 %v10396_v6 }
 0x301   : > { %8249 = vmatprep.subr.bf16.mxu1 %v10401_v30  ;;  %8673 = vmatprep.subr.bf16.mxu0 %v10404_v31 }
 0x304   : > { %8250 = vmatpush1.bf16.msra.mxu1 %v10399_v32  ;;  %8674 = vmatpush1.bf16.msra.mxu0 %v10402_v33 }
 0x305   : > { %8251 = vmatprep.subr.bf16.mxu1 %v10407_v20  ;;  %8675 = vmatprep.subr.bf16.mxu0 %v10410_v21 }
 0x308   : > { %8252 = vmatpush1.bf16.msra.mxu1 %v10405_v3  ;;  %8676 = vmatpush1.bf16.msra.mxu0 %v10408_v2 }
 0x309   : > { %8253 = vmatprep.subr.bf16.mxu1 %v10413_v34  ;;  %8677 = vmatprep.subr.bf16.mxu0 %v10416_v35 }
 0x30c   : > { %8254 = vmatpush1.bf16.msra.mxu1 %v10411_v36  ;;  %8678 = vmatpush1.bf16.msra.mxu0 %v10414_v37 }
 0x30d   : > { %8255 = vmatprep.subr.bf16.mxu1 %v10419_v38  ;;  %8679 = vmatprep.subr.bf16.mxu0 %v10422_v39 }
 0x310   : > { %8256 = vmatpush1.bf16.msra.mxu1 %v10417_v41  ;;  %8680 = vmatpush1.bf16.msra.mxu0 %v10420_v44 }
 0x311   : > { %8257 = vmatprep.subr.bf16.mxu1 %v10425_v50  ;;  %8681 = vmatprep.subr.bf16.mxu0 %v10428_v51 }
 0x314   : > { %8258 = vmatpush1.bf16.msra.mxu1 %v10423_v52  ;;  %8682 = vmatpush1.bf16.msra.mxu0 %v10426_v42 }
 0x315   : > { %8259 = vmatprep.subr.bf16.mxu1 %v10431_v40  ;;  %8683 = vmatprep.subr.bf16.mxu0 %v10434_v45 }
 0x318   : > { %8260 = vmatpush1.bf16.msra.mxu1 %v10429_v48  ;;  %8684 = vmatpush1.bf16.msra.mxu0 %v10432_v49 }
 0x319   : > { %8261 = vmatprep.subr.bf16.mxu1 %v10437_v43  ;;  %8685 = vmatprep.subr.bf16.mxu0 %v10440_v46 }
 0x31c   : > { %8262 = vmatpush1.bf16.msra.mxu1 %v10435_v47  ;;  %8686 = vmatpush1.bf16.msra.mxu0 %v10438_v53 }
 0x31f   : > { %8264 = vmatmul.mubr.bf16.vlgmr.msra.gmra.mrb[0].mxu1 %v8928_v8  ;;  %8688 = vmatmul.mubr.bf16.vlgmr.msra.gmra.mrb[0].mxu0 %v8944_v9 }
 0x320   : > { %8273 = vmatprep.mubr.bf16.mxu1 %v8961_v10  ;;  %8697 = vmatprep.mubr.bf16.mxu0 %v8977_v58 }
 0x327   : > { %8274 = vmatmul.mubr.bf16.gmra.mrb[4].mxu1 %v8960_v59  ;;  %8698 = vmatmul.mubr.bf16.gmra.mrb[4].mxu0 %v8976_v62 }
 0x3f2   : > { %v8265_v13 = vpop.f32.mrb[0].mxu1  ;;  %v8689_v14 = vpop.f32.mrb[0].mxu0 }
 0x3f3   : > { %v9505_v15 = vadd.f32 %v8265_v13, %v4973_v11  ;;  %v8267_v18 = vpop.f32.mrb[1].mxu1  ;;  %v8691_v19 = vpop.f32.mrb[1].mxu0 }
 0x3f4   : > { %v9507_v22 = vadd.f32 %v8267_v18, %v4977_v12  ;;  %v8269_v23 = vpop.f32.mrb[2].mxu1  ;;  %v8693_v24 = vpop.f32.mrb[2].mxu0 }
 0x3f5   : > { %v9506_v25 = vadd.f32 %v9505_v15, %v8689_v14  ;;  %v9509_v26 = vadd.f32 %v8269_v23, %v4973_v11  ;;  %v8271_v27 = vpop.f32.mrb[3].mxu1  ;;  %v8695_v28 = vpop.f32.mrb[3].mxu0 }
 0x3f6   : > { %v9508_v29 = vadd.f32 %v9507_v22, %v8691_v19  ;;  %v9511_v0 = vadd.f32 %v8271_v27, %v4977_v12 }
 0x3f7   : > { %v8708_v1 = vmax.f32 %v9506_v25, 0.0  ;;  %v9510_v16 = vadd.f32 %v9509_v26, %v8693_v24 }
 0x3f8   : > { %v8709_v17 = vmax.f32 %v9508_v29, 0.0  ;;  %v9512_v5 = vadd.f32 %v9511_v0, %v8695_v28 }
 0x3f9   : > { %v8710_v6 = vmax.f32 %v9510_v16, 0.0 }
 0x3fa   : > { %v9500_v30 = vpack.c.bf16 %v8709_v17, %v8708_v1  ;;  %v8711_v31 = vmax.f32 %v9512_v5, 0.0  ;;  %v8275_v32 = vpop.f32.mrb[4].mxu1  ;;  %v8699_v33 = vpop.f32.mrb[4].mxu0 }
 0x3fb   : > { %v9513_v20 = vadd.f32 %v8275_v32, %v4973_v11  ;;  %v8277_v21 = vpop.f32.mrb[5].mxu1  ;;  %v8701_v3 = vpop.f32.mrb[5].mxu0 }
 0x3fc   : > { %8740 = vst [vmem:[%s12428_s27] sm:$0xff] %v9500_v30  ;;  %v9501_v2 = vpack.c.bf16 %v8711_v31, %v8710_v6  ;;  %v9515_v34 = vadd.f32 %v8277_v21, %v4977_v12  ;;  %v8279_v35 = vpop.f32.mrb[6].mxu1  ;;  %v8703_v36 = vpop.f32.mrb[6].mxu0 }
 0x3fd   : > { %v9514_v37 = vadd.f32 %v9513_v20, %v8699_v33  ;;  %v9517_v38 = vadd.f32 %v8279_v35, %v4973_v11  ;;  %v8281_v39 = vpop.f32.mrb[7].mxu1  ;;  %v8705_v41 = vpop.f32.mrb[7].mxu0 }
 0x3fe   : > { %8741 = vst [vmem:[%s12428_s27 + $0x8] sm:$0xff] %v9501_v2  ;;  %v9516_v44 = vadd.f32 %v9515_v34, %v8701_v3  ;;  %v9519_v50 = vadd.f32 %v8281_v39, %v4977_v12 }
 0x3ff   : > { %v8712_v51 = vmax.f32 %v9514_v37, 0.0  ;;  %v9518_v52 = vadd.f32 %v9517_v38, %v8703_v36 }
 0x400   : > { %v8713_v42 = vmax.f32 %v9516_v44, 0.0  ;;  %v9520_v40 = vadd.f32 %v9519_v50, %v8705_v41  ;;  %8750 = sbr.rel (!%p10536_p6) target bundleno = 1039 (0x40f), region = 88 }
 0x401   : > { %v8714_v45 = vmax.f32 %v9518_v52, 0.0 }
 0x402   : > { %v9502_v48 = vpack.c.bf16 %v8713_v42, %v8712_v51  ;;  %v8715_v49 = vmax.f32 %v9520_v40, 0.0 }
 0x403   : > { %v8790_v46 = vld [vmem:[%s12428_s27] sm:$0xff] (%p10536_p6) }
 0x404   : > { %8742 = vst [vmem:[%s12428_s27 + $0x10] sm:$0xff] %v9502_v48  ;;  %v9503_v43 = vpack.c.bf16 %v8715_v49, %v8714_v45  ;;  %8791 = vst [vmem:[%s8756_s29] sm:$0xff] (%p10536_p6), %v8790_v46 }
 0x405   : > { %v8792_v47 = vld [vmem:[%s12428_s27 + $0x8] sm:$0xff] (%p10536_p6) }
 0x406   : > { %8743 = vst [vmem:[%s12428_s27 + $0x18] sm:$0xff] %v9503_v43  ;;  %8793 = vst [vmem:[%s8756_s29 + $0x10] sm:$0xff] (%p10536_p6), %v8792_v47 }
 0x40b   : > { %v8794_v53 = vld [vmem:[%s12428_s27 + $0x10] sm:$0xff] }
 0x40c   : > { %8795 = vst [vmem:[%s8756_s29 + $0x20] sm:$0xff] %v8794_v53 }
 0x40d   : > { %v8796_v54 = vld [vmem:[%s12428_s27 + $0x18] sm:$0xff] }
 0x40e   : > { %8797 = vst [vmem:[%s8756_s29 + $0x30] sm:$0xff] %v8796_v54 }
 0x40f PF: > { %s13_s16 = sadd.s32 1, %s10479_s16   ;;  %s12464_s12 = smov %s10467_s13 }
 0x410   : > { %p10_p12 = scmp.ge.s32.totalorder %s13_s16, 4   ;;  %s12465_s13 = smov %s10541_s22 }
 0x411   : > { %s12466_s14 = smov %s10475_s15  ;;  %s12467_s15 = smov %s12469_s17 }
 0x412   :  { %12 = sbr.rel (!%p10_p12) target bundleno = 3 (0x3), region = 169 }

</bundles_post_ra>
